<compile_context>
chip_gen: v7x
topology: tpu7x:2x2x1
jax: 0.10.0
libtpu: 0.0.40
codegen_flags: <defaults>
</compile_context>

<pallas_src>
import functools
import math

import jax
import jax.numpy as jnp
from jax.experimental import pallas as pl
from jax.experimental.pallas import tpu as pltpu

D_MODEL  = 300      # GloVe dim hard-coded in the module
D_PAD    = 384      # lane-padded feature dim (multiple of 128)
D_FF     = 256      # dim_feedforward of TransformerEncoderLayer
HIDDEN   = 512      # hidden_dim (module default)
OUT_DIM  = 4        # output_dim (chosen for the demo)
OUT_PAD  = 128      # lane-padded head output
LN_EPS   = 1e-5     # PyTorch LayerNorm default eps
N_LAYERS = 2        # nn.TransformerEncoder(num_layers=2)


# ----------------------------- Pallas kernel --------------------------------

def _fused_forward_kernel(ids_ref, embed_ref,
                          wqkv_ref, bqkv_ref, wo_ref, bo_ref,
                          g1_ref, b1_ref, wff1_ref, bff1_ref,
                          wff2_ref, bff2_ref, g2_ref, b2_ref,
                          wfc_ref, bfc_ref, wfc2_ref, bfc2_ref,
                          out_ref, x_scratch, *, batch, seq):
    """Embedding gather -> 2 post-norm encoder layers -> relu/fc/relu/fc_2."""
    BL = batch * seq

    # ---- embedding lookup (self.myvec[embs]); table is VMEM-resident -------
    for r in range(BL):                                     # static unroll
        tid = ids_ref[r // seq, r % seq]                    # scalar from SMEM
        x_scratch[pl.ds(r, 1), :] = embed_ref[pl.ds(tid, 1), :]
    x = x_scratch[...]                                      # (BL, D_PAD) f32

    inv_d = jnp.float32(1.0 / D_MODEL)                      # true LN divisor
    attn_scale = jnp.float32(1.0 / math.sqrt(D_MODEL))      # nhead=1 -> 1/sqrt(300)

    def layer_norm(h, gamma, beta):
        # Padded lanes of h are exactly zero, so sums over D_PAD == sums over
        # the 300 valid lanes; gamma/beta are zero on padded lanes so the
        # output padded lanes stay zero.
        mu = jnp.sum(h, axis=-1, keepdims=True) * inv_d
        var = jnp.sum(h * h, axis=-1, keepdims=True) * inv_d - mu * mu
        return (h - mu) * jax.lax.rsqrt(var + LN_EPS) * gamma + beta

    for lyr in range(N_LAYERS):
        # --- fused Q/K/V projection: one (BL, D) x (D, 3D) matmul ---
        x_bf = x.astype(jnp.bfloat16)
        qkv = jnp.dot(x_bf, wqkv_ref[lyr],
                      preferred_element_type=jnp.float32) + bqkv_ref[lyr]
        q = qkv[:, 0 * D_PAD:1 * D_PAD].reshape(batch, seq, D_PAD)
        k = qkv[:, 1 * D_PAD:2 * D_PAD].reshape(batch, seq, D_PAD)
        v = qkv[:, 2 * D_PAD:3 * D_PAD].reshape(batch, seq, D_PAD)

        # --- single-head attention (softmax in f32) ---
        s = jnp.einsum('bqd,bkd->bqk', q.astype(jnp.bfloat16),
                       k.astype(jnp.bfloat16),
                       preferred_element_type=jnp.float32) * attn_scale
        s = s - jnp.max(s, axis=-1, keepdims=True)
        p = jnp.exp(s)
        p = p * pl.reciprocal(jnp.sum(p, axis=-1, keepdims=True), approx=True)
        attn = jnp.einsum('bqk,bkd->bqd', p.astype(jnp.bfloat16),
                          v.astype(jnp.bfloat16),
                          preferred_element_type=jnp.float32)
        attn = attn.reshape(BL, D_PAD).astype(jnp.bfloat16)
        proj = jnp.dot(attn, wo_ref[lyr],
                       preferred_element_type=jnp.float32) + bo_ref[lyr]

        # residual + LayerNorm 1 (post-norm; dropout identity in eval)
        h = layer_norm(x + proj, g1_ref[lyr], b1_ref[lyr])

        # --- feed-forward: linear -> relu -> linear ---
        ff = jnp.dot(h.astype(jnp.bfloat16), wff1_ref[lyr],
                     preferred_element_type=jnp.float32) + bff1_ref[lyr]
        ff = jnp.maximum(ff, 0.0)
        ff = jnp.dot(ff.astype(jnp.bfloat16), wff2_ref[lyr],
                     preferred_element_type=jnp.float32) + bff2_ref[lyr]

        # residual + LayerNorm 2
        x = layer_norm(h + ff, g2_ref[lyr], b2_ref[lyr])

    # ---- head: relu -> fc(300->H) -> relu -> fc_2(H->O) on last token ------
    last = x.reshape(batch, seq, D_PAD)[:, seq - 1, :]      # (B, D_PAD)
    hdn = jnp.maximum(last, 0.0)
    hdn = jnp.dot(hdn.astype(jnp.bfloat16), wfc_ref[...],
                  preferred_element_type=jnp.float32) + bfc_ref[...]
    hdn = jnp.maximum(hdn, 0.0)
    o = jnp.dot(hdn.astype(jnp.bfloat16), wfc2_ref[...],
                preferred_element_type=jnp.float32) + bfc2_ref[...]
    out_ref[...] = o.astype(out_ref.dtype)                  # (B, OUT_PAD)


# ----------------------------- wrapper ---------------------------------------

def _vmem_spec():
    return pl.BlockSpec(memory_space=pltpu.MemorySpace.VMEM)


@jax.jit
def bilstm_forward(token_ids, params):
    batch, seq = token_ids.shape
    kernel = functools.partial(_fused_forward_kernel, batch=batch, seq=seq)
    weight_args = (
        params['embed'],
        params['wqkv'], params['bqkv'], params['wo'], params['bo'],
        params['ln1_g'], params['ln1_b'],
        params['wff1'], params['bff1'], params['wff2'], params['bff2'],
        params['ln2_g'], params['ln2_b'],
        params['wfc'], params['bfc'], params['wfc2'], params['bfc2'],
    )
    in_specs = ([pl.BlockSpec(memory_space=pltpu.MemorySpace.SMEM)]
                + [_vmem_spec() for _ in weight_args])
    out_pad = pl.pallas_call(
        kernel,
        out_shape=jax.ShapeDtypeStruct((batch, OUT_PAD), jnp.float32),
        in_specs=in_specs,
        out_specs=_vmem_spec(),
        scratch_shapes=[pltpu.VMEM((batch * seq, D_PAD), jnp.float32)],
        compiler_params=pltpu.CompilerParams(vmem_limit_bytes=32 * 1024 * 1024),
    )(token_ids, *weight_args)
    return out_pad[:, :OUT_DIM]                              # drop lane padding


# ----------------------------- parameters ------------------------------------

def init_params(key, vocab_size, hidden_dim=HIDDEN, output_dim=OUT_DIM):
    # TODO(synk): GloVe('840B') pretrained vectors cannot be loaded here; a
    # deterministic random embedding table of the same feature dim is used.
    keys = iter(jax.random.split(key, 64))

    def nrm(shape, scale):
        return (scale * jax.random.normal(next(keys), shape)).astype(jnp.float32)

    def pad_to(a, shape):
        return jnp.pad(a, [(0, t - s) for s, t in zip(a.shape, shape)])

    vocab_pad = ((vocab_size + 7) // 8) * 8
    embed = pad_to(nrm((vocab_size, D_MODEL), 1.0), (vocab_pad, D_PAD))

    wqkv, bqkv, wo, bo = [], [], [], []
    g1, b1n, w1, b1, w2, b2, g2, b2n = ([] for _ in range(8))
    for _ in range(N_LAYERS):
        wq = pad_to(nrm((D_MODEL, D_MODEL), 0.05), (D_PAD, D_PAD))
        wk = pad_to(nrm((D_MODEL, D_MODEL), 0.05), (D_PAD, D_PAD))
        wv = pad_to(nrm((D_MODEL, D_MODEL), 0.05), (D_PAD, D_PAD))
        wqkv.append(jnp.concatenate([wq, wk, wv], axis=1).astype(jnp.bfloat16))
        bq = pad_to(nrm((1, D_MODEL), 0.01), (1, D_PAD))
        bk = pad_to(nrm((1, D_MODEL), 0.01), (1, D_PAD))
        bv = pad_to(nrm((1, D_MODEL), 0.01), (1, D_PAD))
        bqkv.append(jnp.concatenate([bq, bk, bv], axis=1))
        wo.append(pad_to(nrm((D_MODEL, D_MODEL), 0.05),
                         (D_PAD, D_PAD)).astype(jnp.bfloat16))
        bo.append(pad_to(nrm((1, D_MODEL), 0.01), (1, D_PAD)))
        # LN gamma is zero on padded lanes -> acts as the pad mask.
        g1.append(pad_to(jnp.ones((1, D_MODEL), jnp.float32), (1, D_PAD)))
        b1n.append(jnp.zeros((1, D_PAD), jnp.float32))
        w1.append(pad_to(nrm((D_MODEL, D_FF), 0.05),
                         (D_PAD, D_FF)).astype(jnp.bfloat16))
        b1.append(nrm((1, D_FF), 0.01))
        w2.append(pad_to(nrm((D_FF, D_MODEL), 0.05),
                         (D_FF, D_PAD)).astype(jnp.bfloat16))
        b2.append(pad_to(nrm((1, D_MODEL), 0.01), (1, D_PAD)))
        g2.append(pad_to(jnp.ones((1, D_MODEL), jnp.float32), (1, D_PAD)))
        b2n.append(jnp.zeros((1, D_PAD), jnp.float32))

    return dict(
        embed=embed,
        wqkv=jnp.stack(wqkv), bqkv=jnp.stack(bqkv),
        wo=jnp.stack(wo), bo=jnp.stack(bo),
        ln1_g=jnp.stack(g1), ln1_b=jnp.stack(b1n),
        wff1=jnp.stack(w1), bff1=jnp.stack(b1),
        wff2=jnp.stack(w2), bff2=jnp.stack(b2),
        ln2_g=jnp.stack(g2), ln2_b=jnp.stack(b2n),
        wfc=pad_to(nrm((D_MODEL, hidden_dim), 0.05),
                   (D_PAD, hidden_dim)).astype(jnp.bfloat16),
        bfc=nrm((1, hidden_dim), 0.01),
        wfc2=pad_to(nrm((hidden_dim, output_dim), 0.05),
                    (hidden_dim, OUT_PAD)).astype(jnp.bfloat16),
        bfc2=pad_to(nrm((1, output_dim), 0.01), (1, OUT_PAD)),
    )


# ----------------------------- main -------------------------------------------

if __name__ == "__main__":
    key = jax.random.PRNGKey(0)
    k_param, k_tok = jax.random.split(key)

    VOCAB, B, L = 50, 2, 8
    params = init_params(k_param, VOCAB)
    token_ids = jax.random.randint(k_tok, (B, L), 0, VOCAB, dtype=jnp.int32)

    out = bilstm_forward(token_ids, params)
    out = jax.block_until_ready(out)

    assert out.shape == (B, OUT_DIM), out.shape
    assert jnp.all(jnp.isfinite(out))
    print("KERNEL_OK")
</pallas_src>

<mosaic_0001>
module attributes {stable_mosaic.version = 11 : i64} {
  func.func @_fused_forward_kernel(%arg0: memref<2x8xi32, #tpu.memory_space<smem>>, %arg1: memref<56x384xf32, #tpu.memory_space<vmem>>, %arg2: memref<2x384x1152xbf16, #tpu.memory_space<vmem>>, %arg3: memref<2x1x1152xf32, #tpu.memory_space<vmem>>, %arg4: memref<2x384x384xbf16, #tpu.memory_space<vmem>>, %arg5: memref<2x1x384xf32, #tpu.memory_space<vmem>>, %arg6: memref<2x1x384xf32, #tpu.memory_space<vmem>>, %arg7: memref<2x1x384xf32, #tpu.memory_space<vmem>>, %arg8: memref<2x384x256xbf16, #tpu.memory_space<vmem>>, %arg9: memref<2x1x256xf32, #tpu.memory_space<vmem>>, %arg10: memref<2x256x384xbf16, #tpu.memory_space<vmem>>, %arg11: memref<2x1x384xf32, #tpu.memory_space<vmem>>, %arg12: memref<2x1x384xf32, #tpu.memory_space<vmem>>, %arg13: memref<2x1x384xf32, #tpu.memory_space<vmem>>, %arg14: memref<384x512xbf16, #tpu.memory_space<vmem>>, %arg15: memref<1x512xf32, #tpu.memory_space<vmem>>, %arg16: memref<512x128xbf16, #tpu.memory_space<vmem>>, %arg17: memref<1x128xf32, #tpu.memory_space<vmem>>, %arg18: memref<2x128xf32, #tpu.memory_space<vmem>>, %arg19: memref<16x384xf32, #tpu.memory_space<vmem>>) attributes {dimension_semantics = [], scalar_prefetch = 0 : i64, scratch_operands = 1 : i64, tpu.core_type = #tpu.core_type<tc>} {
    %c0 = arith.constant 0 : index
    %c0_0 = arith.constant 0 : index
    %0 = memref.load %arg0[%c0, %c0_0] : memref<2x8xi32, #tpu.memory_space<smem>>
    %1 = arith.index_cast %0 : i32 to index
    %c0_1 = arith.constant 0 : index
    %2 = vector.load %arg1[%1, %c0_1] : memref<56x384xf32, #tpu.memory_space<vmem>>, vector<1x384xf32>
    %c0_2 = arith.constant 0 : index
    %c0_3 = arith.constant 0 : index
    %3 = vector.load %arg19[%c0_2, %c0_3] : memref<16x384xf32, #tpu.memory_space<vmem>>, vector<1x384xf32>
    tpu.vector_store %arg19[%c0_2, %c0_3], %2 {strides = array<i32>} : memref<16x384xf32, #tpu.memory_space<vmem>>, vector<1x384xf32>,
    %c0_4 = arith.constant 0 : index
    %c1 = arith.constant 1 : index
    %4 = memref.load %arg0[%c0_4, %c1] : memref<2x8xi32, #tpu.memory_space<smem>>
    %5 = arith.index_cast %4 : i32 to index
    %c0_5 = arith.constant 0 : index
    %6 = vector.load %arg1[%5, %c0_5] : memref<56x384xf32, #tpu.memory_space<vmem>>, vector<1x384xf32>
    %c1_6 = arith.constant 1 : index
    %c0_7 = arith.constant 0 : index
    %7 = vector.load %arg19[%c1_6, %c0_7] : memref<16x384xf32, #tpu.memory_space<vmem>>, vector<1x384xf32>
    tpu.vector_store %arg19[%c1_6, %c0_7], %6 {strides = array<i32>} : memref<16x384xf32, #tpu.memory_space<vmem>>, vector<1x384xf32>,
    %c0_8 = arith.constant 0 : index
    %c2 = arith.constant 2 : index
    %8 = memref.load %arg0[%c0_8, %c2] : memref<2x8xi32, #tpu.memory_space<smem>>
    %9 = arith.index_cast %8 : i32 to index
    %c0_9 = arith.constant 0 : index
    %10 = vector.load %arg1[%9, %c0_9] : memref<56x384xf32, #tpu.memory_space<vmem>>, vector<1x384xf32>
    %c2_10 = arith.constant 2 : index
    %c0_11 = arith.constant 0 : index
    %11 = vector.load %arg19[%c2_10, %c0_11] : memref<16x384xf32, #tpu.memory_space<vmem>>, vector<1x384xf32>
    tpu.vector_store %arg19[%c2_10, %c0_11], %10 {strides = array<i32>} : memref<16x384xf32, #tpu.memory_space<vmem>>, vector<1x384xf32>,
    %c0_12 = arith.constant 0 : index
    %c3 = arith.constant 3 : index
    %12 = memref.load %arg0[%c0_12, %c3] : memref<2x8xi32, #tpu.memory_space<smem>>
    %13 = arith.index_cast %12 : i32 to index
    %c0_13 = arith.constant 0 : index
    %14 = vector.load %arg1[%13, %c0_13] : memref<56x384xf32, #tpu.memory_space<vmem>>, vector<1x384xf32>
    %c3_14 = arith.constant 3 : index
    %c0_15 = arith.constant 0 : index
    %15 = vector.load %arg19[%c3_14, %c0_15] : memref<16x384xf32, #tpu.memory_space<vmem>>, vector<1x384xf32>
    tpu.vector_store %arg19[%c3_14, %c0_15], %14 {strides = array<i32>} : memref<16x384xf32, #tpu.memory_space<vmem>>, vector<1x384xf32>,
    %c0_16 = arith.constant 0 : index
    %c4 = arith.constant 4 : index
    %16 = memref.load %arg0[%c0_16, %c4] : memref<2x8xi32, #tpu.memory_space<smem>>
    %17 = arith.index_cast %16 : i32 to index
    %c0_17 = arith.constant 0 : index
    %18 = vector.load %arg1[%17, %c0_17] : memref<56x384xf32, #tpu.memory_space<vmem>>, vector<1x384xf32>
    %c4_18 = arith.constant 4 : index
    %c0_19 = arith.constant 0 : index
    %19 = vector.load %arg19[%c4_18, %c0_19] : memref<16x384xf32, #tpu.memory_space<vmem>>, vector<1x384xf32>
    tpu.vector_store %arg19[%c4_18, %c0_19], %18 {strides = array<i32>} : memref<16x384xf32, #tpu.memory_space<vmem>>, vector<1x384xf32>,
    %c0_20 = arith.constant 0 : index
    %c5 = arith.constant 5 : index
    %20 = memref.load %arg0[%c0_20, %c5] : memref<2x8xi32, #tpu.memory_space<smem>>
    %21 = arith.index_cast %20 : i32 to index
    %c0_21 = arith.constant 0 : index
    %22 = vector.load %arg1[%21, %c0_21] : memref<56x384xf32, #tpu.memory_space<vmem>>, vector<1x384xf32>
    %c5_22 = arith.constant 5 : index
    %c0_23 = arith.constant 0 : index
    %23 = vector.load %arg19[%c5_22, %c0_23] : memref<16x384xf32, #tpu.memory_space<vmem>>, vector<1x384xf32>
    tpu.vector_store %arg19[%c5_22, %c0_23], %22 {strides = array<i32>} : memref<16x384xf32, #tpu.memory_space<vmem>>, vector<1x384xf32>,
    %c0_24 = arith.constant 0 : index
    %c6 = arith.constant 6 : index
    %24 = memref.load %arg0[%c0_24, %c6] : memref<2x8xi32, #tpu.memory_space<smem>>
    %25 = arith.index_cast %24 : i32 to index
    %c0_25 = arith.constant 0 : index
    %26 = vector.load %arg1[%25, %c0_25] : memref<56x384xf32, #tpu.memory_space<vmem>>, vector<1x384xf32>
    %c6_26 = arith.constant 6 : index
    %c0_27 = arith.constant 0 : index
    %27 = vector.load %arg19[%c6_26, %c0_27] : memref<16x384xf32, #tpu.memory_space<vmem>>, vector<1x384xf32>
    tpu.vector_store %arg19[%c6_26, %c0_27], %26 {strides = array<i32>} : memref<16x384xf32, #tpu.memory_space<vmem>>, vector<1x384xf32>,
    %c0_28 = arith.constant 0 : index
    %c7 = arith.constant 7 : index
    %28 = memref.load %arg0[%c0_28, %c7] : memref<2x8xi32, #tpu.memory_space<smem>>
    %29 = arith.index_cast %28 : i32 to index
    %c0_29 = arith.constant 0 : index
    %30 = vector.load %arg1[%29, %c0_29] : memref<56x384xf32, #tpu.memory_space<vmem>>, vector<1x384xf32>
    %c7_30 = arith.constant 7 : index
    %c0_31 = arith.constant 0 : index
    %31 = vector.load %arg19[%c7_30, %c0_31] : memref<16x384xf32, #tpu.memory_space<vmem>>, vector<1x384xf32>
    tpu.vector_store %arg19[%c7_30, %c0_31], %30 {strides = array<i32>} : memref<16x384xf32, #tpu.memory_space<vmem>>, vector<1x384xf32>,
    %c1_32 = arith.constant 1 : index
    %c0_33 = arith.constant 0 : index
    %32 = memref.load %arg0[%c1_32, %c0_33] : memref<2x8xi32, #tpu.memory_space<smem>>
    %33 = arith.index_cast %32 : i32 to index
    %c0_34 = arith.constant 0 : index
    %34 = vector.load %arg1[%33, %c0_34] : memref<56x384xf32, #tpu.memory_space<vmem>>, vector<1x384xf32>
    %c8 = arith.constant 8 : index
    %c0_35 = arith.constant 0 : index
    %35 = vector.load %arg19[%c8, %c0_35] : memref<16x384xf32, #tpu.memory_space<vmem>>, vector<1x384xf32>
    tpu.vector_store %arg19[%c8, %c0_35], %34 {strides = array<i32>} : memref<16x384xf32, #tpu.memory_space<vmem>>, vector<1x384xf32>,
    %c1_36 = arith.constant 1 : index
    %c1_37 = arith.constant 1 : index
    %36 = memref.load %arg0[%c1_36, %c1_37] : memref<2x8xi32, #tpu.memory_space<smem>>
    %37 = arith.index_cast %36 : i32 to index
    %c0_38 = arith.constant 0 : index
    %38 = vector.load %arg1[%37, %c0_38] : memref<56x384xf32, #tpu.memory_space<vmem>>, vector<1x384xf32>
    %c9 = arith.constant 9 : index
    %c0_39 = arith.constant 0 : index
    %39 = vector.load %arg19[%c9, %c0_39] : memref<16x384xf32, #tpu.memory_space<vmem>>, vector<1x384xf32>
    tpu.vector_store %arg19[%c9, %c0_39], %38 {strides = array<i32>} : memref<16x384xf32, #tpu.memory_space<vmem>>, vector<1x384xf32>,
    %c1_40 = arith.constant 1 : index
    %c2_41 = arith.constant 2 : index
    %40 = memref.load %arg0[%c1_40, %c2_41] : memref<2x8xi32, #tpu.memory_space<smem>>
    %41 = arith.index_cast %40 : i32 to index
    %c0_42 = arith.constant 0 : index
    %42 = vector.load %arg1[%41, %c0_42] : memref<56x384xf32, #tpu.memory_space<vmem>>, vector<1x384xf32>
    %c10 = arith.constant 10 : index
    %c0_43 = arith.constant 0 : index
    %43 = vector.load %arg19[%c10, %c0_43] : memref<16x384xf32, #tpu.memory_space<vmem>>, vector<1x384xf32>
    tpu.vector_store %arg19[%c10, %c0_43], %42 {strides = array<i32>} : memref<16x384xf32, #tpu.memory_space<vmem>>, vector<1x384xf32>,
    %c1_44 = arith.constant 1 : index
    %c3_45 = arith.constant 3 : index
    %44 = memref.load %arg0[%c1_44, %c3_45] : memref<2x8xi32, #tpu.memory_space<smem>>
    %45 = arith.index_cast %44 : i32 to index
    %c0_46 = arith.constant 0 : index
    %46 = vector.load %arg1[%45, %c0_46] : memref<56x384xf32, #tpu.memory_space<vmem>>, vector<1x384xf32>
    %c11 = arith.constant 11 : index
    %c0_47 = arith.constant 0 : index
    %47 = vector.load %arg19[%c11, %c0_47] : memref<16x384xf32, #tpu.memory_space<vmem>>, vector<1x384xf32>
    tpu.vector_store %arg19[%c11, %c0_47], %46 {strides = array<i32>} : memref<16x384xf32, #tpu.memory_space<vmem>>, vector<1x384xf32>,
    %c1_48 = arith.constant 1 : index
    %c4_49 = arith.constant 4 : index
    %48 = memref.load %arg0[%c1_48, %c4_49] : memref<2x8xi32, #tpu.memory_space<smem>>
    %49 = arith.index_cast %48 : i32 to index
    %c0_50 = arith.constant 0 : index
    %50 = vector.load %arg1[%49, %c0_50] : memref<56x384xf32, #tpu.memory_space<vmem>>, vector<1x384xf32>
    %c12 = arith.constant 12 : index
    %c0_51 = arith.constant 0 : index
    %51 = vector.load %arg19[%c12, %c0_51] : memref<16x384xf32, #tpu.memory_space<vmem>>, vector<1x384xf32>
    tpu.vector_store %arg19[%c12, %c0_51], %50 {strides = array<i32>} : memref<16x384xf32, #tpu.memory_space<vmem>>, vector<1x384xf32>,
    %c1_52 = arith.constant 1 : index
    %c5_53 = arith.constant 5 : index
    %52 = memref.load %arg0[%c1_52, %c5_53] : memref<2x8xi32, #tpu.memory_space<smem>>
    %53 = arith.index_cast %52 : i32 to index
    %c0_54 = arith.constant 0 : index
    %54 = vector.load %arg1[%53, %c0_54] : memref<56x384xf32, #tpu.memory_space<vmem>>, vector<1x384xf32>
    %c13 = arith.constant 13 : index
    %c0_55 = arith.constant 0 : index
    %55 = vector.load %arg19[%c13, %c0_55] : memref<16x384xf32, #tpu.memory_space<vmem>>, vector<1x384xf32>
    tpu.vector_store %arg19[%c13, %c0_55], %54 {strides = array<i32>} : memref<16x384xf32, #tpu.memory_space<vmem>>, vector<1x384xf32>,
    %c1_56 = arith.constant 1 : index
    %c6_57 = arith.constant 6 : index
    %56 = memref.load %arg0[%c1_56, %c6_57] : memref<2x8xi32, #tpu.memory_space<smem>>
    %57 = arith.index_cast %56 : i32 to index
    %c0_58 = arith.constant 0 : index
    %58 = vector.load %arg1[%57, %c0_58] : memref<56x384xf32, #tpu.memory_space<vmem>>, vector<1x384xf32>
    %c14 = arith.constant 14 : index
    %c0_59 = arith.constant 0 : index
    %59 = vector.load %arg19[%c14, %c0_59] : memref<16x384xf32, #tpu.memory_space<vmem>>, vector<1x384xf32>
    tpu.vector_store %arg19[%c14, %c0_59], %58 {strides = array<i32>} : memref<16x384xf32, #tpu.memory_space<vmem>>, vector<1x384xf32>,
    %c1_60 = arith.constant 1 : index
    %c7_61 = arith.constant 7 : index
    %60 = memref.load %arg0[%c1_60, %c7_61] : memref<2x8xi32, #tpu.memory_space<smem>>
    %61 = arith.index_cast %60 : i32 to index
    %c0_62 = arith.constant 0 : index
    %62 = vector.load %arg1[%61, %c0_62] : memref<56x384xf32, #tpu.memory_space<vmem>>, vector<1x384xf32>
    %c15 = arith.constant 15 : index
    %c0_63 = arith.constant 0 : index
    %63 = vector.load %arg19[%c15, %c0_63] : memref<16x384xf32, #tpu.memory_space<vmem>>, vector<1x384xf32>
    tpu.vector_store %arg19[%c15, %c0_63], %62 {strides = array<i32>} : memref<16x384xf32, #tpu.memory_space<vmem>>, vector<1x384xf32>,
    %c0_64 = arith.constant 0 : index
    %c0_65 = arith.constant 0 : index
    %64 = vector.load %arg19[%c0_64, %c0_65] : memref<16x384xf32, #tpu.memory_space<vmem>>, vector<16x384xf32>
    %65 = arith.truncf %64 : vector<16x384xf32> to vector<16x384xbf16>
    %c0_66 = arith.constant 0 : index
    %c0_67 = arith.constant 0 : index
    %c0_68 = arith.constant 0 : index
    %66 = vector.load %arg2[%c0_66, %c0_67, %c0_68] : memref<2x384x1152xbf16, #tpu.memory_space<vmem>>, vector<1x384x1152xbf16>
    %67 = vector.shape_cast %66 : vector<1x384x1152xbf16> to vector<384x1152xbf16>
    %cst = arith.constant dense<0.000000e+00> : vector<16x1152xf32>
    %68 = tpu.matmul %65, %67, %cst {dimension_numbers = #tpu.dot_dimension_numbers<[1], [0], [0], [1], [0, 0, 1, 1], [], []>} : vector<16x384xbf16>, vector<384x1152xbf16>, vector<16x1152xf32> -> vector<16x1152xf32>
    %c0_69 = arith.constant 0 : index
    %c0_70 = arith.constant 0 : index
    %c0_71 = arith.constant 0 : index
    %69 = vector.load %arg3[%c0_69, %c0_70, %c0_71] : memref<2x1x1152xf32, #tpu.memory_space<vmem>>, vector<1x1x1152xf32>
    %70 = vector.shape_cast %69 : vector<1x1x1152xf32> to vector<1x1152xf32>
    %71 = vector.broadcast %70 : vector<1x1152xf32> to vector<16x1152xf32>
    %72 = arith.addf %68, %71 : vector<16x1152xf32>
    %73 = vector.extract_strided_slice %72 {offsets = [0, 0], sizes = [16, 384], strides = [1, 1]} : vector<16x1152xf32> to vector<16x384xf32>
    %74 = vector.shape_cast %73 : vector<16x384xf32> to vector<2x8x384xf32>
    %75 = vector.extract_strided_slice %72 {offsets = [0, 384], sizes = [16, 384], strides = [1, 1]} : vector<16x1152xf32> to vector<16x384xf32>
    %76 = vector.shape_cast %75 : vector<16x384xf32> to vector<2x8x384xf32>
    %77 = vector.extract_strided_slice %72 {offsets = [0, 768], sizes = [16, 384], strides = [1, 1]} : vector<16x1152xf32> to vector<16x384xf32>
    %78 = vector.shape_cast %77 : vector<16x384xf32> to vector<2x8x384xf32>
    %79 = arith.truncf %74 : vector<2x8x384xf32> to vector<2x8x384xbf16>
    %80 = arith.truncf %76 : vector<2x8x384xf32> to vector<2x8x384xbf16>
    "tpu.trace_start"() <{level = 10 : i32, message = "bqd,bkd->bqk"}> : () -> ()
    %cst_72 = arith.constant dense<0.000000e+00> : vector<2x8x8xf32>
    %81 = tpu.matmul %79, %80, %cst_72 {dimension_numbers = #tpu.dot_dimension_numbers<[2], [2], [1], [1], [0, 0, 0, 1, 1, 1], [0], [0]>} : vector<2x8x384xbf16>, vector<2x8x384xbf16>, vector<2x8x8xf32> -> vector<2x8x8xf32>
    "tpu.trace_stop"() : () -> ()
    %cst_73 = arith.constant 0.0577350259 : f32
    %82 = vector.broadcast %cst_73 : f32 to vector<2x8x8xf32>
    %83 = arith.mulf %81, %82 : vector<2x8x8xf32>
    %cst_74 = arith.constant dense<0xFF800000> : vector<2x8xf32>
    %84 = vector.multi_reduction <maximumf>, %83, %cst_74 [2] : vector<2x8x8xf32> to vector<2x8xf32>
    %85 = vector.shape_cast %84 : vector<2x8xf32> to vector<2x8x1xf32>
    %86 = vector.broadcast %85 : vector<2x8x1xf32> to vector<2x8x8xf32>
    %87 = arith.subf %83, %86 : vector<2x8x8xf32>
    %88 = math.exp %87 : vector<2x8x8xf32>
    %cst_75 = arith.constant dense<0.000000e+00> : vector<2x8xf32>
    %89 = vector.multi_reduction <add>, %88, %cst_75 [2] : vector<2x8x8xf32> to vector<2x8xf32>
    %90 = vector.shape_cast %89 : vector<2x8xf32> to vector<2x8x1xf32>
    %91 = tpu.reciprocal %90 {approx = true} : vector<2x8x1xf32> -> vector<2x8x1xf32>
    %92 = vector.broadcast %91 : vector<2x8x1xf32> to vector<2x8x8xf32>
    %93 = arith.mulf %88, %92 : vector<2x8x8xf32>
    %94 = arith.truncf %93 : vector<2x8x8xf32> to vector<2x8x8xbf16>
    %95 = arith.truncf %78 : vector<2x8x384xf32> to vector<2x8x384xbf16>
    "tpu.trace_start"() <{level = 10 : i32, message = "bqk,bkd->bqd"}> : () -> ()
    %cst_76 = arith.constant dense<0.000000e+00> : vector<2x8x384xf32>
    %96 = tpu.matmul %94, %95, %cst_76 {dimension_numbers = #tpu.dot_dimension_numbers<[2], [1], [1], [2], [0, 0, 0, 1, 1, 2], [0], [0]>} : vector<2x8x8xbf16>, vector<2x8x384xbf16>, vector<2x8x384xf32> -> vector<2x8x384xf32>
    "tpu.trace_stop"() : () -> ()
    %97 = vector.shape_cast %96 : vector<2x8x384xf32> to vector<16x384xf32>
    %98 = arith.truncf %97 : vector<16x384xf32> to vector<16x384xbf16>
    %c0_77 = arith.constant 0 : index
    %c0_78 = arith.constant 0 : index
    %c0_79 = arith.constant 0 : index
    %99 = vector.load %arg4[%c0_77, %c0_78, %c0_79] : memref<2x384x384xbf16, #tpu.memory_space<vmem>>, vector<1x384x384xbf16>
    %100 = vector.shape_cast %99 : vector<1x384x384xbf16> to vector<384x384xbf16>
    %cst_80 = arith.constant dense<0.000000e+00> : vector<16x384xf32>
    %101 = tpu.matmul %98, %100, %cst_80 {dimension_numbers = #tpu.dot_dimension_numbers<[1], [0], [0], [1], [0, 0, 1, 1], [], []>} : vector<16x384xbf16>, vector<384x384xbf16>, vector<16x384xf32> -> vector<16x384xf32>
    %c0_81 = arith.constant 0 : index
    %c0_82 = arith.constant 0 : index
    %c0_83 = arith.constant 0 : index
    %102 = vector.load %arg5[%c0_81, %c0_82, %c0_83] : memref<2x1x384xf32, #tpu.memory_space<vmem>>, vector<1x1x384xf32>
    %103 = vector.shape_cast %102 : vector<1x1x384xf32> to vector<1x384xf32>
    %104 = vector.broadcast %103 : vector<1x384xf32> to vector<16x384xf32>
    %105 = arith.addf %101, %104 : vector<16x384xf32>
    %106 = arith.addf %64, %105 : vector<16x384xf32>
    %c0_84 = arith.constant 0 : index
    %c0_85 = arith.constant 0 : index
    %c0_86 = arith.constant 0 : index
    %107 = vector.load %arg6[%c0_84, %c0_85, %c0_86] : memref<2x1x384xf32, #tpu.memory_space<vmem>>, vector<1x1x384xf32>
    %108 = vector.shape_cast %107 : vector<1x1x384xf32> to vector<1x384xf32>
    %c0_87 = arith.constant 0 : index
    %c0_88 = arith.constant 0 : index
    %c0_89 = arith.constant 0 : index
    %109 = vector.load %arg7[%c0_87, %c0_88, %c0_89] : memref<2x1x384xf32, #tpu.memory_space<vmem>>, vector<1x1x384xf32>
    %110 = vector.shape_cast %109 : vector<1x1x384xf32> to vector<1x384xf32>
    %cst_90 = arith.constant dense<0.000000e+00> : vector<16xf32>
    %111 = vector.multi_reduction <add>, %106, %cst_90 [1] : vector<16x384xf32> to vector<16xf32>
    %112 = vector.shape_cast %111 : vector<16xf32> to vector<16x1xf32>
    %cst_91 = arith.constant 0.00333333341 : f32
    %113 = vector.broadcast %cst_91 : f32 to vector<16x1xf32>
    %114 = arith.mulf %112, %113 : vector<16x1xf32>
    %115 = arith.mulf %106, %106 : vector<16x384xf32>
    %cst_92 = arith.constant dense<0.000000e+00> : vector<16xf32>
    %116 = vector.multi_reduction <add>, %115, %cst_92 [1] : vector<16x384xf32> to vector<16xf32>
    %117 = vector.shape_cast %116 : vector<16xf32> to vector<16x1xf32>
    %cst_93 = arith.constant 0.00333333341 : f32
    %118 = vector.broadcast %cst_93 : f32 to vector<16x1xf32>
    %119 = arith.mulf %117, %118 : vector<16x1xf32>
    %120 = arith.mulf %114, %114 : vector<16x1xf32>
    %121 = arith.subf %119, %120 : vector<16x1xf32>
    %122 = vector.broadcast %114 : vector<16x1xf32> to vector<16x384xf32>
    %123 = arith.subf %106, %122 : vector<16x384xf32>
    %cst_94 = arith.constant 9.99999974E-6 : f32
    %124 = vector.broadcast %cst_94 : f32 to vector<16x1xf32>
    %125 = arith.addf %121, %124 : vector<16x1xf32>
    %126 = math.rsqrt %125 : vector<16x1xf32>
    %127 = vector.broadcast %126 : vector<16x1xf32> to vector<16x384xf32>
    %128 = arith.mulf %123, %127 : vector<16x384xf32>
    %129 = vector.broadcast %108 : vector<1x384xf32> to vector<16x384xf32>
    %130 = arith.mulf %128, %129 : vector<16x384xf32>
    %131 = vector.broadcast %110 : vector<1x384xf32> to vector<16x384xf32>
    %132 = arith.addf %130, %131 : vector<16x384xf32>
    %133 = arith.truncf %132 : vector<16x384xf32> to vector<16x384xbf16>
    %c0_95 = arith.constant 0 : index
    %c0_96 = arith.constant 0 : index
    %c0_97 = arith.constant 0 : index
    %134 = vector.load %arg8[%c0_95, %c0_96, %c0_97] : memref<2x384x256xbf16, #tpu.memory_space<vmem>>, vector<1x384x256xbf16>
    %135 = vector.shape_cast %134 : vector<1x384x256xbf16> to vector<384x256xbf16>
    %cst_98 = arith.constant dense<0.000000e+00> : vector<16x256xf32>
    %136 = tpu.matmul %133, %135, %cst_98 {dimension_numbers = #tpu.dot_dimension_numbers<[1], [0], [0], [1], [0, 0, 1, 1], [], []>} : vector<16x384xbf16>, vector<384x256xbf16>, vector<16x256xf32> -> vector<16x256xf32>
    %c0_99 = arith.constant 0 : index
    %c0_100 = arith.constant 0 : index
    %c0_101 = arith.constant 0 : index
    %137 = vector.load %arg9[%c0_99, %c0_100, %c0_101] : memref<2x1x256xf32, #tpu.memory_space<vmem>>, vector<1x1x256xf32>
    %138 = vector.shape_cast %137 : vector<1x1x256xf32> to vector<1x256xf32>
    %139 = vector.broadcast %138 : vector<1x256xf32> to vector<16x256xf32>
    %140 = arith.addf %136, %139 : vector<16x256xf32>
    %cst_102 = arith.constant 0.000000e+00 : f32
    %141 = vector.broadcast %cst_102 : f32 to vector<16x256xf32>
    %142 = arith.maximumf %140, %141 : vector<16x256xf32>
    %143 = arith.truncf %142 : vector<16x256xf32> to vector<16x256xbf16>
    %c0_103 = arith.constant 0 : index
    %c0_104 = arith.constant 0 : index
    %c0_105 = arith.constant 0 : index
    %144 = vector.load %arg10[%c0_103, %c0_104, %c0_105] : memref<2x256x384xbf16, #tpu.memory_space<vmem>>, vector<1x256x384xbf16>
    %145 = vector.shape_cast %144 : vector<1x256x384xbf16> to vector<256x384xbf16>
    %cst_106 = arith.constant dense<0.000000e+00> : vector<16x384xf32>
    %146 = tpu.matmul %143, %145, %cst_106 {dimension_numbers = #tpu.dot_dimension_numbers<[1], [0], [0], [1], [0, 0, 1, 1], [], []>} : vector<16x256xbf16>, vector<256x384xbf16>, vector<16x384xf32> -> vector<16x384xf32>
    %c0_107 = arith.constant 0 : index
    %c0_108 = arith.constant 0 : index
    %c0_109 = arith.constant 0 : index
    %147 = vector.load %arg11[%c0_107, %c0_108, %c0_109] : memref<2x1x384xf32, #tpu.memory_space<vmem>>, vector<1x1x384xf32>
    %148 = vector.shape_cast %147 : vector<1x1x384xf32> to vector<1x384xf32>
    %149 = vector.broadcast %148 : vector<1x384xf32> to vector<16x384xf32>
    %150 = arith.addf %146, %149 : vector<16x384xf32>
    %151 = arith.addf %132, %150 : vector<16x384xf32>
    %c0_110 = arith.constant 0 : index
    %c0_111 = arith.constant 0 : index
    %c0_112 = arith.constant 0 : index
    %152 = vector.load %arg12[%c0_110, %c0_111, %c0_112] : memref<2x1x384xf32, #tpu.memory_space<vmem>>, vector<1x1x384xf32>
    %153 = vector.shape_cast %152 : vector<1x1x384xf32> to vector<1x384xf32>
    %c0_113 = arith.constant 0 : index
    %c0_114 = arith.constant 0 : index
    %c0_115 = arith.constant 0 : index
    %154 = vector.load %arg13[%c0_113, %c0_114, %c0_115] : memref<2x1x384xf32, #tpu.memory_space<vmem>>, vector<1x1x384xf32>
    %155 = vector.shape_cast %154 : vector<1x1x384xf32> to vector<1x384xf32>
    %cst_116 = arith.constant dense<0.000000e+00> : vector<16xf32>
    %156 = vector.multi_reduction <add>, %151, %cst_116 [1] : vector<16x384xf32> to vector<16xf32>
    %157 = vector.shape_cast %156 : vector<16xf32> to vector<16x1xf32>
    %cst_117 = arith.constant 0.00333333341 : f32
    %158 = vector.broadcast %cst_117 : f32 to vector<16x1xf32>
    %159 = arith.mulf %157, %158 : vector<16x1xf32>
    %160 = arith.mulf %151, %151 : vector<16x384xf32>
    %cst_118 = arith.constant dense<0.000000e+00> : vector<16xf32>
    %161 = vector.multi_reduction <add>, %160, %cst_118 [1] : vector<16x384xf32> to vector<16xf32>
    %162 = vector.shape_cast %161 : vector<16xf32> to vector<16x1xf32>
    %cst_119 = arith.constant 0.00333333341 : f32
    %163 = vector.broadcast %cst_119 : f32 to vector<16x1xf32>
    %164 = arith.mulf %162, %163 : vector<16x1xf32>
    %165 = arith.mulf %159, %159 : vector<16x1xf32>
    %166 = arith.subf %164, %165 : vector<16x1xf32>
    %167 = vector.broadcast %159 : vector<16x1xf32> to vector<16x384xf32>
    %168 = arith.subf %151, %167 : vector<16x384xf32>
    %cst_120 = arith.constant 9.99999974E-6 : f32
    %169 = vector.broadcast %cst_120 : f32 to vector<16x1xf32>
    %170 = arith.addf %166, %169 : vector<16x1xf32>
    %171 = math.rsqrt %170 : vector<16x1xf32>
    %172 = vector.broadcast %171 : vector<16x1xf32> to vector<16x384xf32>
    %173 = arith.mulf %168, %172 : vector<16x384xf32>
    %174 = vector.broadcast %153 : vector<1x384xf32> to vector<16x384xf32>
    %175 = arith.mulf %173, %174 : vector<16x384xf32>
    %176 = vector.broadcast %155 : vector<1x384xf32> to vector<16x384xf32>
    %177 = arith.addf %175, %176 : vector<16x384xf32>
    %178 = arith.truncf %177 : vector<16x384xf32> to vector<16x384xbf16>
    %c1_121 = arith.constant 1 : index
    %c0_122 = arith.constant 0 : index
    %c0_123 = arith.constant 0 : index
    %179 = vector.load %arg2[%c1_121, %c0_122, %c0_123] : memref<2x384x1152xbf16, #tpu.memory_space<vmem>>, vector<1x384x1152xbf16>
    %180 = vector.shape_cast %179 : vector<1x384x1152xbf16> to vector<384x1152xbf16>
    %cst_124 = arith.constant dense<0.000000e+00> : vector<16x1152xf32>
    %181 = tpu.matmul %178, %180, %cst_124 {dimension_numbers = #tpu.dot_dimension_numbers<[1], [0], [0], [1], [0, 0, 1, 1], [], []>} : vector<16x384xbf16>, vector<384x1152xbf16>, vector<16x1152xf32> -> vector<16x1152xf32>
    %c1_125 = arith.constant 1 : index
    %c0_126 = arith.constant 0 : index
    %c0_127 = arith.constant 0 : index
    %182 = vector.load %arg3[%c1_125, %c0_126, %c0_127] : memref<2x1x1152xf32, #tpu.memory_space<vmem>>, vector<1x1x1152xf32>
    %183 = vector.shape_cast %182 : vector<1x1x1152xf32> to vector<1x1152xf32>
    %184 = vector.broadcast %183 : vector<1x1152xf32> to vector<16x1152xf32>
    %185 = arith.addf %181, %184 : vector<16x1152xf32>
    %186 = vector.extract_strided_slice %185 {offsets = [0, 0], sizes = [16, 384], strides = [1, 1]} : vector<16x1152xf32> to vector<16x384xf32>
    %187 = vector.shape_cast %186 : vector<16x384xf32> to vector<2x8x384xf32>
    %188 = vector.extract_strided_slice %185 {offsets = [0, 384], sizes = [16, 384], strides = [1, 1]} : vector<16x1152xf32> to vector<16x384xf32>
    %189 = vector.shape_cast %188 : vector<16x384xf32> to vector<2x8x384xf32>
    %190 = vector.extract_strided_slice %185 {offsets = [0, 768], sizes = [16, 384], strides = [1, 1]} : vector<16x1152xf32> to vector<16x384xf32>
    %191 = vector.shape_cast %190 : vector<16x384xf32> to vector<2x8x384xf32>
    %192 = arith.truncf %187 : vector<2x8x384xf32> to vector<2x8x384xbf16>
    %193 = arith.truncf %189 : vector<2x8x384xf32> to vector<2x8x384xbf16>
    "tpu.trace_start"() <{level = 10 : i32, message = "bqd,bkd->bqk"}> : () -> ()
    %cst_128 = arith.constant dense<0.000000e+00> : vector<2x8x8xf32>
    %194 = tpu.matmul %192, %193, %cst_128 {dimension_numbers = #tpu.dot_dimension_numbers<[2], [2], [1], [1], [0, 0, 0, 1, 1, 1], [0], [0]>} : vector<2x8x384xbf16>, vector<2x8x384xbf16>, vector<2x8x8xf32> -> vector<2x8x8xf32>
    "tpu.trace_stop"() : () -> ()
    %cst_129 = arith.constant 0.0577350259 : f32
    %195 = vector.broadcast %cst_129 : f32 to vector<2x8x8xf32>
    %196 = arith.mulf %194, %195 : vector<2x8x8xf32>
    %cst_130 = arith.constant dense<0xFF800000> : vector<2x8xf32>
    %197 = vector.multi_reduction <maximumf>, %196, %cst_130 [2] : vector<2x8x8xf32> to vector<2x8xf32>
    %198 = vector.shape_cast %197 : vector<2x8xf32> to vector<2x8x1xf32>
    %199 = vector.broadcast %198 : vector<2x8x1xf32> to vector<2x8x8xf32>
    %200 = arith.subf %196, %199 : vector<2x8x8xf32>
    %201 = math.exp %200 : vector<2x8x8xf32>
    %cst_131 = arith.constant dense<0.000000e+00> : vector<2x8xf32>
    %202 = vector.multi_reduction <add>, %201, %cst_131 [2] : vector<2x8x8xf32> to vector<2x8xf32>
    %203 = vector.shape_cast %202 : vector<2x8xf32> to vector<2x8x1xf32>
    %204 = tpu.reciprocal %203 {approx = true} : vector<2x8x1xf32> -> vector<2x8x1xf32>
    %205 = vector.broadcast %204 : vector<2x8x1xf32> to vector<2x8x8xf32>
    %206 = arith.mulf %201, %205 : vector<2x8x8xf32>
    %207 = arith.truncf %206 : vector<2x8x8xf32> to vector<2x8x8xbf16>
    %208 = arith.truncf %191 : vector<2x8x384xf32> to vector<2x8x384xbf16>
    "tpu.trace_start"() <{level = 10 : i32, message = "bqk,bkd->bqd"}> : () -> ()
    %cst_132 = arith.constant dense<0.000000e+00> : vector<2x8x384xf32>
    %209 = tpu.matmul %207, %208, %cst_132 {dimension_numbers = #tpu.dot_dimension_numbers<[2], [1], [1], [2], [0, 0, 0, 1, 1, 2], [0], [0]>} : vector<2x8x8xbf16>, vector<2x8x384xbf16>, vector<2x8x384xf32> -> vector<2x8x384xf32>
    "tpu.trace_stop"() : () -> ()
    %210 = vector.shape_cast %209 : vector<2x8x384xf32> to vector<16x384xf32>
    %211 = arith.truncf %210 : vector<16x384xf32> to vector<16x384xbf16>
    %c1_133 = arith.constant 1 : index
    %c0_134 = arith.constant 0 : index
    %c0_135 = arith.constant 0 : index
    %212 = vector.load %arg4[%c1_133, %c0_134, %c0_135] : memref<2x384x384xbf16, #tpu.memory_space<vmem>>, vector<1x384x384xbf16>
    %213 = vector.shape_cast %212 : vector<1x384x384xbf16> to vector<384x384xbf16>
    %cst_136 = arith.constant dense<0.000000e+00> : vector<16x384xf32>
    %214 = tpu.matmul %211, %213, %cst_136 {dimension_numbers = #tpu.dot_dimension_numbers<[1], [0], [0], [1], [0, 0, 1, 1], [], []>} : vector<16x384xbf16>, vector<384x384xbf16>, vector<16x384xf32> -> vector<16x384xf32>
    %c1_137 = arith.constant 1 : index
    %c0_138 = arith.constant 0 : index
    %c0_139 = arith.constant 0 : index
    %215 = vector.load %arg5[%c1_137, %c0_138, %c0_139] : memref<2x1x384xf32, #tpu.memory_space<vmem>>, vector<1x1x384xf32>
    %216 = vector.shape_cast %215 : vector<1x1x384xf32> to vector<1x384xf32>
    %217 = vector.broadcast %216 : vector<1x384xf32> to vector<16x384xf32>
    %218 = arith.addf %214, %217 : vector<16x384xf32>
    %219 = arith.addf %177, %218 : vector<16x384xf32>
    %c1_140 = arith.constant 1 : index
    %c0_141 = arith.constant 0 : index
    %c0_142 = arith.constant 0 : index
    %220 = vector.load %arg6[%c1_140, %c0_141, %c0_142] : memref<2x1x384xf32, #tpu.memory_space<vmem>>, vector<1x1x384xf32>
    %221 = vector.shape_cast %220 : vector<1x1x384xf32> to vector<1x384xf32>
    %c1_143 = arith.constant 1 : index
    %c0_144 = arith.constant 0 : index
    %c0_145 = arith.constant 0 : index
    %222 = vector.load %arg7[%c1_143, %c0_144, %c0_145] : memref<2x1x384xf32, #tpu.memory_space<vmem>>, vector<1x1x384xf32>
    %223 = vector.shape_cast %222 : vector<1x1x384xf32> to vector<1x384xf32>
    %cst_146 = arith.constant dense<0.000000e+00> : vector<16xf32>
    %224 = vector.multi_reduction <add>, %219, %cst_146 [1] : vector<16x384xf32> to vector<16xf32>
    %225 = vector.shape_cast %224 : vector<16xf32> to vector<16x1xf32>
    %cst_147 = arith.constant 0.00333333341 : f32
    %226 = vector.broadcast %cst_147 : f32 to vector<16x1xf32>
    %227 = arith.mulf %225, %226 : vector<16x1xf32>
    %228 = arith.mulf %219, %219 : vector<16x384xf32>
    %cst_148 = arith.constant dense<0.000000e+00> : vector<16xf32>
    %229 = vector.multi_reduction <add>, %228, %cst_148 [1] : vector<16x384xf32> to vector<16xf32>
    %230 = vector.shape_cast %229 : vector<16xf32> to vector<16x1xf32>
    %cst_149 = arith.constant 0.00333333341 : f32
    %231 = vector.broadcast %cst_149 : f32 to vector<16x1xf32>
    %232 = arith.mulf %230, %231 : vector<16x1xf32>
    %233 = arith.mulf %227, %227 : vector<16x1xf32>
    %234 = arith.subf %232, %233 : vector<16x1xf32>
    %235 = vector.broadcast %227 : vector<16x1xf32> to vector<16x384xf32>
    %236 = arith.subf %219, %235 : vector<16x384xf32>
    %cst_150 = arith.constant 9.99999974E-6 : f32
    %237 = vector.broadcast %cst_150 : f32 to vector<16x1xf32>
    %238 = arith.addf %234, %237 : vector<16x1xf32>
    %239 = math.rsqrt %238 : vector<16x1xf32>
    %240 = vector.broadcast %239 : vector<16x1xf32> to vector<16x384xf32>
    %241 = arith.mulf %236, %240 : vector<16x384xf32>
    %242 = vector.broadcast %221 : vector<1x384xf32> to vector<16x384xf32>
    %243 = arith.mulf %241, %242 : vector<16x384xf32>
    %244 = vector.broadcast %223 : vector<1x384xf32> to vector<16x384xf32>
    %245 = arith.addf %243, %244 : vector<16x384xf32>
    %246 = arith.truncf %245 : vector<16x384xf32> to vector<16x384xbf16>
    %c1_151 = arith.constant 1 : index
    %c0_152 = arith.constant 0 : index
    %c0_153 = arith.constant 0 : index
    %247 = vector.load %arg8[%c1_151, %c0_152, %c0_153] : memref<2x384x256xbf16, #tpu.memory_space<vmem>>, vector<1x384x256xbf16>
    %248 = vector.shape_cast %247 : vector<1x384x256xbf16> to vector<384x256xbf16>
    %cst_154 = arith.constant dense<0.000000e+00> : vector<16x256xf32>
    %249 = tpu.matmul %246, %248, %cst_154 {dimension_numbers = #tpu.dot_dimension_numbers<[1], [0], [0], [1], [0, 0, 1, 1], [], []>} : vector<16x384xbf16>, vector<384x256xbf16>, vector<16x256xf32> -> vector<16x256xf32>
    %c1_155 = arith.constant 1 : index
    %c0_156 = arith.constant 0 : index
    %c0_157 = arith.constant 0 : index
    %250 = vector.load %arg9[%c1_155, %c0_156, %c0_157] : memref<2x1x256xf32, #tpu.memory_space<vmem>>, vector<1x1x256xf32>
    %251 = vector.shape_cast %250 : vector<1x1x256xf32> to vector<1x256xf32>
    %252 = vector.broadcast %251 : vector<1x256xf32> to vector<16x256xf32>
    %253 = arith.addf %249, %252 : vector<16x256xf32>
    %cst_158 = arith.constant 0.000000e+00 : f32
    %254 = vector.broadcast %cst_158 : f32 to vector<16x256xf32>
    %255 = arith.maximumf %253, %254 : vector<16x256xf32>
    %256 = arith.truncf %255 : vector<16x256xf32> to vector<16x256xbf16>
    %c1_159 = arith.constant 1 : index
    %c0_160 = arith.constant 0 : index
    %c0_161 = arith.constant 0 : index
    %257 = vector.load %arg10[%c1_159, %c0_160, %c0_161] : memref<2x256x384xbf16, #tpu.memory_space<vmem>>, vector<1x256x384xbf16>
    %258 = vector.shape_cast %257 : vector<1x256x384xbf16> to vector<256x384xbf16>
    %cst_162 = arith.constant dense<0.000000e+00> : vector<16x384xf32>
    %259 = tpu.matmul %256, %258, %cst_162 {dimension_numbers = #tpu.dot_dimension_numbers<[1], [0], [0], [1], [0, 0, 1, 1], [], []>} : vector<16x256xbf16>, vector<256x384xbf16>, vector<16x384xf32> -> vector<16x384xf32>
    %c1_163 = arith.constant 1 : index
    %c0_164 = arith.constant 0 : index
    %c0_165 = arith.constant 0 : index
    %260 = vector.load %arg11[%c1_163, %c0_164, %c0_165] : memref<2x1x384xf32, #tpu.memory_space<vmem>>, vector<1x1x384xf32>
    %261 = vector.shape_cast %260 : vector<1x1x384xf32> to vector<1x384xf32>
    %262 = vector.broadcast %261 : vector<1x384xf32> to vector<16x384xf32>
    %263 = arith.addf %259, %262 : vector<16x384xf32>
    %264 = arith.addf %245, %263 : vector<16x384xf32>
    %c1_166 = arith.constant 1 : index
    %c0_167 = arith.constant 0 : index
    %c0_168 = arith.constant 0 : index
    %265 = vector.load %arg12[%c1_166, %c0_167, %c0_168] : memref<2x1x384xf32, #tpu.memory_space<vmem>>, vector<1x1x384xf32>
    %266 = vector.shape_cast %265 : vector<1x1x384xf32> to vector<1x384xf32>
    %c1_169 = arith.constant 1 : index
    %c0_170 = arith.constant 0 : index
    %c0_171 = arith.constant 0 : index
    %267 = vector.load %arg13[%c1_169, %c0_170, %c0_171] : memref<2x1x384xf32, #tpu.memory_space<vmem>>, vector<1x1x384xf32>
    %268 = vector.shape_cast %267 : vector<1x1x384xf32> to vector<1x384xf32>
    %cst_172 = arith.constant dense<0.000000e+00> : vector<16xf32>
    %269 = vector.multi_reduction <add>, %264, %cst_172 [1] : vector<16x384xf32> to vector<16xf32>
    %270 = vector.shape_cast %269 : vector<16xf32> to vector<16x1xf32>
    %cst_173 = arith.constant 0.00333333341 : f32
    %271 = vector.broadcast %cst_173 : f32 to vector<16x1xf32>
    %272 = arith.mulf %270, %271 : vector<16x1xf32>
    %273 = arith.mulf %264, %264 : vector<16x384xf32>
    %cst_174 = arith.constant dense<0.000000e+00> : vector<16xf32>
    %274 = vector.multi_reduction <add>, %273, %cst_174 [1] : vector<16x384xf32> to vector<16xf32>
    %275 = vector.shape_cast %274 : vector<16xf32> to vector<16x1xf32>
    %cst_175 = arith.constant 0.00333333341 : f32
    %276 = vector.broadcast %cst_175 : f32 to vector<16x1xf32>
    %277 = arith.mulf %275, %276 : vector<16x1xf32>
    %278 = arith.mulf %272, %272 : vector<16x1xf32>
    %279 = arith.subf %277, %278 : vector<16x1xf32>
    %280 = vector.broadcast %272 : vector<16x1xf32> to vector<16x384xf32>
    %281 = arith.subf %264, %280 : vector<16x384xf32>
    %cst_176 = arith.constant 9.99999974E-6 : f32
    %282 = vector.broadcast %cst_176 : f32 to vector<16x1xf32>
    %283 = arith.addf %279, %282 : vector<16x1xf32>
    %284 = math.rsqrt %283 : vector<16x1xf32>
    %285 = vector.broadcast %284 : vector<16x1xf32> to vector<16x384xf32>
    %286 = arith.mulf %281, %285 : vector<16x384xf32>
    %287 = vector.broadcast %266 : vector<1x384xf32> to vector<16x384xf32>
    %288 = arith.mulf %286, %287 : vector<16x384xf32>
    %289 = vector.broadcast %268 : vector<1x384xf32> to vector<16x384xf32>
    %290 = arith.addf %288, %289 : vector<16x384xf32>
    %291 = vector.shape_cast %290 : vector<16x384xf32> to vector<2x8x384xf32>
    %292 = vector.extract_strided_slice %291 {offsets = [0, 7, 0], sizes = [2, 1, 384], strides = [1, 1, 1]} : vector<2x8x384xf32> to vector<2x1x384xf32>
    %293 = vector.shape_cast %292 : vector<2x1x384xf32> to vector<2x384xf32>
    %cst_177 = arith.constant 0.000000e+00 : f32
    %294 = vector.broadcast %cst_177 : f32 to vector<2x384xf32>
    %295 = arith.maximumf %293, %294 : vector<2x384xf32>
    %296 = arith.truncf %295 : vector<2x384xf32> to vector<2x384xbf16>
    %c0_178 = arith.constant 0 : index
    %c0_179 = arith.constant 0 : index
    %297 = vector.load %arg14[%c0_178, %c0_179] : memref<384x512xbf16, #tpu.memory_space<vmem>>, vector<384x512xbf16>
    %cst_180 = arith.constant dense<0.000000e+00> : vector<2x512xf32>
    %298 = tpu.matmul %296, %297, %cst_180 {dimension_numbers = #tpu.dot_dimension_numbers<[1], [0], [0], [1], [0, 0, 1, 1], [], []>} : vector<2x384xbf16>, vector<384x512xbf16>, vector<2x512xf32> -> vector<2x512xf32>
    %c0_181 = arith.constant 0 : index
    %c0_182 = arith.constant 0 : index
    %299 = vector.load %arg15[%c0_181, %c0_182] : memref<1x512xf32, #tpu.memory_space<vmem>>, vector<1x512xf32>
    %300 = vector.broadcast %299 : vector<1x512xf32> to vector<2x512xf32>
    %301 = arith.addf %298, %300 : vector<2x512xf32>
    %cst_183 = arith.constant 0.000000e+00 : f32
    %302 = vector.broadcast %cst_183 : f32 to vector<2x512xf32>
    %303 = arith.maximumf %301, %302 : vector<2x512xf32>
    %304 = arith.truncf %303 : vector<2x512xf32> to vector<2x512xbf16>
    %c0_184 = arith.constant 0 : index
    %c0_185 = arith.constant 0 : index
    %305 = vector.load %arg16[%c0_184, %c0_185] : memref<512x128xbf16, #tpu.memory_space<vmem>>, vector<512x128xbf16>
    %cst_186 = arith.constant dense<0.000000e+00> : vector<2x128xf32>
    %306 = tpu.matmul %304, %305, %cst_186 {dimension_numbers = #tpu.dot_dimension_numbers<[1], [0], [0], [1], [0, 0, 1, 1], [], []>} : vector<2x512xbf16>, vector<512x128xbf16>, vector<2x128xf32> -> vector<2x128xf32>
    %c0_187 = arith.constant 0 : index
    %c0_188 = arith.constant 0 : index
    %307 = vector.load %arg17[%c0_187, %c0_188] : memref<1x128xf32, #tpu.memory_space<vmem>>, vector<1x128xf32>
    %308 = vector.broadcast %307 : vector<1x128xf32> to vector<2x128xf32>
    %309 = arith.addf %306, %308 : vector<2x128xf32>
    %c0_189 = arith.constant 0 : index
    %c0_190 = arith.constant 0 : index
    %310 = vector.load %arg18[%c0_189, %c0_190] : memref<2x128xf32, #tpu.memory_space<vmem>>, vector<2x128xf32>
    tpu.vector_store %arg18[%c0_189, %c0_190], %309 {strides = array<i32>} : memref<2x128xf32, #tpu.memory_space<vmem>>, vector<2x128xf32>,
    return
  }
}

</mosaic_0001>

<bundles_post_ra>
// kernel: bilstm_forward.1
= control target key start
LH: loop header
LB: loop body
LE: loop exit
PB: predicated region body
PF: predicated region fallthrough
CT: control target
= control target key end

     0   :  { %s13808_s0 = inlined_call_operand.hbm [shape: s32[2,8], index: 0, kind: input, shape index: {}]   ;;  %s13809_s1 = inlined_call_operand.hbm [shape: f32[56,384], index: 1, kind: input, shape index: {}]   ;;  %s13810_s2 = inlined_call_operand.hbm [shape: bf16[2,384,1152], index: 2, kind: input, shape index: {}]   ;;  %s13811_s3 = inlined_call_operand.hbm [shape: f32[2,1,1152], index: 3, kind: input, shape index: {}]   ;;  %s13812_s4 = inlined_call_operand.hbm [shape: bf16[2,384,384], index: 4, kind: input, shape index: {}]   ;;  %s13813_s5 = inlined_call_operand.hbm [shape: f32[2,1,384], index: 5, kind: input, shape index: {}]   ;;  %s13814_s6 = inlined_call_operand.hbm [shape: f32[2,1,384], index: 6, kind: input, shape index: {}]   ;;  %s13815_s7 = inlined_call_operand.hbm [shape: f32[2,1,384], index: 7, kind: input, shape index: {}]   ;;  %s13816_s8 = inlined_call_operand.hbm [shape: bf16[2,384,256], index: 8, kind: input, shape index: {}]   ;;  %s13817_s9 = inlined_call_operand.hbm [shape: f32[2,1,256], index: 9, kind: input, shape index: {}]   ;;  %s13818_s10 = inlined_call_operand.hbm [shape: bf16[2,256,384], index: 10, kind: input, shape index: {}]   ;;  %s13819_s11 = inlined_call_operand.hbm [shape: f32[2,1,384], index: 11, kind: input, shape index: {}]   ;;  %s13820_s12 = inlined_call_operand.hbm [shape: f32[2,1,384], index: 12, kind: input, shape index: {}]   ;;  %s13821_s13 = inlined_call_operand.hbm [shape: f32[2,1,384], index: 13, kind: input, shape index: {}]   ;;  %s13822_s14 = inlined_call_operand.hbm [shape: bf16[384,512], index: 14, kind: input, shape index: {}]   ;;  %s13823_s15 = inlined_call_operand.hbm [shape: f32[1,512], index: 15, kind: input, shape index: {}]   ;;  %s13824_s16 = inlined_call_operand.hbm [shape: bf16[512,128], index: 16, kind: input, shape index: {}]   ;;  %s13825_s17 = inlined_call_operand.hbm [shape: f32[1,128], index: 17, kind: input, shape index: {}]   ;;  %s13826_s18 = inlined_call_operand.hbm [shape: f32[2,128], index: 18, kind: output, shape index: {}]  }
   0x1   :  { %13835 = sst [smem:[#allocation44_spill]] %s13808_s0 }
   0x2   :  { %13836 = sst [smem:[#allocation45_spill]] %s13809_s1 }
   0x3   :  { %13837 = sst [smem:[#allocation46_spill]] %s13810_s2 }
   0x4   :  { %13838 = sst [smem:[#allocation47_spill]] %s13826_s18 }
   0x5   :  { %23 = vsyncpa [#allocation6], 0 }
   0x6   :  { %24 = vsyncpa [#allocation4], 0 }
   0x7   :  { %25 = vsyncpa [#allocation9], 0 }
   0x8   :  { %26 = vsyncpa [#allocation12], 0 }
   0x9   :  { %27 = vsyncpa [#allocation15], 0 }
   0xa   :  { %28 = vsyncpa [#allocation18], 0 }
   0xb   :  { %29 = vsyncpa [#allocation21], 0 }
   0xc   :  { %30 = vsyncpa [#allocation24], 0 }
   0xd   :  { %31 = vsyncpa [#allocation27], 0 }
   0xe   :  { %32 = vsyncpa [#allocation30], 0 }
   0xf   :  { %33 = vsyncpa [#allocation5], 0  ;;  %s12731_s27 = smov [#allocation8]   ;;  %s13839_s0 = sld [smem:[#allocation46_spill]] }
  0x10   :  { %s59_s28 = sshll.u32 %s12731_s27, 4  ;;  %s60_s28 = int_to_ptr.vmem [resolvable:$true] %s59_s28 }
  0x15   :  { %s12303_s19 = scalar_lea.hbm %s13839_s0, 55296 }
  0x16   :  { %p12304_p0 = scmp.ne.s32.totalorder %s13839_s0, %s12303_s19  ;;  %p12307_p1 = scmp.lt.u32.totalorder %s12303_s19, %s13839_s0 }
  0x18   :  { %p12309_p2 = pnand %p12307_p1, %p12304_p0 }
  0x1a   :  { %12312 = shalt.err (!%p12309_p2)
}
  0x1b   :  { %s12313_s2 = scalar_lea.vmem %s60_s28, 55296  ;;  %p12318_p4 = scmp.lt.s32.totalorder %s60_s28, %s60_s28 }
  0x1c   :  { %p12314_p3 = scmp.ne.s32.totalorder %s60_s28, %s12313_s2  ;;  %p12319_p5 = scmp.lt.s32.totalorder %s12313_s2, %s12313_s2 }
  0x1e   :  { %p12320_p6 = por %p12319_p5, %p12318_p4 }
  0x20   :  { %p12321_p7 = pnand %p12320_p6, %p12314_p3 }
  0x22   :  { %12324 = shalt.err (!%p12321_p7)
}
  0x23   :  { %s12732_s23 = smov 576   ;;  %s12733_s24 = smov 36  }
  0x24   :  { %65 = dma.hbm_to_vmem [thread:$0]  %s13839_s0, 55296, %s60_s28, [#allocation9], %s12732_s23, %s12732_s23, %s12733_s24  }
  0x25   :  { %s12734_s27 = smov [#allocation11]   ;;  %s12325_s1 = scalar_lea.hbm %s13812_s4, 18432 }
  0x26   :  { %s83_s29 = sshll.u32 %s12734_s27, 4  ;;  %p12326_p8 = scmp.ne.s32.totalorder %s13812_s4, %s12325_s1  ;;  %s84_s29 = int_to_ptr.vmem [resolvable:$true] %s83_s29 }
  0x27   :  { %p12329_p9 = scmp.lt.u32.totalorder %s12325_s1, %s13812_s4 }
  0x29   :  { %p12331_p10 = pnand %p12329_p9, %p12326_p8 }
  0x2b   :  { %12334 = shalt.err (!%p12331_p10)
}
  0x2c   :  { %s12335_s18 = scalar_lea.vmem %s84_s29, 18432  ;;  %p12340_p12 = scmp.lt.s32.totalorder %s84_s29, %s84_s29 }
  0x2d   :  { %p12336_p11 = scmp.ne.s32.totalorder %s84_s29, %s12335_s18  ;;  %p12341_p13 = scmp.lt.s32.totalorder %s12335_s18, %s12335_s18 }
  0x2f   :  { %p12342_p0 = por %p12341_p13, %p12340_p12 }
  0x31   :  { %p12343_p1 = pnand %p12342_p0, %p12336_p11 }
  0x33   :  { %12346 = shalt.err (!%p12343_p1)
}
  0x34   :  { %s12735_s28 = smov 192   ;;  %s12736_s0 = smov 12  }
  0x35   :  { %89 = dma.hbm_to_vmem [thread:$0]  %s13812_s4, 18432, %s84_s29, [#allocation12], %s12735_s28, %s12735_s28, %s12736_s0  }
  0x36   :  { %s12737_s25 = smov [#allocation14]   ;;  %s12738_s27 = smov [#allocation17]  }
  0x37   :  { %s107_s26 = sshll.u32 %s12737_s25, 4  ;;  %s131_s30 = sshll.u32 %s12738_s27, 4  ;;  %s108_s26 = int_to_ptr.vmem [resolvable:$true] %s107_s26  ;;  %s12893_s30 = int_to_ptr.vmem [resolvable:$true] %s131_s30 }
  0x38   :  { %s12347_s1 = scalar_lea.hbm %s13814_s6, 96 }
  0x39   :  { %p12348_p2 = scmp.ne.s32.totalorder %s13814_s6, %s12347_s1  ;;  %p12351_p3 = scmp.lt.u32.totalorder %s12347_s1, %s13814_s6 }
  0x3b   :  { %p12353_p4 = pnand %p12351_p3, %p12348_p2 }
  0x3d   :  { %12356 = shalt.err (!%p12353_p4)
}
  0x3e   :  { %s12357_s4 = scalar_lea.vmem %s108_s26, 96  ;;  %p12362_p6 = scmp.lt.s32.totalorder %s108_s26, %s108_s26 }
  0x3f   :  { %p12358_p5 = scmp.ne.s32.totalorder %s108_s26, %s12357_s4  ;;  %p12363_p7 = scmp.lt.s32.totalorder %s12357_s4, %s12357_s4 }
  0x41   :  { %p12364_p8 = por %p12363_p7, %p12362_p6 }
  0x43   :  { %p12365_p9 = pnand %p12364_p8, %p12358_p5 }
  0x45   :  { %12368 = shalt.err (!%p12365_p9)
}
  0x46   :  { %s13831_s29 = smov 48   ;;  %s13833_s23 = smov 3  }
  0x47   :  { %113 = dma.hbm_to_vmem [thread:$0]  %s13814_s6, 96, %s108_s26, [#allocation15], %s13831_s29, %s13831_s29, %s13833_s23  }
  0x48   :  { %s12369_s19 = scalar_lea.hbm %s13816_s8, 12288 }
  0x49   :  { %p12370_p10 = scmp.ne.s32.totalorder %s13816_s8, %s12369_s19  ;;  %p12373_p11 = scmp.lt.u32.totalorder %s12369_s19, %s13816_s8 }
  0x4b   :  { %p12375_p12 = pnand %p12373_p11, %p12370_p10 }
  0x4d   :  { %12378 = shalt.err (!%p12375_p12)
}
  0x4e   :  { %s12379_s2 = scalar_lea.vmem %s12893_s30, 12288  ;;  %p12384_p0 = scmp.lt.s32.totalorder %s12893_s30, %s12893_s30 }
  0x4f   :  { %p12380_p13 = scmp.ne.s32.totalorder %s12893_s30, %s12379_s2  ;;  %p12385_p1 = scmp.lt.s32.totalorder %s12379_s2, %s12379_s2 }
  0x51   :  { %p12386_p2 = por %p12385_p1, %p12384_p0 }
  0x53   :  { %p12387_p3 = pnand %p12386_p2, %p12380_p13 }
  0x55   :  { %12390 = shalt.err (!%p12387_p3)
}
  0x56   :  { %s12741_s6 = smov 128   ;;  %s12742_s26 = smov 8  }
  0x57   :  { %137 = dma.hbm_to_vmem [thread:$0]  %s13816_s8, 12288, %s12893_s30, [#allocation18], %s12741_s6, %s12741_s6, %s12742_s26  }
  0x58   :  { %s12743_s25 = smov [#allocation20]   ;;  %s12744_s18 = smov [#allocation23]  }
  0x59   :  { %s155_s27 = sshll.u32 %s12743_s25, 4  ;;  %s179_s19 = sshll.u32 %s12744_s18, 4  ;;  %s156_s27 = int_to_ptr.vmem [resolvable:$true] %s155_s27  ;;  %s12927_s19 = int_to_ptr.vmem [resolvable:$true] %s179_s19 }
  0x5a   :  { %s12391_s21 = scalar_lea.hbm %s13818_s10, 12288 }
  0x5b   :  { %p12392_p4 = scmp.ne.s32.totalorder %s13818_s10, %s12391_s21  ;;  %p12395_p5 = scmp.lt.u32.totalorder %s12391_s21, %s13818_s10 }
  0x5d   :  { %p12397_p6 = pnand %p12395_p5, %p12392_p4 }
  0x5f   :  { %12400 = shalt.err (!%p12397_p6)
}
  0x60   :  { %s12401_s8 = scalar_lea.vmem %s156_s27, 12288  ;;  %p12406_p8 = scmp.lt.s32.totalorder %s156_s27, %s156_s27 }
  0x61   :  { %p12402_p7 = scmp.ne.s32.totalorder %s156_s27, %s12401_s8  ;;  %p12407_p9 = scmp.lt.s32.totalorder %s12401_s8, %s12401_s8 }
  0x63   :  { %p12408_p10 = por %p12407_p9, %p12406_p8 }
  0x65   :  { %p12409_p11 = pnand %p12408_p10, %p12402_p7 }
  0x67   :  { %12412 = shalt.err (!%p12409_p11)
}
  0x68   :  { %161 = dma.hbm_to_vmem [thread:$0]  %s13818_s10, 12288, %s156_s27, [#allocation21], %s12735_s28, %s12735_s28, %s12736_s0  }
  0x69   :  { %s12413_s29 = scalar_lea.hbm %s13820_s12, 96 }
  0x6a   :  { %p12414_p12 = scmp.ne.s32.totalorder %s13820_s12, %s12413_s29  ;;  %p12417_p13 = scmp.lt.u32.totalorder %s12413_s29, %s13820_s12 }
  0x6c   :  { %p12419_p0 = pnand %p12417_p13, %p12414_p12 }
  0x6e   :  { %12422 = shalt.err (!%p12419_p0)
}
  0x6f   :  { %s12423_s1 = scalar_lea.vmem %s12927_s19, 96  ;;  %p12428_p2 = scmp.lt.s32.totalorder %s12927_s19, %s12927_s19 }
  0x70   :  { %p12424_p1 = scmp.ne.s32.totalorder %s12927_s19, %s12423_s1  ;;  %p12429_p3 = scmp.lt.s32.totalorder %s12423_s1, %s12423_s1 }
  0x72   :  { %p12430_p4 = por %p12429_p3, %p12428_p2 }
  0x74   :  { %p12431_p5 = pnand %p12430_p4, %p12424_p1 }
  0x76   :  { %12434 = shalt.err (!%p12431_p5)
}
  0x77   :  { %s13840_s10 = smov 3   ;;  %s13841_s28 = smov 48  }
  0x78   :  { %185 = dma.hbm_to_vmem [thread:$0]  %s13820_s12, 96, %s12927_s19, [#allocation24], %s13841_s28, %s13841_s28, %s13840_s10  }
  0x79   :  { %s12745_s20 = smov [#allocation26]   ;;  %s12435_s8 = scalar_lea.hbm %s13822_s14, 12288 }
  0x7a   :  { %s203_s21 = sshll.u32 %s12745_s20, 4  ;;  %p12436_p6 = scmp.ne.s32.totalorder %s13822_s14, %s12435_s8  ;;  %s204_s21 = int_to_ptr.vmem [resolvable:$true] %s203_s21 }
  0x7b   :  { %p12439_p7 = scmp.lt.u32.totalorder %s12435_s8, %s13822_s14 }
  0x7d   :  { %p12441_p8 = pnand %p12439_p7, %p12436_p6 }
  0x7f   :  { %12444 = shalt.err (!%p12441_p8)
}
  0x80   :  { %s12445_s29 = scalar_lea.vmem %s204_s21, 12288  ;;  %p12450_p10 = scmp.lt.s32.totalorder %s204_s21, %s204_s21 }
  0x81   :  { %p12446_p9 = scmp.ne.s32.totalorder %s204_s21, %s12445_s29  ;;  %p12451_p11 = scmp.lt.s32.totalorder %s12445_s29, %s12445_s29 }
  0x83   :  { %p12452_p12 = por %p12451_p11, %p12450_p10 }
  0x85   :  { %p12453_p13 = pnand %p12452_p12, %p12446_p9 }
  0x87   :  { %12456 = shalt.err (!%p12453_p13)
}
  0x88   :  { %s12746_s12 = smov 256   ;;  %s12747_s19 = smov 16  }
  0x89   :  { %209 = dma.hbm_to_vmem [thread:$0]  %s13822_s14, 12288, %s204_s21, [#allocation27], %s12746_s12, %s12746_s12, %s12747_s19  }
  0x8a   :  { %s12748_s25 = smov [#allocation29]   ;;  %s12457_s27 = scalar_lea.hbm %s13824_s16, 4096 }
  0x8b   :  { %s225_s18 = sshll.u32 %s12748_s25, 4  ;;  %p12458_p0 = scmp.ne.s32.totalorder %s13824_s16, %s12457_s27  ;;  %s226_s18 = int_to_ptr.vmem [resolvable:$true] %s225_s18 }
  0x8c   :  { %p12461_p1 = scmp.lt.u32.totalorder %s12457_s27, %s13824_s16 }
  0x8e   :  { %p12463_p2 = pnand %p12461_p1, %p12458_p0 }
  0x90   :  { %12466 = shalt.err (!%p12463_p2)
}
  0x91   :  { %s12467_s30 = scalar_lea.vmem %s226_s18, 4096  ;;  %p12472_p4 = scmp.lt.s32.totalorder %s226_s18, %s226_s18 }
  0x92   :  { %p12468_p3 = scmp.ne.s32.totalorder %s226_s18, %s12467_s30  ;;  %p12473_p5 = scmp.lt.s32.totalorder %s12467_s30, %s12467_s30 }
  0x94   :  { %p12474_p6 = por %p12473_p5, %p12472_p4 }
  0x96   :  { %p12475_p7 = pnand %p12474_p6, %p12468_p3 }
  0x98   :  { %12478 = shalt.err (!%p12475_p7)
}
  0x99   :  { %s12749_s14 = smov 64   ;;  %s12750_s21 = smov 4  }
  0x9a   :  { %231 = dma.hbm_to_vmem [thread:$0]  %s13824_s16, 4096, %s226_s18, [#allocation30], %s12749_s14, %s12749_s14, %s12750_s21  }
  0x9b   :  { %s13842_s12 = sld [smem:[#allocation44_spill]] }
  0xa1   :  { %s12479_s19 = scalar_lea.hbm %s13842_s12, 32 }
  0xa2   :  { %p12480_p8 = scmp.ne.s32.totalorder %s13842_s12, %s12479_s19  ;;  %p12483_p9 = scmp.lt.u32.totalorder %s12479_s19, %s13842_s12 }
  0xa4   :  { %p12485_p10 = pnand %p12483_p9, %p12480_p8 }
  0xa6   :  { %12488 = shalt.err (!%p12485_p10)
}
  0xa7   :  { %s12751_s0 = smov [#allocation3]   ;;  %s12752_s16 = smov [#allocation7]  }
  0xa8   :  { %41 = dma.hbm_to_smem %s13842_s12, 32, %s12751_s0, [#allocation6]  }
  0xa9   :  { %s47_s18 = sshll.u32 %s12752_s16, 4  ;;  %s13843_s8 = sld [smem:[#allocation45_spill]]  ;;  %s48_s18 = int_to_ptr.vmem [resolvable:$true] %s47_s18 }
  0xaf   :  { %s12489_s30 = scalar_lea.hbm %s13843_s8, 2688 }
  0xb0   :  { %p12490_p11 = scmp.ne.s32.totalorder %s13843_s8, %s12489_s30  ;;  %p12493_p12 = scmp.lt.u32.totalorder %s12489_s30, %s13843_s8 }
  0xb2   :  { %p12495_p13 = pnand %p12493_p12, %p12490_p11 }
  0xb4   :  { %12498 = shalt.err (!%p12495_p13)
}
  0xb5   :  { %s12499_s4 = scalar_lea.vmem %s48_s18, 2688  ;;  %p12504_p1 = scmp.lt.s32.totalorder %s48_s18, %s48_s18 }
  0xb6   :  { %p12500_p0 = scmp.ne.s32.totalorder %s48_s18, %s12499_s4  ;;  %p12505_p2 = scmp.lt.s32.totalorder %s12499_s4, %s12499_s4 }
  0xb8   :  { %p12506_p3 = por %p12505_p2, %p12504_p1 }
  0xba   :  { %p12507_p4 = pnand %p12506_p3, %p12500_p0 }
  0xbc   :  { %12510 = shalt.err (!%p12507_p4)
}
  0xbd   :  { %s12753_s29 = smov 384   ;;  %s12754_s12 = smov 24  }
  0xbe   :  { %53 = dma.hbm_to_vmem [thread:$0]  %s13843_s8, 2688, %s48_s18, [#allocation4], %s12753_s29, %s12753_s29, %s12754_s12  }
  0xbf   :  { %s12755_s24 = smov [#allocation10]   ;;  %s12511_s27 = scalar_lea.hbm %s13811_s3, 288 }
  0xc0   :  { %s71_s25 = sshll.u32 %s12755_s24, 4  ;;  %p12512_p5 = scmp.ne.s32.totalorder %s13811_s3, %s12511_s27  ;;  %s72_s25 = int_to_ptr.vmem [resolvable:$true] %s71_s25 }
  0xc1   :  { %p12515_p6 = scmp.lt.u32.totalorder %s12511_s27, %s13811_s3 }
  0xc3   :  { %p12517_p7 = pnand %p12515_p6, %p12512_p5 }
  0xc5   :  { %12520 = shalt.err (!%p12517_p7)
}
  0xc6   :  { %s12521_s30 = scalar_lea.vmem %s72_s25, 288  ;;  %p12526_p9 = scmp.lt.s32.totalorder %s72_s25, %s72_s25 }
  0xc7   :  { %p12522_p8 = scmp.ne.s32.totalorder %s72_s25, %s12521_s30  ;;  %p12527_p10 = scmp.lt.s32.totalorder %s12521_s30, %s12521_s30 }
  0xc9   :  { %p12528_p11 = por %p12527_p10, %p12526_p9 }
  0xcb   :  { %p12529_p12 = pnand %p12528_p11, %p12522_p8 }
  0xcd   :  { %12532 = shalt.err (!%p12529_p12)
}
  0xce   :  { %s12756_s18 = smov 144   ;;  %s12757_s8 = smov 9  }
  0xcf   :  { %77 = dma.hbm_to_vmem [thread:$0]  %s13811_s3, 288, %s72_s25, [#allocation9], %s12756_s18, %s12756_s18, %s12757_s8  }
  0xd0   :  { %s12758_s6 = smov [#allocation13]   ;;  %s12759_s4 = smov [#allocation16]  }
  0xd1   :  { %s95_s26 = sshll.u32 %s12758_s6, 4  ;;  %s119_s29 = sshll.u32 %s12759_s4, 4  ;;  %s96_s26 = int_to_ptr.vmem [resolvable:$true] %s95_s26  ;;  %s120_s29 = int_to_ptr.vmem [resolvable:$true] %s119_s29 }
  0xd2   :  { %s12533_s23 = scalar_lea.hbm %s13813_s5, 96 }
  0xd3   :  { %p12534_p13 = scmp.ne.s32.totalorder %s13813_s5, %s12533_s23  ;;  %p12537_p0 = scmp.lt.u32.totalorder %s12533_s23, %s13813_s5 }
  0xd5   :  { %p12539_p1 = pnand %p12537_p0, %p12534_p13 }
  0xd7   :  { %12542 = shalt.err (!%p12539_p1)
}
  0xd8   :  { %s12543_s3 = scalar_lea.vmem %s96_s26, 96  ;;  %p12548_p3 = scmp.lt.s32.totalorder %s96_s26, %s96_s26 }
  0xd9   :  { %p12544_p2 = scmp.ne.s32.totalorder %s96_s26, %s12543_s3  ;;  %p12549_p4 = scmp.lt.s32.totalorder %s12543_s3, %s12543_s3 }
  0xdb   :  { %p12550_p5 = por %p12549_p4, %p12548_p3 }
  0xdd   :  { %p12551_p6 = pnand %p12550_p5, %p12544_p2 }
  0xdf   :  { %12554 = shalt.err (!%p12551_p6)
}
  0xe0   :  { %101 = dma.hbm_to_vmem [thread:$0]  %s13813_s5, 96, %s96_s26, [#allocation12], %s13841_s28, %s13841_s28, %s13840_s10  }
  0xe1   :  { %s12555_s2 = scalar_lea.hbm %s13815_s7, 96 }
  0xe2   :  { %p12556_p7 = scmp.ne.s32.totalorder %s13815_s7, %s12555_s2  ;;  %p12559_p8 = scmp.lt.u32.totalorder %s12555_s2, %s13815_s7 }
  0xe4   :  { %p12561_p9 = pnand %p12559_p8, %p12556_p7 }
  0xe6   :  { %12564 = shalt.err (!%p12561_p9)
}
  0xe7   :  { %s12565_s21 = scalar_lea.vmem %s120_s29, 96  ;;  %p12570_p11 = scmp.lt.s32.totalorder %s120_s29, %s120_s29 }
  0xe8   :  { %p12566_p10 = scmp.ne.s32.totalorder %s120_s29, %s12565_s21  ;;  %p12571_p12 = scmp.lt.s32.totalorder %s12565_s21, %s12565_s21 }
  0xea   :  { %p12572_p13 = por %p12571_p12, %p12570_p11 }
  0xec   :  { %p12573_p0 = pnand %p12572_p13, %p12566_p10 }
  0xee   :  { %12576 = shalt.err (!%p12573_p0)
}
  0xef   :  { %125 = dma.hbm_to_vmem [thread:$0]  %s13815_s7, 96, %s120_s29, [#allocation15], %s13841_s28, %s13841_s28, %s13840_s10  }
  0xf0   :  { %s12760_s26 = smov [#allocation19]   ;;  %s12577_s23 = scalar_lea.hbm %s13817_s9, 64 }
  0xf1   :  { %s143_s4 = sshll.u32 %s12760_s26, 4  ;;  %p12578_p1 = scmp.ne.s32.totalorder %s13817_s9, %s12577_s23  ;;  %s144_s4 = int_to_ptr.vmem [resolvable:$true] %s143_s4 }
  0xf2   :  { %p12581_p2 = scmp.lt.u32.totalorder %s12577_s23, %s13817_s9 }
  0xf4   :  { %p12583_p3 = pnand %p12581_p2, %p12578_p1 }
  0xf6   :  { %12586 = shalt.err (!%p12583_p3)
}
  0xf7   :  { %s12587_s3 = scalar_lea.vmem %s144_s4, 64  ;;  %p12592_p5 = scmp.lt.s32.totalorder %s144_s4, %s144_s4 }
  0xf8   :  { %p12588_p4 = scmp.ne.s32.totalorder %s144_s4, %s12587_s3  ;;  %p12593_p6 = scmp.lt.s32.totalorder %s12587_s3, %s12587_s3 }
  0xfa   :  { %p12594_p7 = por %p12593_p6, %p12592_p5 }
  0xfc   :  { %p12595_p8 = pnand %p12594_p7, %p12588_p4 }
  0xfe   :  { %12598 = shalt.err (!%p12595_p8)
}
  0xff   :  { %s12761_s7 = smov 32   ;;  %s12762_s29 = smov 2  }
 0x100   :  { %149 = dma.hbm_to_vmem [thread:$0]  %s13817_s9, 64, %s144_s4, [#allocation18], %s12761_s7, %s12761_s7, %s12762_s29  }
 0x101   :  { %s12763_s16 = smov [#allocation22]   ;;  %s12764_s2 = smov [#allocation25]  }
 0x102   :  { %s167_s22 = sshll.u32 %s12763_s16, 4  ;;  %s191_s30 = sshll.u32 %s12764_s2, 4  ;;  %s168_s22 = int_to_ptr.vmem [resolvable:$true] %s167_s22  ;;  %s13066_s30 = int_to_ptr.vmem [resolvable:$true] %s191_s30 }
 0x103   :  { %s12599_s14 = scalar_lea.hbm %s13819_s11, 96 }
 0x104   :  { %p12600_p9 = scmp.ne.s32.totalorder %s13819_s11, %s12599_s14  ;;  %p12603_p10 = scmp.lt.u32.totalorder %s12599_s14, %s13819_s11 }
 0x106   :  { %p12605_p11 = pnand %p12603_p10, %p12600_p9 }
 0x108   :  { %12608 = shalt.err (!%p12605_p11)
}
 0x109   :  { %s12609_s9 = scalar_lea.vmem %s168_s22, 96  ;;  %p12614_p13 = scmp.lt.s32.totalorder %s168_s22, %s168_s22 }
 0x10a   :  { %p12610_p12 = scmp.ne.s32.totalorder %s168_s22, %s12609_s9  ;;  %p12615_p0 = scmp.lt.s32.totalorder %s12609_s9, %s12609_s9 }
 0x10c   :  { %p12616_p1 = por %p12615_p0, %p12614_p13 }
 0x10e   :  { %p12617_p2 = pnand %p12616_p1, %p12610_p12 }
 0x110   :  { %12620 = shalt.err (!%p12617_p2)
}
 0x111   :  { %173 = dma.hbm_to_vmem [thread:$0]  %s13819_s11, 96, %s168_s22, [#allocation21], %s13841_s28, %s13841_s28, %s13840_s10  }
 0x112   :  { %s12621_s24 = scalar_lea.hbm %s13821_s13, 96 }
 0x113   :  { %p12622_p3 = scmp.ne.s32.totalorder %s13821_s13, %s12621_s24  ;;  %p12625_p4 = scmp.lt.u32.totalorder %s12621_s24, %s13821_s13 }
 0x115   :  { %p12627_p5 = pnand %p12625_p4, %p12622_p3 }
 0x117   :  { %12630 = shalt.err (!%p12627_p5)
}
 0x118   :  { %s12631_s7 = scalar_lea.vmem %s13066_s30, 96  ;;  %p12636_p7 = scmp.lt.s32.totalorder %s13066_s30, %s13066_s30 }
 0x119   :  { %p12632_p6 = scmp.ne.s32.totalorder %s13066_s30, %s12631_s7  ;;  %p12637_p8 = scmp.lt.s32.totalorder %s12631_s7, %s12631_s7 }
 0x11b   :  { %p12638_p9 = por %p12637_p8, %p12636_p7 }
 0x11d   :  { %p12639_p10 = pnand %p12638_p9, %p12632_p6 }
 0x11f   :  { %12642 = shalt.err (!%p12639_p10)
}
 0x120   :  { %197 = dma.hbm_to_vmem [thread:$0]  %s13821_s13, 96, %s13066_s30, [#allocation24], %s13841_s28, %s13841_s28, %s13840_s10  }
 0x121   :  { %s12765_s25 = smov [#allocation28]   ;;  %s12766_s16 = smov [#allocation31]  }
 0x122   :  { %s216_s20 = sshll.u32 %s12765_s25, 4  ;;  %s238_s22 = sshll.u32 %s12766_s16, 4  ;;  %s217_s20 = int_to_ptr.vmem [resolvable:$true] %s216_s20  ;;  %s239_s22 = int_to_ptr.vmem [resolvable:$true] %s238_s22 }
 0x123   :  { %s12643_s8 = scalar_lea.hbm %s13823_s15, 64 }
 0x124   :  { %p12644_p11 = scmp.ne.s32.totalorder %s13823_s15, %s12643_s8  ;;  %p12647_p12 = scmp.lt.u32.totalorder %s12643_s8, %s13823_s15 }
 0x126   :  { %p12649_p13 = pnand %p12647_p12, %p12644_p11 }
 0x128   :  { %12652 = shalt.err (!%p12649_p13)
}
 0x129   :  { %s12653_s13 = scalar_lea.vmem %s217_s20, 64  ;;  %p12658_p1 = scmp.lt.s32.totalorder %s217_s20, %s217_s20 }
 0x12a   :  { %p12654_p0 = scmp.ne.s32.totalorder %s217_s20, %s12653_s13  ;;  %p12659_p2 = scmp.lt.s32.totalorder %s12653_s13, %s12653_s13 }
 0x12c   :  { %p12660_p3 = por %p12659_p2, %p12658_p1 }
 0x12e   :  { %p12661_p4 = pnand %p12660_p3, %p12654_p0 }
 0x130   :  { %12664 = shalt.err (!%p12661_p4)
}
 0x131   :  { %219 = dma.hbm_to_vmem [thread:$0]  %s13823_s15, 64, %s217_s20, [#allocation27]  }
 0x132   :  { %s12665_s9 = scalar_lea.hbm %s13825_s17, 16 }
 0x133   :  { %p12666_p5 = scmp.ne.s32.totalorder %s13825_s17, %s12665_s9  ;;  %p12669_p6 = scmp.lt.u32.totalorder %s12665_s9, %s13825_s17 }
 0x135   :  { %p12671_p7 = pnand %p12669_p6, %p12666_p5 }
 0x137   :  { %12674 = shalt.err (!%p12671_p7)
}
 0x138   :  { %s12675_s24 = scalar_lea.vmem %s239_s22, 16  ;;  %s12679_s1 = scalar_lea.vmem %s239_s22, 32 }
 0x139   :  { %p12676_p8 = scmp.ne.s32.totalorder %s239_s22, %s12675_s24  ;;  %p12680_p9 = scmp.lt.s32.totalorder %s239_s22, %s239_s22 }
 0x13a   :  { %p12681_p10 = scmp.lt.s32.totalorder %s12679_s1, %s12675_s24 }
 0x13c   :  { %p12682_p11 = por %p12681_p10, %p12680_p9 }
 0x13e   :  { %p12683_p12 = pnand %p12682_p11, %p12676_p8 }
 0x140   :  { %12686 = shalt.err (!%p12683_p12)
}
 0x141   :  { %241 = dma.hbm_to_vmem [thread:$0]  %s13825_s17, 16, %s239_s22, [#allocation30]  }
 0x142   :  { %12709 = dma.done.wait [#allocation6], 32  }
 0x143   :  { %12710 = vsyncadd [#allocation6], 4294967264 }
 0x144   :  { %12711 = dma.done.wait [#allocation4], 2688  }
 0x145   :  { %12712 = vsyncadd [#allocation4], 4294964608 }
 0x146   :  { %12713 = dma.done.wait [#allocation9], 55584  }
 0x147   :  { %12714 = vsyncadd [#allocation9], 4294911712 }
 0x148   :  { %12715 = dma.done.wait [#allocation12], 18528  }
 0x149   :  { %12716 = vsyncadd [#allocation12], 4294948768 }
 0x14a   :  { %12717 = dma.done.wait [#allocation15], 192  }
 0x14b   :  { %12718 = vsyncadd [#allocation15], 4294967104 }
 0x14c   :  { %12719 = dma.done.wait [#allocation18], 12352  }
 0x14d   :  { %12720 = vsyncadd [#allocation18], 4294954944 }
 0x14e   :  { %12721 = dma.done.wait [#allocation21], 12384  }
 0x14f   :  { %12722 = vsyncadd [#allocation21], 4294954912 }
 0x150   :  { %12723 = dma.done.wait [#allocation24], 192  }
 0x151   :  { %12724 = vsyncadd [#allocation24], 4294967104 }
 0x152   :  { %12725 = dma.done.wait [#allocation27], 12352  }
 0x153   :  { %12726 = vsyncadd [#allocation27], 4294954944 }
 0x154   :  { %12727 = dma.done.wait [#allocation30], 4112  }
 0x155   :  { %12728 = vsyncadd [#allocation30], 4294963184 }
 0x156   :  { %296 = sfence }
 0x157   :  { %v11001_v0 = vld [vmem:[#allocation8 + $0x4] ss:$36 sps:$4 sm:$0xff]   ;;  %s13127_s17 = sld [smem:[#allocation3]]  ;;  %s13129_s27 = sld [smem:[#allocation3 + $0x1]]  ;;  %v11004_v2 = vld [vmem:[#allocation8 + $0x4c] ss:$36 sps:$4 sm:$0xff]   ;;  %v308_v11 = vlaneseq }
 0x158   :  { %v11003_v1 = vld [vmem:[#allocation8] ss:$36 sps:$4 sm:$0xff]   ;;  %1911 = vmatprep.subr.bf16.mxu0 %v11001_v0  ;;  %v11006_v3 = vld [vmem:[#allocation8 + $0x48] ss:$36 sps:$4 sm:$0xff]   ;;  %v11007_v4 = vld [vmem:[#allocation8 + $0x94] ss:$36 sps:$4 sm:$0xff]  }
 0x159   :  { %1912 = vmatpush1.bf16.msra.mxu0 %v11003_v1  ;;  %s13131_s3 = sld [smem:[#allocation3 + $0x2]]  ;;  %s13133_s7 = sld [smem:[#allocation3 + $0x3]]  ;;  %v11009_v5 = vld [vmem:[#allocation8 + $0x90] ss:$36 sps:$4 sm:$0xff]   ;;  %v11010_v6 = vld [vmem:[#allocation8 + $0xdc] ss:$36 sps:$4 sm:$0xff]  }
 0x15a   :  { %1913 = vmatprep.subr.bf16.mxu0 %v11004_v2  ;;  %v11012_v7 = vld [vmem:[#allocation8 + $0xd8] ss:$36 sps:$4 sm:$0xff]   ;;  %v11013_v8 = vld [vmem:[#allocation8 + $0x124] ss:$36 sps:$4 sm:$0xff]   ;;  %v11016_v10 = vld [vmem:[#allocation8 + $0x16c] ss:$36 sps:$4 sm:$0xff]  }
 0x15b   :  { %v11015_v9 = vld [vmem:[#allocation8 + $0x120] ss:$36 sps:$4 sm:$0xff]   ;;  %s13143_s28 = sld [smem:[#allocation3 + $0x4]]  ;;  %v11018_v12 = vld [vmem:[#allocation8 + $0x168] ss:$36 sps:$4 sm:$0xff]   ;;  %s13145_s26 = sld [smem:[#allocation3 + $0x5]] }
 0x15c   :  { %v11019_v13 = vld [vmem:[#allocation8 + $0x1b4] ss:$36 sps:$4 sm:$0xff]   ;;  %vm13148_vm0 = vcmp.lt.s32.totalorder %v308_v11, 384  ;;  %s13152_s9 = sld [smem:[#allocation3 + $0x6]]  ;;  %v11022_v16 = vld [vmem:[#allocation8 + $0x1fc] ss:$36 sps:$4 sm:$0xff]  }
 0x15d   :  { %1914 = vmatpush1.bf16.msra.mxu0 %v11006_v3  ;;  %s299_s11 = sshra.s32 %s13127_s17, 3  ;;  %s315_s29 = sshra.s32 %s13129_s27, 3  ;;  %v11021_v14 = vld [vmem:[#allocation8 + $0x1b0] ss:$36 sps:$4 sm:$0xff]   ;;  %v11051_v18 = vld [vmem:[#allocation8 + $0x8] ss:$36 sps:$4 sm:$0xff]  }
 0x15e   :  { %1915 = vmatprep.subr.bf16.mxu0 %v11007_v4  ;;  %s302_s20 = sand.u32 7, %s13127_s17  ;;  %s9539_s16 = smul.u32 24, %s299_s11  ;;  %v11049_v17 = vld [vmem:[#allocation8 + $0xc] ss:$36 sps:$4 sm:$0xff]   ;;  %v11024_v23 = vld [vmem:[#allocation8 + $0x1f8] ss:$36 sps:$4 sm:$0xff]  }
 0x15f   :  { %s328_s25 = sshra.s32 %s13131_s3, 3  ;;  %s318_s22 = sand.u32 7, %s13129_s27  ;;  %1997 = vmatprep.subr.bf16.mxu1 %v11049_v17  ;;  %v11055_v24 = vld [vmem:[#allocation8 + $0x54] ss:$36 sps:$4 sm:$0xff]   ;;  %v11025_v26 = vld [vmem:[#allocation8 + $0x244] ss:$36 sps:$4 sm:$0xff]  }
 0x160   :  { %s9541_s2 = smul.u32 24, %s315_s29  ;;  %s341_s8 = sshra.s32 %s13133_s7, 3  ;;  %1998 = vmatpush1.bf16.msra.mxu1 %v11051_v18  ;;  %v11057_v25 = vld [vmem:[#allocation8 + $0x50] ss:$36 sps:$4 sm:$0xff]   ;;  %v11027_v27 = vld [vmem:[#allocation8 + $0x240] ss:$36 sps:$4 sm:$0xff]  }
 0x161   :  { %1916 = vmatpush1.bf16.msra.mxu0 %v11009_v5  ;;  %s9543_s18 = smul.u32 24, %s328_s25  ;;  %s331_s14 = sand.u32 7, %s13131_s3  ;;  %1999 = vmatprep.subr.bf16.mxu1 %v11055_v24  ;;  %v11028_v28 = vld [vmem:[#allocation8 + $0x28c] ss:$36 sps:$4 sm:$0xff]   ;;  %v11061_v31 = vld [vmem:[#allocation8 + $0x9c] ss:$36 sps:$4 sm:$0xff]  }
 0x162   :  { %1917 = vmatprep.subr.bf16.mxu0 %v11010_v6  ;;  %s344_s21 = sand.u32 7, %s13133_s7  ;;  %s9545_s5 = smul.u32 24, %s341_s8  ;;  %v11063_v32 = vld [vmem:[#allocation8 + $0x98] ss:$36 sps:$4 sm:$0xff]   ;;  %v11030_v33 = vld [vmem:[#allocation8 + $0x288] ss:$36 sps:$4 sm:$0xff]  }
 0x163   :  { %s305_s6 = sadd.s32 %s9539_s16, %s302_s20  ;;  %s321_s13 = sadd.s32 %s9541_s2, %s318_s22  ;;  %v11031_v34 = vld [vmem:[#allocation8 + $0x2d4] ss:$36 sps:$4 sm:$0xff]   ;;  %v11067_v35 = vld [vmem:[#allocation8 + $0xe4] ss:$36 sps:$4 sm:$0xff]   ;;  %v11034_v40 = vld [vmem:[#allocation8 + $0x31c] ss:$36 sps:$4 sm:$0xff]  }
 0x164   :  { %s334_s10 = sadd.s32 %s9543_s18, %s331_s14  ;;  %s347_s30 = sadd.s32 %s9545_s5, %s344_s21  ;;  %2000 = vmatpush1.bf16.msra.mxu1 %v11057_v25  ;;  %v11069_v38 = vld [vmem:[#allocation8 + $0xe0] ss:$36 sps:$4 sm:$0xff]   ;;  %v11033_v39 = vld [vmem:[#allocation8 + $0x2d0] ss:$36 sps:$4 sm:$0xff]   ;;  %v11075_v42 = vld [vmem:[#allocation8 + $0x128] ss:$36 sps:$4 sm:$0xff]  }
 0x165   :  { %1918 = vmatpush1.bf16.msra.mxu0 %v11012_v7  ;;  %s13154_s4 = sld [smem:[#allocation3 + $0x7]]  ;;  %s306_s12 = scalar_lea.vmem [#allocation7], %s305_s6  ;;  %2001 = vmatprep.subr.bf16.mxu1 %v11061_v31  ;;  %v11073_v41 = vld [vmem:[#allocation8 + $0x12c] ss:$36 sps:$4 sm:$0xff]   ;;  %v11036_v43 = vld [vmem:[#allocation8 + $0x318] ss:$36 sps:$4 sm:$0xff]  }
 0x166   :  { %1919 = vmatprep.subr.bf16.mxu0 %v11013_v8  ;;  %v307_v19 = vld [vmem:[%s306_s12] ss:$8 sm:$0x7]  ;;  %s322_s19 = scalar_lea.vmem [#allocation7], %s321_s13  ;;  %s335_s23 = scalar_lea.vmem [#allocation7], %s334_s10  ;;  %v12767_v24 = vmov 0  }
 0x167   :  { %v323_v20 = vld [vmem:[%s322_s19] ss:$8 sm:$0x7]  ;;  %312 = vst.msk [vmem:[#allocation2] ss:$8 sm:$0x7] %vm13148_vm0, %v307_v19 }
 0x168   :  { %325 = vst.msk [vmem:[#allocation2 + $0x1] ss:$8 sm:$0x7] %vm13148_vm0, %v323_v20  ;;  %v336_v21 = vld [vmem:[%s335_s23] ss:$8 sm:$0x7]  ;;  %2002 = vmatpush1.bf16.msra.mxu1 %v11063_v32 }
 0x169   :  { %1920 = vmatpush1.bf16.msra.mxu0 %v11015_v9  ;;  %s348_s24 = scalar_lea.vmem [#allocation7], %s347_s30  ;;  %338 = vst.msk [vmem:[#allocation2 + $0x2] ss:$8 sm:$0x7] %vm13148_vm0, %v336_v21  ;;  %s354_s1 = sshra.s32 %s13143_s28, 3  ;;  %2003 = vmatprep.subr.bf16.mxu1 %v11067_v35  ;;  %vm12769_vm1 = vmmov 0  }
 0x16a   :  { %1921 = vmatprep.subr.bf16.mxu0 %v11016_v10  ;;  %v349_v22 = vld [vmem:[%s348_s24] ss:$8 sm:$0x7]  ;;  %s357_s15 = sand.u32 7, %s13143_s28  ;;  %s9547_s0 = smul.u32 24, %s354_s1  ;;  %vm2545_vm2 = vcmask 1043456  }
 0x16b   :  { %351 = vst.msk [vmem:[#allocation2 + $0x3] ss:$8 sm:$0x7] %vm13148_vm0, %v349_v22  ;;  %s367_s17 = sshra.s32 %s13145_s26, 3  ;;  %s370_s27 = sand.u32 7, %s13145_s26  ;;  %vm2511_vm3 = vcmask 64512  }
 0x16c   :  { %s9549_s3 = smul.u32 24, %s367_s17  ;;  %s360_s7 = sadd.s32 %s9547_s0, %s357_s15  ;;  %2004 = vmatpush1.bf16.msra.mxu1 %v11069_v38  ;;  %v11079_v44 = vld [vmem:[#allocation8 + $0x174] ss:$36 sps:$4 sm:$0xff]   ;;  %v11037_v45 = vld [vmem:[#allocation8 + $0x364] ss:$36 sps:$4 sm:$0xff]   ;;  %vm8457_vm4 = vcmask 1041409  }
 0x16d   :  { %1922 = vmatpush1.bf16.msra.mxu0 %v11018_v12  ;;  %s380_s11 = sshra.s32 %s13152_s9, 3  ;;  %s361_s25 = scalar_lea.vmem [#allocation7], %s360_s7  ;;  %2005 = vmatprep.subr.bf16.mxu1 %v11073_v41  ;;  %v11081_v47 = vld [vmem:[#allocation8 + $0x170] ss:$36 sps:$4 sm:$0xff]   ;;  %v11039_v49 = vld [vmem:[#allocation8 + $0x360] ss:$36 sps:$4 sm:$0xff]  }
 0x16e   :  { %1923 = vmatprep.subr.bf16.mxu0 %v11019_v13  ;;  %s373_s29 = sadd.s32 %s9549_s3, %s370_s27  ;;  %v362_v29 = vld [vmem:[%s361_s25] ss:$8 sm:$0x7]  ;;  %s383_s20 = sand.u32 7, %s13152_s9  ;;  %v11085_v51 = vld [vmem:[#allocation8 + $0x1bc] ss:$36 sps:$4 sm:$0xff]  }
 0x16f   :  { %364 = vst.msk [vmem:[#allocation2 + $0x4] ss:$8 sm:$0x7] %vm13148_vm0, %v362_v29  ;;  %s374_s16 = scalar_lea.vmem [#allocation7], %s373_s29  ;;  %s9551_s22 = smul.u32 24, %s380_s11 }
 0x170   :  { %v375_v30 = vld [vmem:[%s374_s16] ss:$8 sm:$0x7]  ;;  %s393_s2 = sshra.s32 %s13154_s4, 3  ;;  %s396_s18 = sand.u32 7, %s13154_s4  ;;  %2006 = vmatpush1.bf16.msra.mxu1 %v11075_v42 }
 0x171   :  { %1924 = vmatpush1.bf16.msra.mxu0 %v11021_v14  ;;  %377 = vst.msk [vmem:[#allocation2 + $0x5] ss:$8 sm:$0x7] %vm13148_vm0, %v375_v30  ;;  %s9553_s8 = smul.u32 24, %s393_s2  ;;  %s386_s14 = sadd.s32 %s9551_s22, %s383_s20  ;;  %2007 = vmatprep.subr.bf16.mxu1 %v11079_v44  ;;  %v11040_v50 = vld [vmem:[#allocation8 + $0x3ac] ss:$36 sps:$4 sm:$0xff]  }
 0x172   :  { %1925 = vmatprep.subr.bf16.mxu0 %v11022_v16  ;;  %s13176_s21 = sld [smem:[#allocation3 + $0x80]]  ;;  %s387_s6 = scalar_lea.vmem [#allocation7], %s386_s14  ;;  %v11087_v52 = vld [vmem:[#allocation8 + $0x1b8] ss:$36 sps:$4 sm:$0xff]   ;;  %v11042_v54 = vld [vmem:[#allocation8 + $0x3a8] ss:$36 sps:$4 sm:$0xff]  }
 0x173   :  { %s399_s5 = sadd.s32 %s9553_s8, %s396_s18  ;;  %v388_v36 = vld [vmem:[%s387_s6] ss:$8 sm:$0x7]  ;;  %s13178_s13 = sld [smem:[#allocation3 + $0x81]]  ;;  %v11093_v58 = vld [vmem:[#allocation8 + $0x200] ss:$36 sps:$4 sm:$0xff]  }
 0x174   :  { %390 = vst.msk [vmem:[#allocation2 + $0x6] ss:$8 sm:$0x7] %vm13148_vm0, %v388_v36  ;;  %s400_s10 = scalar_lea.vmem [#allocation7], %s399_s5  ;;  %s13182_s28 = sld [smem:[#allocation3 + $0x82]]  ;;  %2008 = vmatpush1.bf16.msra.mxu1 %v11081_v47 }
 0x175   :  { %1926 = vmatpush1.bf16.msra.mxu0 %v11024_v23  ;;  %v401_v37 = vld [vmem:[%s400_s10] ss:$8 sm:$0x7]  ;;  %s13186_s30 = sld [smem:[#allocation3 + $0x83]]  ;;  %s13188_s26 = sld [smem:[#allocation3 + $0x84]]  ;;  %2009 = vmatprep.subr.bf16.mxu1 %v11085_v51 }
 0x176   :  { %1927 = vmatprep.subr.bf16.mxu0 %v11025_v26  ;;  %403 = vst.msk [vmem:[#allocation2 + $0x7] ss:$8 sm:$0x7] %vm13148_vm0, %v401_v37  ;;  %s13190_s9 = sld [smem:[#allocation3 + $0x85]]  ;;  %s13192_s4 = sld [smem:[#allocation3 + $0x86]] }
 0x177   :  { %s13196_s24 = sld [smem:[#allocation3 + $0x87]]  ;;  %v11043_v55 = vld [vmem:[#allocation8 + $0x3f4] ss:$36 sps:$4 sm:$0xff]   ;;  %v11091_v57 = vld [vmem:[#allocation8 + $0x204] ss:$36 sps:$4 sm:$0xff]  }
 0x178   :  { %s406_s12 = sshra.s32 %s13176_s21, 3  ;;  %s409_s19 = sand.u32 7, %s13176_s21  ;;  %2010 = vmatpush1.bf16.msra.mxu1 %v11087_v52  ;;  %v11045_v59 = vld [vmem:[#allocation8 + $0x3f0] ss:$36 sps:$4 sm:$0xff]   ;;  %v11046_v60 = vld [vmem:[#allocation8 + $0x43c] ss:$36 sps:$4 sm:$0xff]  }
 0x179   :  { %1928 = vmatpush1.bf16.msra.mxu0 %v11027_v27  ;;  %s9555_s23 = smul.u32 24, %s406_s12  ;;  %s419_s1 = sshra.s32 %s13178_s13, 3  ;;  %2011 = vmatprep.subr.bf16.mxu1 %v11091_v57  ;;  %v11097_v62 = vld [vmem:[#allocation8 + $0x24c] ss:$36 sps:$4 sm:$0xff]   ;;  %v11048_v1 = vld [vmem:[#allocation8 + $0x438] ss:$36 sps:$4 sm:$0xff]  }
 0x17a   :  { %1929 = vmatprep.subr.bf16.mxu0 %v11028_v28  ;;  %s422_s15 = sand.u32 7, %s13178_s13  ;;  %s9557_s17 = smul.u32 24, %s419_s1  ;;  %v11099_v0 = vld [vmem:[#allocation8 + $0x248] ss:$36 sps:$4 sm:$0xff]   ;;  %v11103_v3 = vld [vmem:[#allocation8 + $0x294] ss:$36 sps:$4 sm:$0xff]  }
 0x17b   :  { %s412_s0 = sadd.s32 %s9555_s23, %s409_s19  ;;  %s432_s27 = sshra.s32 %s13182_s28, 3  ;;  %v11054_v4 = vld [vmem:[#allocation8 + $0x484] ss:$36 sps:$4 sm:$0xff]   ;;  %v11105_v5 = vld [vmem:[#allocation8 + $0x290] ss:$36 sps:$4 sm:$0xff]  }
 0x17c   :  { %s413_s3 = scalar_lea.vmem [#allocation7], %s412_s0  ;;  %s425_s7 = sadd.s32 %s9557_s17, %s422_s15  ;;  %2012 = vmatpush1.bf16.msra.mxu1 %v11093_v58  ;;  %v11109_v7 = vld [vmem:[#allocation8 + $0x2dc] ss:$36 sps:$4 sm:$0xff]   ;;  %v11115_v9 = vld [vmem:[#allocation8 + $0x324] ss:$36 sps:$4 sm:$0xff]  }
 0x17d   :  { %1930 = vmatpush1.bf16.msra.mxu0 %v11030_v33  ;;  %v414_v46 = vld [vmem:[%s413_s3] ss:$8 sm:$0x7]  ;;  %s435_s11 = sand.u32 7, %s13182_s28  ;;  %s9559_s29 = smul.u32 24, %s432_s27  ;;  %2013 = vmatprep.subr.bf16.mxu1 %v11097_v62 }
 0x17e   :  { %1931 = vmatprep.subr.bf16.mxu0 %v11031_v34  ;;  %416 = vst.msk [vmem:[#allocation2 + $0x18] ss:$8 sm:$0x7] %vm13148_vm0, %v414_v46  ;;  %s426_s25 = scalar_lea.vmem [#allocation7], %s425_s7  ;;  %s445_s20 = sshra.s32 %s13186_s30, 3  ;;  %v510_v10 = vld [vmem:[#allocation2 + $0x8] sm:$0xff] }
 0x17f   :  { %v427_v48 = vld [vmem:[%s426_s25] ss:$8 sm:$0x7]  ;;  %s448_s16 = sand.u32 7, %s13186_s30  ;;  %s438_s22 = sadd.s32 %s9559_s29, %s435_s11  ;;  %v11117_v13 = vld [vmem:[#allocation8 + $0x320] ss:$36 sps:$4 sm:$0xff]  }
 0x180   :  { %429 = vst.msk [vmem:[#allocation2 + $0x19] ss:$8 sm:$0x7] %vm13148_vm0, %v427_v48  ;;  %s9561_s2 = smul.u32 24, %s445_s20  ;;  %s458_s18 = sshra.s32 %s13188_s26, 3  ;;  %2014 = vmatpush1.bf16.msra.mxu1 %v11099_v0  ;;  %v509_v12 = vld [vmem:[#allocation2] sm:$0xff] }
 0x181   :  { %1932 = vmatpush1.bf16.msra.mxu0 %v11033_v39  ;;  %s439_s8 = scalar_lea.vmem [#allocation7], %s438_s22  ;;  %s461_s21 = sand.u32 7, %s13188_s26  ;;  %2015 = vmatprep.subr.bf16.mxu1 %v11103_v3  ;;  %v11111_v8 = vld [vmem:[#allocation8 + $0x2d8] ss:$36 sps:$4 sm:$0xff]   ;;  %v11121_v14 = vld [vmem:[#allocation8 + $0x36c] ss:$36 sps:$4 sm:$0xff]  }
 0x182   :  { %1933 = vmatprep.subr.bf16.mxu0 %v11034_v40  ;;  %v440_v53 = vld [vmem:[%s439_s8] ss:$8 sm:$0x7]  ;;  %s451_s14 = sadd.s32 %s9561_s2, %s448_s16  ;;  %s9563_s5 = smul.u32 24, %s458_s18  ;;  %v11052_v19 = vld [vmem:[#allocation8 + $0x480] ss:$36 sps:$4 sm:$0xff]  }
 0x183   :  { %442 = vst.msk [vmem:[#allocation2 + $0x1a] ss:$8 sm:$0x7] %vm13148_vm0, %v440_v53  ;;  %s452_s6 = scalar_lea.vmem [#allocation7], %s451_s14  ;;  %s471_s13 = sshra.s32 %s13190_s9, 3 }
 0x184   :  { %v453_v56 = vld [vmem:[%s452_s6] ss:$8 sm:$0x7]  ;;  %s474_s10 = sand.u32 7, %s13190_s9  ;;  %s464_s28 = sadd.s32 %s9563_s5, %s461_s21  ;;  %2016 = vmatpush1.bf16.msra.mxu1 %v11105_v5  ;;  %v11133_v27 = vld [vmem:[#allocation8 + $0x3fc] ss:$36 sps:$4 sm:$0xff]  }
 0x185   :  { %1934 = vmatpush1.bf16.msra.mxu0 %v11036_v43  ;;  %455 = vst.msk [vmem:[#allocation2 + $0x1b] ss:$8 sm:$0x7] %vm13148_vm0, %v453_v56  ;;  %s9565_s30 = smul.u32 24, %s471_s13  ;;  %s484_s26 = sshra.s32 %s13192_s4, 3  ;;  %2017 = vmatprep.subr.bf16.mxu1 %v11109_v7 }
 0x186   :  { %1935 = vmatprep.subr.bf16.mxu0 %v11037_v45  ;;  %s465_s12 = scalar_lea.vmem [#allocation7], %s464_s28  ;;  %s487_s23 = sand.u32 7, %s13192_s4  ;;  %v11060_v20 = vld [vmem:[#allocation8 + $0x4cc] ss:$36 sps:$4 sm:$0xff]   ;;  %v11127_v22 = vld [vmem:[#allocation8 + $0x3b4] ss:$36 sps:$4 sm:$0xff]  }
 0x187   :  { %v466_v61 = vld [vmem:[%s465_s12] ss:$8 sm:$0x7]  ;;  %s477_s19 = sadd.s32 %s9565_s30, %s474_s10  ;;  %s9567_s9 = smul.u32 24, %s484_s26  ;;  %v11072_v29 = vld [vmem:[#allocation8 + $0x55c] ss:$36 sps:$4 sm:$0xff]  }
 0x188   :  { %468 = vst.msk [vmem:[#allocation2 + $0x1c] ss:$8 sm:$0x7] %vm13148_vm0, %v466_v61  ;;  %s478_s1 = scalar_lea.vmem [#allocation7], %s477_s19  ;;  %s497_s15 = sshra.s32 %s13196_s24, 3  ;;  %2018 = vmatpush1.bf16.msra.mxu1 %v11111_v8 }
 0x189   :  { %1936 = vmatpush1.bf16.msra.mxu0 %v11039_v49  ;;  %v479_v63 = vld [vmem:[%s478_s1] ss:$8 sm:$0x7]  ;;  %s500_s0 = sand.u32 7, %s13196_s24  ;;  %s490_s17 = sadd.s32 %s9567_s9, %s487_s23  ;;  %2019 = vmatprep.subr.bf16.mxu1 %v11115_v9  ;;  %v11141_v34 = vld [vmem:[#allocation8 + $0x440] ss:$36 sps:$4 sm:$0xff]  }
 0x18a   :  { %1937 = vmatprep.subr.bf16.mxu0 %v11040_v50  ;;  %481 = vst.msk [vmem:[#allocation2 + $0x1d] ss:$8 sm:$0x7] %vm13148_vm0, %v479_v63  ;;  %s9569_s27 = smul.u32 24, %s497_s15  ;;  %s491_s4 = scalar_lea.vmem [#allocation7], %s490_s17  ;;  %v511_v49 = vld [vmem:[#allocation2 + $0x10] sm:$0xff] }
 0x18b   :  { %v492_v2 = vld [vmem:[%s491_s4] ss:$8 sm:$0x7]  ;;  %v11076_v36 = vld [vmem:[#allocation8 + $0x5a0] ss:$36 sps:$4 sm:$0xff]   ;;  %s12770_s7 = smov [#allocation32]  }
 0x18c   :  { %s503_s3 = sadd.s32 %s9569_s27, %s500_s0  ;;  %494 = vst.msk [vmem:[#allocation2 + $0x1e] ss:$8 sm:$0x7] %vm13148_vm0, %v492_v2  ;;  %2020 = vmatpush1.bf16.msra.mxu1 %v11117_v13  ;;  %v11123_v21 = vld [vmem:[#allocation8 + $0x368] ss:$36 sps:$4 sm:$0xff]   ;;  %s9473_s11 = sshll.u32 %s12770_s7, 4  ;;  %s9474_s11 = int_to_ptr.vmem [resolvable:$true] %s9473_s11 }
 0x18d   :  { %1938 = vmatpush1.bf16.msra.mxu0 %v11042_v54  ;;  %s504_s24 = scalar_lea.vmem [#allocation7], %s503_s3  ;;  %2021 = vmatprep.subr.bf16.mxu1 %v11121_v14  ;;  %v11058_v23 = vld [vmem:[#allocation8 + $0x4c8] ss:$36 sps:$4 sm:$0xff]   ;;  %v11066_v25 = vld [vmem:[#allocation8 + $0x514] ss:$36 sps:$4 sm:$0xff]   ;;  %s12687_s29 = scalar_lea.vmem %s9474_s11, 32 }
 0x18e   :  { %1939 = vmatprep.subr.bf16.mxu0 %v11043_v55  ;;  %v505_v6 = vld [vmem:[%s504_s24] ss:$8 sm:$0x7]  ;;  %v11159_v43 = vld [vmem:[#allocation8 + $0x51c] ss:$36 sps:$4 sm:$0xff]   ;;  %p12688_p13 = scmp.ne.s32.totalorder %s9474_s11, %s12687_s29  ;;  %p12692_p0 = scmp.lt.s32.totalorder %s9474_s11, %s9474_s11 }
 0x18f   :  { %507 = vst.msk [vmem:[#allocation2 + $0x1f] ss:$8 sm:$0x7] %vm13148_vm0, %v505_v6  ;;  %v11129_v26 = vld [vmem:[#allocation8 + $0x3b0] ss:$36 sps:$4 sm:$0xff]   ;;  %p12693_p1 = scmp.lt.s32.totalorder %s12687_s29, %s12687_s29 }
 0x190   :  { %2022 = vmatpush1.bf16.msra.mxu1 %v11123_v21  ;;  %v11064_v28 = vld [vmem:[#allocation8 + $0x510] ss:$36 sps:$4 sm:$0xff]   ;;  %v11135_v30 = vld [vmem:[#allocation8 + $0x3f8] ss:$36 sps:$4 sm:$0xff]   ;;  %v11139_v31 = vld [vmem:[#allocation8 + $0x444] ss:$36 sps:$4 sm:$0xff]  }
 0x191   :  { %1940 = vmatpush1.bf16.msra.mxu0 %v11045_v59  ;;  %2023 = vmatprep.subr.bf16.mxu1 %v11127_v22  ;;  %v11070_v32 = vld [vmem:[#allocation8 + $0x558] ss:$36 sps:$4 sm:$0xff]   ;;  %v11078_v33 = vld [vmem:[#allocation8 + $0x5a4] ss:$36 sps:$4 sm:$0xff]   ;;  %v11147_v35 = vld [vmem:[#allocation8 + $0x48c] ss:$36 sps:$4 sm:$0xff]   ;;  %p12694_p2 = por %p12693_p1, %p12692_p0 }
 0x192   :  { %1941 = vmatprep.subr.bf16.mxu0 %v11046_v60  ;;  %v11084_v37 = vld [vmem:[#allocation8 + $0x5ec] ss:$36 sps:$4 sm:$0xff]   ;;  %v11153_v39 = vld [vmem:[#allocation8 + $0x4d4] ss:$36 sps:$4 sm:$0xff]   ;;  %v11096_v45 = vld [vmem:[#allocation8 + $0x67c] ss:$36 sps:$4 sm:$0xff]  }
 0x193   :  { %v11145_v38 = vld [vmem:[#allocation8 + $0x488] ss:$36 sps:$4 sm:$0xff]   ;;  %v11090_v41 = vld [vmem:[#allocation8 + $0x634] ss:$36 sps:$4 sm:$0xff]   ;;  %v11163_v52 = vld [vmem:[#allocation8 + $0x560] ss:$36 sps:$4 sm:$0xff]   ;;  %p12695_p3 = pnand %p12694_p2, %p12688_p13 }
 0x194   :  { %2024 = vmatpush1.bf16.msra.mxu1 %v11129_v26  ;;  %v11082_v40 = vld [vmem:[#allocation8 + $0x5e8] ss:$36 sps:$4 sm:$0xff]   ;;  %v11151_v42 = vld [vmem:[#allocation8 + $0x4d0] ss:$36 sps:$4 sm:$0xff]   ;;  %v11157_v46 = vld [vmem:[#allocation8 + $0x518] ss:$36 sps:$4 sm:$0xff]  }
 0x195   :  { %1942 = vmatpush1.bf16.msra.mxu0 %v11048_v1  ;;  %2025 = vmatprep.subr.bf16.mxu1 %v11133_v27  ;;  %v11088_v44 = vld [vmem:[#allocation8 + $0x630] ss:$36 sps:$4 sm:$0xff]   ;;  %v11165_v47 = vld [vmem:[#allocation8 + $0x564] ss:$36 sps:$4 sm:$0xff]   ;;  %v11094_v48 = vld [vmem:[#allocation8 + $0x678] ss:$36 sps:$4 sm:$0xff]  }
 0x196   :  { %1954 = vmatprep.subr.bf16.mxu0 %v11054_v4  ;;  %v513_v16 = vld [vmem:[#allocation2 + $0x20] sm:$0xff]  ;;  %v512_v17 = vld [vmem:[#allocation2 + $0x18] sm:$0xff]  ;;  %v514_v50 = vld [vmem:[#allocation2 + $0x28] sm:$0xff] }
 0x197   :  { %v13228_v18 = vpack.c.bf16 %v513_v16, %v510_v10  ;;  %v13230_v15 = vpack.c.bf16 %v512_v17, %v509_v12  ;;  %v11102_v51 = vld [vmem:[#allocation8 + $0x14] ss:$36 sps:$4 sm:$0xff]   ;;  %v11171_v53 = vld [vmem:[#allocation8 + $0x5ac] ss:$36 sps:$4 sm:$0xff]   ;;  %v13238_v54 = vpack.c.bf16 %v514_v50, %v511_v49  ;;  %v11108_v56 = vld [vmem:[#allocation8 + $0x5c] ss:$36 sps:$4 sm:$0xff]  }
 0x198   :  { %2026 = vmatpush1.bf16.msra.mxu1 %v11135_v30  ;;  %v11100_v55 = vld [vmem:[#allocation8 + $0x10] ss:$36 sps:$4 sm:$0xff]   ;;  %v11169_v57 = vld [vmem:[#allocation8 + $0x5a8] ss:$36 sps:$4 sm:$0xff]   ;;  %v11106_v59 = vld [vmem:[#allocation8 + $0x58] ss:$36 sps:$4 sm:$0xff]  }
 0x199   :  { %1943 = vmatprep.mubr.bf16.mxu0 %v13228_v18  ;;  %2029 = vmatprep.mubr.bf16.mxu1 %v13228_v18  ;;  %v11177_v58 = vld [vmem:[#allocation8 + $0x5f4] ss:$36 sps:$4 sm:$0xff]   ;;  %v11114_v60 = vld [vmem:[#allocation8 + $0xa4] ss:$36 sps:$4 sm:$0xff]   ;;  %v11183_v62 = vld [vmem:[#allocation8 + $0x63c] ss:$36 sps:$4 sm:$0xff]  }
 0x19a   :  { %1944 = vmatmul.mubr.bf16.vlgmr.msra.gmra.mrb[0].mxu0 %v13230_v15  ;;  %2027 = vmatprep.subr.bf16.mxu1 %v11139_v31  ;;  %v11175_v61 = vld [vmem:[#allocation8 + $0x5f0] ss:$36 sps:$4 sm:$0xff]   ;;  %v11112_v63 = vld [vmem:[#allocation8 + $0xa0] ss:$36 sps:$4 sm:$0xff]   ;;  %v11181_v1 = vld [vmem:[#allocation8 + $0x638] ss:$36 sps:$4 sm:$0xff]  }
 0x19b   :  { %1955 = vmatpush1.bf16.msra.mxu0 %v11052_v19  ;;  %1986 = vmatprep.mubr.bf16.mxu0 %v12767_v24  ;;  %v11120_v0 = vld [vmem:[#allocation8 + $0xec] ss:$36 sps:$4 sm:$0xff]   ;;  %v11189_v2 = vld [vmem:[#allocation8 + $0x684] ss:$36 sps:$4 sm:$0xff]   ;;  %v11126_v4 = vld [vmem:[#allocation8 + $0x134] ss:$36 sps:$4 sm:$0xff]  }
 0x19c   :  { %1956 = vmatprep.subr.bf16.mxu0 %v11060_v20  ;;  %2028 = vmatpush1.bf16.msra.mxu1 %v11141_v34  ;;  %v11118_v3 = vld [vmem:[#allocation8 + $0xe8] ss:$36 sps:$4 sm:$0xff]   ;;  %v11187_v5 = vld [vmem:[#allocation8 + $0x680] ss:$36 sps:$4 sm:$0xff]   ;;  %v11124_v7 = vld [vmem:[#allocation8 + $0x130] ss:$36 sps:$4 sm:$0xff]  }
 0x19d   :  { %2040 = vmatprep.subr.bf16.mxu1 %v11147_v35  ;;  %v11216_v6 = vld [vmem:[#allocation8 + $0x1c] ss:$36 sps:$4 sm:$0xff]   ;;  %v11222_v10 = vld [vmem:[#allocation8 + $0x64] ss:$36 sps:$4 sm:$0xff]   ;;  %v11225_v16 = vld [vmem:[#allocation8 + $0xac] ss:$36 sps:$4 sm:$0xff]  }
 0x19e   :  { %v11132_v8 = vld [vmem:[#allocation8 + $0x17c] ss:$36 sps:$4 sm:$0xff]   ;;  %v11138_v13 = vld [vmem:[#allocation8 + $0x1c4] ss:$36 sps:$4 sm:$0xff]   ;;  %v11144_v19 = vld [vmem:[#allocation8 + $0x20c] ss:$36 sps:$4 sm:$0xff]  }
 0x19f   :  { %1957 = vmatpush1.bf16.msra.mxu0 %v11058_v23  ;;  %2030 = vmatmul.mubr.bf16.vlgmr.msra.gmra.mrb[0].mxu1 %v13230_v15  ;;  %v11214_v9 = vld [vmem:[#allocation8 + $0x18] ss:$36 sps:$4 sm:$0xff]   ;;  %v11220_v14 = vld [vmem:[#allocation8 + $0x60] ss:$36 sps:$4 sm:$0xff]   ;;  %v11223_v20 = vld [vmem:[#allocation8 + $0xa8] ss:$36 sps:$4 sm:$0xff]  }
 0x1a0   :  { %1958 = vmatprep.subr.bf16.mxu0 %v11066_v25  ;;  %2041 = vmatpush1.bf16.msra.mxu1 %v11145_v38  ;;  %v11130_v12 = vld [vmem:[#allocation8 + $0x178] ss:$36 sps:$4 sm:$0xff]   ;;  %v11136_v17 = vld [vmem:[#allocation8 + $0x1c0] ss:$36 sps:$4 sm:$0xff]   ;;  %v11142_v22 = vld [vmem:[#allocation8 + $0x208] ss:$36 sps:$4 sm:$0xff]  }
 0x1a1   :  { %2042 = vmatprep.subr.bf16.mxu1 %v11153_v39  ;;  %2072 = vmatprep.mubr.bf16.mxu1 %v12767_v24  ;;  %v11228_v21 = vld [vmem:[#allocation8 + $0xf4] ss:$36 sps:$4 sm:$0xff]   ;;  %v11231_v26 = vld [vmem:[#allocation8 + $0x13c] ss:$36 sps:$4 sm:$0xff]   ;;  %v11234_v30 = vld [vmem:[#allocation8 + $0x184] ss:$36 sps:$4 sm:$0xff]  }
 0x1a2   :  { %v11150_v23 = vld [vmem:[#allocation8 + $0x254] ss:$36 sps:$4 sm:$0xff]   ;;  %v11237_v34 = vld [vmem:[#allocation8 + $0x1cc] ss:$36 sps:$4 sm:$0xff]   ;;  %v11160_v35 = vld [vmem:[#allocation8 + $0x2e0] ss:$36 sps:$4 sm:$0xff]  }
 0x1a3   :  { %1959 = vmatpush1.bf16.msra.mxu0 %v11064_v28  ;;  %v11226_v25 = vld [vmem:[#allocation8 + $0xf0] ss:$36 sps:$4 sm:$0xff]   ;;  %v11156_v28 = vld [vmem:[#allocation8 + $0x29c] ss:$36 sps:$4 sm:$0xff]   ;;  %v11166_v39 = vld [vmem:[#allocation8 + $0x328] ss:$36 sps:$4 sm:$0xff]  }
 0x1a4   :  { %1960 = vmatprep.subr.bf16.mxu0 %v11072_v29  ;;  %2043 = vmatpush1.bf16.msra.mxu1 %v11151_v42  ;;  %v11148_v27 = vld [vmem:[#allocation8 + $0x250] ss:$36 sps:$4 sm:$0xff]   ;;  %v11229_v29 = vld [vmem:[#allocation8 + $0x138] ss:$36 sps:$4 sm:$0xff]   ;;  %v11244_v49 = vld [vmem:[#allocation8 + $0x2a0] ss:$36 sps:$4 sm:$0xff]  }
 0x1a5   :  { %2044 = vmatprep.subr.bf16.mxu1 %v11159_v43  ;;  %v11154_v31 = vld [vmem:[#allocation8 + $0x298] ss:$36 sps:$4 sm:$0xff]   ;;  %v11172_v42 = vld [vmem:[#allocation8 + $0x370] ss:$36 sps:$4 sm:$0xff]  }
 0x1a6   :  { %v11240_v38 = vld [vmem:[#allocation8 + $0x214] ss:$36 sps:$4 sm:$0xff]   ;;  %v11243_v43 = vld [vmem:[#allocation8 + $0x25c] ss:$36 sps:$4 sm:$0xff]   ;;  %v11249_v50 = vld [vmem:[#allocation8 + $0x2ec] ss:$36 sps:$4 sm:$0xff]  }
 0x1a7   :  { %1961 = vmatpush1.bf16.msra.mxu0 %v11070_v32  ;;  %v11162_v32 = vld [vmem:[#allocation8 + $0x2e4] ss:$36 sps:$4 sm:$0xff]  }
 0x1a8   :  { %1962 = vmatprep.subr.bf16.mxu0 %v11078_v33  ;;  %2045 = vmatpush1.bf16.msra.mxu1 %v11157_v46  ;;  %v11232_v33 = vld [vmem:[#allocation8 + $0x180] ss:$36 sps:$4 sm:$0xff]  }
 0x1a9   :  { %2046 = vmatprep.subr.bf16.mxu1 %v11165_v47  ;;  %v11246_v46 = vld [vmem:[#allocation8 + $0x2a4] ss:$36 sps:$4 sm:$0xff]   ;;  %v11178_v47 = vld [vmem:[#allocation8 + $0x3b8] ss:$36 sps:$4 sm:$0xff]  }
 0x1ab   :  { %1963 = vmatpush1.bf16.msra.mxu0 %v11076_v36  ;;  %v11168_v36 = vld [vmem:[#allocation8 + $0x32c] ss:$36 sps:$4 sm:$0xff]  }
 0x1ac   :  { %1964 = vmatprep.subr.bf16.mxu0 %v11084_v37  ;;  %2047 = vmatpush1.bf16.msra.mxu1 %v11163_v52  ;;  %v11235_v37 = vld [vmem:[#allocation8 + $0x1c8] ss:$36 sps:$4 sm:$0xff]  }
 0x1ad   :  { %2048 = vmatprep.subr.bf16.mxu1 %v11171_v53  ;;  %v11192_v52 = vld [vmem:[#allocation8 + $0x44c] ss:$36 sps:$4 sm:$0xff]  }
 0x1ae   :  { %v11247_v53 = vld [vmem:[#allocation8 + $0x2e8] ss:$36 sps:$4 sm:$0xff]  }
 0x1af   :  { %1965 = vmatpush1.bf16.msra.mxu0 %v11082_v40  ;;  %v11174_v40 = vld [vmem:[#allocation8 + $0x374] ss:$36 sps:$4 sm:$0xff]  }
 0x1b0   :  { %1966 = vmatprep.subr.bf16.mxu0 %v11090_v41  ;;  %2049 = vmatpush1.bf16.msra.mxu1 %v11169_v57  ;;  %v11238_v41 = vld [vmem:[#allocation8 + $0x210] ss:$36 sps:$4 sm:$0xff]  }
 0x1b1   :  { %2050 = vmatprep.subr.bf16.mxu1 %v11177_v58  ;;  %v11195_v57 = vld [vmem:[#allocation8 + $0x494] ss:$36 sps:$4 sm:$0xff]  }
 0x1b2   :  { %v11250_v58 = vld [vmem:[#allocation8 + $0x330] ss:$36 sps:$4 sm:$0xff]  }
 0x1b3   :  { %1967 = vmatpush1.bf16.msra.mxu0 %v11088_v44  ;;  %v11180_v44 = vld [vmem:[#allocation8 + $0x3bc] ss:$36 sps:$4 sm:$0xff]  }
 0x1b4   :  { %1968 = vmatprep.subr.bf16.mxu0 %v11096_v45  ;;  %2051 = vmatpush1.bf16.msra.mxu1 %v11175_v61  ;;  %v11241_v45 = vld [vmem:[#allocation8 + $0x258] ss:$36 sps:$4 sm:$0xff]  }
 0x1b5   :  { %2052 = vmatprep.subr.bf16.mxu1 %v11183_v62  ;;  %v11198_v61 = vld [vmem:[#allocation8 + $0x4dc] ss:$36 sps:$4 sm:$0xff]  }
 0x1b6   :  { %v11253_v62 = vld [vmem:[#allocation8 + $0x378] ss:$36 sps:$4 sm:$0xff]  }
 0x1b7   :  { %1969 = vmatpush1.bf16.msra.mxu0 %v11094_v48  ;;  %v11186_v48 = vld [vmem:[#allocation8 + $0x404] ss:$36 sps:$4 sm:$0xff]  }
 0x1b8   :  { %2083 = vmatprep.subr.bf16.mxu0 %v11102_v51  ;;  %2053 = vmatpush1.bf16.msra.mxu1 %v11181_v1  ;;  %v11184_v51 = vld [vmem:[#allocation8 + $0x400] ss:$36 sps:$4 sm:$0xff]  }
 0x1b9   :  { %2054 = vmatprep.subr.bf16.mxu1 %v11189_v2  ;;  %v11201_v1 = vld [vmem:[#allocation8 + $0x524] ss:$36 sps:$4 sm:$0xff]  }
 0x1ba   :  { %1987 = vmatmul.mubr.bf16.vlgmr.msra.gmra.mrb[0].mxu0 %v13238_v54  ;;  %v11256_v2 = vld [vmem:[#allocation8 + $0x3c0] ss:$36 sps:$4 sm:$0xff]  }
 0x1bb   :  { %2084 = vmatpush1.bf16.msra.mxu0 %v11100_v55  ;;  %2115 = vmatprep.mubr.bf16.mxu0 %v13228_v18  ;;  %v11252_v55 = vld [vmem:[#allocation8 + $0x334] ss:$36 sps:$4 sm:$0xff]  }
 0x1bc   :  { %2085 = vmatprep.subr.bf16.mxu0 %v11108_v56  ;;  %2055 = vmatpush1.bf16.msra.mxu1 %v11187_v5  ;;  %v11190_v56 = vld [vmem:[#allocation8 + $0x448] ss:$36 sps:$4 sm:$0xff]  }
 0x1bd   :  { %2169 = vmatprep.subr.bf16.mxu1 %v11216_v6  ;;  %v11204_v5 = vld [vmem:[#allocation8 + $0x56c] ss:$36 sps:$4 sm:$0xff]  }
 0x1be   :  { %v11259_v6 = vld [vmem:[#allocation8 + $0x408] ss:$36 sps:$4 sm:$0xff]  }
 0x1bf   :  { %2086 = vmatpush1.bf16.msra.mxu0 %v11106_v59  ;;  %2073 = vmatmul.mubr.bf16.vlgmr.msra.gmra.mrb[0].mxu1 %v13238_v54  ;;  %v11255_v59 = vld [vmem:[#allocation8 + $0x37c] ss:$36 sps:$4 sm:$0xff]  }
 0x1c0   :  { %2087 = vmatprep.subr.bf16.mxu0 %v11114_v60  ;;  %2170 = vmatpush1.bf16.msra.mxu1 %v11214_v9  ;;  %v11193_v60 = vld [vmem:[#allocation8 + $0x490] ss:$36 sps:$4 sm:$0xff]  }
 0x1c1   :  { %2171 = vmatprep.subr.bf16.mxu1 %v11222_v10  ;;  %2201 = vmatprep.mubr.bf16.mxu1 %v13228_v18  ;;  %v11207_v9 = vld [vmem:[#allocation8 + $0x5b4] ss:$36 sps:$4 sm:$0xff]  }
 0x1c2   :  { %v11262_v10 = vld [vmem:[#allocation8 + $0x450] ss:$36 sps:$4 sm:$0xff]  }
 0x1c3   :  { %2088 = vmatpush1.bf16.msra.mxu0 %v11112_v63  ;;  %v11258_v63 = vld [vmem:[#allocation8 + $0x3c4] ss:$36 sps:$4 sm:$0xff]  }
 0x1c4   :  { %2089 = vmatprep.subr.bf16.mxu0 %v11120_v0  ;;  %2172 = vmatpush1.bf16.msra.mxu1 %v11220_v14  ;;  %v11196_v0 = vld [vmem:[#allocation8 + $0x4d8] ss:$36 sps:$4 sm:$0xff]  }
 0x1c5   :  { %2173 = vmatprep.subr.bf16.mxu1 %v11225_v16  ;;  %v11210_v14 = vld [vmem:[#allocation8 + $0x5fc] ss:$36 sps:$4 sm:$0xff]  }
 0x1c6   :  { %v11265_v16 = vld [vmem:[#allocation8 + $0x498] ss:$36 sps:$4 sm:$0xff]  }
 0x1c7   :  { %2090 = vmatpush1.bf16.msra.mxu0 %v11118_v3  ;;  %v11261_v3 = vld [vmem:[#allocation8 + $0x40c] ss:$36 sps:$4 sm:$0xff]  }
 0x1c8   :  { %2091 = vmatprep.subr.bf16.mxu0 %v11126_v4  ;;  %2174 = vmatpush1.bf16.msra.mxu1 %v11223_v20  ;;  %v11199_v4 = vld [vmem:[#allocation8 + $0x520] ss:$36 sps:$4 sm:$0xff]  }
 0x1c9   :  { %2175 = vmatprep.subr.bf16.mxu1 %v11228_v21  ;;  %v11213_v20 = vld [vmem:[#allocation8 + $0x644] ss:$36 sps:$4 sm:$0xff]  }
 0x1ca   :  { %v11268_v21 = vld [vmem:[#allocation8 + $0x4e0] ss:$36 sps:$4 sm:$0xff]  }
 0x1cb   :  { %2092 = vmatpush1.bf16.msra.mxu0 %v11124_v7  ;;  %v11264_v7 = vld [vmem:[#allocation8 + $0x454] ss:$36 sps:$4 sm:$0xff]  }
 0x1cc   :  { %2093 = vmatprep.subr.bf16.mxu0 %v11132_v8  ;;  %2176 = vmatpush1.bf16.msra.mxu1 %v11226_v25  ;;  %v11202_v8 = vld [vmem:[#allocation8 + $0x568] ss:$36 sps:$4 sm:$0xff]  }
 0x1cd   :  { %2177 = vmatprep.subr.bf16.mxu1 %v11231_v26  ;;  %v11219_v25 = vld [vmem:[#allocation8 + $0x68c] ss:$36 sps:$4 sm:$0xff]  }
 0x1ce   :  { %v11271_v26 = vld [vmem:[#allocation8 + $0x528] ss:$36 sps:$4 sm:$0xff]  }
 0x1cf   :  { %2094 = vmatpush1.bf16.msra.mxu0 %v11130_v12  ;;  %v11267_v12 = vld [vmem:[#allocation8 + $0x49c] ss:$36 sps:$4 sm:$0xff]  }
 0x1d0   :  { %2095 = vmatprep.subr.bf16.mxu0 %v11138_v13  ;;  %2178 = vmatpush1.bf16.msra.mxu1 %v11229_v29  ;;  %v11205_v13 = vld [vmem:[#allocation8 + $0x5b0] ss:$36 sps:$4 sm:$0xff]  }
 0x1d1   :  { %2179 = vmatprep.subr.bf16.mxu1 %v11234_v30  ;;  %v11274_v29 = vld [vmem:[#allocation8 + $0x570] ss:$36 sps:$4 sm:$0xff]   ;;  %v11279_v30 = vld [vmem:[#allocation8 + $0x5bc] ss:$36 sps:$4 sm:$0xff]  }
 0x1d3   :  { %2096 = vmatpush1.bf16.msra.mxu0 %v11136_v17  ;;  %v11270_v17 = vld [vmem:[#allocation8 + $0x4e4] ss:$36 sps:$4 sm:$0xff]  }
 0x1d4   :  { %2097 = vmatprep.subr.bf16.mxu0 %v11144_v19  ;;  %2180 = vmatpush1.bf16.msra.mxu1 %v11232_v33  ;;  %v11208_v19 = vld [vmem:[#allocation8 + $0x5f8] ss:$36 sps:$4 sm:$0xff]   ;;  %v11280_v33 = vld [vmem:[#allocation8 + $0x600] ss:$36 sps:$4 sm:$0xff]  }
 0x1d5   :  { %2181 = vmatprep.subr.bf16.mxu1 %v11237_v34  ;;  %v11285_v34 = vld [vmem:[#allocation8 + $0x64c] ss:$36 sps:$4 sm:$0xff]  }
 0x1d7   :  { %2098 = vmatpush1.bf16.msra.mxu0 %v11142_v22  ;;  %v11211_v22 = vld [vmem:[#allocation8 + $0x640] ss:$36 sps:$4 sm:$0xff]  }
 0x1d8   :  { %2099 = vmatprep.subr.bf16.mxu0 %v11150_v23  ;;  %2182 = vmatpush1.bf16.msra.mxu1 %v11235_v37  ;;  %v11273_v23 = vld [vmem:[#allocation8 + $0x52c] ss:$36 sps:$4 sm:$0xff]   ;;  %v11297_v37 = vld [vmem:[#allocation8 + $0x260] ss:$36 sps:$4 sm:$0xff]  }
 0x1d9   :  { %2183 = vmatprep.subr.bf16.mxu1 %v11240_v38  ;;  %v11298_v38 = vld [vmem:[#allocation8 + $0x20] ss:$36 sps:$4 sm:$0xff]  }
 0x1db   :  { %2100 = vmatpush1.bf16.msra.mxu0 %v11148_v27  ;;  %v11276_v27 = vld [vmem:[#allocation8 + $0x574] ss:$36 sps:$4 sm:$0xff]  }
 0x1dc   :  { %2101 = vmatprep.subr.bf16.mxu0 %v11156_v28  ;;  %2184 = vmatpush1.bf16.msra.mxu1 %v11238_v41  ;;  %v11217_v28 = vld [vmem:[#allocation8 + $0x688] ss:$36 sps:$4 sm:$0xff]  }
 0x1dd   :  { %2185 = vmatprep.subr.bf16.mxu1 %v11243_v43  ;;  %v11300_v41 = vld [vmem:[#allocation8 + $0x68] ss:$36 sps:$4 sm:$0xff]   ;;  %v11289_v43 = vld [vmem:[#allocation8 + $0x4a0] ss:$36 sps:$4 sm:$0xff]  }
 0x1df   :  { %2102 = vmatpush1.bf16.msra.mxu0 %v11154_v31  ;;  %v11277_v31 = vld [vmem:[#allocation8 + $0x5b8] ss:$36 sps:$4 sm:$0xff]  }
 0x1e0   :  { %2103 = vmatprep.subr.bf16.mxu0 %v11162_v32  ;;  %2186 = vmatpush1.bf16.msra.mxu1 %v11241_v45  ;;  %v11282_v32 = vld [vmem:[#allocation8 + $0x604] ss:$36 sps:$4 sm:$0xff]   ;;  %v12768_v45 = vmov 0.0  }
 0x1e1   :  { %2187 = vmatprep.subr.bf16.mxu1 %v11246_v46  ;;  %v11290_v46 = vld [vmem:[#allocation8 + $0x4e8] ss:$36 sps:$4 sm:$0xff]  }
 0x1e3   :  { %2104 = vmatpush1.bf16.msra.mxu0 %v11160_v35  ;;  %v11283_v35 = vld [vmem:[#allocation8 + $0x648] ss:$36 sps:$4 sm:$0xff]  }
 0x1e4   :  { %2105 = vmatprep.subr.bf16.mxu0 %v11168_v36  ;;  %2188 = vmatpush1.bf16.msra.mxu1 %v11244_v49  ;;  %v11288_v36 = vld [vmem:[#allocation8 + $0x694] ss:$36 sps:$4 sm:$0xff]  }
 0x1e5   :  { %2189 = vmatprep.subr.bf16.mxu1 %v11249_v50  ;;  %v11291_v49 = vld [vmem:[#allocation8 + $0x530] ss:$36 sps:$4 sm:$0xff]   ;;  %v11306_v50 = vld [vmem:[#allocation8 + $0x140] ss:$36 sps:$4 sm:$0xff]  }
 0x1e7   :  { %2106 = vmatpush1.bf16.msra.mxu0 %v11166_v39  ;;  %v11286_v39 = vld [vmem:[#allocation8 + $0x690] ss:$36 sps:$4 sm:$0xff]  }
 0x1e8   :  { %2107 = vmatprep.subr.bf16.mxu0 %v11174_v40  ;;  %2190 = vmatpush1.bf16.msra.mxu1 %v11247_v53  ;;  %v11299_v40 = vld [vmem:[#allocation8 + $0x2a8] ss:$36 sps:$4 sm:$0xff]  }
 0x1e9   :  { %2191 = vmatprep.subr.bf16.mxu1 %v11252_v55  ;;  %v11308_v53 = vld [vmem:[#allocation8 + $0x188] ss:$36 sps:$4 sm:$0xff]   ;;  %v11309_v55 = vld [vmem:[#allocation8 + $0x410] ss:$36 sps:$4 sm:$0xff]  }
 0x1eb   :  { %2108 = vmatpush1.bf16.msra.mxu0 %v11172_v42  ;;  %v11301_v42 = vld [vmem:[#allocation8 + $0x2f0] ss:$36 sps:$4 sm:$0xff]  }
 0x1ec   :  { %2109 = vmatprep.subr.bf16.mxu0 %v11180_v44  ;;  %2192 = vmatpush1.bf16.msra.mxu1 %v11250_v58  ;;  %v11303_v44 = vld [vmem:[#allocation8 + $0x338] ss:$36 sps:$4 sm:$0xff]  }
 0x1ed   :  { %2193 = vmatprep.subr.bf16.mxu1 %v11255_v59  ;;  %v11311_v58 = vld [vmem:[#allocation8 + $0x458] ss:$36 sps:$4 sm:$0xff]   ;;  %v11294_v59 = vld [vmem:[#allocation8 + $0x608] ss:$36 sps:$4 sm:$0xff]  }
 0x1ef   :  { %2110 = vmatpush1.bf16.msra.mxu0 %v11178_v47  ;;  %v11304_v47 = vld [vmem:[#allocation8 + $0xf8] ss:$36 sps:$4 sm:$0xff]  }
 0x1f0   :  { %2111 = vmatprep.subr.bf16.mxu0 %v11186_v48  ;;  %2194 = vmatpush1.bf16.msra.mxu1 %v11253_v62  ;;  %v11305_v48 = vld [vmem:[#allocation8 + $0x380] ss:$36 sps:$4 sm:$0xff]   ;;  %v11296_v62 = vld [vmem:[#allocation8 + $0x698] ss:$36 sps:$4 sm:$0xff]  }
 0x1f1   :  { %2195 = vmatprep.subr.bf16.mxu1 %v11258_v63  ;;  %v13265_v63 = vshrl.u32 %v308_v11, 7 }
 0x1f3   :  { %2112 = vmatpush1.bf16.msra.mxu0 %v11184_v51  ;;  %v11307_v51 = vld [vmem:[#allocation8 + $0x3c8] ss:$36 sps:$4 sm:$0xff]  }
 0x1f4   :  { %2113 = vmatprep.subr.bf16.mxu0 %v11192_v52  ;;  %2196 = vmatpush1.bf16.msra.mxu1 %v11256_v2  ;;  %v11292_v52 = vld [vmem:[#allocation8 + $0x578] ss:$36 sps:$4 sm:$0xff]  }
 0x1f5   :  { %2197 = vmatprep.subr.bf16.mxu1 %v11261_v3 }
 0x1f7   :  { %2114 = vmatpush1.bf16.msra.mxu0 %v11190_v56  ;;  %v11293_v56 = vld [vmem:[#allocation8 + $0x5c0] ss:$36 sps:$4 sm:$0xff]  }
 0x1f8   :  { %2126 = vmatprep.subr.bf16.mxu0 %v11195_v57  ;;  %2198 = vmatpush1.bf16.msra.mxu1 %v11259_v6  ;;  %v11310_v57 = vld [vmem:[#allocation8 + $0x1d0] ss:$36 sps:$4 sm:$0xff]  }
 0x1f9   :  { %2199 = vmatprep.subr.bf16.mxu1 %v11264_v7 }
 0x1fa   :  { %2116 = vmatmul.mubr.bf16.vlgmr.msra.gmra.mrb[4].mxu0 %v13230_v15 }
 0x1fb   :  { %2127 = vmatpush1.bf16.msra.mxu0 %v11193_v60  ;;  %2158 = vmatprep.mubr.bf16.mxu0 %v12767_v24  ;;  %v11312_v60 = vld [vmem:[#allocation8 + $0x218] ss:$36 sps:$4 sm:$0xff]  }
 0x1fc   :  { %2128 = vmatprep.subr.bf16.mxu0 %v11198_v61  ;;  %2200 = vmatpush1.bf16.msra.mxu1 %v11262_v10  ;;  %v11295_v61 = vld [vmem:[#allocation8 + $0x650] ss:$36 sps:$4 sm:$0xff]  }
 0x1fd   :  { %2212 = vmatprep.subr.bf16.mxu1 %v11267_v12  ;;  %v13278_v12 = vsub.s32 3, %v13265_v63 }
 0x1ff   :  { %2129 = vmatpush1.bf16.msra.mxu0 %v11196_v0  ;;  %2202 = vmatmul.mubr.bf16.vlgmr.msra.gmra.mrb[4].mxu1 %v13230_v15  ;;  %v13268_v0 = vsub.s32 1, %v13265_v63 }
 0x200   :  { %2130 = vmatprep.subr.bf16.mxu0 %v11201_v1  ;;  %2213 = vmatpush1.bf16.msra.mxu1 %v11265_v16  ;;  %v758_v1 = vld [vmem:[#allocation10] sm:$0xff] }
 0x201   :  { %2214 = vmatprep.subr.bf16.mxu1 %v11270_v17  ;;  %2244 = vmatprep.mubr.bf16.mxu1 %v12767_v24  ;;  %v769_v2 = vrot.slane %v758_v1, %v13268_v0  ;;  %v13285_v17 = vsub.s32 0, %v13265_v63 }
 0x203   :  { %2131 = vmatpush1.bf16.msra.mxu0 %v11199_v4 }
 0x204   :  { %2132 = vmatprep.subr.bf16.mxu0 %v11204_v5  ;;  %2215 = vmatpush1.bf16.msra.mxu1 %v11268_v21  ;;  %v784_v21 = vsub.s32 5, %v13265_v63 }
 0x205   :  { %2216 = vmatprep.subr.bf16.mxu1 %v11273_v23 }
 0x207   :  { %2133 = vmatpush1.bf16.msra.mxu0 %v11202_v8 }
 0x208   :  { %2134 = vmatprep.subr.bf16.mxu0 %v11207_v9  ;;  %2217 = vmatpush1.bf16.msra.mxu1 %v11271_v26  ;;  %v765_v26 = vrot.slane %v758_v1, %v13285_v17 }
 0x209   :  { %2218 = vmatprep.subr.bf16.mxu1 %v11276_v27 }
 0x20b   :  { %2135 = vmatpush1.bf16.msra.mxu0 %v11205_v13  ;;  %v780_v13 = vsub.s32 4, %v13265_v63 }
 0x20c   :  { %2136 = vmatprep.subr.bf16.mxu0 %v11210_v14  ;;  %2219 = vmatpush1.bf16.msra.mxu1 %v11274_v29  ;;  %v777_v14 = vrot.slane %v758_v1, %v13278_v12 }
 0x20d   :  { %2220 = vmatprep.subr.bf16.mxu1 %v11279_v30  ;;  %v781_v16 = vrot.slane %v758_v1, %v780_v13  ;;  %v785_v30 = vrot.slane %v758_v1, %v784_v21 }
 0x20f   :  { %2137 = vmatpush1.bf16.msra.mxu0 %v11208_v19 }
 0x210   :  { %2138 = vmatprep.subr.bf16.mxu0 %v11213_v20  ;;  %2221 = vmatpush1.bf16.msra.mxu1 %v11277_v31  ;;  %v13292_v31 = vsub.s32 2, %v13265_v63 }
 0x211   :  { %2222 = vmatprep.subr.bf16.mxu1 %v11282_v32  ;;  %v788_v32 = vsub.s32 6, %v13265_v63 }
 0x213   :  { %2139 = vmatpush1.bf16.msra.mxu0 %v11211_v22 }
 0x214   :  { %2140 = vmatprep.subr.bf16.mxu0 %v11219_v25  ;;  %2223 = vmatpush1.bf16.msra.mxu1 %v11280_v33  ;;  %v792_v33 = vsub.s32 7, %v13265_v63 }
 0x215   :  { %2224 = vmatprep.subr.bf16.mxu1 %v11285_v34 }
 0x217   :  { %2141 = vmatpush1.bf16.msra.mxu0 %v11217_v28 }
 0x218   :  { %10481 = vmatprep.subr.bf16.mxu0 %v11297_v37  ;;  %2225 = vmatpush1.bf16.msra.mxu1 %v11283_v35 }
 0x219   :  { %2226 = vmatprep.subr.bf16.mxu1 %v11288_v36 }
 0x21a   :  { %2159 = vmatmul.mubr.bf16.vlgmr.msra.gmra.mrb[4].mxu0 %v13238_v54 }
 0x21b   :  { %2287 = vmatprep.mubr.bf16.mxu0 %v13228_v18  ;;  %10482 = vmatpush3.bf16.msra.mxu0 %v11298_v38  ;;  %v11302_v18 = vld [vmem:[#allocation8 + $0xb0] ss:$36 sps:$4 sm:$0xff]  }
 0x21c   :  { %10483 = vmatprep.subr.bf16.mxu0 %v11299_v40  ;;  %2227 = vmatpush1.bf16.msra.mxu1 %v11286_v39  ;;  %v789_v40 = vrot.slane %v758_v1, %v788_v32 }
 0x21d   :  { %10709 = vmatprep.subr.bf16.mxu1 %v12768_v45 }
 0x21f   :  { %10484 = vmatpush3.bf16.msra.mxu0 %v11300_v41  ;;  %2245 = vmatmul.mubr.bf16.vlgmr.msra.gmra.mrb[4].mxu1 %v13238_v54  ;;  %v773_v41 = vrot.slane %v758_v1, %v13292_v31 }
 0x220   :  { %10485 = vmatprep.subr.bf16.mxu0 %v11301_v42  ;;  %10710 = vmatpush3.bf16.msra.mxu1 %v11289_v43  ;;  %v793_v42 = vrot.slane %v758_v1, %v792_v33 }
 0x221   :  { %10725 = vmatprep.mubr.msk.bf16.mxu1 %vm12769_vm1, %v12768_v45  ;;  %10711 = vmatprep.subr.bf16.mxu1 %v12768_v45 }
 0x223   :  { %10486 = vmatpush3.bf16.msra.mxu0 %v11302_v18 }
 0x224   :  { %10487 = vmatprep.subr.bf16.mxu0 %v11303_v44  ;;  %10712 = vmatpush3.bf16.msra.mxu1 %v11290_v46 }
 0x225   :  { %10713 = vmatprep.subr.bf16.mxu1 %v12768_v45 }
 0x227   :  { %10488 = vmatpush3.bf16.msra.mxu0 %v11304_v47 }
 0x228   :  { %10489 = vmatprep.subr.bf16.mxu0 %v11305_v48  ;;  %10714 = vmatpush3.bf16.msra.mxu1 %v11291_v49 }
 0x229   :  { %10715 = vmatprep.subr.bf16.mxu1 %v12768_v45 }
 0x22b   :  { %10490 = vmatpush3.bf16.msra.mxu0 %v11306_v50 }
 0x22c   :  { %10491 = vmatprep.subr.bf16.mxu0 %v11307_v51  ;;  %10716 = vmatpush3.bf16.msra.mxu1 %v11292_v52 }
 0x22d   :  { %10717 = vmatprep.subr.bf16.mxu1 %v12768_v45 }
 0x22f   :  { %10492 = vmatpush3.bf16.msra.mxu0 %v11308_v53 }
 0x230   :  { %10493 = vmatprep.subr.bf16.mxu0 %v11309_v55  ;;  %10718 = vmatpush3.bf16.msra.mxu1 %v11293_v56 }
 0x231   :  { %10719 = vmatprep.subr.bf16.mxu1 %v12768_v45 }
 0x233   :  { %10494 = vmatpush3.bf16.msra.mxu0 %v11310_v57 }
 0x234   :  { %10495 = vmatprep.subr.bf16.mxu0 %v11311_v58  ;;  %10720 = vmatpush3.bf16.msra.mxu1 %v11294_v59 }
 0x235   :  { %10721 = vmatprep.subr.bf16.mxu1 %v12768_v45 }
 0x237   :  { %10496 = vmatpush3.bf16.msra.mxu0 %v11312_v60 }
 0x238   :  { %10722 = vmatpush3.bf16.msra.mxu1 %v11295_v61 }
 0x239   :  { %10723 = vmatprep.subr.bf16.mxu1 %v12768_v45 }
 0x23a   :  { %2288 = vmatmul.mubr.bf16.vlgmr.msra.gmra.mrb[8].mxu0 %v13230_v15 }
 0x23b   :  { %2587 = vmatprep.mubr.bf16.mxu0 %v12767_v24 }
 0x23c   :  { %10724 = vmatpush3.bf16.msra.mxu1 %v11296_v62 }
 0x23f   :  { %10726 = vmatmul.mubr.bf16.vlgmr.msra.gmra.mrb[8].mxu1 %v13238_v54 }
 0x28d   :  { %v1988_v3 = vpop.f32.mrb[0].mxu0 }
 0x28e   :  { %v1990_v4 = vpop.f32.mrb[1].mxu0  ;;  %v10837_v34 = vadd.f32 %v1988_v3, %v765_v26 }
 0x28f   :  { %v10838_v5 = vadd.f32 %v1990_v4, %v769_v2  ;;  %v13271_v15 = vpop.f32.mrb[2].mxu0 }
 0x290   :  { %v1994_v6 = vpop.f32.mrb[3].mxu0  ;;  %v2337_v37 = vpack.c.bf16 %v10837_v34, %v10837_v34  ;;  %v10839_v61 = vadd.f32 %v13271_v15, %v765_v26 }
 0x291   :  { %v2338_v7 = vpack.c.bf16 %v10838_v5, %v10838_v5  ;;  %v13273_v8 = vadd.f32 %v1994_v6, %v769_v2 }
 0x292   :  { %v2074_v54 = vpop.f32.mrb[0].mxu1  ;;  %v2340_v1 = vpack.c.bf16 %v10839_v61, %v10839_v61  ;;  %v11340_v61 = vld [vmem:[#allocation11 + $0xc8] ss:$12 sps:$4 sm:$0xff]  }
 0x293   :  { %2381 = vmatprep.mubr.bf16.mxu1 %v2338_v7  ;;  %v2076_v9 = vpop.f32.mrb[1].mxu1  ;;  %v10841_v46 = vadd.f32 %v2074_v54, %v773_v41  ;;  %v2341_v59 = vpack.c.bf16 %v13273_v8, %v13273_v8  ;;  %v9570_v7 = vld [vmem:[#allocation10 + $0x8] ss:$0 sm:$0xff] }
 0x294   :  { %v13275_v11 = vpop.f32.mrb[2].mxu1  ;;  %v10842_v19 = vadd.f32 %v2076_v9, %v777_v14 }
 0x295   :  { %v2080_v10 = vpop.f32.mrb[3].mxu1  ;;  %v2339_v57 = vpack.c.bf16 %v10841_v46, %v10841_v46  ;;  %v10843_v3 = vadd.f32 %v13275_v11, %v773_v41 }
 0x296   :  { %v2343_v29 = vpack.c.bf16 %v10842_v19, %v10842_v19  ;;  %v10844_v49 = vadd.f32 %v2080_v10, %v777_v14 }
 0x297   :  { %v2342_v5 = vpack.c.bf16 %v10843_v3, %v10843_v3 }
 0x298   :  { %v2346_v60 = vpack.c.bf16 %v10844_v49, %v10844_v49 }
 0x2ed   :  { %v2160_v20 = vpop.f32.mrb[4].mxu0 }
 0x2ee   :  { %v10845_v22 = vadd.f32 %v2160_v20, %v781_v16  ;;  %v2162_v23 = vpop.f32.mrb[5].mxu0 }
 0x2ef   :  { %v2164_v25 = vpop.f32.mrb[6].mxu0  ;;  %v10846_v35 = vadd.f32 %v2162_v23, %v785_v30 }
 0x2f0   :  { %v2344_v27 = vpack.c.bf16 %v10845_v22, %v10845_v22  ;;  %v2166_v28 = vpop.f32.mrb[7].mxu0  ;;  %v10847_v36 = vadd.f32 %v2164_v25, %v781_v16 }
 0x2f1   :  { %v2345_v38 = vpack.c.bf16 %v10846_v35, %v10846_v35  ;;  %v10848_v62 = vadd.f32 %v2166_v28, %v785_v30 }
 0x2f2   :  { %2349 = vmatprep.subr.bf16.mxu1 %v2344_v27  ;;  %v2347_v39 = vpack.c.bf16 %v10847_v36, %v10847_v36  ;;  %v2246_v43 = vpop.f32.mrb[4].mxu1 }
 0x2f3   :  { %2350 = vmatpush1.bf16.xpose.msra.mxu1 %v2343_v29  ;;  %v10849_v18 = vadd.f32 %v2246_v43, %v789_v40  ;;  %v2248_v44 = vpop.f32.mrb[5].mxu1  ;;  %v2348_v2 = vpack.c.bf16 %v10848_v62, %v10848_v62 }
 0x2f4   :  { %10729 = vmatprep.subr.bf16.mxu1 %v12768_v45  ;;  %v10850_v47 = vadd.f32 %v2248_v44, %v793_v42  ;;  %v2250_v48 = vpop.f32.mrb[6].mxu1 }
 0x2f5   :  { %v2536_v50 = vpack.c.bf16 %v10849_v18, %v10849_v18  ;;  %v13304_v51 = vadd.f32 %v2250_v48, %v789_v40  ;;  %v2252_v52 = vpop.f32.mrb[7].mxu1 }
 0x2f6   :  { %v2537_v53 = vpack.c.bf16 %v10850_v47, %v10850_v47  ;;  %v10852_v55 = vadd.f32 %v2252_v52, %v793_v42 }
 0x2f7   :  { %v2547_v56 = vsel %vm2545_vm2, %v2536_v50, 0 }
 0x2f8   :  { %v2540_v58 = vpack.c.bf16 %v10852_v55, %v10852_v55  ;;  %9787 = vmatprep.subr.msk.bf16.mxu0 %vm2545_vm2, %v2537_v53 }
 0x2f9   :  { %2556 = vmatpush1.bf16.msra.mxu0 %v2547_v56  ;;  %v2539_v56 = vpack.c.bf16 %v13304_v51, %v13304_v51 }
 0x2fa   :  { %2382 = vmatmul.mubr.bf16.vlgmr.msra.gmra.mrb[12].mxu1 %v2337_v37  ;;  %9790 = vmatprep.subr.msk.bf16.mxu0 %vm2545_vm2, %v2540_v58 }
 0x2fb   :  { %10730 = vmatpush3.bf16.xpose.msra.mxu1 %v2345_v38  ;;  %10731 = vmatprep.mubr.msk.bf16.mxu1 %vm12769_vm1, %v12768_v45  ;;  %v2640_v62 = vsel %vm2545_vm2, %v2539_v56, 0  ;;  %v11371_v56 = vld [vmem:[#allocation11 + $0x98] ss:$12 sps:$4 sm:$0xff]  }
 0x2fc   :  { %2429 = vmatprep.subr.bf16.mxu1 %v2347_v39 }
 0x306   :  { %10732 = vmatmul.mubr.bf16.vlgmr.msra.gmra.mrb[12].mxu1 %v2339_v57 }
 0x307   :  { %2430 = vmatpush1.bf16.xpose.msra.mxu1 %v2346_v60  ;;  %2461 = vmatprep.mubr.bf16.mxu1 %v2341_v59  ;;  %v11315_v60 = vld [vmem:[#allocation11 + $0x4] ss:$12 sps:$4 sm:$0xff]  }
 0x308   :  { %10735 = vmatprep.subr.bf16.mxu1 %v12768_v45 }
 0x30d   :  { %v10497_v4 = vpop.f32.mrb[8].mxu0 }
 0x30e   :  { %2462 = vmatmul.mubr.bf16.vlgmr.msra.gmra.mrb[16].mxu1 %v2340_v1  ;;  %v10498_v6 = vpop.f32.mrb[9].mxu0 }
 0x30f   :  { %10736 = vmatpush3.bf16.xpose.msra.mxu1 %v2348_v2  ;;  %10737 = vmatprep.mubr.msk.bf16.mxu1 %vm12769_vm1, %v12768_v45  ;;  %v10499_v8 = vadd.f32 %v10498_v6, %v10497_v4  ;;  %v10500_v15 = vpop.f32.mrb[10].mxu0  ;;  %v11313_v4 = vld [vmem:[#allocation11] ss:$12 sps:$4 sm:$0xff]  }
 0x310   :  { %10741 = vmatprep.subr.bf16.mxu1 %v12768_v45  ;;  %v10501_v54 = vpop.f32.mrb[11].mxu0 }
 0x311   :  { %v10502_v9 = vadd.f32 %v10501_v54, %v10500_v15  ;;  %v2290_v10 = vadd.f32 %v10499_v8, %v9570_v7  ;;  %v11345_v8 = vld [vmem:[#allocation11 + $0xe0] ss:$12 sps:$4 sm:$0xff]   ;;  %v11316_v15 = vld [vmem:[#allocation11 + $0x18] ss:$12 sps:$4 sm:$0xff]  }
 0x312   :  { %v2330_v16 = vpop.f32.mrb[8].mxu1  ;;  %v11346_v54 = vld [vmem:[#allocation11 + $0x20] ss:$12 sps:$4 sm:$0xff]  }
 0x313   :  { %v2293_v14 = vadd.f32 %v10502_v9, %v9570_v7  ;;  %v2331_v19 = vadd.f32 %v2330_v16, %v2290_v10  ;;  %v10727_v20 = vpop.f32.mrb[9].mxu1  ;;  %v11318_v7 = vld [vmem:[#allocation11 + $0x1c] ss:$12 sps:$4 sm:$0xff]   ;;  %v11321_v9 = vld [vmem:[#allocation11 + $0x34] ss:$12 sps:$4 sm:$0xff]  }
 0x314   :  { %v2333_v22 = vpop.f32.mrb[10].mxu1  ;;  %v11319_v10 = vld [vmem:[#allocation11 + $0x30] ss:$12 sps:$4 sm:$0xff]   ;;  %v11322_v16 = vld [vmem:[#allocation11 + $0x48] ss:$12 sps:$4 sm:$0xff]  }
 0x315   :  { %v2538_v23 = vpack.c.bf16 %v2331_v19, %v2331_v19  ;;  %v2334_v11 = vadd.f32 %v2333_v22, %v2293_v14  ;;  %v10728_v25 = vpop.f32.mrb[11].mxu1  ;;  %v11324_v14 = vld [vmem:[#allocation11 + $0x4c] ss:$12 sps:$4 sm:$0xff]   ;;  %v11327_v19 = vld [vmem:[#allocation11 + $0x64] ss:$12 sps:$4 sm:$0xff]  }
 0x316   :  { %v11325_v20 = vld [vmem:[#allocation11 + $0x60] ss:$12 sps:$4 sm:$0xff]   ;;  %v11330_v22 = vld [vmem:[#allocation11 + $0x7c] ss:$12 sps:$4 sm:$0xff]  }
 0x317   :  { %v2553_v26 = vsel %vm2545_vm2, %v2538_v23, 0  ;;  %v2541_v57 = vpack.c.bf16 %v2334_v11, %v2334_v11  ;;  %v11328_v23 = vld [vmem:[#allocation11 + $0x78] ss:$12 sps:$4 sm:$0xff]   ;;  %v11333_v11 = vld [vmem:[#allocation11 + $0x94] ss:$12 sps:$4 sm:$0xff]  }
 0x318   :  { %v11331_v25 = vld [vmem:[#allocation11 + $0x90] ss:$12 sps:$4 sm:$0xff]  }
 0x319   :  { %v2646_v1 = vsel %vm2545_vm2, %v2541_v57, 0  ;;  %v11374_v57 = vld [vmem:[#allocation11 + $0x16c] ss:$12 sps:$4 sm:$0xff]  }
 0x31a   :  { %10738 = vmatmul.mubr.bf16.vlgmr.msra.gmra.mrb[16].mxu1 %v2342_v5  ;;  %v11341_v5 = vld [vmem:[#allocation11 + $0x8] ss:$12 sps:$4 sm:$0xff]  }
 0x31b   :  { %10743 = vmatprep.mubr.msk.bf16.mxu1 %vm12769_vm1, %v12768_v45  ;;  %10742 = vmatpush3.bf16.msra.mxu1 %v2553_v26  ;;  %v11336_v26 = vld [vmem:[#allocation11 + $0xac] ss:$12 sps:$4 sm:$0xff]  }
 0x31c   :  { %10747 = vmatprep.subr.bf16.mxu1 %v12768_v45 }
 0x3d9   :  { %v2423_v27 = vpop.f32.mrb[12].mxu1 }
 0x3da   :  { %v2509_v28 = vmul.f32 0.057735026, %v2423_v27  ;;  %v10733_v29 = vpop.f32.mrb[13].mxu1  ;;  %v11334_v27 = vld [vmem:[#allocation11 + $0xa8] ss:$12 sps:$4 sm:$0xff]  }
 0x3db   :  { %v2426_v30 = vpop.f32.mrb[14].mxu1  ;;  %v11337_v29 = vld [vmem:[#allocation11 + $0xc0] ss:$12 sps:$4 sm:$0xff]  }
 0x3dc   :  { %v10734_v34 = vpop.f32.mrb[15].mxu1  ;;  %v2512_v35 = vsel %vm2511_vm3, %v2509_v28, -inf  ;;  %v11344_v30 = vld [vmem:[#allocation11 + $0xdc] ss:$12 sps:$4 sm:$0xff]  }
 0x3dd   :  { %2513 = vmax.xlane.f32.xlu0 %v2512_v35  ;;  %v11342_v34 = vld [vmem:[#allocation11 + $0xd8] ss:$12 sps:$4 sm:$0xff]   ;;  %v11349_v35 = vld [vmem:[#allocation11 + $0xf4] ss:$12 sps:$4 sm:$0xff]  }
 0x3ed   :  { %v2503_v36 = vpop.f32.mrb[16].mxu1 }
 0x3ee   :  { %v2510_v37 = vmul.f32 0.057735026, %v2503_v36  ;;  %v10739_v38 = vpop.f32.mrb[17].mxu1  ;;  %v11350_v36 = vld [vmem:[#allocation11 + $0xf8] ss:$12 sps:$4 sm:$0xff]  }
 0x3ef   :  { %v2506_v39 = vpop.f32.mrb[18].mxu1  ;;  %v11351_v38 = vld [vmem:[#allocation11 + $0x38] ss:$12 sps:$4 sm:$0xff]  }
 0x3f0   :  { %v10740_v40 = vpop.f32.mrb[19].mxu1  ;;  %v2515_v41 = vsel %vm2511_vm3, %v2510_v37, -inf  ;;  %v11352_v39 = vld [vmem:[#allocation11 + $0x108] ss:$12 sps:$4 sm:$0xff]  }
 0x3f1   :  { %2516 = vmax.xlane.f32.xlu0 %v2515_v41  ;;  %v11354_v40 = vld [vmem:[#allocation11 + $0x10c] ss:$12 sps:$4 sm:$0xff]   ;;  %v11355_v41 = vld [vmem:[#allocation11 + $0x110] ss:$12 sps:$4 sm:$0xff]  }
 0x46a   :  { %v2514_v42 = vpop.xlane.xlu0 %2513 }
 0x46b   :  { %v2518_v43 = vsub.f32 %v2509_v28, %v2514_v42  ;;  %v11339_v28 = vld [vmem:[#allocation11 + $0xc4] ss:$12 sps:$4 sm:$0xff]  }
 0x46c   :  { %v11356_v42 = vld [vmem:[#allocation11 + $0x50] ss:$12 sps:$4 sm:$0xff]  }
 0x46d   :  { %v2520_v18 = vmul.f32 1.442695, %v2518_v43  ;;  %v11359_v43 = vld [vmem:[#allocation11 + $0x124] ss:$12 sps:$4 sm:$0xff]  }
 0x46f   :  { %12265 = vpow2.f32 %v2520_v18  ;;  %v11360_v18 = vld [vmem:[#allocation11 + $0x128] ss:$12 sps:$4 sm:$0xff]  }
 0x479   :  { %v12266_v44 = vpop.eup %12265 }
 0x47a   :  { %v2524_v46 = vsel %vm2511_vm3, %v12266_v44, 0.0 }
 0x47b   :  { %2525 = vadd.xlane.f32.xlu1 %v2524_v46  ;;  %v11361_v46 = vld [vmem:[#allocation11 + $0x68] ss:$12 sps:$4 sm:$0xff]  }
 0x47e   :  { %v2517_v47 = vpop.xlane.xlu0 %2516 }
 0x47f   :  { %v2519_v48 = vsub.f32 %v2510_v37, %v2517_v47  ;;  %v11347_v37 = vld [vmem:[#allocation11 + $0xf0] ss:$12 sps:$4 sm:$0xff]  }
 0x480   :  { %v11364_v47 = vld [vmem:[#allocation11 + $0x13c] ss:$12 sps:$4 sm:$0xff]  }
 0x481   :  { %v2522_v49 = vmul.f32 1.442695, %v2519_v48  ;;  %v11365_v48 = vld [vmem:[#allocation11 + $0x140] ss:$12 sps:$4 sm:$0xff]  }
 0x483   :  { %12267 = vpow2.f32 %v2522_v49  ;;  %v11362_v49 = vld [vmem:[#allocation11 + $0x138] ss:$12 sps:$4 sm:$0xff]  }
 0x48d   :  { %v12268_v50 = vpop.eup %12267 }
 0x48e   :  { %v2527_v52 = vsel %vm2511_vm3, %v12268_v50, 0.0 }
 0x48f   :  { %2528 = vadd.xlane.f32.xlu1 %v2527_v52  ;;  %v11369_v52 = vld [vmem:[#allocation11 + $0x154] ss:$12 sps:$4 sm:$0xff]  }
 0x508   :  { %v2526_v53 = vpop.xlane.xlu1 %2525 }
 0x509   :  { %12269 = vrcp.f32 %v2526_v53  ;;  %v11370_v53 = vld [vmem:[#allocation11 + $0x158] ss:$12 sps:$4 sm:$0xff]  }
 0x513   :  { %v12270_v55 = vpop.eup %12269 }
 0x514   :  { %v2532_v58 = vmul.f32 %v12270_v55, %v12266_v44  ;;  %v11357_v44 = vld [vmem:[#allocation11 + $0x120] ss:$12 sps:$4 sm:$0xff]   ;;  %v11367_v55 = vld [vmem:[#allocation11 + $0x150] ss:$12 sps:$4 sm:$0xff]  }
 0x516   :  { %v2534_v59 = vpack.c.bf16 %v2532_v58, %v2532_v58  ;;  %v11375_v58 = vld [vmem:[#allocation11 + $0x170] ss:$12 sps:$4 sm:$0xff]  }
 0x518   :  { %9788 = vmatmul.mubr.msk.bf16.vlgmr.msra.gmra.mrb[12].mxu0 %vm2511_vm3, %v2534_v59  ;;  %10744 = vmatmul.mubr.msk.bf16.vlgmr.msra.gmra.mrb[20].mxu1 %vm2511_vm3, %v2534_v59  ;;  %v11372_v59 = vld [vmem:[#allocation11 + $0x168] ss:$12 sps:$4 sm:$0xff]  }
 0x519   :  { %2649 = vmatpush1.bf16.msra.mxu0 %v2640_v62  ;;  %10748 = vmatpush3.bf16.msra.mxu1 %v2646_v1 }
 0x51a   :  { %2680 = vmatprep.mubr.bf16.mxu0 %v12767_v24  ;;  %10749 = vmatprep.mubr.msk.bf16.mxu1 %vm12769_vm1, %v12768_v45 }
 0x51b   :  { %3229 = vmatprep.subr.bf16.mxu0 %v11315_v60  ;;  %10520 = vmatprep.subr.bf16.mxu1 %v11340_v61  ;;  %v11376_v60 = vld [vmem:[#allocation11 + $0xb0] ss:$12 sps:$4 sm:$0xff]  }
 0x51c   :  { %v2529_v51 = vpop.xlane.xlu1 %2528  ;;  %v11379_v61 = vld [vmem:[#allocation11 + $0x184] ss:$12 sps:$4 sm:$0xff]  }
 0x51d   :  { %12271 = vrcp.f32 %v2529_v51 }
 0x527   :  { %v12272_v2 = vpop.eup %12271 }
 0x528   :  { %v2533_v3 = vmul.f32 %v12272_v2, %v12268_v50  ;;  %v11366_v50 = vld [vmem:[#allocation11 + $0x80] ss:$12 sps:$4 sm:$0xff]  }
 0x52a   :  { %v2535_v6 = vpack.c.bf16 %v2533_v3, %v2533_v3 }
 0x52c   :  { %9791 = vmatmul.mubr.msk.bf16.vlgmr.msra.gmra.mrb[16].mxu0 %vm2511_vm3, %v2535_v6  ;;  %10750 = vmatmul.mubr.msk.bf16.vlgmr.msra.gmra.mrb[24].mxu1 %vm2511_vm3, %v2535_v6 }
 0x52d   :  { %3230 = vmatpush1.bf16.msra.mxu0 %v11313_v4  ;;  %10521 = vmatpush3.bf16.msra.mxu1 %v11341_v5 }
 0x52e   :  { %3231 = vmatprep.subr.bf16.mxu0 %v11318_v7  ;;  %10522 = vmatprep.subr.bf16.mxu1 %v11345_v8 }
 0x531   :  { %3232 = vmatpush1.bf16.msra.mxu0 %v11316_v15  ;;  %10523 = vmatpush3.bf16.msra.mxu1 %v11346_v54 }
 0x532   :  { %3233 = vmatprep.subr.bf16.mxu0 %v11321_v9  ;;  %10524 = vmatprep.subr.bf16.mxu1 %v11350_v36  ;;  %v11392_v36 = vld [vmem:[#allocation11 + $0x1d0] ss:$12 sps:$4 sm:$0xff]  }
 0x535   :  { %3234 = vmatpush1.bf16.msra.mxu0 %v11319_v10  ;;  %10525 = vmatpush3.bf16.msra.mxu1 %v11351_v38  ;;  %v11393_v38 = vld [vmem:[#allocation11 + $0x1e0] ss:$12 sps:$4 sm:$0xff]  }
 0x536   :  { %3235 = vmatprep.subr.bf16.mxu0 %v11324_v14  ;;  %10526 = vmatprep.subr.bf16.mxu1 %v11355_v41  ;;  %v11397_v41 = vld [vmem:[#allocation11 + $0x1f8] ss:$12 sps:$4 sm:$0xff]  }
 0x539   :  { %3236 = vmatpush1.bf16.msra.mxu0 %v11322_v16  ;;  %10527 = vmatpush3.bf16.msra.mxu1 %v11356_v42  ;;  %v11400_v42 = vld [vmem:[#allocation11 + $0x200] ss:$12 sps:$4 sm:$0xff]  }
 0x53a   :  { %3237 = vmatprep.subr.bf16.mxu0 %v11327_v19  ;;  %10528 = vmatprep.subr.bf16.mxu1 %v11360_v18  ;;  %v11401_v18 = vld [vmem:[#allocation11 + $0x210] ss:$12 sps:$4 sm:$0xff]  }
 0x53d   :  { %3238 = vmatpush1.bf16.msra.mxu0 %v11325_v20  ;;  %10529 = vmatpush3.bf16.msra.mxu1 %v11361_v46  ;;  %v11377_v20 = vld [vmem:[#allocation11 + $0x180] ss:$12 sps:$4 sm:$0xff]  }
 0x53e   :  { %3239 = vmatprep.subr.bf16.mxu0 %v11330_v22  ;;  %10530 = vmatprep.subr.bf16.mxu1 %v11365_v48  ;;  %v11380_v22 = vld [vmem:[#allocation11 + $0x188] ss:$12 sps:$4 sm:$0xff]   ;;  %v11407_v46 = vld [vmem:[#allocation11 + $0x22c] ss:$12 sps:$4 sm:$0xff]   ;;  %v11408_v48 = vld [vmem:[#allocation11 + $0x230] ss:$12 sps:$4 sm:$0xff]  }
 0x541   :  { %3240 = vmatpush1.bf16.msra.mxu0 %v11328_v23  ;;  %10531 = vmatpush3.bf16.msra.mxu1 %v11366_v50  ;;  %v11411_v50 = vld [vmem:[#allocation17 + $0x4] ss:$8 sps:$4 sm:$0xff]  }
 0x542   :  { %3241 = vmatprep.subr.bf16.mxu0 %v11333_v11  ;;  %10532 = vmatprep.subr.bf16.mxu1 %v11370_v53  ;;  %v11412_v53 = vld [vmem:[#allocation17 + $0x10] ss:$8 sps:$4 sm:$0xff]  }
 0x545   :  { %3242 = vmatpush1.bf16.msra.mxu0 %v11331_v25  ;;  %10533 = vmatpush3.bf16.msra.mxu1 %v11371_v56  ;;  %v11383_v25 = vld [vmem:[#allocation11 + $0x19c] ss:$12 sps:$4 sm:$0xff]  }
 0x546   :  { %3243 = vmatprep.subr.bf16.mxu0 %v11336_v26  ;;  %10534 = vmatprep.subr.bf16.mxu1 %v11375_v58  ;;  %v11381_v26 = vld [vmem:[#allocation11 + $0x198] ss:$12 sps:$4 sm:$0xff]  }
 0x547   :  { %v11415_v56 = vld [vmem:[#allocation17 + $0x20] ss:$8 sps:$4 sm:$0xff]   ;;  %v11418_v58 = vld [vmem:[#allocation17 + $0x30] ss:$8 sps:$4 sm:$0xff]  }
 0x549   :  { %3244 = vmatpush1.bf16.msra.mxu0 %v11334_v27  ;;  %10535 = vmatpush3.bf16.msra.mxu1 %v11376_v60  ;;  %v11384_v27 = vld [vmem:[#allocation11 + $0x1a0] ss:$12 sps:$4 sm:$0xff]   ;;  %v11421_v60 = vld [vmem:[#allocation17 + $0x40] ss:$8 sps:$4 sm:$0xff]  }
 0x54a   :  { %3245 = vmatprep.subr.bf16.mxu0 %v11339_v28  ;;  %10753 = vmatprep.subr.bf16.mxu1 %v12768_v45  ;;  %v11387_v28 = vld [vmem:[#allocation11 + $0x1b4] ss:$12 sps:$4 sm:$0xff]  }
 0x54d   :  { %3246 = vmatpush1.bf16.msra.mxu0 %v11337_v29  ;;  %v11385_v29 = vld [vmem:[#allocation11 + $0x1b0] ss:$12 sps:$4 sm:$0xff]  }
 0x54e   :  { %3247 = vmatprep.subr.bf16.mxu0 %v11344_v30  ;;  %v11388_v30 = vld [vmem:[#allocation11 + $0x1b8] ss:$12 sps:$4 sm:$0xff]  }
 0x551   :  { %3248 = vmatpush1.bf16.msra.mxu0 %v11342_v34  ;;  %v11391_v34 = vld [vmem:[#allocation11 + $0x1cc] ss:$12 sps:$4 sm:$0xff]  }
 0x552   :  { %3249 = vmatprep.subr.bf16.mxu0 %v11349_v35  ;;  %v11389_v35 = vld [vmem:[#allocation11 + $0x1c8] ss:$12 sps:$4 sm:$0xff]  }
 0x555   :  { %3250 = vmatpush1.bf16.msra.mxu0 %v11347_v37  ;;  %v11395_v37 = vld [vmem:[#allocation11 + $0x1e4] ss:$12 sps:$4 sm:$0xff]  }
 0x556   :  { %3251 = vmatprep.subr.bf16.mxu0 %v11354_v40  ;;  %v11399_v40 = vld [vmem:[#allocation11 + $0x1fc] ss:$12 sps:$4 sm:$0xff]  }
 0x559   :  { %3252 = vmatpush1.bf16.msra.mxu0 %v11352_v39  ;;  %v11396_v39 = vld [vmem:[#allocation11 + $0x1e8] ss:$12 sps:$4 sm:$0xff]  }
 0x55a   :  { %3253 = vmatprep.subr.bf16.mxu0 %v11359_v43  ;;  %v11403_v43 = vld [vmem:[#allocation11 + $0x214] ss:$12 sps:$4 sm:$0xff]  }
 0x55d   :  { %3254 = vmatpush1.bf16.msra.mxu0 %v11357_v44  ;;  %v11404_v44 = vld [vmem:[#allocation11 + $0x218] ss:$12 sps:$4 sm:$0xff]  }
 0x55e   :  { %3255 = vmatprep.subr.bf16.mxu0 %v11364_v47  ;;  %v11405_v47 = vld [vmem:[#allocation11 + $0x228] ss:$12 sps:$4 sm:$0xff]  }
 0x561   :  { %3256 = vmatpush1.bf16.msra.mxu0 %v11362_v49  ;;  %v11409_v49 = vld [vmem:[#allocation17] ss:$8 sps:$4 sm:$0xff]  }
 0x562   :  { %3257 = vmatprep.subr.bf16.mxu0 %v11369_v52  ;;  %v11414_v52 = vld [vmem:[#allocation17 + $0x14] ss:$8 sps:$4 sm:$0xff]  }
 0x565   :  { %3258 = vmatpush1.bf16.msra.mxu0 %v11367_v55  ;;  %v11417_v55 = vld [vmem:[#allocation17 + $0x24] ss:$8 sps:$4 sm:$0xff]  }
 0x566   :  { %3259 = vmatprep.subr.bf16.mxu0 %v11374_v57  ;;  %v11420_v57 = vld [vmem:[#allocation17 + $0x34] ss:$8 sps:$4 sm:$0xff]  }
 0x569   :  { %3260 = vmatpush1.bf16.msra.mxu0 %v11372_v59  ;;  %v11423_v59 = vld [vmem:[#allocation17 + $0x44] ss:$8 sps:$4 sm:$0xff]  }
 0x56a   :  { %3272 = vmatprep.subr.bf16.mxu0 %v11379_v61  ;;  %v11426_v61 = vld [vmem:[#allocation17 + $0x54] ss:$8 sps:$4 sm:$0xff]  }
 0x5eb   :  { %v2589_v62 = vpop.f32.mrb[12].mxu0  ;;  %v2630_v1 = vpop.f32.mrb[20].mxu1 }
 0x5ec   :  { %v2591_v51 = vpop.f32.mrb[13].mxu0  ;;  %v10745_v2 = vpop.f32.mrb[21].mxu1 }
 0x5ed   :  { %v2593_v3 = vpop.f32.mrb[14].mxu0  ;;  %v2633_v4 = vpop.f32.mrb[22].mxu1  ;;  %v11432_v2 = vld [vmem:[#allocation17 + $0x74] ss:$8 sps:$4 sm:$0xff]  }
 0x5ee   :  { %v2594_v5 = vpop.f32.mrb[15].mxu0  ;;  %v10746_v6 = vpop.f32.mrb[23].mxu1  ;;  %v11430_v3 = vld [vmem:[#allocation17 + $0x70] ss:$8 sps:$4 sm:$0xff]   ;;  %v11435_v4 = vld [vmem:[#allocation17 + $0x84] ss:$8 sps:$4 sm:$0xff]  }
 0x5ef   :  { %v11433_v5 = vld [vmem:[#allocation17 + $0x80] ss:$8 sps:$4 sm:$0xff]  }
 0x5ff   :  { %v2682_v7 = vpop.f32.mrb[16].mxu0  ;;  %v2723_v8 = vpop.f32.mrb[24].mxu1 }
 0x600   :  { %v2729_v15 = vpack.c.bf16 %v2682_v7, %v2589_v62  ;;  %v13337_v54 = vpack.c.bf16 %v2723_v8, %v2630_v1  ;;  %v2684_v9 = vpop.f32.mrb[17].mxu0  ;;  %v10751_v10 = vpop.f32.mrb[25].mxu1  ;;  %v11424_v62 = vld [vmem:[#allocation17 + $0x50] ss:$8 sps:$4 sm:$0xff]   ;;  %v11429_v1 = vld [vmem:[#allocation17 + $0x64] ss:$8 sps:$4 sm:$0xff]  }
 0x601   :  { %v2730_v14 = vpack.c.bf16 %v2684_v9, %v2591_v51  ;;  %v2686_v16 = vpop.f32.mrb[18].mxu0  ;;  %v2726_v19 = vpop.f32.mrb[26].mxu1  ;;  %v11427_v51 = vld [vmem:[#allocation17 + $0x60] ss:$8 sps:$4 sm:$0xff]   ;;  %v2828_v10 = vld [vmem:[#allocation13] sm:$0x7] }
 0x602   :  { %v2687_v23 = vpop.f32.mrb[19].mxu0  ;;  %v10752_v11 = vpop.f32.mrb[27].mxu1  ;;  %v2833_v16 = vrot.slane %v2828_v10, %v13285_v17  ;;  %v2837_v19 = vrot.slane %v2828_v10, %v13268_v0 }
 0x603   :  { %3261 = vmatprep.mubr.bf16.mxu0 %v2730_v14  ;;  %3347 = vmatprep.mubr.bf16.mxu1 %v2730_v14  ;;  %v2841_v14 = vrot.slane %v2828_v10, %v13292_v31  ;;  %v11445_v10 = vld [vmem:[#allocation17 + $0xc0] ss:$8 sps:$4 sm:$0xff]  }
 0x604   :  { %3262 = vmatmul.mubr.bf16.vlgmr.msra.gmra.mrb[20].mxu0 %v2729_v15  ;;  %3348 = vmatmul.mubr.bf16.vlgmr.msra.gmra.mrb[28].mxu1 %v2729_v15 }
 0x605   :  { %3273 = vmatpush1.bf16.msra.mxu0 %v11377_v20  ;;  %10754 = vmatpush3.bf16.msra.mxu1 %v11380_v22 }
 0x606   :  { %3274 = vmatprep.subr.bf16.mxu0 %v11383_v25  ;;  %10755 = vmatprep.subr.bf16.mxu1 %v12768_v45 }
 0x607   :  { %3304 = vmatprep.mubr.bf16.mxu0 %v12767_v24  ;;  %10769 = vmatprep.mubr.msk.bf16.mxu1 %vm12769_vm1, %v12768_v45 }
 0x609   :  { %3275 = vmatpush1.bf16.msra.mxu0 %v11381_v26  ;;  %10756 = vmatpush3.bf16.msra.mxu1 %v11384_v27 }
 0x60a   :  { %3276 = vmatprep.subr.bf16.mxu0 %v11387_v28  ;;  %10757 = vmatprep.subr.bf16.mxu1 %v12768_v45 }
 0x60d   :  { %3277 = vmatpush1.bf16.msra.mxu0 %v11385_v29  ;;  %10758 = vmatpush3.bf16.msra.mxu1 %v11388_v30 }
 0x60e   :  { %3278 = vmatprep.subr.bf16.mxu0 %v11391_v34  ;;  %10759 = vmatprep.subr.bf16.mxu1 %v12768_v45 }
 0x611   :  { %3279 = vmatpush1.bf16.msra.mxu0 %v11389_v35  ;;  %10760 = vmatpush3.bf16.msra.mxu1 %v11392_v36  ;;  %v12297_v35 = vld [vmem:[#allocation2] sm:$0xff] }
 0x612   :  { %3280 = vmatprep.subr.bf16.mxu0 %v11395_v37  ;;  %10761 = vmatprep.subr.bf16.mxu1 %v12768_v45 }
 0x615   :  { %3281 = vmatpush1.bf16.msra.mxu0 %v11393_v38  ;;  %10762 = vmatpush3.bf16.msra.mxu1 %v11396_v39 }
 0x616   :  { %3282 = vmatprep.subr.bf16.mxu0 %v11399_v40  ;;  %10763 = vmatprep.subr.bf16.mxu1 %v12768_v45 }
 0x619   :  { %3283 = vmatpush1.bf16.msra.mxu0 %v11397_v41  ;;  %10764 = vmatpush3.bf16.msra.mxu1 %v11400_v42  ;;  %v12298_v41 = vld [vmem:[#allocation2 + $0x8] sm:$0xff] }
 0x61a   :  { %3284 = vmatprep.subr.bf16.mxu0 %v11403_v43  ;;  %10765 = vmatprep.subr.bf16.mxu1 %v12768_v45 }
 0x61d   :  { %3285 = vmatpush1.bf16.msra.mxu0 %v11401_v18  ;;  %10766 = vmatpush3.bf16.msra.mxu1 %v11404_v44  ;;  %v12299_v18 = vld [vmem:[#allocation2 + $0x18] sm:$0xff] }
 0x61e   :  { %3286 = vmatprep.subr.bf16.mxu0 %v11407_v46  ;;  %10767 = vmatprep.subr.bf16.mxu1 %v12768_v45 }
 0x621   :  { %3287 = vmatpush1.bf16.msra.mxu0 %v11405_v47  ;;  %10768 = vmatpush3.bf16.msra.mxu1 %v11408_v48  ;;  %v12300_v47 = vld [vmem:[#allocation2 + $0x10] sm:$0xff] }
 0x622   :  { %3798 = vmatprep.subr.bf16.mxu1 %v11411_v50 }
 0x624   :  { %3305 = vmatmul.mubr.bf16.vlgmr.msra.gmra.mrb[20].mxu0 %v13337_v54  ;;  %10770 = vmatmul.mubr.bf16.vlgmr.msra.gmra.mrb[32].mxu1 %v13337_v54 }
 0x625   :  { %3799 = vmatpush1.bf16.msra.mxu1 %v11409_v49  ;;  %v12301_v49 = vld [vmem:[#allocation2 + $0x20] sm:$0xff] }
 0x626   :  { %3800 = vmatprep.subr.bf16.mxu1 %v11414_v52 }
 0x629   :  { %3801 = vmatpush1.bf16.msra.mxu1 %v11412_v53 }
 0x62a   :  { %3802 = vmatprep.subr.bf16.mxu1 %v11417_v55  ;;  %v12302_v55 = vld [vmem:[#allocation2 + $0x28] sm:$0xff] }
 0x62d   :  { %3803 = vmatpush1.bf16.msra.mxu1 %v11415_v56 }
 0x62e   :  { %3804 = vmatprep.subr.bf16.mxu1 %v11420_v57 }
 0x631   :  { %3805 = vmatpush1.bf16.msra.mxu1 %v11418_v58 }
 0x632   :  { %3806 = vmatprep.subr.bf16.mxu1 %v11423_v59 }
 0x635   :  { %3807 = vmatpush1.bf16.msra.mxu1 %v11421_v60 }
 0x636   :  { %3808 = vmatprep.subr.bf16.mxu1 %v11426_v61 }
 0x639   :  { %3809 = vmatpush1.bf16.msra.mxu1 %v11424_v62 }
 0x63a   :  { %3810 = vmatprep.subr.bf16.mxu1 %v11429_v1 }
 0x63d   :  { %3811 = vmatpush1.bf16.msra.mxu1 %v11427_v51 }
 0x63e   :  { %3812 = vmatprep.subr.bf16.mxu1 %v11432_v2 }
 0x641   :  { %3813 = vmatpush1.bf16.msra.mxu1 %v11430_v3 }
 0x642   :  { %3814 = vmatprep.subr.bf16.mxu1 %v11435_v4 }
 0x645   :  { %3815 = vmatpush1.bf16.msra.mxu1 %v11433_v5  ;;  %v11438_v5 = vld [vmem:[#allocation17 + $0x94] ss:$8 sps:$4 sm:$0xff]  }
 0x646   :  { %3816 = vmatprep.subr.bf16.mxu1 %v11438_v5 }
 0x6d7   :  { %v10536_v6 = vpop.f32.mrb[28].mxu1 }
 0x6d8   :  { %v10537_v7 = vpop.f32.mrb[29].mxu1 }
 0x6d9   :  { %v10538_v8 = vadd.f32 %v10537_v7, %v10536_v6  ;;  %v10539_v15 = vpop.f32.mrb[30].mxu1  ;;  %v11436_v6 = vld [vmem:[#allocation17 + $0x90] ss:$8 sps:$4 sm:$0xff]   ;;  %v11441_v7 = vld [vmem:[#allocation17 + $0xa4] ss:$8 sps:$4 sm:$0xff]  }
 0x6da   :  { %v10540_v54 = vpop.f32.mrb[31].mxu1  ;;  %3817 = vmatpush1.bf16.msra.mxu1 %v11436_v6 }
 0x6db   :  { %v10541_v9 = vadd.f32 %v10540_v54, %v10539_v15  ;;  %v3350_v20 = vadd.f32 %v10538_v8, %v2841_v14  ;;  %v11439_v8 = vld [vmem:[#allocation17 + $0xa0] ss:$8 sps:$4 sm:$0xff]   ;;  %3818 = vmatprep.subr.bf16.mxu1 %v11441_v7  ;;  %v11444_v15 = vld [vmem:[#allocation17 + $0xb4] ss:$8 sps:$4 sm:$0xff]   ;;  %v11442_v54 = vld [vmem:[#allocation17 + $0xb0] ss:$8 sps:$4 sm:$0xff]  }
 0x6dd   :  { %v3353_v28 = vadd.f32 %v10541_v9, %v2841_v14  ;;  %v11447_v9 = vld [vmem:[#allocation17 + $0xc4] ss:$8 sps:$4 sm:$0xff]   ;;  %v11450_v14 = vld [vmem:[#allocation17 + $0xd4] ss:$8 sps:$4 sm:$0xff]  }
 0x6de   :  { %3819 = vmatpush1.bf16.msra.mxu1 %v11439_v8 }
 0x6df   :  { %3820 = vmatprep.subr.bf16.mxu1 %v11444_v15 }
 0x6e2   :  { %3821 = vmatpush1.bf16.msra.mxu1 %v11442_v54 }
 0x6e3   :  { %3822 = vmatprep.subr.bf16.mxu1 %v11447_v9 }
 0x6e6   :  { %3823 = vmatpush1.bf16.msra.mxu1 %v11445_v10 }
 0x6e7   :  { %3824 = vmatprep.subr.bf16.mxu1 %v11450_v14 }
 0x6f7   :  { %v3306_v22 = vpop.f32.mrb[20].mxu0  ;;  %v3390_v23 = vpop.f32.mrb[32].mxu1 }
 0x6f8   :  { %v10853_v11 = vadd.f32 %v3306_v22, %v2833_v16  ;;  %v3391_v25 = vadd.f32 %v3390_v23, %v3350_v20  ;;  %v3308_v26 = vpop.f32.mrb[21].mxu0  ;;  %v10771_v27 = vpop.f32.mrb[33].mxu1  ;;  %v11451_v20 = vld [vmem:[#allocation17 + $0xe0] ss:$8 sps:$4 sm:$0xff]   ;;  %v11456_v22 = vld [vmem:[#allocation17 + $0xf4] ss:$8 sps:$4 sm:$0xff]  }
 0x6f9   :  { %v10854_v29 = vadd.f32 %v3308_v26, %v2837_v19  ;;  %v3310_v30 = vpop.f32.mrb[22].mxu0  ;;  %v3393_v34 = vpop.f32.mrb[34].mxu1  ;;  %v11454_v23 = vld [vmem:[#allocation17 + $0xf0] ss:$8 sps:$4 sm:$0xff]   ;;  %v11483_v26 = vld [vmem:[#allocation20 + $0x4] ss:$12 sps:$4 sm:$0xff]  }
 0x6fa   :  { %v13354_v36 = vadd.f32 %v12297_v35, %v10853_v11  ;;  %v10855_v37 = vadd.f32 %v3310_v30, %v2833_v16  ;;  %v3394_v38 = vadd.f32 %v3393_v34, %v3353_v28  ;;  %v3312_v39 = vpop.f32.mrb[23].mxu0  ;;  %v10772_v40 = vpop.f32.mrb[35].mxu1  ;;  %v13362_v48 = vadd.f32 %v12300_v47, %v3391_v25  ;;  %v11448_v16 = vld [vmem:[#allocation17 + $0xd0] ss:$8 sps:$4 sm:$0xff]   ;;  %v11459_v11 = vld [vmem:[#allocation17 + $0x104] ss:$8 sps:$4 sm:$0xff]   ;;  %4227 = vmatprep.subr.bf16.mxu0 %v11483_v26 }
 0x6fb   :  { %v13356_v42 = vadd.f32 %v12298_v41, %v10854_v29  ;;  %v10856_v43 = vadd.f32 %v3312_v39, %v2837_v19  ;;  %v11453_v19 = vld [vmem:[#allocation17 + $0xe4] ss:$8 sps:$4 sm:$0xff]   ;;  %3825 = vmatpush1.bf16.msra.mxu1 %v11448_v16  ;;  %v11484_v28 = vld [vmem:[#allocation20 + $0x18] ss:$12 sps:$4 sm:$0xff]   ;;  %v11487_v30 = vld [vmem:[#allocation20 + $0x30] ss:$12 sps:$4 sm:$0xff]  }
 0x6fc   :  { %v13358_v44 = vadd.f32 %v12299_v18, %v10855_v37  ;;  %v3415_v46 = vmul.f32 %v13354_v36, %v13354_v36  ;;  %v13370_v56 = vadd.f32 %v12302_v55, %v3394_v38  ;;  %v3417_v1 = vmul.f32 %v13362_v48, %v13362_v48  ;;  %3826 = vmatprep.subr.bf16.mxu1 %v11453_v19  ;;  %v11481_v25 = vld [vmem:[#allocation20] ss:$12 sps:$4 sm:$0xff]   ;;  %v11486_v27 = vld [vmem:[#allocation20 + $0x1c] ss:$12 sps:$4 sm:$0xff]   ;;  %v11495_v37 = vld [vmem:[#allocation20 + $0x64] ss:$12 sps:$4 sm:$0xff]  }
 0x6fd   :  { %v13364_v50 = vadd.f32 %v12301_v49, %v10856_v43  ;;  %v3405_v52 = vadd.f32 %v13356_v42, %v13354_v36  ;;  %v3416_v53 = vmul.f32 %v13356_v42, %v13356_v42  ;;  %4228 = vmatpush1.bf16.msra.mxu0 %v11481_v25  ;;  %v11489_v29 = vld [vmem:[#allocation20 + $0x34] ss:$12 sps:$4 sm:$0xff]   ;;  %v11492_v34 = vld [vmem:[#allocation20 + $0x4c] ss:$12 sps:$4 sm:$0xff]   ;;  %v11498_v39 = vld [vmem:[#allocation20 + $0x7c] ss:$12 sps:$4 sm:$0xff]  }
 0x6fe   :  { %v3418_v57 = vmul.f32 %v13358_v44, %v13358_v44  ;;  %v3420_v3 = vmul.f32 %v13370_v56, %v13370_v56  ;;  %4229 = vmatprep.subr.bf16.mxu0 %v11486_v27  ;;  %v11490_v35 = vld [vmem:[#allocation20 + $0x48] ss:$12 sps:$4 sm:$0xff]   ;;  %v11493_v38 = vld [vmem:[#allocation20 + $0x60] ss:$12 sps:$4 sm:$0xff]   ;;  %v11496_v40 = vld [vmem:[#allocation20 + $0x78] ss:$12 sps:$4 sm:$0xff]  }
 0x6ff   :  { %v3406_v58 = vadd.f32 %v3405_v52, %v13362_v48  ;;  %v3409_v59 = vadd.f32 %v13364_v50, %v13358_v44  ;;  %v3421_v60 = vadd.f32 %v3416_v53, %v3415_v46  ;;  %v3419_v61 = vmul.f32 %v13364_v50, %v13364_v50  ;;  %3827 = vmatpush1.bf16.msra.mxu1 %v11451_v20  ;;  %v11501_v41 = vld [vmem:[#allocation20 + $0x94] ss:$12 sps:$4 sm:$0xff]   ;;  %v11499_v43 = vld [vmem:[#allocation20 + $0x90] ss:$12 sps:$4 sm:$0xff]   ;;  %v11504_v18 = vld [vmem:[#allocation20 + $0xac] ss:$12 sps:$4 sm:$0xff]  }
 0x700   :  { %3828 = vmatprep.subr.bf16.mxu1 %v11456_v22  ;;  %v11502_v46 = vld [vmem:[#allocation20 + $0xa8] ss:$12 sps:$4 sm:$0xff]   ;;  %v11507_v47 = vld [vmem:[#allocation20 + $0xc4] ss:$12 sps:$4 sm:$0xff]   ;;  %v11505_v49 = vld [vmem:[#allocation20 + $0xc0] ss:$12 sps:$4 sm:$0xff]  }
 0x701   :  { %3407 = vadd.xlane.f32.xlu0 %v3406_v58  ;;  %v3410_v62 = vadd.f32 %v3409_v59, %v13370_v56  ;;  %v3425_v51 = vadd.f32 %v3419_v61, %v3418_v57  ;;  %v3422_v2 = vadd.f32 %v3421_v60, %v3417_v1  ;;  %4230 = vmatpush1.bf16.msra.mxu0 %v11484_v28  ;;  %v11510_v52 = vld [vmem:[#allocation20 + $0xdc] ss:$12 sps:$4 sm:$0xff]   ;;  %v11508_v53 = vld [vmem:[#allocation20 + $0xd8] ss:$12 sps:$4 sm:$0xff]   ;;  %v11513_v55 = vld [vmem:[#allocation20 + $0xf4] ss:$12 sps:$4 sm:$0xff]  }
 0x702   :  { %4231 = vmatprep.subr.bf16.mxu0 %v11489_v29  ;;  %v11511_v57 = vld [vmem:[#allocation20 + $0xf0] ss:$12 sps:$4 sm:$0xff]   ;;  %v11516_v58 = vld [vmem:[#allocation20 + $0x10c] ss:$12 sps:$4 sm:$0xff]   ;;  %v11514_v59 = vld [vmem:[#allocation20 + $0x108] ss:$12 sps:$4 sm:$0xff]  }
 0x703   :  { %3411 = vadd.xlane.f32.xlu1 %v3410_v62  ;;  %v3426_v4 = vadd.f32 %v3425_v51, %v3420_v3  ;;  %3829 = vmatpush1.bf16.msra.mxu1 %v11454_v23  ;;  %v11519_v60 = vld [vmem:[#allocation20 + $0x124] ss:$12 sps:$4 sm:$0xff]   ;;  %v11517_v61 = vld [vmem:[#allocation20 + $0x120] ss:$12 sps:$4 sm:$0xff]   ;;  %v11522_v62 = vld [vmem:[#allocation20 + $0x13c] ss:$12 sps:$4 sm:$0xff]  }
 0x704   :  { %3841 = vmatprep.subr.bf16.mxu1 %v11459_v11  ;;  %v11520_v1 = vld [vmem:[#allocation20 + $0x138] ss:$12 sps:$4 sm:$0xff]   ;;  %v3403_v19 = vld [vmem:[#allocation14] sm:$0x7] }
 0x705   :  { %3423 = vadd.xlane.f32.xlu0 %v3422_v2  ;;  %4232 = vmatpush1.bf16.msra.mxu0 %v11487_v30  ;;  %v3404_v23 = vld [vmem:[#allocation16] sm:$0x7]  ;;  %v3459_v11 = vrot.slane %v3403_v19, %v13268_v0  ;;  %v3455_v25 = vrot.slane %v3403_v19, %v13285_v17 }
 0x706   :  { %4233 = vmatprep.subr.bf16.mxu0 %v11492_v34 }
 0x707   :  { %3427 = vadd.xlane.f32.xlu1 %v3426_v4 }
 0x709   :  { %4234 = vmatpush1.bf16.msra.mxu0 %v11490_v35  ;;  %v3477_v35 = vrot.slane %v3404_v23, %v13285_v17 }
 0x70a   :  { %4235 = vmatprep.subr.bf16.mxu0 %v11495_v37 }
 0x70d   :  { %4236 = vmatpush1.bf16.msra.mxu0 %v11493_v38 }
 0x70e   :  { %4237 = vmatprep.subr.bf16.mxu0 %v11498_v39 }
 0x711   :  { %4238 = vmatpush1.bf16.msra.mxu0 %v11496_v40 }
 0x712   :  { %4239 = vmatprep.subr.bf16.mxu0 %v11501_v41 }
 0x715   :  { %4240 = vmatpush1.bf16.msra.mxu0 %v11499_v43 }
 0x716   :  { %4241 = vmatprep.subr.bf16.mxu0 %v11504_v18 }
 0x719   :  { %4242 = vmatpush1.bf16.msra.mxu0 %v11502_v46 }
 0x71a   :  { %4243 = vmatprep.subr.bf16.mxu0 %v11507_v47  ;;  %v11457_v47 = vld [vmem:[#allocation17 + $0x100] ss:$8 sps:$4 sm:$0xff]  }
 0x71d   :  { %4244 = vmatpush1.bf16.msra.mxu0 %v11505_v49 }
 0x71e   :  { %4245 = vmatprep.subr.bf16.mxu0 %v11510_v52  ;;  %v11462_v52 = vld [vmem:[#allocation17 + $0x114] ss:$8 sps:$4 sm:$0xff]  }
 0x721   :  { %4246 = vmatpush1.bf16.msra.mxu0 %v11508_v53  ;;  %v11460_v53 = vld [vmem:[#allocation17 + $0x110] ss:$8 sps:$4 sm:$0xff]  }
 0x722   :  { %4247 = vmatprep.subr.bf16.mxu0 %v11513_v55  ;;  %v11465_v55 = vld [vmem:[#allocation17 + $0x124] ss:$8 sps:$4 sm:$0xff]  }
 0x725   :  { %4248 = vmatpush1.bf16.msra.mxu0 %v11511_v57  ;;  %v11463_v57 = vld [vmem:[#allocation17 + $0x120] ss:$8 sps:$4 sm:$0xff]  }
 0x726   :  { %4249 = vmatprep.subr.bf16.mxu0 %v11516_v58  ;;  %v11468_v58 = vld [vmem:[#allocation17 + $0x134] ss:$8 sps:$4 sm:$0xff]  }
 0x729   :  { %4250 = vmatpush1.bf16.msra.mxu0 %v11514_v59  ;;  %v11466_v59 = vld [vmem:[#allocation17 + $0x130] ss:$8 sps:$4 sm:$0xff]  }
 0x72a   :  { %4251 = vmatprep.subr.bf16.mxu0 %v11519_v60  ;;  %v11471_v60 = vld [vmem:[#allocation17 + $0x144] ss:$8 sps:$4 sm:$0xff]  }
 0x72d   :  { %4252 = vmatpush1.bf16.msra.mxu0 %v11517_v61  ;;  %v11469_v61 = vld [vmem:[#allocation17 + $0x140] ss:$8 sps:$4 sm:$0xff]  }
 0x72e   :  { %4253 = vmatprep.subr.bf16.mxu0 %v11522_v62  ;;  %v11474_v62 = vld [vmem:[#allocation17 + $0x154] ss:$8 sps:$4 sm:$0xff]  }
 0x731   :  { %4254 = vmatpush1.bf16.msra.mxu0 %v11520_v1 }
 0x78e   :  { %v3408_v51 = vpop.xlane.xlu0 %3407 }
 0x78f   :  { %v13384_v2 = vmul.f32 0.0033333334, %v3408_v51  ;;  %v11472_v51 = vld [vmem:[#allocation17 + $0x150] ss:$8 sps:$4 sm:$0xff]  }
 0x790   :  { %v3412_v3 = vpop.xlane.xlu1 %3411 }
 0x791   :  { %v13386_v4 = vmul.f32 0.0033333334, %v3412_v3  ;;  %v3431_v6 = vmul.f32 %v13384_v2, %v13384_v2  ;;  %v3435_v20 = vsub.f32 %v13354_v36, %v13384_v2  ;;  %v3436_v22 = vsub.f32 %v13356_v42, %v13384_v2 }
 0x792   :  { %v3424_v5 = vpop.xlane.xlu0 %3423  ;;  %v3481_v36 = vrot.slane %v3404_v23, %v13268_v0  ;;  %v3437_v3 = vsub.f32 %v13362_v48, %v13384_v2 }
 0x793   :  { %v3429_v7 = vmul.f32 0.0033333334, %v3424_v5  ;;  %v3432_v54 = vmul.f32 %v13386_v4, %v13386_v4  ;;  %v3438_v27 = vsub.f32 %v13358_v44, %v13386_v4  ;;  %v3439_v28 = vsub.f32 %v13364_v50, %v13386_v4  ;;  %v11477_v5 = vld [vmem:[#allocation17 + $0x164] ss:$8 sps:$4 sm:$0xff]  }
 0x794   :  { %v3428_v8 = vpop.xlane.xlu1 %3427  ;;  %v3440_v1 = vsub.f32 %v13370_v56, %v13386_v4  ;;  %v11478_v56 = vld [vmem:[#allocation17 + $0x170] ss:$8 sps:$4 sm:$0xff]  }
 0x795   :  { %v3433_v15 = vsub.f32 %v3429_v7, %v3431_v6  ;;  %v3430_v9 = vmul.f32 0.0033333334, %v3428_v8  ;;  %v3463_v8 = vrot.slane %v3403_v19, %v13292_v31  ;;  %v11523_v19 = vld [vmem:[#allocation20 + $0x150] ss:$12 sps:$4 sm:$0xff]  }
 0x797   :  { %v3441_v10 = vadd.f32 1e-05, %v3433_v15  ;;  %v3434_v14 = vsub.f32 %v3430_v9, %v3432_v54  ;;  %v11475_v15 = vld [vmem:[#allocation17 + $0x160] ss:$8 sps:$4 sm:$0xff]   ;;  %v11480_v54 = vld [vmem:[#allocation17 + $0x174] ss:$8 sps:$4 sm:$0xff]  }
 0x799   :  { %12273 = vrsqrt.f32 %v3441_v10  ;;  %v3442_v16 = vadd.f32 1e-05, %v3434_v14  ;;  %v3485_v14 = vrot.slane %v3404_v23, %v13292_v31  ;;  %v11529_v23 = vld [vmem:[#allocation20 + $0xc8] ss:$12 sps:$4 sm:$0xff]  }
 0x79b   :  { %12275 = vrsqrt.f32 %v3442_v16  ;;  %v11525_v16 = vld [vmem:[#allocation20 + $0x154] ss:$12 sps:$4 sm:$0xff]  }
 0x79c   :  { %4255 = vmatprep.subr.bf16.mxu0 %v11525_v16  ;;  %v11557_v16 = vld [vmem:[#allocation8 + $0x750] ss:$36 sps:$4 sm:$0xff]  }
 0x79d   :  { %4256 = vmatpush1.bf16.msra.mxu0 %v11523_v19  ;;  %v11560_v19 = vld [vmem:[#allocation8 + $0x758] ss:$36 sps:$4 sm:$0xff]  }
 0x7a3   :  { %v12274_v26 = vpop.eup %12273 }
 0x7a4   :  { %v3446_v29 = vmul.f32 %v12274_v26, %v3436_v22  ;;  %v3445_v30 = vmul.f32 %v12274_v26, %v3435_v20  ;;  %v3447_v7 = vmul.f32 %v12274_v26, %v3437_v3  ;;  %v11528_v20 = vld [vmem:[#allocation20 + $0x16c] ss:$12 sps:$4 sm:$0xff]   ;;  %v11526_v22 = vld [vmem:[#allocation20 + $0x168] ss:$12 sps:$4 sm:$0xff]   ;;  %v11543_v3 = vld [vmem:[#allocation20 + $0x170] ss:$12 sps:$4 sm:$0xff]  }
 0x7a5   :  { %v12276_v34 = vpop.eup %12275  ;;  %4257 = vmatprep.subr.bf16.mxu0 %v11528_v20  ;;  %v11565_v20 = vld [vmem:[#allocation8 + $0x79c] ss:$36 sps:$4 sm:$0xff]  }
 0x7a6   :  { %v3449_v42 = vmul.f32 %v12276_v34, %v3439_v28  ;;  %v3468_v37 = vmul.f32 %v3459_v11, %v3446_v29  ;;  %v3448_v38 = vmul.f32 %v12276_v34, %v3438_v27  ;;  %v3467_v39 = vmul.f32 %v3455_v25, %v3445_v30  ;;  %4258 = vmatpush1.bf16.msra.mxu0 %v11526_v22  ;;  %v11568_v22 = vld [vmem:[#allocation8 + $0x7a4] ss:$36 sps:$4 sm:$0xff]  }
 0x7a7   :  { %v3450_v6 = vmul.f32 %v12276_v34, %v3440_v1  ;;  %v3469_v10 = vmul.f32 %v3463_v8, %v3447_v7  ;;  %10551 = vmatprep.subr.bf16.mxu0 %v11529_v23  ;;  %v11541_v1 = vld [vmem:[#allocation20 + $0x158] ss:$12 sps:$4 sm:$0xff]   ;;  %v11547_v7 = vld [vmem:[#allocation8 + $0x6c4] ss:$36 sps:$4 sm:$0xff]   ;;  %v11563_v23 = vld [vmem:[#allocation8 + $0x798] ss:$36 sps:$4 sm:$0xff]  }
 0x7a8   :  { %v3471_v40 = vmul.f32 %v3459_v11, %v3449_v42  ;;  %v3470_v41 = vmul.f32 %v3455_v25, %v3448_v38  ;;  %v13404_v43 = vadd.f32 %v3481_v36, %v3468_v37  ;;  %v13408_v44 = vadd.f32 %v3477_v35, %v3467_v39  ;;  %v3546_v11 = vld [vmem:[#allocation19] sm:$0x3] }
 0x7a9   :  { %v3472_v9 = vmul.f32 %v3463_v8, %v3450_v6  ;;  %v13425_v48 = vadd.f32 %v3485_v14, %v3469_v10  ;;  %v3551_v25 = vrot.slane %v3546_v11, %v13285_v17  ;;  %v3555_v26 = vrot.slane %v3546_v11, %v13268_v0  ;;  %v11545_v6 = vld [vmem:[#allocation8 + $0x6c0] ss:$36 sps:$4 sm:$0xff]   ;;  %v11548_v8 = vld [vmem:[#allocation8 + $0x6c8] ss:$36 sps:$4 sm:$0xff]  }
 0x7aa   :  { %v13406_v18 = vadd.f32 %v3481_v36, %v3471_v40  ;;  %v13410_v50 = vadd.f32 %v3477_v35, %v3470_v41  ;;  %v11551_v10 = vld [vmem:[#allocation8 + $0x708] ss:$36 sps:$4 sm:$0xff]   ;;  %v11566_v11 = vld [vmem:[#allocation8 + $0x7a0] ss:$36 sps:$4 sm:$0xff]  }
 0x7ab   :  { %v13423_v4 = vadd.f32 %v3485_v14, %v3472_v9  ;;  %v11556_v9 = vld [vmem:[#allocation8 + $0x714] ss:$36 sps:$4 sm:$0xff]  }
 0x7ac   :  { %v3496_v46 = vpack.c.bf16 %v13406_v18, %v13404_v43  ;;  %v3495_v49 = vpack.c.bf16 %v13410_v50, %v13408_v44  ;;  %v11554_v14 = vld [vmem:[#allocation8 + $0x710] ss:$36 sps:$4 sm:$0xff]  }
 0x7ad   :  { %v3497_v2 = vpack.c.bf16 %v13423_v4, %v13425_v48 }
 0x7ae   :  { %3830 = vmatprep.mubr.bf16.mxu1 %v3496_v46 }
 0x7af   :  { %3831 = vmatmul.mubr.bf16.vlgmr.msra.gmra.mrb[36].mxu1 %v3495_v49  ;;  %v11531_v49 = vld [vmem:[#allocation20 + $0xe0] ss:$12 sps:$4 sm:$0xff]  }
 0x7b0   :  { %3842 = vmatpush1.bf16.msra.mxu1 %v11457_v47  ;;  %3873 = vmatprep.mubr.bf16.mxu1 %v12767_v24  ;;  %v11530_v47 = vld [vmem:[#allocation20 + $0x8] ss:$12 sps:$4 sm:$0xff]  }
 0x7b1   :  { %3843 = vmatprep.subr.bf16.mxu1 %v11462_v52  ;;  %v11532_v52 = vld [vmem:[#allocation20 + $0x20] ss:$12 sps:$4 sm:$0xff]  }
 0x7b4   :  { %3844 = vmatpush1.bf16.msra.mxu1 %v11460_v53  ;;  %v11533_v53 = vld [vmem:[#allocation20 + $0xf8] ss:$12 sps:$4 sm:$0xff]  }
 0x7b5   :  { %3845 = vmatprep.subr.bf16.mxu1 %v11465_v55  ;;  %v11534_v55 = vld [vmem:[#allocation20 + $0x38] ss:$12 sps:$4 sm:$0xff]  }
 0x7b8   :  { %3846 = vmatpush1.bf16.msra.mxu1 %v11463_v57  ;;  %v11535_v57 = vld [vmem:[#allocation20 + $0x110] ss:$12 sps:$4 sm:$0xff]  }
 0x7b9   :  { %3847 = vmatprep.subr.bf16.mxu1 %v11468_v58  ;;  %v11536_v58 = vld [vmem:[#allocation20 + $0x50] ss:$12 sps:$4 sm:$0xff]  }
 0x7bc   :  { %3848 = vmatpush1.bf16.msra.mxu1 %v11466_v59  ;;  %v11537_v59 = vld [vmem:[#allocation20 + $0x128] ss:$12 sps:$4 sm:$0xff]  }
 0x7bd   :  { %3849 = vmatprep.subr.bf16.mxu1 %v11471_v60  ;;  %v11538_v60 = vld [vmem:[#allocation20 + $0x68] ss:$12 sps:$4 sm:$0xff]  }
 0x7c0   :  { %3850 = vmatpush1.bf16.msra.mxu1 %v11469_v61  ;;  %v11539_v61 = vld [vmem:[#allocation20 + $0x140] ss:$12 sps:$4 sm:$0xff]  }
 0x7c1   :  { %3851 = vmatprep.subr.bf16.mxu1 %v11474_v62  ;;  %v11540_v62 = vld [vmem:[#allocation20 + $0x80] ss:$12 sps:$4 sm:$0xff]  }
 0x7c4   :  { %3852 = vmatpush1.bf16.msra.mxu1 %v11472_v51  ;;  %v11542_v51 = vld [vmem:[#allocation20 + $0x98] ss:$12 sps:$4 sm:$0xff]  }
 0x7c5   :  { %3853 = vmatprep.subr.bf16.mxu1 %v11477_v5  ;;  %v11544_v5 = vld [vmem:[#allocation20 + $0xb0] ss:$12 sps:$4 sm:$0xff]  }
 0x7c8   :  { %3854 = vmatpush1.bf16.msra.mxu1 %v11475_v15  ;;  %v11550_v15 = vld [vmem:[#allocation8 + $0x6cc] ss:$36 sps:$4 sm:$0xff]  }
 0x7c9   :  { %3855 = vmatprep.subr.bf16.mxu1 %v11480_v54  ;;  %v11553_v54 = vld [vmem:[#allocation8 + $0x70c] ss:$36 sps:$4 sm:$0xff]  }
 0x7cc   :  { %3856 = vmatpush1.bf16.msra.mxu1 %v11478_v56  ;;  %v11559_v56 = vld [vmem:[#allocation8 + $0x754] ss:$36 sps:$4 sm:$0xff]  }
 0x7cd   :  { %5807 = vmatprep.subr.bf16.mxu1 %v11547_v7 }
 0x7cf   :  { %3874 = vmatmul.mubr.bf16.vlgmr.msra.gmra.mrb[36].mxu1 %v3497_v2  ;;  %v11562_v2 = vld [vmem:[#allocation8 + $0x75c] ss:$36 sps:$4 sm:$0xff]  }
 0x7d0   :  { %5808 = vmatpush1.bf16.msra.mxu1 %v11545_v6 }
 0x7d1   :  { %5809 = vmatprep.subr.bf16.mxu1 %v11553_v54 }
 0x7d4   :  { %5810 = vmatpush1.bf16.msra.mxu1 %v11551_v10 }
 0x7d5   :  { %5811 = vmatprep.subr.bf16.mxu1 %v11559_v56 }
 0x7d8   :  { %5812 = vmatpush1.bf16.msra.mxu1 %v11557_v16 }
 0x7d9   :  { %5813 = vmatprep.subr.bf16.mxu1 %v11565_v20 }
 0x7dc   :  { %5814 = vmatpush1.bf16.msra.mxu1 %v11563_v23 }
 0x8a2   :  { %v3875_v27 = vpop.f32.mrb[36].mxu1 }
 0x8a3   :  { %v10857_v28 = vadd.f32 %v3875_v27, %v3551_v25  ;;  %v3877_v29 = vpop.f32.mrb[37].mxu1  ;;  %v11569_v27 = vld [vmem:[#allocation8 + $0x7e0] ss:$36 sps:$4 sm:$0xff]  }
 0x8a4   :  { %v10858_v30 = vadd.f32 %v3877_v29, %v3555_v26  ;;  %v3879_v34 = vpop.f32.mrb[38].mxu1  ;;  %v11577_v29 = vld [vmem:[#allocation8 + $0x82c] ss:$36 sps:$4 sm:$0xff]  }
 0x8a5   :  { %v10859_v36 = vadd.f32 %v3879_v34, %v3551_v25  ;;  %v3881_v35 = vpop.f32.mrb[39].mxu1  ;;  %v3884_v37 = vmax.f32 %v10857_v28, 0.0  ;;  %v11571_v25 = vld [vmem:[#allocation8 + $0x7e4] ss:$36 sps:$4 sm:$0xff]  }
 0x8a6   :  { %v10860_v42 = vadd.f32 %v3881_v35, %v3555_v26  ;;  %v3885_v39 = vmax.f32 %v10858_v30, 0.0  ;;  %v11574_v26 = vld [vmem:[#allocation8 + $0x7ec] ss:$36 sps:$4 sm:$0xff]   ;;  %5815 = vmatprep.subr.bf16.mxu1 %v11571_v25  ;;  %v11580_v30 = vld [vmem:[#allocation8 + $0x834] ss:$36 sps:$4 sm:$0xff]  }
 0x8a7   :  { %v3886_v38 = vmax.f32 %v10859_v36, 0.0  ;;  %v11572_v28 = vld [vmem:[#allocation8 + $0x7e8] ss:$36 sps:$4 sm:$0xff]   ;;  %5816 = vmatpush1.bf16.msra.mxu1 %v11569_v27  ;;  %v11578_v36 = vld [vmem:[#allocation8 + $0x830] ss:$36 sps:$4 sm:$0xff]  }
 0x8a8   :  { %v3887_v40 = vmax.f32 %v10860_v42, 0.0  ;;  %v11575_v34 = vld [vmem:[#allocation8 + $0x828] ss:$36 sps:$4 sm:$0xff]   ;;  %5817 = vmatprep.subr.bf16.mxu1 %v11577_v29  ;;  %v11583_v35 = vld [vmem:[#allocation8 + $0x874] ss:$36 sps:$4 sm:$0xff]  }
 0x8a9   :  { %v3888_v41 = vpack.c.bf16 %v3886_v38, %v3884_v37  ;;  %v11586_v42 = vld [vmem:[#allocation8 + $0x87c] ss:$36 sps:$4 sm:$0xff]   ;;  %v11581_v37 = vld [vmem:[#allocation8 + $0x870] ss:$36 sps:$4 sm:$0xff]  }
 0x8aa   :  { %v3889_v46 = vpack.c.bf16 %v3887_v40, %v3885_v39  ;;  %v11584_v38 = vld [vmem:[#allocation8 + $0x878] ss:$36 sps:$4 sm:$0xff]   ;;  %v11592_v40 = vld [vmem:[#allocation8 + $0x8c4] ss:$36 sps:$4 sm:$0xff]  }
 0x8ab   :  { %5818 = vmatpush1.bf16.msra.mxu1 %v11575_v34  ;;  %v11589_v39 = vld [vmem:[#allocation8 + $0x8bc] ss:$36 sps:$4 sm:$0xff]  }
 0x8ac   :  { %4259 = vmatprep.mubr.bf16.mxu0 %v3889_v46  ;;  %5819 = vmatprep.subr.bf16.mxu1 %v11583_v35  ;;  %v11604_v35 = vld [vmem:[#allocation8 + $0x954] ss:$36 sps:$4 sm:$0xff]  }
 0x8ad   :  { %4260 = vmatmul.mubr.bf16.vlgmr.msra.gmra.mrb[24].mxu0 %v3888_v41 }
 0x8ae   :  { %10552 = vmatpush3.bf16.msra.mxu0 %v11530_v47  ;;  %4302 = vmatprep.mubr.bf16.mxu0 %v3889_v46  ;;  %v11590_v46 = vld [vmem:[#allocation8 + $0x8c0] ss:$36 sps:$4 sm:$0xff]  }
 0x8af   :  { %10553 = vmatprep.subr.bf16.mxu0 %v11531_v49  ;;  %5820 = vmatpush1.bf16.msra.mxu1 %v11581_v37  ;;  %v11595_v47 = vld [vmem:[#allocation8 + $0x904] ss:$36 sps:$4 sm:$0xff]   ;;  %v11598_v49 = vld [vmem:[#allocation8 + $0x90c] ss:$36 sps:$4 sm:$0xff]  }
 0x8b0   :  { %5821 = vmatprep.subr.bf16.mxu1 %v11589_v39  ;;  %v11602_v37 = vld [vmem:[#allocation8 + $0x950] ss:$36 sps:$4 sm:$0xff]   ;;  %v11610_v39 = vld [vmem:[#allocation8 + $0x99c] ss:$36 sps:$4 sm:$0xff]  }
 0x8b2   :  { %10554 = vmatpush3.bf16.msra.mxu0 %v11532_v52  ;;  %v11593_v52 = vld [vmem:[#allocation8 + $0x900] ss:$36 sps:$4 sm:$0xff]  }
 0x8b3   :  { %10555 = vmatprep.subr.bf16.mxu0 %v11533_v53  ;;  %v11596_v53 = vld [vmem:[#allocation8 + $0x908] ss:$36 sps:$4 sm:$0xff]  }
 0x8b6   :  { %10556 = vmatpush3.bf16.msra.mxu0 %v11534_v55 }
 0x8b7   :  { %10557 = vmatprep.subr.bf16.mxu0 %v11535_v57 }
 0x8ba   :  { %10558 = vmatpush3.bf16.msra.mxu0 %v11536_v58 }
 0x8bb   :  { %10559 = vmatprep.subr.bf16.mxu0 %v11537_v59 }
 0x8be   :  { %10560 = vmatpush3.bf16.msra.mxu0 %v11538_v60  ;;  %v3954_v60 = vld [vmem:[#allocation22] sm:$0x7] }
 0x8bf   :  { %10561 = vmatprep.subr.bf16.mxu0 %v11539_v61  ;;  %v3959_v61 = vrot.slane %v3954_v60, %v13285_v17  ;;  %v3967_v7 = vrot.slane %v3954_v60, %v13292_v31 }
 0x8c2   :  { %10562 = vmatpush3.bf16.msra.mxu0 %v11540_v62  ;;  %v3963_v62 = vrot.slane %v3954_v60, %v13268_v0  ;;  %v11628_v60 = vld [vmem:[#allocation8 + $0xa74] ss:$36 sps:$4 sm:$0xff]  }
 0x8c3   :  { %10563 = vmatprep.subr.bf16.mxu0 %v11541_v1 }
 0x8c6   :  { %10564 = vmatpush3.bf16.msra.mxu0 %v11542_v51 }
 0x8c7   :  { %10565 = vmatprep.subr.bf16.mxu0 %v11543_v3 }
 0x8ca   :  { %10566 = vmatpush3.bf16.msra.mxu0 %v11544_v5 }
 0x8cb   :  { %5893 = vmatprep.subr.bf16.mxu0 %v11550_v15 }
 0x8cd   :  { %4303 = vmatmul.mubr.bf16.vlgmr.msra.gmra.mrb[28].mxu0 %v3888_v41  ;;  %v11587_v41 = vld [vmem:[#allocation8 + $0x8b8] ss:$36 sps:$4 sm:$0xff]  }
 0x8ce   :  { %5894 = vmatpush1.bf16.msra.mxu0 %v11548_v8  ;;  %5822 = vmatpush1.bf16.msra.mxu1 %v11587_v41  ;;  %v11608_v41 = vld [vmem:[#allocation8 + $0x998] ss:$36 sps:$4 sm:$0xff]  }
 0x8cf   :  { %5895 = vmatprep.subr.bf16.mxu0 %v11556_v9  ;;  %5823 = vmatprep.subr.bf16.mxu1 %v11595_v47  ;;  %v11616_v47 = vld [vmem:[#allocation8 + $0x9e4] ss:$36 sps:$4 sm:$0xff]  }
 0x8d2   :  { %5896 = vmatpush1.bf16.msra.mxu0 %v11554_v14  ;;  %5824 = vmatpush1.bf16.msra.mxu1 %v11593_v52  ;;  %v11614_v52 = vld [vmem:[#allocation8 + $0x9e0] ss:$36 sps:$4 sm:$0xff]  }
 0x8d3   :  { %5897 = vmatprep.subr.bf16.mxu0 %v11562_v2 }
 0x8d6   :  { %5898 = vmatpush1.bf16.msra.mxu0 %v11560_v19 }
 0x8d7   :  { %5899 = vmatprep.subr.bf16.mxu0 %v11568_v22 }
 0x8da   :  { %5900 = vmatpush1.bf16.msra.mxu0 %v11566_v11 }
 0x8db   :  { %5901 = vmatprep.subr.bf16.mxu0 %v11574_v26 }
 0x8de   :  { %5902 = vmatpush1.bf16.msra.mxu0 %v11572_v28 }
 0x8df   :  { %5903 = vmatprep.subr.bf16.mxu0 %v11580_v30 }
 0x8e2   :  { %5904 = vmatpush1.bf16.msra.mxu0 %v11578_v36  ;;  %v11601_v36 = vld [vmem:[#allocation8 + $0x94c] ss:$36 sps:$4 sm:$0xff]  }
 0x8e3   :  { %5905 = vmatprep.subr.bf16.mxu0 %v11586_v42  ;;  %v11599_v42 = vld [vmem:[#allocation8 + $0x948] ss:$36 sps:$4 sm:$0xff]   ;;  %5825 = vmatprep.subr.bf16.mxu1 %v11601_v36  ;;  %v13484_v36 = vld [vmem:[#allocation25] sm:$0x7] }
 0x8e4   :  { %5826 = vmatpush1.bf16.msra.mxu1 %v11599_v42 }
 0x8e6   :  { %5906 = vmatpush1.bf16.msra.mxu0 %v11584_v38  ;;  %v11607_v38 = vld [vmem:[#allocation8 + $0x994] ss:$36 sps:$4 sm:$0xff]  }
 0x8e7   :  { %5907 = vmatprep.subr.bf16.mxu0 %v11592_v40  ;;  %v11605_v40 = vld [vmem:[#allocation8 + $0x990] ss:$36 sps:$4 sm:$0xff]   ;;  %5827 = vmatprep.subr.bf16.mxu1 %v11607_v38 }
 0x8e8   :  { %5828 = vmatpush1.bf16.msra.mxu1 %v11605_v40 }
 0x8ea   :  { %5908 = vmatpush1.bf16.msra.mxu0 %v11590_v46  ;;  %v11613_v46 = vld [vmem:[#allocation8 + $0x9dc] ss:$36 sps:$4 sm:$0xff]  }
 0x8eb   :  { %5909 = vmatprep.subr.bf16.mxu0 %v11598_v49  ;;  %v11611_v49 = vld [vmem:[#allocation8 + $0x9d8] ss:$36 sps:$4 sm:$0xff]   ;;  %5829 = vmatprep.subr.bf16.mxu1 %v11613_v46  ;;  %v4391_v46 = vrot.slane %v13484_v36, %v13285_v17 }
 0x8ec   :  { %5830 = vmatpush1.bf16.msra.mxu1 %v11611_v49 }
 0x8ee   :  { %5910 = vmatpush1.bf16.msra.mxu0 %v11596_v53  ;;  %v11619_v53 = vld [vmem:[#allocation8 + $0xa24] ss:$36 sps:$4 sm:$0xff]  }
 0x8ef   :  { %5911 = vmatprep.subr.bf16.mxu0 %v11604_v35  ;;  %5831 = vmatprep.subr.bf16.mxu1 %v11619_v53 }
 0x8f2   :  { %5912 = vmatpush1.bf16.msra.mxu0 %v11602_v37 }
 0x8f3   :  { %5913 = vmatprep.subr.bf16.mxu0 %v11610_v39 }
 0x8f6   :  { %5914 = vmatpush1.bf16.msra.mxu0 %v11608_v41  ;;  %v4395_v41 = vrot.slane %v13484_v36, %v13268_v0 }
 0x8f7   :  { %5915 = vmatprep.subr.bf16.mxu0 %v11616_v47 }
 0x8fa   :  { %5916 = vmatpush1.bf16.msra.mxu0 %v11614_v52 }
 0x980   :  { %v4261_v55 = vpop.f32.mrb[24].mxu0 }
 0x981   :  { %v4263_v57 = vpop.f32.mrb[25].mxu0  ;;  %v4262_v1 = vadd.f32 %v4261_v55, %v3959_v61  ;;  %v11617_v55 = vld [vmem:[#allocation8 + $0xa20] ss:$36 sps:$4 sm:$0xff]  }
 0x982   :  { %v4265_v58 = vpop.f32.mrb[26].mxu0  ;;  %v4264_v51 = vadd.f32 %v4263_v57, %v3963_v62  ;;  %v11620_v57 = vld [vmem:[#allocation8 + $0xa28] ss:$36 sps:$4 sm:$0xff]   ;;  %5832 = vmatpush1.bf16.msra.mxu1 %v11617_v55 }
 0x983   :  { %v4267_v59 = vpop.f32.mrb[27].mxu0  ;;  %v4266_v3 = vadd.f32 %v4265_v58, %v3959_v61  ;;  %v13435_v8 = vadd.f32 %v4262_v1, %v13408_v44  ;;  %v11622_v58 = vld [vmem:[#allocation8 + $0xa2c] ss:$36 sps:$4 sm:$0xff]   ;;  %v11631_v1 = vld [vmem:[#allocation8 + $0xab4] ss:$36 sps:$4 sm:$0xff]  }
 0x984   :  { %v4268_v5 = vadd.f32 %v4267_v59, %v3963_v62  ;;  %v13438_v54 = vadd.f32 %v4264_v51, %v13404_v43  ;;  %v11625_v59 = vld [vmem:[#allocation8 + $0xa6c] ss:$36 sps:$4 sm:$0xff]   ;;  %5917 = vmatprep.subr.bf16.mxu0 %v11622_v58  ;;  %v11634_v51 = vld [vmem:[#allocation8 + $0xabc] ss:$36 sps:$4 sm:$0xff]  }
 0x985   :  { %v13441_v14 = vadd.f32 %v4266_v3, %v13410_v50  ;;  %v4329_v20 = vmul.f32 %v13435_v8, %v13435_v8  ;;  %5918 = vmatpush1.bf16.msra.mxu0 %v11620_v57  ;;  %v11623_v61 = vld [vmem:[#allocation8 + $0xa68] ss:$36 sps:$4 sm:$0xff]   ;;  %v11626_v62 = vld [vmem:[#allocation8 + $0xa70] ss:$36 sps:$4 sm:$0xff]   ;;  %5833 = vmatprep.subr.bf16.mxu1 %v11625_v59 }
 0x986   :  { %v13444_v56 = vadd.f32 %v4268_v5, %v13406_v18  ;;  %v4319_v43 = vadd.f32 %v13438_v54, %v13435_v8  ;;  %v4330_v50 = vmul.f32 %v13438_v54, %v13438_v54  ;;  %5919 = vmatprep.subr.bf16.mxu0 %v11628_v60  ;;  %5834 = vmatpush1.bf16.msra.mxu1 %v11623_v61  ;;  %v11629_v3 = vld [vmem:[#allocation8 + $0xab0] ss:$36 sps:$4 sm:$0xff]   ;;  %v11632_v5 = vld [vmem:[#allocation8 + $0xab8] ss:$36 sps:$4 sm:$0xff]   ;;  %v11641_v61 = vld [vmem:[#allocation8 + $0xb40] ss:$36 sps:$4 sm:$0xff]  }
 0x987   :  { %v4332_v23 = vmul.f32 %v13441_v14, %v13441_v14  ;;  %5835 = vmatprep.subr.bf16.mxu1 %v11631_v1 }
 0x988   :  { %v4323_v18 = vadd.f32 %v13444_v56, %v13441_v14  ;;  %v4333_v26 = vmul.f32 %v13444_v56, %v13444_v56  ;;  %v4335_v28 = vadd.f32 %v4330_v50, %v4329_v20 }
 0x989   :  { %5920 = vmatpush1.bf16.msra.mxu0 %v11626_v62  ;;  %v11644_v62 = vld [vmem:[#allocation8 + $0xb48] ss:$36 sps:$4 sm:$0xff]  }
 0x98a   :  { %v4339_v34 = vadd.f32 %v4333_v26, %v4332_v23  ;;  %5921 = vmatprep.subr.bf16.mxu0 %v11634_v51  ;;  %5836 = vmatpush1.bf16.msra.mxu1 %v11629_v3  ;;  %v11649_v51 = vld [vmem:[#allocation8 + $0xb8c] ss:$36 sps:$4 sm:$0xff]   ;;  %v11652_v3 = vld [vmem:[#allocation8 + $0xb94] ss:$36 sps:$4 sm:$0xff]  }
 0x98d   :  { %5922 = vmatpush1.bf16.msra.mxu0 %v11632_v5  ;;  %v11647_v5 = vld [vmem:[#allocation8 + $0xb88] ss:$36 sps:$4 sm:$0xff]  }
 0x9a0   :  { %v10567_v6 = vpop.f32.mrb[28].mxu0 }
 0x9a1   :  { %v10568_v15 = vpop.f32.mrb[29].mxu0 }
 0x9a2   :  { %v10569_v9 = vadd.f32 %v10568_v15, %v10567_v6  ;;  %v10570_v10 = vpop.f32.mrb[30].mxu0  ;;  %v11637_v6 = vld [vmem:[#allocation8 + $0xafc] ss:$36 sps:$4 sm:$0xff]  }
 0x9a3   :  { %v10571_v2 = vpop.f32.mrb[31].mxu0  ;;  %v11635_v15 = vld [vmem:[#allocation8 + $0xaf8] ss:$36 sps:$4 sm:$0xff]   ;;  %5837 = vmatprep.subr.bf16.mxu1 %v11637_v6  ;;  %v11650_v6 = vld [vmem:[#allocation8 + $0xb90] ss:$36 sps:$4 sm:$0xff]  }
 0x9a4   :  { %v4305_v16 = vadd.f32 %v10569_v9, %v3967_v7  ;;  %v10572_v19 = vadd.f32 %v10571_v2, %v10570_v10  ;;  %v11638_v9 = vld [vmem:[#allocation8 + $0xb00] ss:$36 sps:$4 sm:$0xff]   ;;  %5838 = vmatpush1.bf16.msra.mxu1 %v11635_v15  ;;  %v11646_v2 = vld [vmem:[#allocation8 + $0xb4c] ss:$36 sps:$4 sm:$0xff]  }
 0x9a5   :  { %v11643_v10 = vld [vmem:[#allocation8 + $0xb44] ss:$36 sps:$4 sm:$0xff]   ;;  %v11658_v15 = vld [vmem:[#allocation8 + $0xbdc] ss:$36 sps:$4 sm:$0xff]  }
 0x9a6   :  { %v13449_v44 = vadd.f32 %v4305_v16, %v13425_v48  ;;  %v4308_v22 = vadd.f32 %v10572_v19, %v3967_v7  ;;  %v11640_v7 = vld [vmem:[#allocation8 + $0xb04] ss:$36 sps:$4 sm:$0xff]   ;;  %5850 = vmatprep.subr.bf16.mxu1 %v11643_v10  ;;  %v11656_v10 = vld [vmem:[#allocation8 + $0xbd8] ss:$36 sps:$4 sm:$0xff]  }
 0x9a7   :  { %5923 = vmatprep.subr.bf16.mxu0 %v11640_v7  ;;  %v11655_v7 = vld [vmem:[#allocation8 + $0xbd4] ss:$36 sps:$4 sm:$0xff]  }
 0x9a8   :  { %v13460_v11 = vadd.f32 %v4308_v22, %v13423_v4  ;;  %v4320_v25 = vadd.f32 %v4319_v43, %v13449_v44  ;;  %v4331_v48 = vmul.f32 %v13449_v44, %v13449_v44  ;;  %5924 = vmatpush1.bf16.msra.mxu0 %v11638_v9  ;;  %v11653_v9 = vld [vmem:[#allocation8 + $0xbd0] ss:$36 sps:$4 sm:$0xff]  }
 0x9a9   :  { %5936 = vmatprep.subr.bf16.mxu0 %v11646_v2  ;;  %v11661_v2 = vld [vmem:[#allocation8 + $0xc1c] ss:$36 sps:$4 sm:$0xff]  }
 0x9aa   :  { %4321 = vadd.xlane.f32.xlu0 %v4320_v25  ;;  %v4324_v27 = vadd.f32 %v4323_v18, %v13460_v11  ;;  %v4334_v29 = vmul.f32 %v13460_v11, %v13460_v11  ;;  %v4336_v30 = vadd.f32 %v4335_v28, %v4331_v48 }
 0x9ac   :  { %4325 = vadd.xlane.f32.xlu1 %v4324_v27  ;;  %v4340_v4 = vadd.f32 %v4339_v34, %v4334_v29 }
 0x9ae   :  { %4337 = vadd.xlane.f32.xlu0 %v4336_v30  ;;  %v13478_v30 = vld [vmem:[#allocation23] sm:$0x7] }
 0x9af   :  { %v4373_v35 = vrot.slane %v13478_v30, %v13268_v0  ;;  %v4369_v42 = vrot.slane %v13478_v30, %v13285_v17 }
 0x9b0   :  { %4341 = vadd.xlane.f32.xlu1 %v4340_v4 }
 0xa37   :  { %v4322_v16 = vpop.xlane.xlu0 %4321 }
 0xa38   :  { %v13470_v19 = vmul.f32 0.0033333334, %v4322_v16  ;;  %v11664_v16 = vld [vmem:[#allocation8 + $0xc24] ss:$36 sps:$4 sm:$0xff]  }
 0xa39   :  { %v4326_v20 = vpop.xlane.xlu1 %4325 }
 0xa3a   :  { %v13472_v22 = vmul.f32 0.0033333334, %v4326_v20  ;;  %v4345_v50 = vmul.f32 %v13470_v19, %v13470_v19  ;;  %v4349_v34 = vsub.f32 %v13435_v8, %v13470_v19  ;;  %v4350_v4 = vsub.f32 %v13438_v54, %v13470_v19  ;;  %v11659_v20 = vld [vmem:[#allocation8 + $0xc18] ss:$36 sps:$4 sm:$0xff]  }
 0xa3b   :  { %v4338_v43 = vpop.xlane.xlu0 %4337 }
 0xa3c   :  { %v4343_v18 = vmul.f32 0.0033333334, %v4338_v43  ;;  %v4346_v48 = vmul.f32 %v13472_v22, %v13472_v22  ;;  %v4352_v38 = vsub.f32 %v13441_v14, %v13472_v22  ;;  %v4353_v39 = vsub.f32 %v13444_v56, %v13472_v22  ;;  %v11662_v43 = vld [vmem:[#allocation8 + $0xc20] ss:$36 sps:$4 sm:$0xff]  }
 0xa3d   :  { %v4342_v23 = vpop.xlane.xlu1 %4341 }
 0xa3e   :  { %v4347_v25 = vsub.f32 %v4343_v18, %v4345_v50  ;;  %v4344_v26 = vmul.f32 0.0033333334, %v4342_v23  ;;  %v11667_v50 = vld [vmem:[#allocation8 + $0xc64] ss:$36 sps:$4 sm:$0xff]   ;;  %v11670_v18 = vld [vmem:[#allocation8 + $0xc6c] ss:$36 sps:$4 sm:$0xff]  }
 0xa3f   :  { %v11665_v23 = vld [vmem:[#allocation8 + $0xc60] ss:$36 sps:$4 sm:$0xff]  }
 0xa40   :  { %v4355_v27 = vadd.f32 1e-05, %v4347_v25  ;;  %v4348_v28 = vsub.f32 %v4344_v26, %v4346_v48  ;;  %v11668_v25 = vld [vmem:[#allocation8 + $0xc68] ss:$36 sps:$4 sm:$0xff]   ;;  %v11676_v26 = vld [vmem:[#allocation8 + $0xcb4] ss:$36 sps:$4 sm:$0xff]  }
 0xa41   :  { %v11673_v48 = vld [vmem:[#allocation8 + $0xcac] ss:$36 sps:$4 sm:$0xff]  }
 0xa42   :  { %12277 = vrsqrt.f32 %v4355_v27  ;;  %v4356_v29 = vadd.f32 1e-05, %v4348_v28  ;;  %v4354_v27 = vsub.f32 %v13460_v11, %v13472_v22  ;;  %v11671_v28 = vld [vmem:[#allocation8 + $0xca8] ss:$36 sps:$4 sm:$0xff]   ;;  %v11677_v11 = vld [vmem:[#allocation8 + $0xcf0] ss:$36 sps:$4 sm:$0xff]  }
 0xa43   :  { %v11680_v22 = vld [vmem:[#allocation8 + $0xcf8] ss:$36 sps:$4 sm:$0xff]  }
 0xa44   :  { %12279 = vrsqrt.f32 %v4356_v29  ;;  %v11674_v29 = vld [vmem:[#allocation8 + $0xcb0] ss:$36 sps:$4 sm:$0xff]  }
 0xa4c   :  { %v13490_v37 = vpop.eup %12277 }
 0xa4d   :  { %v4360_v8 = vmul.f32 %v13490_v37, %v4350_v4  ;;  %v4359_v54 = vmul.f32 %v13490_v37, %v4349_v34  ;;  %v4351_v34 = vsub.f32 %v13449_v44, %v13470_v19  ;;  %v11679_v4 = vld [vmem:[#allocation8 + $0xcf4] ss:$36 sps:$4 sm:$0xff]  }
 0xa4e   :  { %v13498_v40 = vpop.eup %12279 }
 0xa4f   :  { %v4363_v47 = vmul.f32 %v13498_v40, %v4353_v39  ;;  %v4382_v49 = vmul.f32 %v4373_v35, %v4360_v8  ;;  %v4362_v14 = vmul.f32 %v13498_v40, %v4352_v38  ;;  %v4381_v52 = vmul.f32 %v4369_v42, %v4359_v54  ;;  %v11685_v8 = vld [vmem:[#allocation8 + $0xd3c] ss:$36 sps:$4 sm:$0xff]   ;;  %v11688_v54 = vld [vmem:[#allocation8 + $0xd44] ss:$36 sps:$4 sm:$0xff]  }
 0xa50   :  { %v4361_v38 = vmul.f32 %v13490_v37, %v4351_v34  ;;  %v4377_v39 = vrot.slane %v13478_v30, %v13292_v31  ;;  %v11686_v37 = vld [vmem:[#allocation8 + $0xd40] ss:$36 sps:$4 sm:$0xff]   ;;  %v11736_v34 = vld [vmem:[#allocation8 + $0x8d4] ss:$36 sps:$4 sm:$0xff]  }
 0xa51   :  { %v4385_v53 = vmul.f32 %v4373_v35, %v4363_v47  ;;  %v4384_v56 = vmul.f32 %v4369_v42, %v4362_v14  ;;  %v13506_v55 = vadd.f32 %v4395_v41, %v4382_v49  ;;  %v13510_v58 = vadd.f32 %v4391_v46, %v4381_v52  ;;  %v11682_v35 = vld [vmem:[#allocation8 + $0xcfc] ss:$36 sps:$4 sm:$0xff]   ;;  %v11689_v14 = vld [vmem:[#allocation8 + $0x6d0] ss:$36 sps:$4 sm:$0xff]  }
 0xa52   :  { %v4364_v42 = vmul.f32 %v13498_v40, %v4354_v27  ;;  %v4383_v19 = vmul.f32 %v4377_v39, %v4361_v38  ;;  %v11683_v40 = vld [vmem:[#allocation8 + $0xd38] ss:$36 sps:$4 sm:$0xff]   ;;  %v11725_v27 = vld [vmem:[#allocation8 + $0x880] ss:$36 sps:$4 sm:$0xff]  }
 0xa53   :  { %v13508_v57 = vadd.f32 %v4395_v41, %v4385_v53  ;;  %v13512_v59 = vadd.f32 %v4391_v46, %v4384_v56  ;;  %v4399_v41 = vrot.slane %v13484_v36, %v13292_v31  ;;  %v11691_v46 = vld [vmem:[#allocation8 + $0x6d4] ss:$36 sps:$4 sm:$0xff]   ;;  %v11694_v47 = vld [vmem:[#allocation8 + $0x6dc] ss:$36 sps:$4 sm:$0xff]   ;;  %v11700_v56 = vld [vmem:[#allocation8 + $0x724] ss:$36 sps:$4 sm:$0xff]  }
 0xa54   :  { %v4386_v44 = vmul.f32 %v4377_v39, %v4364_v42  ;;  %v11692_v36 = vld [vmem:[#allocation8 + $0x6d8] ss:$36 sps:$4 sm:$0xff]   ;;  %v11737_v39 = vld [vmem:[#allocation8 + $0x910] ss:$36 sps:$4 sm:$0xff]  }
 0xa55   :  { %v13516_v60 = vpack.c.bf16 %v13508_v57, %v13506_v55  ;;  %v13520_v1 = vpack.c.bf16 %v13512_v59, %v13510_v58  ;;  %v13540_v49 = vadd.f32 %v4399_v41, %v4383_v19  ;;  %v11697_v53 = vld [vmem:[#allocation8 + $0x71c] ss:$36 sps:$4 sm:$0xff]   ;;  %v11739_v42 = vld [vmem:[#allocation8 + $0x914] ss:$36 sps:$4 sm:$0xff]   ;;  %v11751_v19 = vld [vmem:[#allocation8 + $0x9a4] ss:$36 sps:$4 sm:$0xff]  }
 0xa56   :  { %v13538_v30 = vadd.f32 %v4399_v41, %v4386_v44  ;;  %v11742_v38 = vld [vmem:[#allocation8 + $0x91c] ss:$36 sps:$4 sm:$0xff]   ;;  %v11754_v41 = vld [vmem:[#allocation8 + $0x9ac] ss:$36 sps:$4 sm:$0xff]  }
 0xa57   :  { %5839 = vmatprep.mubr.bf16.mxu1 %v13516_v60  ;;  %5925 = vmatprep.mubr.bf16.mxu0 %v13516_v60  ;;  %v11746_v44 = vld [vmem:[#allocation8 + $0x960] ss:$36 sps:$4 sm:$0xff]  }
 0xa58   :  { %5840 = vmatmul.mubr.bf16.vlgmr.msra.gmra.mrb[40].mxu1 %v13520_v1  ;;  %5926 = vmatmul.mubr.bf16.vlgmr.msra.gmra.mrb[32].mxu0 %v13520_v1  ;;  %v13544_v52 = vpack.c.bf16 %v13538_v30, %v13540_v49 }
 0xa59   :  { %5851 = vmatpush1.bf16.msra.mxu1 %v11641_v61  ;;  %5937 = vmatpush1.bf16.msra.mxu0 %v11644_v62  ;;  %v11695_v61 = vld [vmem:[#allocation8 + $0x718] ss:$36 sps:$4 sm:$0xff]   ;;  %v11698_v62 = vld [vmem:[#allocation8 + $0x720] ss:$36 sps:$4 sm:$0xff]  }
 0xa5a   :  { %5852 = vmatprep.subr.bf16.mxu1 %v11649_v51  ;;  %5938 = vmatprep.subr.bf16.mxu0 %v11652_v3  ;;  %v11703_v51 = vld [vmem:[#allocation8 + $0x764] ss:$36 sps:$4 sm:$0xff]   ;;  %v11706_v3 = vld [vmem:[#allocation8 + $0x76c] ss:$36 sps:$4 sm:$0xff]  }
 0xa5b   :  { %5882 = vmatprep.mubr.bf16.mxu1 %v12767_v24  ;;  %5968 = vmatprep.mubr.bf16.mxu0 %v12767_v24 }
 0xa5d   :  { %5853 = vmatpush1.bf16.msra.mxu1 %v11647_v5  ;;  %5939 = vmatpush1.bf16.msra.mxu0 %v11650_v6  ;;  %v11701_v5 = vld [vmem:[#allocation8 + $0x760] ss:$36 sps:$4 sm:$0xff]   ;;  %v11704_v6 = vld [vmem:[#allocation8 + $0x768] ss:$36 sps:$4 sm:$0xff]  }
 0xa5e   :  { %5854 = vmatprep.subr.bf16.mxu1 %v11655_v7  ;;  %5940 = vmatprep.subr.bf16.mxu0 %v11658_v15  ;;  %v11709_v7 = vld [vmem:[#allocation8 + $0x7ac] ss:$36 sps:$4 sm:$0xff]   ;;  %v11712_v15 = vld [vmem:[#allocation8 + $0x7b4] ss:$36 sps:$4 sm:$0xff]  }
 0xa61   :  { %5855 = vmatpush1.bf16.msra.mxu1 %v11653_v9  ;;  %5941 = vmatpush1.bf16.msra.mxu0 %v11656_v10  ;;  %v11707_v9 = vld [vmem:[#allocation8 + $0x7a8] ss:$36 sps:$4 sm:$0xff]   ;;  %v11710_v10 = vld [vmem:[#allocation8 + $0x7b0] ss:$36 sps:$4 sm:$0xff]  }
 0xa62   :  { %5856 = vmatprep.subr.bf16.mxu1 %v11661_v2  ;;  %5942 = vmatprep.subr.bf16.mxu0 %v11664_v16  ;;  %v11715_v2 = vld [vmem:[#allocation8 + $0x7f4] ss:$36 sps:$4 sm:$0xff]   ;;  %v11718_v16 = vld [vmem:[#allocation8 + $0x7fc] ss:$36 sps:$4 sm:$0xff]  }
 0xa65   :  { %5857 = vmatpush1.bf16.msra.mxu1 %v11659_v20  ;;  %5943 = vmatpush1.bf16.msra.mxu0 %v11662_v43  ;;  %v11713_v20 = vld [vmem:[#allocation8 + $0x7f0] ss:$36 sps:$4 sm:$0xff]   ;;  %v11716_v43 = vld [vmem:[#allocation8 + $0x7f8] ss:$36 sps:$4 sm:$0xff]  }
 0xa66   :  { %5858 = vmatprep.subr.bf16.mxu1 %v11667_v50  ;;  %5944 = vmatprep.subr.bf16.mxu0 %v11670_v18  ;;  %v11721_v50 = vld [vmem:[#allocation8 + $0x83c] ss:$36 sps:$4 sm:$0xff]   ;;  %v11724_v18 = vld [vmem:[#allocation8 + $0x844] ss:$36 sps:$4 sm:$0xff]  }
 0xa69   :  { %5859 = vmatpush1.bf16.msra.mxu1 %v11665_v23  ;;  %5945 = vmatpush1.bf16.msra.mxu0 %v11668_v25  ;;  %v11719_v23 = vld [vmem:[#allocation8 + $0x838] ss:$36 sps:$4 sm:$0xff]   ;;  %v11722_v25 = vld [vmem:[#allocation8 + $0x840] ss:$36 sps:$4 sm:$0xff]  }
 0xa6a   :  { %5860 = vmatprep.subr.bf16.mxu1 %v11673_v48  ;;  %5946 = vmatprep.subr.bf16.mxu0 %v11676_v26  ;;  %v11727_v48 = vld [vmem:[#allocation8 + $0x884] ss:$36 sps:$4 sm:$0xff]   ;;  %v11730_v26 = vld [vmem:[#allocation8 + $0x88c] ss:$36 sps:$4 sm:$0xff]  }
 0xa6d   :  { %5861 = vmatpush1.bf16.msra.mxu1 %v11671_v28  ;;  %5947 = vmatpush1.bf16.msra.mxu0 %v11674_v29  ;;  %v11728_v28 = vld [vmem:[#allocation8 + $0x888] ss:$36 sps:$4 sm:$0xff]  }
 0xa6e   :  { %5862 = vmatprep.subr.bf16.mxu1 %v11679_v4  ;;  %5948 = vmatprep.subr.bf16.mxu0 %v11682_v35  ;;  %v11733_v29 = vld [vmem:[#allocation8 + $0x8cc] ss:$36 sps:$4 sm:$0xff]  }
 0xa6f   :  { %v11731_v4 = vld [vmem:[#allocation8 + $0x8c8] ss:$36 sps:$4 sm:$0xff]   ;;  %v11734_v35 = vld [vmem:[#allocation8 + $0x8d0] ss:$36 sps:$4 sm:$0xff]  }
 0xa71   :  { %5863 = vmatpush1.bf16.msra.mxu1 %v11677_v11  ;;  %5949 = vmatpush1.bf16.msra.mxu0 %v11680_v22  ;;  %v11740_v11 = vld [vmem:[#allocation8 + $0x918] ss:$36 sps:$4 sm:$0xff]  }
 0xa72   :  { %5864 = vmatprep.subr.bf16.mxu1 %v11685_v8  ;;  %5950 = vmatprep.subr.bf16.mxu0 %v11688_v54  ;;  %v11745_v22 = vld [vmem:[#allocation8 + $0x95c] ss:$36 sps:$4 sm:$0xff]   ;;  %v11748_v8 = vld [vmem:[#allocation8 + $0x964] ss:$36 sps:$4 sm:$0xff]  }
 0xa73   :  { %v11743_v54 = vld [vmem:[#allocation8 + $0x958] ss:$36 sps:$4 sm:$0xff]  }
 0xa75   :  { %5865 = vmatpush1.bf16.msra.mxu1 %v11683_v40  ;;  %5951 = vmatpush1.bf16.msra.mxu0 %v11686_v37  ;;  %v11749_v40 = vld [vmem:[#allocation8 + $0x9a0] ss:$36 sps:$4 sm:$0xff]   ;;  %v11752_v37 = vld [vmem:[#allocation8 + $0x9a8] ss:$36 sps:$4 sm:$0xff]  }
 0xa76   :  { %5979 = vmatprep.subr.bf16.mxu1 %v11691_v46  ;;  %6065 = vmatprep.subr.bf16.mxu0 %v11694_v47  ;;  %v11757_v46 = vld [vmem:[#allocation8 + $0x9ec] ss:$36 sps:$4 sm:$0xff]   ;;  %v11760_v47 = vld [vmem:[#allocation8 + $0x9f4] ss:$36 sps:$4 sm:$0xff]  }
 0xa78   :  { %5883 = vmatmul.mubr.bf16.vlgmr.msra.gmra.mrb[40].mxu1 %v13544_v52  ;;  %5969 = vmatmul.mubr.bf16.vlgmr.msra.gmra.mrb[32].mxu0 %v13544_v52 }
 0xa79   :  { %5980 = vmatpush1.bf16.msra.mxu1 %v11689_v14  ;;  %6011 = vmatprep.mubr.bf16.mxu1 %v13516_v60  ;;  %v11755_v14 = vld [vmem:[#allocation8 + $0x9e8] ss:$36 sps:$4 sm:$0xff]  }
 0xa7a   :  { %6066 = vmatpush1.bf16.msra.mxu0 %v11692_v36  ;;  %6097 = vmatprep.mubr.bf16.mxu0 %v13516_v60  ;;  %v11758_v36 = vld [vmem:[#allocation8 + $0x9f0] ss:$36 sps:$4 sm:$0xff]  }
 0xa7b   :  { %5981 = vmatprep.subr.bf16.mxu1 %v11697_v53  ;;  %6067 = vmatprep.subr.bf16.mxu0 %v11700_v56  ;;  %v11763_v53 = vld [vmem:[#allocation8 + $0xa34] ss:$36 sps:$4 sm:$0xff]   ;;  %v11766_v56 = vld [vmem:[#allocation8 + $0xa3c] ss:$36 sps:$4 sm:$0xff]  }
 0xa7d   :  { %5982 = vmatpush1.bf16.msra.mxu1 %v11695_v61  ;;  %v11761_v61 = vld [vmem:[#allocation8 + $0xa30] ss:$36 sps:$4 sm:$0xff]  }
 0xa7e   :  { %6068 = vmatpush1.bf16.msra.mxu0 %v11698_v62  ;;  %5983 = vmatprep.subr.bf16.mxu1 %v11703_v51  ;;  %v11764_v62 = vld [vmem:[#allocation8 + $0xa38] ss:$36 sps:$4 sm:$0xff]  }
 0xa7f   :  { %6069 = vmatprep.subr.bf16.mxu0 %v11706_v3  ;;  %v11769_v51 = vld [vmem:[#allocation8 + $0xa7c] ss:$36 sps:$4 sm:$0xff]   ;;  %v11772_v3 = vld [vmem:[#allocation8 + $0xa84] ss:$36 sps:$4 sm:$0xff]  }
 0xa81   :  { %5984 = vmatpush1.bf16.msra.mxu1 %v11701_v5  ;;  %v11767_v5 = vld [vmem:[#allocation8 + $0xa78] ss:$36 sps:$4 sm:$0xff]  }
 0xa82   :  { %6070 = vmatpush1.bf16.msra.mxu0 %v11704_v6  ;;  %5985 = vmatprep.subr.bf16.mxu1 %v11709_v7  ;;  %v11770_v6 = vld [vmem:[#allocation8 + $0xa80] ss:$36 sps:$4 sm:$0xff]  }
 0xa83   :  { %6071 = vmatprep.subr.bf16.mxu0 %v11712_v15  ;;  %v11775_v7 = vld [vmem:[#allocation8 + $0xac4] ss:$36 sps:$4 sm:$0xff]   ;;  %v11778_v15 = vld [vmem:[#allocation8 + $0xacc] ss:$36 sps:$4 sm:$0xff]  }
 0xa85   :  { %5986 = vmatpush1.bf16.msra.mxu1 %v11707_v9  ;;  %v11773_v9 = vld [vmem:[#allocation8 + $0xac0] ss:$36 sps:$4 sm:$0xff]  }
 0xa86   :  { %6072 = vmatpush1.bf16.msra.mxu0 %v11710_v10  ;;  %5987 = vmatprep.subr.bf16.mxu1 %v11715_v2  ;;  %v11776_v10 = vld [vmem:[#allocation8 + $0xac8] ss:$36 sps:$4 sm:$0xff]  }
 0xa87   :  { %6073 = vmatprep.subr.bf16.mxu0 %v11718_v16  ;;  %v11781_v2 = vld [vmem:[#allocation8 + $0xb0c] ss:$36 sps:$4 sm:$0xff]   ;;  %v11784_v16 = vld [vmem:[#allocation8 + $0xb14] ss:$36 sps:$4 sm:$0xff]  }
 0xa89   :  { %5988 = vmatpush1.bf16.msra.mxu1 %v11713_v20  ;;  %v11779_v20 = vld [vmem:[#allocation8 + $0xb08] ss:$36 sps:$4 sm:$0xff]  }
 0xa8a   :  { %6074 = vmatpush1.bf16.msra.mxu0 %v11716_v43  ;;  %5989 = vmatprep.subr.bf16.mxu1 %v11721_v50  ;;  %v11782_v43 = vld [vmem:[#allocation8 + $0xb10] ss:$36 sps:$4 sm:$0xff]  }
 0xa8b   :  { %6075 = vmatprep.subr.bf16.mxu0 %v11724_v18  ;;  %v11787_v50 = vld [vmem:[#allocation8 + $0xb54] ss:$36 sps:$4 sm:$0xff]   ;;  %v11790_v18 = vld [vmem:[#allocation8 + $0xb5c] ss:$36 sps:$4 sm:$0xff]  }
 0xa8d   :  { %5990 = vmatpush1.bf16.msra.mxu1 %v11719_v23  ;;  %v11785_v23 = vld [vmem:[#allocation8 + $0xb50] ss:$36 sps:$4 sm:$0xff]  }
 0xa8e   :  { %6076 = vmatpush1.bf16.msra.mxu0 %v11722_v25  ;;  %5991 = vmatprep.subr.bf16.mxu1 %v11727_v48  ;;  %v11788_v25 = vld [vmem:[#allocation8 + $0xb58] ss:$36 sps:$4 sm:$0xff]  }
 0xa8f   :  { %6077 = vmatprep.subr.bf16.mxu0 %v11730_v26  ;;  %v11793_v48 = vld [vmem:[#allocation8 + $0xb9c] ss:$36 sps:$4 sm:$0xff]   ;;  %v11796_v26 = vld [vmem:[#allocation8 + $0xba4] ss:$36 sps:$4 sm:$0xff]  }
 0xa91   :  { %5992 = vmatpush1.bf16.msra.mxu1 %v11725_v27  ;;  %v11791_v27 = vld [vmem:[#allocation8 + $0xb98] ss:$36 sps:$4 sm:$0xff]  }
 0xa92   :  { %6078 = vmatpush1.bf16.msra.mxu0 %v11728_v28  ;;  %5993 = vmatprep.subr.bf16.mxu1 %v11733_v29  ;;  %v11794_v28 = vld [vmem:[#allocation8 + $0xba0] ss:$36 sps:$4 sm:$0xff]  }
 0xa93   :  { %6079 = vmatprep.subr.bf16.mxu0 %v11736_v34  ;;  %v11799_v29 = vld [vmem:[#allocation8 + $0xbe4] ss:$36 sps:$4 sm:$0xff]   ;;  %v11802_v34 = vld [vmem:[#allocation8 + $0xbec] ss:$36 sps:$4 sm:$0xff]  }
 0xa95   :  { %5994 = vmatpush1.bf16.msra.mxu1 %v11731_v4  ;;  %v11797_v4 = vld [vmem:[#allocation8 + $0xbe0] ss:$36 sps:$4 sm:$0xff]  }
 0xa96   :  { %6080 = vmatpush1.bf16.msra.mxu0 %v11734_v35  ;;  %5995 = vmatprep.subr.bf16.mxu1 %v11739_v42  ;;  %v11800_v35 = vld [vmem:[#allocation8 + $0xbe8] ss:$36 sps:$4 sm:$0xff]  }
 0xa97   :  { %6081 = vmatprep.subr.bf16.mxu0 %v11742_v38  ;;  %v11805_v42 = vld [vmem:[#allocation8 + $0xc2c] ss:$36 sps:$4 sm:$0xff]   ;;  %v11808_v38 = vld [vmem:[#allocation8 + $0xc34] ss:$36 sps:$4 sm:$0xff]  }
 0xa99   :  { %5996 = vmatpush1.bf16.msra.mxu1 %v11737_v39  ;;  %v11803_v39 = vld [vmem:[#allocation8 + $0xc28] ss:$36 sps:$4 sm:$0xff]  }
 0xa9a   :  { %6082 = vmatpush1.bf16.msra.mxu0 %v11740_v11  ;;  %5997 = vmatprep.subr.bf16.mxu1 %v11745_v22  ;;  %v11806_v11 = vld [vmem:[#allocation8 + $0xc30] ss:$36 sps:$4 sm:$0xff]  }
 0xa9b   :  { %6083 = vmatprep.subr.bf16.mxu0 %v11748_v8  ;;  %v11811_v22 = vld [vmem:[#allocation8 + $0xc74] ss:$36 sps:$4 sm:$0xff]   ;;  %v11814_v8 = vld [vmem:[#allocation8 + $0xc7c] ss:$36 sps:$4 sm:$0xff]  }
 0xa9d   :  { %5998 = vmatpush1.bf16.msra.mxu1 %v11743_v54  ;;  %v11809_v54 = vld [vmem:[#allocation8 + $0xc70] ss:$36 sps:$4 sm:$0xff]  }
 0xa9e   :  { %6084 = vmatpush1.bf16.msra.mxu0 %v11746_v44  ;;  %5999 = vmatprep.subr.bf16.mxu1 %v11751_v19  ;;  %v11812_v44 = vld [vmem:[#allocation8 + $0xc78] ss:$36 sps:$4 sm:$0xff]  }
 0xa9f   :  { %6085 = vmatprep.subr.bf16.mxu0 %v11754_v41  ;;  %v11817_v19 = vld [vmem:[#allocation8 + $0xcbc] ss:$36 sps:$4 sm:$0xff]   ;;  %v11820_v41 = vld [vmem:[#allocation8 + $0xcc4] ss:$36 sps:$4 sm:$0xff]  }
 0xaa1   :  { %6000 = vmatpush1.bf16.msra.mxu1 %v11749_v40  ;;  %v11815_v40 = vld [vmem:[#allocation8 + $0xcb8] ss:$36 sps:$4 sm:$0xff]  }
 0xaa2   :  { %6086 = vmatpush1.bf16.msra.mxu0 %v11752_v37  ;;  %6001 = vmatprep.subr.bf16.mxu1 %v11757_v46  ;;  %v11818_v37 = vld [vmem:[#allocation8 + $0xcc0] ss:$36 sps:$4 sm:$0xff]  }
 0xaa3   :  { %6087 = vmatprep.subr.bf16.mxu0 %v11760_v47  ;;  %v11823_v46 = vld [vmem:[#allocation8 + $0xd04] ss:$36 sps:$4 sm:$0xff]   ;;  %v11826_v47 = vld [vmem:[#allocation8 + $0xd0c] ss:$36 sps:$4 sm:$0xff]  }
 0xaa5   :  { %6002 = vmatpush1.bf16.msra.mxu1 %v11755_v14  ;;  %v11821_v14 = vld [vmem:[#allocation8 + $0xd00] ss:$36 sps:$4 sm:$0xff]  }
 0xaa6   :  { %6088 = vmatpush1.bf16.msra.mxu0 %v11758_v36  ;;  %6003 = vmatprep.subr.bf16.mxu1 %v11763_v53  ;;  %v11824_v36 = vld [vmem:[#allocation8 + $0xd08] ss:$36 sps:$4 sm:$0xff]  }
 0xaa7   :  { %6089 = vmatprep.subr.bf16.mxu0 %v11766_v56  ;;  %v11829_v53 = vld [vmem:[#allocation8 + $0xd4c] ss:$36 sps:$4 sm:$0xff]   ;;  %v11832_v56 = vld [vmem:[#allocation8 + $0xd54] ss:$36 sps:$4 sm:$0xff]  }
 0xaa9   :  { %6004 = vmatpush1.bf16.msra.mxu1 %v11761_v61  ;;  %v11827_v61 = vld [vmem:[#allocation8 + $0xd48] ss:$36 sps:$4 sm:$0xff]  }
 0xaaa   :  { %6090 = vmatpush1.bf16.msra.mxu0 %v11764_v62  ;;  %6005 = vmatprep.subr.bf16.mxu1 %v11769_v51  ;;  %v11830_v62 = vld [vmem:[#allocation8 + $0xd50] ss:$36 sps:$4 sm:$0xff]   ;;  %v11833_v51 = vld [vmem:[#allocation8 + $0x920] ss:$36 sps:$4 sm:$0xff]  }
 0xaab   :  { %6091 = vmatprep.subr.bf16.mxu0 %v11772_v3  ;;  %v11834_v3 = vld [vmem:[#allocation8 + $0x6e0] ss:$36 sps:$4 sm:$0xff]  }
 0xaad   :  { %6006 = vmatpush1.bf16.msra.mxu1 %v11767_v5  ;;  %v11835_v5 = vld [vmem:[#allocation8 + $0xb60] ss:$36 sps:$4 sm:$0xff]  }
 0xaae   :  { %6092 = vmatpush1.bf16.msra.mxu0 %v11770_v6  ;;  %6007 = vmatprep.subr.bf16.mxu1 %v11775_v7  ;;  %v11836_v6 = vld [vmem:[#allocation8 + $0x968] ss:$36 sps:$4 sm:$0xff]  }
 0xaaf   :  { %6093 = vmatprep.subr.bf16.mxu0 %v11778_v15  ;;  %v11837_v7 = vld [vmem:[#allocation8 + $0x728] ss:$36 sps:$4 sm:$0xff]  }
 0xab0   :  { %v11838_v15 = vld [vmem:[#allocation8 + $0xba8] ss:$36 sps:$4 sm:$0xff]  }
 0xab1   :  { %6008 = vmatpush1.bf16.msra.mxu1 %v11773_v9  ;;  %v11839_v9 = vld [vmem:[#allocation8 + $0x9b0] ss:$36 sps:$4 sm:$0xff]  }
 0xab2   :  { %6094 = vmatpush1.bf16.msra.mxu0 %v11776_v10  ;;  %6009 = vmatprep.subr.bf16.mxu1 %v11781_v2  ;;  %v11840_v10 = vld [vmem:[#allocation8 + $0x770] ss:$36 sps:$4 sm:$0xff]  }
 0xab3   :  { %6095 = vmatprep.subr.bf16.mxu0 %v11784_v16  ;;  %v11841_v2 = vld [vmem:[#allocation8 + $0xbf0] ss:$36 sps:$4 sm:$0xff]   ;;  %v11842_v16 = vld [vmem:[#allocation8 + $0x9f8] ss:$36 sps:$4 sm:$0xff]  }
 0xab5   :  { %6010 = vmatpush1.bf16.msra.mxu1 %v11779_v20  ;;  %v11843_v20 = vld [vmem:[#allocation8 + $0x7b8] ss:$36 sps:$4 sm:$0xff]  }
 0xab6   :  { %6096 = vmatpush1.bf16.msra.mxu0 %v11782_v43  ;;  %6022 = vmatprep.subr.bf16.mxu1 %v11787_v50  ;;  %v11845_v43 = vld [vmem:[#allocation8 + $0xa40] ss:$36 sps:$4 sm:$0xff]  }
 0xab7   :  { %6108 = vmatprep.subr.bf16.mxu0 %v11790_v18  ;;  %v11846_v50 = vld [vmem:[#allocation8 + $0x800] ss:$36 sps:$4 sm:$0xff]  }
 0xab8   :  { %6012 = vmatmul.mubr.bf16.vlgmr.msra.gmra.mrb[44].mxu1 %v13520_v1  ;;  %v11847_v18 = vld [vmem:[#allocation8 + $0xc80] ss:$36 sps:$4 sm:$0xff]  }
 0xab9   :  { %6098 = vmatmul.mubr.bf16.vlgmr.msra.gmra.mrb[36].mxu0 %v13520_v1  ;;  %6023 = vmatpush1.bf16.msra.mxu1 %v11785_v23  ;;  %v11848_v23 = vld [vmem:[#allocation8 + $0xa88] ss:$36 sps:$4 sm:$0xff]  }
 0xaba   :  { %6109 = vmatpush1.bf16.msra.mxu0 %v11788_v25  ;;  %6024 = vmatprep.subr.bf16.mxu1 %v11793_v48  ;;  %v11849_v25 = vld [vmem:[#allocation8 + $0x848] ss:$36 sps:$4 sm:$0xff]  }
 0xabb   :  { %6110 = vmatprep.subr.bf16.mxu0 %v11796_v26  ;;  %6054 = vmatprep.mubr.bf16.mxu1 %v12767_v24  ;;  %v11850_v48 = vld [vmem:[#allocation8 + $0xcc8] ss:$36 sps:$4 sm:$0xff]   ;;  %v11851_v26 = vld [vmem:[#allocation8 + $0xad0] ss:$36 sps:$4 sm:$0xff]  }
 0xabc   :  { %6140 = vmatprep.mubr.bf16.mxu0 %v12767_v24 }
 0xabd   :  { %6025 = vmatpush1.bf16.msra.mxu1 %v11791_v27  ;;  %v11852_v27 = vld [vmem:[#allocation8 + $0x890] ss:$36 sps:$4 sm:$0xff]  }
 0xabe   :  { %6111 = vmatpush1.bf16.msra.mxu0 %v11794_v28  ;;  %6026 = vmatprep.subr.bf16.mxu1 %v11799_v29  ;;  %v11853_v28 = vld [vmem:[#allocation8 + $0xd10] ss:$36 sps:$4 sm:$0xff]   ;;  %v11854_v29 = vld [vmem:[#allocation8 + $0xb18] ss:$36 sps:$4 sm:$0xff]  }
 0xabf   :  { %6112 = vmatprep.subr.bf16.mxu0 %v11802_v34  ;;  %v11855_v34 = vld [vmem:[#allocation8 + $0x8d8] ss:$36 sps:$4 sm:$0xff]  }
 0xac1   :  { %6027 = vmatpush1.bf16.msra.mxu1 %v11797_v4  ;;  %v11856_v4 = vld [vmem:[#allocation8 + $0xd58] ss:$36 sps:$4 sm:$0xff]  }
 0xac2   :  { %6113 = vmatpush1.bf16.msra.mxu0 %v11800_v35  ;;  %6028 = vmatprep.subr.bf16.mxu1 %v11805_v42  ;;  %v4654_v35 = vld [vmem:[#allocation10 + $0x9] sm:$0xff] }
 0xac3   :  { %6114 = vmatprep.subr.bf16.mxu0 %v11808_v38  ;;  %v4665_v42 = vrot.slane %v4654_v35, %v13268_v0 }
 0xac5   :  { %6029 = vmatpush1.bf16.msra.mxu1 %v11803_v39 }
 0xac6   :  { %6115 = vmatpush1.bf16.msra.mxu0 %v11806_v11  ;;  %6030 = vmatprep.subr.bf16.mxu1 %v11811_v22 }
 0xac7   :  { %6116 = vmatprep.subr.bf16.mxu0 %v11814_v8 }
 0xac9   :  { %6031 = vmatpush1.bf16.msra.mxu1 %v11809_v54 }
 0xaca   :  { %6117 = vmatpush1.bf16.msra.mxu0 %v11812_v44  ;;  %6032 = vmatprep.subr.bf16.mxu1 %v11817_v19 }
 0xacb   :  { %6118 = vmatprep.subr.bf16.mxu0 %v11820_v41 }
 0xacd   :  { %6033 = vmatpush1.bf16.msra.mxu1 %v11815_v40 }
 0xace   :  { %6119 = vmatpush1.bf16.msra.mxu0 %v11818_v37  ;;  %6034 = vmatprep.subr.bf16.mxu1 %v11823_v46  ;;  %v4685_v46 = vrot.slane %v4654_v35, %v788_v32  ;;  %v4681_v32 = vrot.slane %v4654_v35, %v784_v21 }
 0xacf   :  { %6120 = vmatprep.subr.bf16.mxu0 %v11826_v47  ;;  %v4689_v47 = vrot.slane %v4654_v35, %v792_v33 }
 0xad1   :  { %6035 = vmatpush1.bf16.msra.mxu1 %v11821_v14 }
 0xad2   :  { %6121 = vmatpush1.bf16.msra.mxu0 %v11824_v36  ;;  %6036 = vmatprep.subr.bf16.mxu1 %v11829_v53 }
 0xad3   :  { %6122 = vmatprep.subr.bf16.mxu0 %v11832_v56 }
 0xad5   :  { %6037 = vmatpush1.bf16.msra.mxu1 %v11827_v61 }
 0xad6   :  { %6123 = vmatpush1.bf16.msra.mxu0 %v11830_v62  ;;  %10573 = vmatprep.subr.bf16.mxu1 %v11833_v51 }
 0xad7   :  { %10773 = vmatprep.subr.bf16.mxu0 %v12768_v45 }
 0xad8   :  { %6055 = vmatmul.mubr.bf16.vlgmr.msra.gmra.mrb[44].mxu1 %v13544_v52 }
 0xad9   :  { %6141 = vmatmul.mubr.bf16.vlgmr.msra.gmra.mrb[36].mxu0 %v13544_v52  ;;  %10574 = vmatpush3.bf16.msra.mxu1 %v11834_v3 }
 0xada   :  { %6183 = vmatprep.mubr.bf16.mxu1 %v13516_v60  ;;  %10774 = vmatpush3.bf16.msra.mxu0 %v11835_v5  ;;  %v11844_v60 = vld [vmem:[#allocation8 + $0xc38] ss:$36 sps:$4 sm:$0xff]   ;;  %v4661_v5 = vrot.slane %v4654_v35, %v13285_v17 }
 0xadb   :  { %10575 = vmatprep.subr.bf16.mxu1 %v11836_v6  ;;  %10775 = vmatprep.subr.bf16.mxu0 %v12768_v45 }
 0xadc   :  { %10789 = vmatprep.mubr.msk.bf16.mxu0 %vm12769_vm1, %v12768_v45 }
 0xadd   :  { %10576 = vmatpush3.bf16.msra.mxu1 %v11837_v7 }
 0xade   :  { %10776 = vmatpush3.bf16.msra.mxu0 %v11838_v15  ;;  %10577 = vmatprep.subr.bf16.mxu1 %v11839_v9 }
 0xadf   :  { %10777 = vmatprep.subr.bf16.mxu0 %v12768_v45 }
 0xae1   :  { %10578 = vmatpush3.bf16.msra.mxu1 %v11840_v10 }
 0xae2   :  { %10778 = vmatpush3.bf16.msra.mxu0 %v11841_v2  ;;  %10579 = vmatprep.subr.bf16.mxu1 %v11842_v16 }
 0xae3   :  { %10779 = vmatprep.subr.bf16.mxu0 %v12768_v45 }
 0xae5   :  { %10580 = vmatpush3.bf16.msra.mxu1 %v11843_v20 }
 0xae6   :  { %10780 = vmatpush3.bf16.msra.mxu0 %v11844_v60  ;;  %10581 = vmatprep.subr.bf16.mxu1 %v11845_v43 }
 0xae7   :  { %10781 = vmatprep.subr.bf16.mxu0 %v12768_v45 }
 0xae9   :  { %10582 = vmatpush3.bf16.msra.mxu1 %v11846_v50 }
 0xaea   :  { %10782 = vmatpush3.bf16.msra.mxu0 %v11847_v18  ;;  %10583 = vmatprep.subr.bf16.mxu1 %v11848_v23 }
 0xaeb   :  { %10783 = vmatprep.subr.bf16.mxu0 %v12768_v45 }
 0xaed   :  { %10584 = vmatpush3.bf16.msra.mxu1 %v11849_v25 }
 0xaee   :  { %10784 = vmatpush3.bf16.msra.mxu0 %v11850_v48  ;;  %10585 = vmatprep.subr.bf16.mxu1 %v11851_v26  ;;  %v4669_v48 = vrot.slane %v4654_v35, %v13292_v31 }
 0xaef   :  { %10785 = vmatprep.subr.bf16.mxu0 %v12768_v45 }
 0xaf1   :  { %10586 = vmatpush3.bf16.msra.mxu1 %v11852_v27 }
 0xaf2   :  { %10786 = vmatpush3.bf16.msra.mxu0 %v11853_v28  ;;  %10587 = vmatprep.subr.bf16.mxu1 %v11854_v29 }
 0xaf3   :  { %10787 = vmatprep.subr.bf16.mxu0 %v12768_v45 }
 0xaf5   :  { %10588 = vmatpush3.bf16.msra.mxu1 %v11855_v34 }
 0xaf6   :  { %10788 = vmatpush3.bf16.msra.mxu0 %v11856_v4 }
 0xaf8   :  { %6184 = vmatmul.mubr.bf16.vlgmr.msra.gmra.mrb[48].mxu1 %v13520_v1  ;;  %v4673_v1 = vrot.slane %v4654_v35, %v13278_v12 }
 0xaf9   :  { %10790 = vmatmul.mubr.bf16.vlgmr.msra.gmra.mrb[40].mxu0 %v13544_v52  ;;  %v4677_v52 = vrot.slane %v4654_v35, %v780_v13 }
 0xafa   :  { %6481 = vmatprep.mubr.bf16.mxu0 %v12767_v24 }
 0xb4b   :  { %v5884_v38 = vpop.f32.mrb[40].mxu1  ;;  %v5970_v39 = vpop.f32.mrb[32].mxu0 }
 0xb4c   :  { %v5886_v11 = vpop.f32.mrb[41].mxu1  ;;  %v5972_v22 = vpop.f32.mrb[33].mxu0  ;;  %v10861_v43 = vadd.f32 %v5884_v38, %v4661_v5  ;;  %v10865_v26 = vadd.f32 %v5970_v39, %v4669_v48 }
 0xb4d   :  { %v10862_v8 = vadd.f32 %v5886_v11, %v4665_v42  ;;  %v5888_v54 = vpop.f32.mrb[42].mxu1  ;;  %v13571_v44 = vpop.f32.mrb[34].mxu0  ;;  %v10866_v14 = vadd.f32 %v5972_v22, %v4673_v1 }
 0xb4e   :  { %v5890_v19 = vpop.f32.mrb[43].mxu1  ;;  %v5976_v41 = vpop.f32.mrb[35].mxu0  ;;  %v6233_v63 = vpack.c.bf16 %v10861_v43, %v10861_v43  ;;  %v6235_v28 = vpack.c.bf16 %v10865_v26, %v10865_v26  ;;  %v10863_v4 = vadd.f32 %v5888_v54, %v4661_v5 }
 0xb4f   :  { %v6234_v40 = vpack.c.bf16 %v10862_v8, %v10862_v8  ;;  %v10864_v37 = vadd.f32 %v5890_v19, %v4665_v42  ;;  %v6239_v9 = vpack.c.bf16 %v10866_v14, %v10866_v14  ;;  %v10868_v27 = vadd.f32 %v5976_v41, %v4673_v1  ;;  %v9961_v19 = vld [vmem:[#allocation10 + $0x11] ss:$0 sm:$0xff] }
 0xb50   :  { %v6236_v38 = vpack.c.bf16 %v10863_v4, %v10863_v4  ;;  %v11859_v4 = vld [vmem:[#allocation11 + $0x244] ss:$12 sps:$4 sm:$0xff]  }
 0xb51   :  { %6277 = vmatprep.mubr.bf16.mxu1 %v6234_v40  ;;  %v6237_v29 = vpack.c.bf16 %v10864_v37, %v10864_v37  ;;  %v6242_v34 = vpack.c.bf16 %v10868_v27, %v10868_v27 }
 0xbab   :  { %v6056_v36 = vpop.f32.mrb[44].mxu1 }
 0xbac   :  { %v10869_v53 = vadd.f32 %v6056_v36, %v4677_v52  ;;  %v6142_v56 = vpop.f32.mrb[36].mxu0  ;;  %v6058_v61 = vpop.f32.mrb[45].mxu1  ;;  %v10867_v36 = vadd.f32 %v13571_v44, %v4669_v48 }
 0xbad   :  { %v10873_v62 = vadd.f32 %v6142_v56, %v4685_v46  ;;  %v6144_v51 = vpop.f32.mrb[37].mxu0  ;;  %v6060_v3 = vpop.f32.mrb[46].mxu1  ;;  %v10870_v18 = vadd.f32 %v6058_v61, %v4681_v32 }
 0xbae   :  { %v6240_v6 = vpack.c.bf16 %v10869_v53, %v10869_v53  ;;  %v10874_v7 = vadd.f32 %v6144_v51, %v4689_v47  ;;  %v6146_v15 = vpop.f32.mrb[38].mxu0  ;;  %v6062_v13 = vpop.f32.mrb[47].mxu1  ;;  %v10871_v23 = vadd.f32 %v6060_v3, %v4677_v52  ;;  %v6238_v61 = vpack.c.bf16 %v10867_v36, %v10867_v36  ;;  %v11869_v36 = vld [vmem:[#allocation11 + $0x2a0] ss:$12 sps:$4 sm:$0xff]  }
 0xbaf   :  { %v6431_v10 = vpack.c.bf16 %v10873_v62, %v10873_v62  ;;  %v13583_v33 = vadd.f32 %v6146_v15, %v4685_v46  ;;  %v6148_v2 = vpop.f32.mrb[39].mxu0  ;;  %v6241_v21 = vpack.c.bf16 %v10870_v18, %v10870_v18  ;;  %v10872_v42 = vadd.f32 %v6062_v13, %v4681_v32 }
 0xbb0   :  { %v6432_v16 = vpack.c.bf16 %v10874_v7, %v10874_v7  ;;  %v10876_v20 = vadd.f32 %v6148_v2, %v4689_v47  ;;  %6245 = vmatprep.subr.bf16.mxu1 %v6240_v6  ;;  %v6243_v25 = vpack.c.bf16 %v10871_v23, %v10871_v23 }
 0xbb1   :  { %v6441_v60 = vsel %vm2545_vm2, %v6431_v10, 0  ;;  %6246 = vmatpush1.bf16.xpose.msra.mxu1 %v6239_v9  ;;  %v6244_v11 = vpack.c.bf16 %v10872_v42, %v10872_v42  ;;  %v6434_v27 = vpack.c.bf16 %v13583_v33, %v13583_v33  ;;  %v11884_v42 = vld [vmem:[#allocation11 + $0x308] ss:$12 sps:$4 sm:$0xff]  }
 0xbb2   :  { %v6435_v50 = vpack.c.bf16 %v10876_v20, %v10876_v20  ;;  %10178 = vmatprep.subr.msk.bf16.mxu0 %vm2545_vm2, %v6432_v16  ;;  %10793 = vmatprep.subr.bf16.mxu1 %v12768_v45 }
 0xbb3   :  { %6450 = vmatpush1.bf16.msra.mxu0 %v6441_v60 }
 0xbb4   :  { %10181 = vmatprep.subr.msk.bf16.mxu0 %vm2545_vm2, %v6435_v50 }
 0xbb8   :  { %6278 = vmatmul.mubr.bf16.vlgmr.msra.gmra.mrb[52].mxu1 %v6233_v63 }
 0xbb9   :  { %10794 = vmatpush3.bf16.xpose.msra.mxu1 %v6241_v21  ;;  %10795 = vmatprep.mubr.msk.bf16.mxu1 %vm12769_vm1, %v12768_v45 }
 0xbba   :  { %6325 = vmatprep.subr.bf16.mxu1 %v6243_v25 }
 0xbc4   :  { %10796 = vmatmul.mubr.bf16.vlgmr.msra.gmra.mrb[52].mxu1 %v6235_v28 }
 0xbc5   :  { %6326 = vmatpush1.bf16.xpose.msra.mxu1 %v6242_v34  ;;  %6357 = vmatprep.mubr.bf16.mxu1 %v6237_v29 }
 0xbc6   :  { %10799 = vmatprep.subr.bf16.mxu1 %v12768_v45 }
 0xbcb   :  { %v10589_v22 = vpop.f32.mrb[48].mxu1 }
 0xbcc   :  { %v6226_v8 = vpop.f32.mrb[40].mxu0  ;;  %v10590_v40 = vpop.f32.mrb[49].mxu1  ;;  %6358 = vmatmul.mubr.bf16.vlgmr.msra.gmra.mrb[56].mxu1 %v6236_v38  ;;  %v6534_v38 = vsel %vm2545_vm2, %v6434_v27, 0  ;;  %v11911_v27 = vld [vmem:[#allocation11 + $0x390] ss:$12 sps:$4 sm:$0xff]  }
 0xbcd   :  { %v10591_v35 = vadd.f32 %v10590_v40, %v10589_v22  ;;  %v10791_v39 = vpop.f32.mrb[41].mxu0  ;;  %10800 = vmatpush3.bf16.xpose.msra.mxu1 %v6244_v11  ;;  %v10592_v41 = vpop.f32.mrb[50].mxu1  ;;  %10801 = vmatprep.mubr.msk.bf16.mxu1 %vm12769_vm1, %v12768_v45  ;;  %v11885_v40 = vld [vmem:[#allocation11 + $0x248] ss:$12 sps:$4 sm:$0xff]  }
 0xbce   :  { %v6229_v37 = vpop.f32.mrb[42].mxu0  ;;  %v10593_v1 = vpop.f32.mrb[51].mxu1  ;;  %10805 = vmatprep.subr.bf16.mxu1 %v12768_v45  ;;  %v11862_v39 = vld [vmem:[#allocation11 + $0x25c] ss:$12 sps:$4 sm:$0xff]  }
 0xbcf   :  { %v6186_v54 = vadd.f32 %v10591_v35, %v9961_v19  ;;  %v10594_v52 = vadd.f32 %v10593_v1, %v10592_v41  ;;  %v10792_v46 = vpop.f32.mrb[43].mxu0  ;;  %v11889_v41 = vld [vmem:[#allocation11 + $0x320] ss:$12 sps:$4 sm:$0xff]  }
 0xbd0   :  { %v11890_v1 = vld [vmem:[#allocation11 + $0x260] ss:$12 sps:$4 sm:$0xff]  }
 0xbd1   :  { %v6227_v47 = vadd.f32 %v6226_v8, %v6186_v54  ;;  %v6189_v14 = vadd.f32 %v10594_v52, %v9961_v19  ;;  %v11857_v19 = vld [vmem:[#allocation11 + $0x240] ss:$12 sps:$4 sm:$0xff]   ;;  %v11863_v52 = vld [vmem:[#allocation11 + $0x270] ss:$12 sps:$4 sm:$0xff]  }
 0xbd2   :  { %v11865_v54 = vld [vmem:[#allocation11 + $0x274] ss:$12 sps:$4 sm:$0xff]   ;;  %v11868_v46 = vld [vmem:[#allocation11 + $0x28c] ss:$12 sps:$4 sm:$0xff]  }
 0xbd3   :  { %v6230_v53 = vadd.f32 %v6229_v37, %v6189_v14  ;;  %v6433_v56 = vpack.c.bf16 %v6227_v47, %v6227_v47  ;;  %v11860_v37 = vld [vmem:[#allocation11 + $0x258] ss:$12 sps:$4 sm:$0xff]   ;;  %v11866_v47 = vld [vmem:[#allocation11 + $0x288] ss:$12 sps:$4 sm:$0xff]  }
 0xbd4   :  { %v11871_v14 = vld [vmem:[#allocation11 + $0x2a4] ss:$12 sps:$4 sm:$0xff]  }
 0xbd5   :  { %v6447_v62 = vsel %vm2545_vm2, %v6433_v56, 0  ;;  %v6436_v28 = vpack.c.bf16 %v6230_v53, %v6230_v53  ;;  %v11874_v53 = vld [vmem:[#allocation11 + $0x2bc] ss:$12 sps:$4 sm:$0xff]   ;;  %v11872_v56 = vld [vmem:[#allocation11 + $0x2b8] ss:$12 sps:$4 sm:$0xff]  }
 0xbd7   :  { %v6540_v11 = vsel %vm2545_vm2, %v6436_v28, 0  ;;  %v11915_v28 = vld [vmem:[#allocation11 + $0x2d8] ss:$12 sps:$4 sm:$0xff]  }
 0xbd8   :  { %10802 = vmatmul.mubr.bf16.vlgmr.msra.gmra.mrb[56].mxu1 %v6238_v61  ;;  %v11877_v61 = vld [vmem:[#allocation11 + $0x2d4] ss:$12 sps:$4 sm:$0xff]  }
 0xbd9   :  { %10806 = vmatpush3.bf16.msra.mxu1 %v6447_v62  ;;  %10807 = vmatprep.mubr.msk.bf16.mxu1 %vm12769_vm1, %v12768_v45  ;;  %v11875_v62 = vld [vmem:[#allocation11 + $0x2d0] ss:$12 sps:$4 sm:$0xff]  }
 0xbda   :  { %10811 = vmatprep.subr.bf16.mxu1 %v12768_v45 }
 0xc97   :  { %v6319_v51 = vpop.f32.mrb[52].mxu1 }
 0xc98   :  { %v6405_v3 = vmul.f32 0.057735026, %v6319_v51  ;;  %v10797_v5 = vpop.f32.mrb[53].mxu1  ;;  %v11880_v51 = vld [vmem:[#allocation11 + $0x2ec] ss:$12 sps:$4 sm:$0xff]  }
 0xc99   :  { %v6322_v6 = vpop.f32.mrb[54].mxu1  ;;  %v11883_v5 = vld [vmem:[#allocation11 + $0x304] ss:$12 sps:$4 sm:$0xff]  }
 0xc9a   :  { %v10798_v7 = vpop.f32.mrb[55].mxu1  ;;  %v6407_v15 = vsel %vm2511_vm3, %v6405_v3, -inf  ;;  %v11881_v6 = vld [vmem:[#allocation11 + $0x300] ss:$12 sps:$4 sm:$0xff]  }
 0xc9b   :  { %6408 = vmax.xlane.f32.xlu0 %v6407_v15  ;;  %v11888_v7 = vld [vmem:[#allocation11 + $0x31c] ss:$12 sps:$4 sm:$0xff]   ;;  %v11886_v15 = vld [vmem:[#allocation11 + $0x318] ss:$12 sps:$4 sm:$0xff]  }
 0xcab   :  { %v6399_v44 = vpop.f32.mrb[56].mxu1 }
 0xcac   :  { %v6406_v13 = vmul.f32 0.057735026, %v6399_v44  ;;  %v10803_v9 = vpop.f32.mrb[57].mxu1  ;;  %v11893_v44 = vld [vmem:[#allocation11 + $0x334] ss:$12 sps:$4 sm:$0xff]  }
 0xcad   :  { %v6402_v10 = vpop.f32.mrb[58].mxu1  ;;  %v11891_v9 = vld [vmem:[#allocation11 + $0x330] ss:$12 sps:$4 sm:$0xff]  }
 0xcae   :  { %v10804_v32 = vpop.f32.mrb[59].mxu1  ;;  %v6410_v2 = vsel %vm2511_vm3, %v6406_v13, -inf  ;;  %v11895_v10 = vld [vmem:[#allocation11 + $0x278] ss:$12 sps:$4 sm:$0xff]  }
 0xcaf   :  { %6411 = vmax.xlane.f32.xlu1 %v6410_v2  ;;  %v11896_v32 = vld [vmem:[#allocation11 + $0x348] ss:$12 sps:$4 sm:$0xff]   ;;  %v11898_v2 = vld [vmem:[#allocation11 + $0x34c] ss:$12 sps:$4 sm:$0xff]  }
 0xd28   :  { %v6409_v16 = vpop.xlane.xlu0 %6408 }
 0xd29   :  { %v6413_v20 = vsub.f32 %v6405_v3, %v6409_v16  ;;  %v11878_v3 = vld [vmem:[#allocation11 + $0x2e8] ss:$12 sps:$4 sm:$0xff]   ;;  %v11899_v16 = vld [vmem:[#allocation11 + $0x350] ss:$12 sps:$4 sm:$0xff]  }
 0xd2b   :  { %v6415_v60 = vmul.f32 1.442695, %v6413_v20  ;;  %v11900_v20 = vld [vmem:[#allocation11 + $0x290] ss:$12 sps:$4 sm:$0xff]  }
 0xd2d   :  { %12281 = vpow2.f32 %v6415_v60  ;;  %v11903_v60 = vld [vmem:[#allocation11 + $0x364] ss:$12 sps:$4 sm:$0xff]  }
 0xd37   :  { %v12282_v43 = vpop.eup %12281 }
 0xd38   :  { %v6419_v50 = vsel %vm2511_vm3, %v12282_v43, 0.0 }
 0xd39   :  { %6420 = vadd.xlane.f32.xlu0 %v6419_v50  ;;  %v11901_v50 = vld [vmem:[#allocation11 + $0x360] ss:$12 sps:$4 sm:$0xff]  }
 0xd3c   :  { %v6412_v18 = vpop.xlane.xlu1 %6411 }
 0xd3d   :  { %v6414_v23 = vsub.f32 %v6406_v13, %v6412_v18  ;;  %v11894_v13 = vld [vmem:[#allocation11 + $0x338] ss:$12 sps:$4 sm:$0xff]   ;;  %v11905_v18 = vld [vmem:[#allocation11 + $0x2a8] ss:$12 sps:$4 sm:$0xff]  }
 0xd3f   :  { %v6417_v63 = vmul.f32 1.442695, %v6414_v23  ;;  %v11908_v23 = vld [vmem:[#allocation11 + $0x37c] ss:$12 sps:$4 sm:$0xff]  }
 0xd41   :  { %12283 = vpow2.f32 %v6417_v63  ;;  %v11909_v63 = vld [vmem:[#allocation11 + $0x380] ss:$12 sps:$4 sm:$0xff]  }
 0xd4b   :  { %v12284_v21 = vpop.eup %12283 }
 0xd4c   :  { %v6422_v25 = vsel %vm2511_vm3, %v12284_v21, 0.0 }
 0xd4d   :  { %6423 = vadd.xlane.f32.xlu1 %v6422_v25  ;;  %v11910_v25 = vld [vmem:[#allocation11 + $0x2c0] ss:$12 sps:$4 sm:$0xff]  }
 0xdc6   :  { %v6421_v48 = vpop.xlane.xlu0 %6420 }
 0xdc7   :  { %12285 = vrcp.f32 %v6421_v48  ;;  %v11913_v48 = vld [vmem:[#allocation11 + $0x394] ss:$12 sps:$4 sm:$0xff]  }
 0xdd1   :  { %v12286_v26 = vpop.eup %12285 }
 0xdd2   :  { %v6427_v29 = vmul.f32 %v12286_v26, %v12282_v43  ;;  %v11904_v43 = vld [vmem:[#allocation11 + $0x368] ss:$12 sps:$4 sm:$0xff]   ;;  %v11914_v26 = vld [vmem:[#allocation11 + $0x398] ss:$12 sps:$4 sm:$0xff]  }
 0xdd4   :  { %v6429_v34 = vpack.c.bf16 %v6427_v29, %v6427_v29  ;;  %v11918_v29 = vld [vmem:[#allocation11 + $0x3ac] ss:$12 sps:$4 sm:$0xff]  }
 0xdd6   :  { %10179 = vmatmul.mubr.msk.bf16.vlgmr.msra.gmra.mrb[44].mxu0 %vm2511_vm3, %v6429_v34  ;;  %10808 = vmatmul.mubr.msk.bf16.vlgmr.msra.gmra.mrb[60].mxu1 %vm2511_vm3, %v6429_v34  ;;  %v11919_v34 = vld [vmem:[#allocation11 + $0x3b0] ss:$12 sps:$4 sm:$0xff]  }
 0xdd7   :  { %6543 = vmatpush1.bf16.msra.mxu0 %v6534_v38  ;;  %10812 = vmatpush3.bf16.msra.mxu1 %v6540_v11  ;;  %v11923_v38 = vld [vmem:[#allocation11 + $0x3c4] ss:$12 sps:$4 sm:$0xff]  }
 0xdd8   :  { %6574 = vmatprep.mubr.bf16.mxu0 %v12767_v24  ;;  %10813 = vmatprep.mubr.msk.bf16.mxu1 %vm12769_vm1, %v12768_v45 }
 0xdd9   :  { %7125 = vmatprep.subr.bf16.mxu0 %v11859_v4  ;;  %10612 = vmatprep.subr.bf16.mxu1 %v11884_v42  ;;  %v11916_v4 = vld [vmem:[#allocation11 + $0x3a8] ss:$12 sps:$4 sm:$0xff]   ;;  %v11920_v42 = vld [vmem:[#allocation11 + $0x2f0] ss:$12 sps:$4 sm:$0xff]  }
 0xdda   :  { %v6424_v33 = vpop.xlane.xlu1 %6423 }
 0xddb   :  { %12287 = vrcp.f32 %v6424_v33 }
 0xde5   :  { %v12288_v22 = vpop.eup %12287 }
 0xde6   :  { %v6428_v8 = vmul.f32 %v12288_v22, %v12284_v21  ;;  %v11906_v21 = vld [vmem:[#allocation11 + $0x378] ss:$12 sps:$4 sm:$0xff]  }
 0xde8   :  { %v6430_v35 = vpack.c.bf16 %v6428_v8, %v6428_v8 }
 0xdea   :  { %10182 = vmatmul.mubr.msk.bf16.vlgmr.msra.gmra.mrb[48].mxu0 %vm2511_vm3, %v6430_v35  ;;  %10814 = vmatmul.mubr.msk.bf16.vlgmr.msra.gmra.mrb[64].mxu1 %vm2511_vm3, %v6430_v35 }
 0xdeb   :  { %7126 = vmatpush1.bf16.msra.mxu0 %v11857_v19  ;;  %10613 = vmatpush3.bf16.msra.mxu1 %v11885_v40 }
 0xdec   :  { %7127 = vmatprep.subr.bf16.mxu0 %v11862_v39  ;;  %10614 = vmatprep.subr.bf16.mxu1 %v11889_v41 }
 0xdef   :  { %7128 = vmatpush1.bf16.msra.mxu0 %v11860_v37  ;;  %10615 = vmatpush3.bf16.msra.mxu1 %v11890_v1 }
 0xdf0   :  { %7129 = vmatprep.subr.bf16.mxu0 %v11865_v54  ;;  %10616 = vmatprep.subr.bf16.mxu1 %v11894_v13  ;;  %v11933_v13 = vld [vmem:[#allocation11 + $0x408] ss:$12 sps:$4 sm:$0xff]  }
 0xdf3   :  { %7130 = vmatpush1.bf16.msra.mxu0 %v11863_v52  ;;  %10617 = vmatpush3.bf16.msra.mxu1 %v11895_v10  ;;  %v11939_v10 = vld [vmem:[#allocation11 + $0x424] ss:$12 sps:$4 sm:$0xff]  }
 0xdf4   :  { %7131 = vmatprep.subr.bf16.mxu0 %v11868_v46  ;;  %10618 = vmatprep.subr.bf16.mxu1 %v11899_v16  ;;  %v11943_v16 = vld [vmem:[#allocation11 + $0x43c] ss:$12 sps:$4 sm:$0xff]  }
 0xdf7   :  { %7132 = vmatpush1.bf16.msra.mxu0 %v11866_v47  ;;  %10619 = vmatpush3.bf16.msra.mxu1 %v11900_v20  ;;  %v11941_v20 = vld [vmem:[#allocation11 + $0x438] ss:$12 sps:$4 sm:$0xff]  }
 0xdf8   :  { %7133 = vmatprep.subr.bf16.mxu0 %v11871_v14  ;;  %10620 = vmatprep.subr.bf16.mxu1 %v11904_v43  ;;  %v11947_v43 = vld [vmem:[#allocation11 + $0x454] ss:$12 sps:$4 sm:$0xff]  }
 0xdfb   :  { %7134 = vmatpush1.bf16.msra.mxu0 %v11869_v36  ;;  %10621 = vmatpush3.bf16.msra.mxu1 %v11905_v18  ;;  %v11948_v18 = vld [vmem:[#allocation11 + $0x458] ss:$12 sps:$4 sm:$0xff]  }
 0xdfc   :  { %7135 = vmatprep.subr.bf16.mxu0 %v11874_v53  ;;  %10622 = vmatprep.subr.bf16.mxu1 %v11909_v63  ;;  %v11921_v53 = vld [vmem:[#allocation11 + $0x3c0] ss:$12 sps:$4 sm:$0xff]   ;;  %v11949_v63 = vld [vmem:[#allocation11 + $0x468] ss:$12 sps:$4 sm:$0xff]  }
 0xdff   :  { %7136 = vmatpush1.bf16.msra.mxu0 %v11872_v56  ;;  %10623 = vmatpush3.bf16.msra.mxu1 %v11910_v25  ;;  %v11924_v56 = vld [vmem:[#allocation11 + $0x3c8] ss:$12 sps:$4 sm:$0xff]  }
 0xe00   :  { %7137 = vmatprep.subr.bf16.mxu0 %v11877_v61  ;;  %10624 = vmatprep.subr.bf16.mxu1 %v11914_v26  ;;  %v11953_v25 = vld [vmem:[#allocation17 + $0x180] ss:$8 sps:$4 sm:$0xff]   ;;  %v11958_v26 = vld [vmem:[#allocation17 + $0x194] ss:$8 sps:$4 sm:$0xff]  }
 0xe03   :  { %7138 = vmatpush1.bf16.msra.mxu0 %v11875_v62  ;;  %10625 = vmatpush3.bf16.msra.mxu1 %v11915_v28  ;;  %v11961_v28 = vld [vmem:[#allocation17 + $0x1a4] ss:$8 sps:$4 sm:$0xff]  }
 0xe04   :  { %7139 = vmatprep.subr.bf16.mxu0 %v11880_v51  ;;  %10626 = vmatprep.subr.bf16.mxu1 %v11919_v34  ;;  %v11927_v51 = vld [vmem:[#allocation11 + $0x3dc] ss:$12 sps:$4 sm:$0xff]  }
 0xe05   :  { %v11964_v34 = vld [vmem:[#allocation17 + $0x1b4] ss:$8 sps:$4 sm:$0xff]  }
 0xe07   :  { %7140 = vmatpush1.bf16.msra.mxu0 %v11878_v3  ;;  %10627 = vmatpush3.bf16.msra.mxu1 %v11920_v42  ;;  %v11925_v3 = vld [vmem:[#allocation11 + $0x3d8] ss:$12 sps:$4 sm:$0xff]  }
 0xe08   :  { %7141 = vmatprep.subr.bf16.mxu0 %v11883_v5  ;;  %10817 = vmatprep.subr.bf16.mxu1 %v12768_v45  ;;  %v11928_v5 = vld [vmem:[#allocation11 + $0x3e0] ss:$12 sps:$4 sm:$0xff]   ;;  %v11965_v42 = vld [vmem:[#allocation17 + $0x1c0] ss:$8 sps:$4 sm:$0xff]  }
 0xe0b   :  { %7142 = vmatpush1.bf16.msra.mxu0 %v11881_v6  ;;  %v11931_v6 = vld [vmem:[#allocation11 + $0x3f4] ss:$12 sps:$4 sm:$0xff]  }
 0xe0c   :  { %7143 = vmatprep.subr.bf16.mxu0 %v11888_v7  ;;  %v11929_v7 = vld [vmem:[#allocation11 + $0x3f0] ss:$12 sps:$4 sm:$0xff]  }
 0xe0f   :  { %7144 = vmatpush1.bf16.msra.mxu0 %v11886_v15  ;;  %v11932_v15 = vld [vmem:[#allocation11 + $0x3f8] ss:$12 sps:$4 sm:$0xff]  }
 0xe10   :  { %7145 = vmatprep.subr.bf16.mxu0 %v11893_v44  ;;  %v11935_v44 = vld [vmem:[#allocation11 + $0x40c] ss:$12 sps:$4 sm:$0xff]  }
 0xe13   :  { %7146 = vmatpush1.bf16.msra.mxu0 %v11891_v9  ;;  %v11936_v9 = vld [vmem:[#allocation11 + $0x410] ss:$12 sps:$4 sm:$0xff]  }
 0xe14   :  { %7147 = vmatprep.subr.bf16.mxu0 %v11898_v2  ;;  %v11940_v2 = vld [vmem:[#allocation11 + $0x428] ss:$12 sps:$4 sm:$0xff]  }
 0xe17   :  { %7148 = vmatpush1.bf16.msra.mxu0 %v11896_v32  ;;  %v11937_v32 = vld [vmem:[#allocation11 + $0x420] ss:$12 sps:$4 sm:$0xff]  }
 0xe18   :  { %7149 = vmatprep.subr.bf16.mxu0 %v11903_v60  ;;  %v11944_v60 = vld [vmem:[#allocation11 + $0x440] ss:$12 sps:$4 sm:$0xff]  }
 0xe1b   :  { %7150 = vmatpush1.bf16.msra.mxu0 %v11901_v50  ;;  %v11945_v50 = vld [vmem:[#allocation11 + $0x450] ss:$12 sps:$4 sm:$0xff]  }
 0xe1c   :  { %7151 = vmatprep.subr.bf16.mxu0 %v11908_v23  ;;  %v11951_v23 = vld [vmem:[#allocation11 + $0x46c] ss:$12 sps:$4 sm:$0xff]  }
 0xe1f   :  { %7152 = vmatpush1.bf16.msra.mxu0 %v11906_v21  ;;  %v11952_v21 = vld [vmem:[#allocation11 + $0x470] ss:$12 sps:$4 sm:$0xff]  }
 0xe20   :  { %7153 = vmatprep.subr.bf16.mxu0 %v11913_v48  ;;  %v11955_v48 = vld [vmem:[#allocation17 + $0x184] ss:$8 sps:$4 sm:$0xff]  }
 0xe23   :  { %7154 = vmatpush1.bf16.msra.mxu0 %v11911_v27  ;;  %v11956_v27 = vld [vmem:[#allocation17 + $0x190] ss:$8 sps:$4 sm:$0xff]  }
 0xe24   :  { %7155 = vmatprep.subr.bf16.mxu0 %v11918_v29  ;;  %v11959_v29 = vld [vmem:[#allocation17 + $0x1a0] ss:$8 sps:$4 sm:$0xff]  }
 0xe27   :  { %7156 = vmatpush1.bf16.msra.mxu0 %v11916_v4  ;;  %v11967_v4 = vld [vmem:[#allocation17 + $0x1c4] ss:$8 sps:$4 sm:$0xff]  }
 0xe28   :  { %7168 = vmatprep.subr.bf16.mxu0 %v11923_v38  ;;  %v11970_v38 = vld [vmem:[#allocation17 + $0x1d4] ss:$8 sps:$4 sm:$0xff]  }
 0xea9   :  { %v6483_v11 = vpop.f32.mrb[44].mxu0  ;;  %v6524_v33 = vpop.f32.mrb[60].mxu1 }
 0xeaa   :  { %v6485_v22 = vpop.f32.mrb[45].mxu0  ;;  %v10809_v8 = vpop.f32.mrb[61].mxu1 }
 0xeab   :  { %v6487_v19 = vpop.f32.mrb[46].mxu0  ;;  %v6527_v40 = vpop.f32.mrb[62].mxu1  ;;  %v11976_v8 = vld [vmem:[#allocation17 + $0x1f4] ss:$8 sps:$4 sm:$0xff]  }
 0xeac   :  { %v6488_v35 = vpop.f32.mrb[47].mxu0  ;;  %v10810_v39 = vpop.f32.mrb[63].mxu1  ;;  %v11974_v19 = vld [vmem:[#allocation17 + $0x1f0] ss:$8 sps:$4 sm:$0xff]   ;;  %v11979_v40 = vld [vmem:[#allocation17 + $0x204] ss:$8 sps:$4 sm:$0xff]  }
 0xead   :  { %v11977_v35 = vld [vmem:[#allocation17 + $0x200] ss:$8 sps:$4 sm:$0xff]  }
 0xebd   :  { %v6576_v41 = vpop.f32.mrb[48].mxu0  ;;  %v6617_v37 = vpop.f32.mrb[64].mxu1 }
 0xebe   :  { %v6623_v1 = vpack.c.bf16 %v6576_v41, %v6483_v11  ;;  %v13617_v54 = vpack.c.bf16 %v6617_v37, %v6524_v33  ;;  %v6578_v52 = vpop.f32.mrb[49].mxu0  ;;  %v10815_v46 = vpop.f32.mrb[65].mxu1  ;;  %v11968_v11 = vld [vmem:[#allocation17 + $0x1d0] ss:$8 sps:$4 sm:$0xff]   ;;  %v11973_v33 = vld [vmem:[#allocation17 + $0x1e4] ss:$8 sps:$4 sm:$0xff]  }
 0xebf   :  { %v6624_v47 = vpack.c.bf16 %v6578_v52, %v6485_v22  ;;  %v6580_v14 = vpop.f32.mrb[50].mxu0  ;;  %v6620_v36 = vpop.f32.mrb[66].mxu1  ;;  %v11971_v22 = vld [vmem:[#allocation17 + $0x1e0] ss:$8 sps:$4 sm:$0xff]   ;;  %v6724_v46 = vld [vmem:[#allocation13 + $0x3] sm:$0x7] }
 0xec0   :  { %v6581_v61 = vpop.f32.mrb[51].mxu0  ;;  %v10816_v62 = vpop.f32.mrb[67].mxu1  ;;  %v6729_v14 = vrot.slane %v6724_v46, %v13285_v17  ;;  %v6733_v36 = vrot.slane %v6724_v46, %v13268_v0 }
 0xec1   :  { %7157 = vmatprep.mubr.bf16.mxu0 %v6624_v47  ;;  %7243 = vmatprep.mubr.bf16.mxu1 %v6624_v47  ;;  %v6737_v47 = vrot.slane %v6724_v46, %v13292_v31  ;;  %v12033_v46 = vld [vmem:[#allocation20 + $0x1b4] ss:$12 sps:$4 sm:$0xff]  }
 0xec2   :  { %7158 = vmatmul.mubr.bf16.vlgmr.msra.gmra.mrb[52].mxu0 %v6623_v1  ;;  %7244 = vmatmul.mubr.bf16.vlgmr.msra.gmra.mrb[68].mxu1 %v6623_v1 }
 0xec3   :  { %7169 = vmatpush1.bf16.msra.mxu0 %v11921_v53  ;;  %10818 = vmatpush3.bf16.msra.mxu1 %v11924_v56 }
 0xec4   :  { %7170 = vmatprep.subr.bf16.mxu0 %v11927_v51  ;;  %10819 = vmatprep.subr.bf16.mxu1 %v12768_v45 }
 0xec5   :  { %7200 = vmatprep.mubr.bf16.mxu0 %v12767_v24  ;;  %10833 = vmatprep.mubr.msk.bf16.mxu1 %vm12769_vm1, %v12768_v45 }
 0xec7   :  { %7171 = vmatpush1.bf16.msra.mxu0 %v11925_v3  ;;  %10820 = vmatpush3.bf16.msra.mxu1 %v11928_v5 }
 0xec8   :  { %7172 = vmatprep.subr.bf16.mxu0 %v11931_v6  ;;  %10821 = vmatprep.subr.bf16.mxu1 %v12768_v45 }
 0xecb   :  { %7173 = vmatpush1.bf16.msra.mxu0 %v11929_v7  ;;  %10822 = vmatpush3.bf16.msra.mxu1 %v11932_v15 }
 0xecc   :  { %7174 = vmatprep.subr.bf16.mxu0 %v11935_v44  ;;  %10823 = vmatprep.subr.bf16.mxu1 %v12768_v45 }
 0xecf   :  { %7175 = vmatpush1.bf16.msra.mxu0 %v11933_v13  ;;  %10824 = vmatpush3.bf16.msra.mxu1 %v11936_v9 }
 0xed0   :  { %7176 = vmatprep.subr.bf16.mxu0 %v11939_v10  ;;  %10825 = vmatprep.subr.bf16.mxu1 %v12768_v45 }
 0xed3   :  { %7177 = vmatpush1.bf16.msra.mxu0 %v11937_v32  ;;  %10826 = vmatpush3.bf16.msra.mxu1 %v11940_v2 }
 0xed4   :  { %7178 = vmatprep.subr.bf16.mxu0 %v11943_v16  ;;  %10827 = vmatprep.subr.bf16.mxu1 %v12768_v45 }
 0xed7   :  { %7179 = vmatpush1.bf16.msra.mxu0 %v11941_v20  ;;  %10828 = vmatpush3.bf16.msra.mxu1 %v11944_v60 }
 0xed8   :  { %7180 = vmatprep.subr.bf16.mxu0 %v11947_v43  ;;  %10829 = vmatprep.subr.bf16.mxu1 %v12768_v45 }
 0xedb   :  { %7181 = vmatpush1.bf16.msra.mxu0 %v11945_v50  ;;  %10830 = vmatpush3.bf16.msra.mxu1 %v11948_v18 }
 0xedc   :  { %7182 = vmatprep.subr.bf16.mxu0 %v11951_v23  ;;  %10831 = vmatprep.subr.bf16.mxu1 %v12768_v45  ;;  %v11962_v45 = vld [vmem:[#allocation17 + $0x1b0] ss:$8 sps:$4 sm:$0xff]  }
 0xedf   :  { %7183 = vmatpush1.bf16.msra.mxu0 %v11949_v63  ;;  %10832 = vmatpush3.bf16.msra.mxu1 %v11952_v21 }
 0xee0   :  { %7698 = vmatprep.subr.bf16.mxu1 %v11955_v48 }
 0xee2   :  { %7201 = vmatmul.mubr.bf16.vlgmr.msra.gmra.mrb[52].mxu0 %v13617_v54  ;;  %10834 = vmatmul.mubr.bf16.vlgmr.msra.gmra.mrb[72].mxu1 %v13617_v54 }
 0xee3   :  { %7699 = vmatpush1.bf16.msra.mxu1 %v11953_v25 }
 0xee4   :  { %7700 = vmatprep.subr.bf16.mxu1 %v11958_v26 }
 0xee7   :  { %7701 = vmatpush1.bf16.msra.mxu1 %v11956_v27 }
 0xee8   :  { %7702 = vmatprep.subr.bf16.mxu1 %v11961_v28 }
 0xeeb   :  { %7703 = vmatpush1.bf16.msra.mxu1 %v11959_v29  ;;  %v11982_v29 = vld [vmem:[#allocation17 + $0x214] ss:$8 sps:$4 sm:$0xff]  }
 0xeec   :  { %7704 = vmatprep.subr.bf16.mxu1 %v11964_v34  ;;  %v11980_v34 = vld [vmem:[#allocation17 + $0x210] ss:$8 sps:$4 sm:$0xff]  }
 0xeef   :  { %7705 = vmatpush1.bf16.msra.mxu1 %v11962_v45  ;;  %v11985_v45 = vld [vmem:[#allocation17 + $0x224] ss:$8 sps:$4 sm:$0xff]  }
 0xef0   :  { %7706 = vmatprep.subr.bf16.mxu1 %v11967_v4  ;;  %v11983_v4 = vld [vmem:[#allocation17 + $0x220] ss:$8 sps:$4 sm:$0xff]  }
 0xef3   :  { %7707 = vmatpush1.bf16.msra.mxu1 %v11965_v42  ;;  %v11988_v42 = vld [vmem:[#allocation17 + $0x234] ss:$8 sps:$4 sm:$0xff]  }
 0xef4   :  { %7708 = vmatprep.subr.bf16.mxu1 %v11970_v38  ;;  %v11986_v38 = vld [vmem:[#allocation17 + $0x230] ss:$8 sps:$4 sm:$0xff]  }
 0xef7   :  { %7709 = vmatpush1.bf16.msra.mxu1 %v11968_v11  ;;  %v11991_v11 = vld [vmem:[#allocation17 + $0x244] ss:$8 sps:$4 sm:$0xff]  }
 0xef8   :  { %7710 = vmatprep.subr.bf16.mxu1 %v11973_v33  ;;  %v11989_v33 = vld [vmem:[#allocation17 + $0x240] ss:$8 sps:$4 sm:$0xff]  }
 0xefb   :  { %7711 = vmatpush1.bf16.msra.mxu1 %v11971_v22  ;;  %v11994_v22 = vld [vmem:[#allocation17 + $0x254] ss:$8 sps:$4 sm:$0xff]  }
 0xefc   :  { %7712 = vmatprep.subr.bf16.mxu1 %v11976_v8  ;;  %v11992_v8 = vld [vmem:[#allocation17 + $0x250] ss:$8 sps:$4 sm:$0xff]  }
 0xeff   :  { %7713 = vmatpush1.bf16.msra.mxu1 %v11974_v19  ;;  %v11997_v19 = vld [vmem:[#allocation17 + $0x264] ss:$8 sps:$4 sm:$0xff]  }
 0xf00   :  { %7714 = vmatprep.subr.bf16.mxu1 %v11979_v40  ;;  %v11995_v40 = vld [vmem:[#allocation17 + $0x260] ss:$8 sps:$4 sm:$0xff]  }
 0xf03   :  { %7715 = vmatpush1.bf16.msra.mxu1 %v11977_v35  ;;  %v12000_v35 = vld [vmem:[#allocation17 + $0x274] ss:$8 sps:$4 sm:$0xff]  }
 0xf04   :  { %7716 = vmatprep.subr.bf16.mxu1 %v11982_v29 }
 0xf07   :  { %7717 = vmatpush1.bf16.msra.mxu1 %v11980_v34 }
 0xf08   :  { %7718 = vmatprep.subr.bf16.mxu1 %v11985_v45 }
 0xf0b   :  { %7719 = vmatpush1.bf16.msra.mxu1 %v11983_v4 }
 0xf0c   :  { %7720 = vmatprep.subr.bf16.mxu1 %v11988_v42  ;;  %v7300_v42 = vld [vmem:[#allocation14 + $0x3] sm:$0x7] }
 0xf0f   :  { %7721 = vmatpush1.bf16.msra.mxu1 %v11986_v38 }
 0xf10   :  { %7722 = vmatprep.subr.bf16.mxu1 %v11991_v11 }
 0xf13   :  { %7723 = vmatpush1.bf16.msra.mxu1 %v11989_v33  ;;  %v7302_v33 = vld [vmem:[#allocation16 + $0x3] sm:$0x7] }
 0xf14   :  { %7724 = vmatprep.subr.bf16.mxu1 %v11994_v22  ;;  %v7357_v22 = vrot.slane %v7300_v42, %v13268_v0 }
 0xf17   :  { %7725 = vmatpush1.bf16.msra.mxu1 %v11992_v8  ;;  %v7353_v8 = vrot.slane %v7300_v42, %v13285_v17 }
 0xf18   :  { %7726 = vmatprep.subr.bf16.mxu1 %v11997_v19 }
 0xf1b   :  { %7727 = vmatpush1.bf16.msra.mxu1 %v11995_v40 }
 0xf1c   :  { %7728 = vmatprep.subr.bf16.mxu1 %v12000_v35 }
 0xf95   :  { %v10628_v39 = vpop.f32.mrb[68].mxu1 }
 0xf96   :  { %v10629_v41 = vpop.f32.mrb[69].mxu1 }
 0xf97   :  { %v10630_v37 = vadd.f32 %v10629_v41, %v10628_v39  ;;  %v10631_v1 = vpop.f32.mrb[70].mxu1  ;;  %v11998_v39 = vld [vmem:[#allocation17 + $0x270] ss:$8 sps:$4 sm:$0xff]   ;;  %v12003_v41 = vld [vmem:[#allocation17 + $0x284] ss:$8 sps:$4 sm:$0xff]  }
 0xf98   :  { %v10632_v54 = vpop.f32.mrb[71].mxu1  ;;  %7729 = vmatpush1.bf16.msra.mxu1 %v11998_v39 }
 0xf99   :  { %v10633_v52 = vadd.f32 %v10632_v54, %v10631_v1  ;;  %v7246_v53 = vadd.f32 %v10630_v37, %v6737_v47  ;;  %7741 = vmatprep.subr.bf16.mxu1 %v12003_v41  ;;  %v12025_v37 = vld [vmem:[#allocation20 + $0x180] ss:$12 sps:$4 sm:$0xff]   ;;  %v12027_v1 = vld [vmem:[#allocation20 + $0x184] ss:$12 sps:$4 sm:$0xff]   ;;  %v12030_v54 = vld [vmem:[#allocation20 + $0x19c] ss:$12 sps:$4 sm:$0xff]  }
 0xf9a   :  { %8129 = vmatprep.subr.bf16.mxu0 %v12027_v1  ;;  %v7375_v1 = vrot.slane %v7302_v33, %v13285_v17 }
 0xf9b   :  { %v7249_v6 = vadd.f32 %v10633_v52, %v6737_v47  ;;  %8130 = vmatpush1.bf16.msra.mxu0 %v12025_v37  ;;  %v12028_v52 = vld [vmem:[#allocation20 + $0x198] ss:$12 sps:$4 sm:$0xff]   ;;  %v12031_v47 = vld [vmem:[#allocation20 + $0x1b0] ss:$12 sps:$4 sm:$0xff]  }
 0xf9c   :  { %8131 = vmatprep.subr.bf16.mxu0 %v12030_v54 }
 0xf9f   :  { %8132 = vmatpush1.bf16.msra.mxu0 %v12028_v52 }
 0xfa0   :  { %8133 = vmatprep.subr.bf16.mxu0 %v12033_v46 }
 0xfa3   :  { %8134 = vmatpush1.bf16.msra.mxu0 %v12031_v47 }
 0xfb5   :  { %v7202_v56 = vpop.f32.mrb[52].mxu0  ;;  %v7286_v61 = vpop.f32.mrb[72].mxu1 }
 0xfb6   :  { %v10877_v62 = vadd.f32 %v7202_v56, %v6729_v14  ;;  %v7287_v51 = vadd.f32 %v7286_v61, %v7246_v53  ;;  %v7204_v3 = vpop.f32.mrb[53].mxu0  ;;  %v10835_v5 = vpop.f32.mrb[73].mxu1  ;;  %v12039_v53 = vld [vmem:[#allocation20 + $0x1e4] ss:$12 sps:$4 sm:$0xff]   ;;  %v12037_v56 = vld [vmem:[#allocation20 + $0x1e0] ss:$12 sps:$4 sm:$0xff]  }
 0xfb7   :  { %v10878_v7 = vadd.f32 %v7204_v3, %v6733_v36  ;;  %v7206_v15 = vpop.f32.mrb[54].mxu0  ;;  %v7289_v44 = vpop.f32.mrb[74].mxu1  ;;  %v12042_v61 = vld [vmem:[#allocation20 + $0x1fc] ss:$12 sps:$4 sm:$0xff]   ;;  %v12048_v5 = vld [vmem:[#allocation20 + $0x22c] ss:$12 sps:$4 sm:$0xff]  }
 0xfb8   :  { %v13635_v13 = vadd.f32 %v10877_v62, %v13510_v58  ;;  %v10879_v9 = vadd.f32 %v7206_v15, %v6729_v14  ;;  %v7290_v10 = vadd.f32 %v7289_v44, %v7249_v6  ;;  %v7208_v32 = vpop.f32.mrb[55].mxu0  ;;  %v10836_v2 = vpop.f32.mrb[75].mxu1  ;;  %v13646_v50 = vadd.f32 %v7287_v51, %v13540_v49  ;;  %v12036_v14 = vld [vmem:[#allocation20 + $0x1cc] ss:$12 sps:$4 sm:$0xff]   ;;  %v12045_v51 = vld [vmem:[#allocation20 + $0x214] ss:$12 sps:$4 sm:$0xff]  }
 0xfb9   :  { %v13638_v16 = vadd.f32 %v10878_v7, %v13506_v55  ;;  %v10880_v20 = vadd.f32 %v7208_v32, %v6733_v36  ;;  %v12034_v36 = vld [vmem:[#allocation20 + $0x1c8] ss:$12 sps:$4 sm:$0xff]   ;;  %8135 = vmatprep.subr.bf16.mxu0 %v12036_v14  ;;  %v12040_v62 = vld [vmem:[#allocation20 + $0x1f8] ss:$12 sps:$4 sm:$0xff]   ;;  %v12043_v3 = vld [vmem:[#allocation20 + $0x210] ss:$12 sps:$4 sm:$0xff]  }
 0xfba   :  { %v13641_v60 = vadd.f32 %v10879_v9, %v13512_v59  ;;  %v7313_v43 = vmul.f32 %v13635_v13, %v13635_v13  ;;  %v13656_v23 = vadd.f32 %v7290_v10, %v13538_v30  ;;  %v7315_v48 = vmul.f32 %v13646_v50, %v13646_v50  ;;  %8136 = vmatpush1.bf16.msra.mxu0 %v12034_v36  ;;  %v12046_v6 = vld [vmem:[#allocation20 + $0x228] ss:$12 sps:$4 sm:$0xff]   ;;  %v12051_v7 = vld [vmem:[#allocation20 + $0x244] ss:$12 sps:$4 sm:$0xff]   ;;  %v12049_v15 = vld [vmem:[#allocation20 + $0x240] ss:$12 sps:$4 sm:$0xff]  }
 0xfbb   :  { %v13649_v58 = vadd.f32 %v10880_v20, %v13508_v57  ;;  %v7303_v18 = vadd.f32 %v13638_v16, %v13635_v13  ;;  %v7314_v55 = vmul.f32 %v13638_v16, %v13638_v16  ;;  %8137 = vmatprep.subr.bf16.mxu0 %v12039_v53  ;;  %v12054_v44 = vld [vmem:[#allocation20 + $0x25c] ss:$12 sps:$4 sm:$0xff]   ;;  %v12052_v9 = vld [vmem:[#allocation20 + $0x258] ss:$12 sps:$4 sm:$0xff]   ;;  %v12057_v10 = vld [vmem:[#allocation20 + $0x274] ss:$12 sps:$4 sm:$0xff]  }
 0xfbc   :  { %v7316_v59 = vmul.f32 %v13641_v60, %v13641_v60  ;;  %v7318_v27 = vmul.f32 %v13656_v23, %v13656_v23  ;;  %v12055_v32 = vld [vmem:[#allocation20 + $0x270] ss:$12 sps:$4 sm:$0xff]   ;;  %v12060_v2 = vld [vmem:[#allocation20 + $0x28c] ss:$12 sps:$4 sm:$0xff]   ;;  %v12058_v20 = vld [vmem:[#allocation20 + $0x288] ss:$12 sps:$4 sm:$0xff]  }
 0xfbd   :  { %v7304_v63 = vadd.f32 %v7303_v18, %v13646_v50  ;;  %v7307_v49 = vadd.f32 %v13649_v58, %v13641_v60  ;;  %v7319_v21 = vadd.f32 %v7314_v55, %v7313_v43  ;;  %v7317_v57 = vmul.f32 %v13649_v58, %v13649_v58  ;;  %v12063_v43 = vld [vmem:[#allocation20 + $0x2a4] ss:$12 sps:$4 sm:$0xff]   ;;  %v12061_v18 = vld [vmem:[#allocation20 + $0x2a0] ss:$12 sps:$4 sm:$0xff]   ;;  %v12066_v55 = vld [vmem:[#allocation20 + $0x2bc] ss:$12 sps:$4 sm:$0xff]  }
 0xfbe   :  { %8138 = vmatpush1.bf16.msra.mxu0 %v12037_v56 }
 0xfbf   :  { %7305 = vadd.xlane.f32.xlu0 %v7304_v63  ;;  %v7308_v25 = vadd.f32 %v7307_v49, %v13656_v23  ;;  %v7323_v30 = vadd.f32 %v7317_v57, %v7316_v59  ;;  %v7320_v26 = vadd.f32 %v7319_v21, %v7315_v48  ;;  %8139 = vmatprep.subr.bf16.mxu0 %v12042_v61  ;;  %v12064_v59 = vld [vmem:[#allocation20 + $0x2b8] ss:$12 sps:$4 sm:$0xff]  }
 0xfc0   :  { %v12001_v61 = vld [vmem:[#allocation17 + $0x280] ss:$8 sps:$4 sm:$0xff]  }
 0xfc1   :  { %7309 = vadd.xlane.f32.xlu1 %v7308_v25  ;;  %v7324_v28 = vadd.f32 %v7323_v30, %v7318_v27 }
 0xfc2   :  { %8140 = vmatpush1.bf16.msra.mxu0 %v12040_v62 }
 0xfc3   :  { %7321 = vadd.xlane.f32.xlu0 %v7320_v26  ;;  %8141 = vmatprep.subr.bf16.mxu0 %v12045_v51  ;;  %v12006_v51 = vld [vmem:[#allocation17 + $0x294] ss:$8 sps:$4 sm:$0xff]  }
 0xfc5   :  { %7325 = vadd.xlane.f32.xlu1 %v7324_v28 }
 0xfc6   :  { %8142 = vmatpush1.bf16.msra.mxu0 %v12043_v3  ;;  %v12004_v3 = vld [vmem:[#allocation17 + $0x290] ss:$8 sps:$4 sm:$0xff]  }
 0xfc7   :  { %8143 = vmatprep.subr.bf16.mxu0 %v12048_v5  ;;  %v12009_v5 = vld [vmem:[#allocation17 + $0x2a4] ss:$8 sps:$4 sm:$0xff]  }
 0xfca   :  { %8144 = vmatpush1.bf16.msra.mxu0 %v12046_v6  ;;  %v12007_v6 = vld [vmem:[#allocation17 + $0x2a0] ss:$8 sps:$4 sm:$0xff]  }
 0xfcb   :  { %8145 = vmatprep.subr.bf16.mxu0 %v12051_v7  ;;  %v12012_v7 = vld [vmem:[#allocation17 + $0x2b4] ss:$8 sps:$4 sm:$0xff]  }
 0xfce   :  { %8146 = vmatpush1.bf16.msra.mxu0 %v12049_v15  ;;  %v12010_v15 = vld [vmem:[#allocation17 + $0x2b0] ss:$8 sps:$4 sm:$0xff]  }
 0xfcf   :  { %8147 = vmatprep.subr.bf16.mxu0 %v12054_v44  ;;  %v12015_v44 = vld [vmem:[#allocation17 + $0x2c4] ss:$8 sps:$4 sm:$0xff]  }
 0xfd2   :  { %8148 = vmatpush1.bf16.msra.mxu0 %v12052_v9  ;;  %v12013_v9 = vld [vmem:[#allocation17 + $0x2c0] ss:$8 sps:$4 sm:$0xff]  }
 0xfd3   :  { %8149 = vmatprep.subr.bf16.mxu0 %v12057_v10  ;;  %v12018_v10 = vld [vmem:[#allocation17 + $0x2d4] ss:$8 sps:$4 sm:$0xff]  }
 0xfd6   :  { %8150 = vmatpush1.bf16.msra.mxu0 %v12055_v32 }
 0xfd7   :  { %8151 = vmatprep.subr.bf16.mxu0 %v12060_v2  ;;  %v12016_v2 = vld [vmem:[#allocation17 + $0x2d0] ss:$8 sps:$4 sm:$0xff]  }
 0xfda   :  { %8152 = vmatpush1.bf16.msra.mxu0 %v12058_v20 }
 0xfdb   :  { %8153 = vmatprep.subr.bf16.mxu0 %v12063_v43  ;;  %v12021_v43 = vld [vmem:[#allocation17 + $0x2e4] ss:$8 sps:$4 sm:$0xff]  }
 0xfde   :  { %8154 = vmatpush1.bf16.msra.mxu0 %v12061_v18 }
 0xfdf   :  { %8155 = vmatprep.subr.bf16.mxu0 %v12066_v55 }
 0xfe2   :  { %8156 = vmatpush1.bf16.msra.mxu0 %v12064_v59  ;;  %v7361_v59 = vrot.slane %v7300_v42, %v13292_v31 }
0x104c   :  { %v7306_v63 = vpop.xlane.xlu0 %7305 }
0x104d   :  { %v13670_v49 = vmul.f32 0.0033333334, %v7306_v63  ;;  %v12019_v63 = vld [vmem:[#allocation17 + $0x2e0] ss:$8 sps:$4 sm:$0xff]  }
0x104e   :  { %v7310_v21 = vpop.xlane.xlu1 %7309 }
0x104f   :  { %v13672_v57 = vmul.f32 0.0033333334, %v7310_v21  ;;  %v7329_v48 = vmul.f32 %v13670_v49, %v13670_v49  ;;  %v7333_v38 = vsub.f32 %v13635_v13, %v13670_v49  ;;  %v7334_v11 = vsub.f32 %v13638_v16, %v13670_v49  ;;  %v12024_v21 = vld [vmem:[#allocation17 + $0x2f4] ss:$8 sps:$4 sm:$0xff]  }
0x1050   :  { %v7322_v25 = vpop.xlane.xlu0 %7321  ;;  %v7379_v13 = vrot.slane %v7302_v33, %v13268_v0  ;;  %v7335_v20 = vsub.f32 %v13646_v50, %v13670_v49 }
0x1051   :  { %v7327_v30 = vmul.f32 0.0033333334, %v7322_v25  ;;  %v7330_v28 = vmul.f32 %v13672_v57, %v13672_v57  ;;  %v7336_v40 = vsub.f32 %v13641_v60, %v13672_v57  ;;  %v7337_v35 = vsub.f32 %v13649_v58, %v13672_v57 }
0x1052   :  { %v7326_v26 = vpop.xlane.xlu1 %7325  ;;  %v7338_v32 = vsub.f32 %v13656_v23, %v13672_v57  ;;  %v12022_v23 = vld [vmem:[#allocation17 + $0x2f0] ss:$8 sps:$4 sm:$0xff]  }
0x1053   :  { %v7331_v27 = vsub.f32 %v7327_v30, %v7329_v48  ;;  %v7328_v29 = vmul.f32 0.0033333334, %v7326_v26  ;;  %v7383_v30 = vrot.slane %v7302_v33, %v13292_v31  ;;  %v12069_v26 = vld [vmem:[#allocation20 + $0x2d4] ss:$12 sps:$4 sm:$0xff]  }
0x1054   :  { %8157 = vmatprep.subr.bf16.mxu0 %v12069_v26  ;;  %v12115_v26 = vld [vmem:[#allocation26 + $0x84] ss:$16 sps:$4 sm:$0xff]  }
0x1055   :  { %v7339_v34 = vadd.f32 1e-05, %v7331_v27  ;;  %v7332_v45 = vsub.f32 %v7328_v29, %v7330_v28  ;;  %v12067_v27 = vld [vmem:[#allocation20 + $0x2d0] ss:$12 sps:$4 sm:$0xff]   ;;  %v12072_v28 = vld [vmem:[#allocation20 + $0x2ec] ss:$12 sps:$4 sm:$0xff]  }
0x1056   :  { %8158 = vmatpush1.bf16.msra.mxu0 %v12067_v27  ;;  %v12070_v29 = vld [vmem:[#allocation20 + $0x2e8] ss:$12 sps:$4 sm:$0xff]   ;;  %v12118_v27 = vld [vmem:[#allocation26 + $0x8c] ss:$16 sps:$4 sm:$0xff]  }
0x1057   :  { %12289 = vrsqrt.f32 %v7339_v34  ;;  %v7340_v4 = vadd.f32 1e-05, %v7332_v45  ;;  %8159 = vmatprep.subr.bf16.mxu0 %v12072_v28  ;;  %v12073_v34 = vld [vmem:[#allocation20 + $0x248] ss:$12 sps:$4 sm:$0xff]   ;;  %v7446_v45 = vld [vmem:[#allocation19 + $0x2] sm:$0x3] }
0x1058   :  { %v7455_v42 = vrot.slane %v7446_v45, %v13268_v0  ;;  %v12113_v28 = vld [vmem:[#allocation26 + $0x80] ss:$16 sps:$4 sm:$0xff]  }
0x1059   :  { %12291 = vrsqrt.f32 %v7340_v4  ;;  %v7451_v4 = vrot.slane %v7446_v45, %v13285_v17  ;;  %v12124_v45 = vld [vmem:[#allocation26 + $0xac] ss:$16 sps:$4 sm:$0xff]  }
0x105a   :  { %8160 = vmatpush1.bf16.msra.mxu0 %v12070_v29  ;;  %v12116_v29 = vld [vmem:[#allocation26 + $0x88] ss:$16 sps:$4 sm:$0xff]  }
0x105b   :  { %10643 = vmatprep.subr.bf16.mxu0 %v12073_v34  ;;  %v12121_v34 = vld [vmem:[#allocation26 + $0xa4] ss:$16 sps:$4 sm:$0xff]  }
0x1061   :  { %v12290_v19 = vpop.eup %12289 }
0x1062   :  { %v7344_v39 = vmul.f32 %v12290_v19, %v7334_v11  ;;  %v7343_v41 = vmul.f32 %v12290_v19, %v7333_v38  ;;  %v7345_v55 = vmul.f32 %v12290_v19, %v7335_v20  ;;  %v12097_v20 = vld [vmem:[#allocation26 + $0x24] ss:$16 sps:$4 sm:$0xff]  }
0x1063   :  { %v12292_v37 = vpop.eup %12291 }
0x1064   :  { %v7347_v16 = vmul.f32 %v12292_v37, %v7337_v35  ;;  %v7366_v54 = vmul.f32 %v7357_v22, %v7344_v39  ;;  %v7346_v52 = vmul.f32 %v12292_v37, %v7336_v40  ;;  %v7365_v46 = vmul.f32 %v7353_v8, %v7343_v41 }
0x1065   :  { %v7348_v18 = vmul.f32 %v12292_v37, %v7338_v32  ;;  %v7367_v48 = vmul.f32 %v7361_v59, %v7345_v55  ;;  %v12092_v32 = vld [vmem:[#allocation26 + $0x8] ss:$16 sps:$4 sm:$0xff]  }
0x1066   :  { %v7369_v47 = vmul.f32 %v7357_v22, %v7347_v16  ;;  %v7368_v14 = vmul.f32 %v7353_v8, %v7346_v52  ;;  %v13690_v36 = vadd.f32 %v7379_v13, %v7366_v54  ;;  %v13694_v60 = vadd.f32 %v7375_v1, %v7365_v46  ;;  %v12074_v54 = vld [vmem:[#allocation20 + $0x188] ss:$12 sps:$4 sm:$0xff]   ;;  %v12075_v52 = vld [vmem:[#allocation20 + $0x260] ss:$12 sps:$4 sm:$0xff]  }
0x1067   :  { %v7370_v25 = vmul.f32 %v7361_v59, %v7348_v18  ;;  %v13711_v50 = vadd.f32 %v7383_v30, %v7367_v48  ;;  %v12076_v46 = vld [vmem:[#allocation20 + $0x1a0] ss:$12 sps:$4 sm:$0xff]   ;;  %v12103_v59 = vld [vmem:[#allocation26 + $0x44] ss:$16 sps:$4 sm:$0xff]  }
0x1068   :  { %v13692_v53 = vadd.f32 %v7379_v13, %v7369_v47  ;;  %v13696_v58 = vadd.f32 %v7375_v1, %v7368_v14  ;;  %v12077_v47 = vld [vmem:[#allocation20 + $0x278] ss:$12 sps:$4 sm:$0xff]  }
0x1069   :  { %v13709_v57 = vadd.f32 %v7383_v30, %v7370_v25  ;;  %v12078_v14 = vld [vmem:[#allocation20 + $0x1b8] ss:$12 sps:$4 sm:$0xff]   ;;  %v12112_v30 = vld [vmem:[#allocation26 + $0x6c] ss:$16 sps:$4 sm:$0xff]  }
0x106a   :  { %v7394_v56 = vpack.c.bf16 %v13692_v53, %v13690_v36  ;;  %v7393_v62 = vpack.c.bf16 %v13696_v58, %v13694_v60  ;;  %v12095_v18 = vld [vmem:[#allocation26 + $0x20] ss:$16 sps:$4 sm:$0xff]   ;;  %v12098_v55 = vld [vmem:[#allocation26 + $0x28] ss:$16 sps:$4 sm:$0xff]   ;;  %v12109_v48 = vld [vmem:[#allocation26 + $0x64] ss:$16 sps:$4 sm:$0xff]  }
0x106b   :  { %v7395_v49 = vpack.c.bf16 %v13709_v57, %v13711_v50  ;;  %v12104_v25 = vld [vmem:[#allocation26 + $0x48] ss:$16 sps:$4 sm:$0xff]  }
0x106c   :  { %7730 = vmatprep.mubr.bf16.mxu1 %v7394_v56  ;;  %v12079_v56 = vld [vmem:[#allocation20 + $0x290] ss:$12 sps:$4 sm:$0xff]  }
0x106d   :  { %7731 = vmatmul.mubr.bf16.vlgmr.msra.gmra.mrb[76].mxu1 %v7393_v62  ;;  %v12081_v62 = vld [vmem:[#allocation20 + $0x2a8] ss:$12 sps:$4 sm:$0xff]  }
0x106e   :  { %7742 = vmatpush1.bf16.msra.mxu1 %v12001_v61  ;;  %7773 = vmatprep.mubr.bf16.mxu1 %v12767_v24  ;;  %v12080_v61 = vld [vmem:[#allocation20 + $0x1d0] ss:$12 sps:$4 sm:$0xff]  }
0x106f   :  { %7743 = vmatprep.subr.bf16.mxu1 %v12006_v51  ;;  %v12082_v51 = vld [vmem:[#allocation20 + $0x1e8] ss:$12 sps:$4 sm:$0xff]  }
0x1072   :  { %7744 = vmatpush1.bf16.msra.mxu1 %v12004_v3  ;;  %v12083_v3 = vld [vmem:[#allocation20 + $0x2c0] ss:$12 sps:$4 sm:$0xff]  }
0x1073   :  { %7745 = vmatprep.subr.bf16.mxu1 %v12009_v5  ;;  %v12084_v5 = vld [vmem:[#allocation20 + $0x200] ss:$12 sps:$4 sm:$0xff]  }
0x1076   :  { %7746 = vmatpush1.bf16.msra.mxu1 %v12007_v6  ;;  %v12085_v6 = vld [vmem:[#allocation20 + $0x2d8] ss:$12 sps:$4 sm:$0xff]  }
0x1077   :  { %7747 = vmatprep.subr.bf16.mxu1 %v12012_v7  ;;  %v12086_v7 = vld [vmem:[#allocation20 + $0x218] ss:$12 sps:$4 sm:$0xff]  }
0x107a   :  { %7748 = vmatpush1.bf16.msra.mxu1 %v12010_v15  ;;  %v12087_v15 = vld [vmem:[#allocation20 + $0x2f0] ss:$12 sps:$4 sm:$0xff]  }
0x107b   :  { %7749 = vmatprep.subr.bf16.mxu1 %v12015_v44  ;;  %v12088_v44 = vld [vmem:[#allocation20 + $0x230] ss:$12 sps:$4 sm:$0xff]  }
0x107e   :  { %7750 = vmatpush1.bf16.msra.mxu1 %v12013_v9  ;;  %v12089_v9 = vld [vmem:[#allocation26] ss:$16 sps:$4 sm:$0xff]  }
0x107f   :  { %7751 = vmatprep.subr.bf16.mxu1 %v12018_v10  ;;  %v12091_v10 = vld [vmem:[#allocation26 + $0x4] ss:$16 sps:$4 sm:$0xff]  }
0x1082   :  { %7752 = vmatpush1.bf16.msra.mxu1 %v12016_v2  ;;  %v12094_v2 = vld [vmem:[#allocation26 + $0xc] ss:$16 sps:$4 sm:$0xff]  }
0x1083   :  { %7753 = vmatprep.subr.bf16.mxu1 %v12021_v43  ;;  %v12100_v43 = vld [vmem:[#allocation26 + $0x2c] ss:$16 sps:$4 sm:$0xff]  }
0x1086   :  { %7754 = vmatpush1.bf16.msra.mxu1 %v12019_v63  ;;  %v12106_v63 = vld [vmem:[#allocation26 + $0x4c] ss:$16 sps:$4 sm:$0xff]  }
0x1087   :  { %7755 = vmatprep.subr.bf16.mxu1 %v12024_v21  ;;  %v12101_v21 = vld [vmem:[#allocation26 + $0x40] ss:$16 sps:$4 sm:$0xff]  }
0x108a   :  { %7756 = vmatpush1.bf16.msra.mxu1 %v12022_v23  ;;  %v12107_v23 = vld [vmem:[#allocation26 + $0x60] ss:$16 sps:$4 sm:$0xff]  }
0x108b   :  { %8951 = vmatprep.subr.bf16.mxu1 %v12091_v10 }
0x108d   :  { %7774 = vmatmul.mubr.bf16.vlgmr.msra.gmra.mrb[76].mxu1 %v7395_v49  ;;  %v12110_v49 = vld [vmem:[#allocation26 + $0x68] ss:$16 sps:$4 sm:$0xff]  }
0x108e   :  { %8952 = vmatpush1.bf16.msra.mxu1 %v12089_v9 }
0x108f   :  { %8953 = vmatprep.subr.bf16.mxu1 %v12097_v20 }
0x1092   :  { %8954 = vmatpush1.bf16.msra.mxu1 %v12095_v18  ;;  %v12130_v18 = vld [vmem:[#allocation26 + $0xcc] ss:$16 sps:$4 sm:$0xff]  }
0x1093   :  { %8955 = vmatprep.subr.bf16.mxu1 %v12103_v59  ;;  %v12128_v59 = vld [vmem:[#allocation26 + $0xc8] ss:$16 sps:$4 sm:$0xff]  }
0x1096   :  { %8956 = vmatpush1.bf16.msra.mxu1 %v12101_v21  ;;  %v12136_v21 = vld [vmem:[#allocation26 + $0xec] ss:$16 sps:$4 sm:$0xff]  }
0x1097   :  { %8957 = vmatprep.subr.bf16.mxu1 %v12109_v48  ;;  %v12134_v48 = vld [vmem:[#allocation26 + $0xe8] ss:$16 sps:$4 sm:$0xff]  }
0x109a   :  { %8958 = vmatpush1.bf16.msra.mxu1 %v12107_v23  ;;  %v12142_v23 = vld [vmem:[#allocation26 + $0x10c] ss:$16 sps:$4 sm:$0xff]  }
0x109b   :  { %8959 = vmatprep.subr.bf16.mxu1 %v12115_v26  ;;  %v12140_v26 = vld [vmem:[#allocation26 + $0x108] ss:$16 sps:$4 sm:$0xff]  }
0x109e   :  { %8960 = vmatpush1.bf16.msra.mxu1 %v12113_v28  ;;  %v12148_v28 = vld [vmem:[#allocation26 + $0x12c] ss:$16 sps:$4 sm:$0xff]  }
0x109f   :  { %8961 = vmatprep.subr.bf16.mxu1 %v12121_v34  ;;  %v12146_v34 = vld [vmem:[#allocation26 + $0x128] ss:$16 sps:$4 sm:$0xff]  }
0x1160   :  { %v7775_v38 = vpop.f32.mrb[76].mxu1 }
0x1161   :  { %v10881_v11 = vadd.f32 %v7775_v38, %v7451_v4  ;;  %v7777_v33 = vpop.f32.mrb[77].mxu1 }
0x1162   :  { %v10882_v22 = vadd.f32 %v7777_v33, %v7455_v42  ;;  %v7779_v8 = vpop.f32.mrb[78].mxu1 }
0x1163   :  { %v10883_v19 = vadd.f32 %v7779_v8, %v7451_v4  ;;  %v7781_v40 = vpop.f32.mrb[79].mxu1  ;;  %v7784_v39 = vmax.f32 %v10881_v11, 0.0  ;;  %v12119_v4 = vld [vmem:[#allocation26 + $0xa0] ss:$16 sps:$4 sm:$0xff]  }
0x1164   :  { %v10884_v35 = vadd.f32 %v7781_v40, %v7455_v42  ;;  %v7785_v37 = vmax.f32 %v10882_v22, 0.0  ;;  %v12122_v42 = vld [vmem:[#allocation26 + $0xa8] ss:$16 sps:$4 sm:$0xff]   ;;  %8962 = vmatpush1.bf16.msra.mxu1 %v12119_v4  ;;  %v7856_v8 = vld [vmem:[#allocation22 + $0x3] sm:$0x7] }
0x1165   :  { %v7786_v41 = vmax.f32 %v10883_v19, 0.0  ;;  %v7861_v19 = vrot.slane %v7856_v8, %v13285_v17  ;;  %v7865_v40 = vrot.slane %v7856_v8, %v13268_v0  ;;  %v12154_v4 = vld [vmem:[#allocation26 + $0x14c] ss:$16 sps:$4 sm:$0xff]  }
0x1166   :  { %v7787_v13 = vmax.f32 %v10884_v35, 0.0 }
0x1167   :  { %v7788_v1 = vpack.c.bf16 %v7786_v41, %v7784_v39 }
0x1168   :  { %v7789_v16 = vpack.c.bf16 %v7787_v13, %v7785_v37 }
0x116a   :  { %8161 = vmatprep.mubr.bf16.mxu0 %v7789_v16 }
0x116b   :  { %8162 = vmatmul.mubr.bf16.vlgmr.msra.gmra.mrb[56].mxu0 %v7788_v1 }
0x116c   :  { %10644 = vmatpush3.bf16.msra.mxu0 %v12074_v54  ;;  %8204 = vmatprep.mubr.bf16.mxu0 %v7789_v16 }
0x116d   :  { %10645 = vmatprep.subr.bf16.mxu0 %v12075_v52 }
0x1170   :  { %10646 = vmatpush3.bf16.msra.mxu0 %v12076_v46 }
0x1171   :  { %10647 = vmatprep.subr.bf16.mxu0 %v12077_v47 }
0x1174   :  { %10648 = vmatpush3.bf16.msra.mxu0 %v12078_v14 }
0x1175   :  { %10649 = vmatprep.subr.bf16.mxu0 %v12079_v56 }
0x1178   :  { %10650 = vmatpush3.bf16.msra.mxu0 %v12080_v61 }
0x1179   :  { %10651 = vmatprep.subr.bf16.mxu0 %v12081_v62 }
0x117c   :  { %10652 = vmatpush3.bf16.msra.mxu0 %v12082_v51 }
0x117d   :  { %10653 = vmatprep.subr.bf16.mxu0 %v12083_v3 }
0x1180   :  { %10654 = vmatpush3.bf16.msra.mxu0 %v12084_v5 }
0x1181   :  { %10655 = vmatprep.subr.bf16.mxu0 %v12085_v6 }
0x1184   :  { %10656 = vmatpush3.bf16.msra.mxu0 %v12086_v7 }
0x1185   :  { %10657 = vmatprep.subr.bf16.mxu0 %v12087_v15 }
0x1188   :  { %10658 = vmatpush3.bf16.msra.mxu0 %v12088_v44 }
0x1189   :  { %9033 = vmatprep.subr.bf16.mxu0 %v12094_v2 }
0x118b   :  { %8205 = vmatmul.mubr.bf16.vlgmr.msra.gmra.mrb[60].mxu0 %v7788_v1  ;;  %v7869_v1 = vrot.slane %v7856_v8, %v13292_v31  ;;  %v12158_v8 = vld [vmem:[#allocation26 + $0x168] ss:$16 sps:$4 sm:$0xff]  }
0x118c   :  { %9034 = vmatpush1.bf16.msra.mxu0 %v12092_v32 }
0x118d   :  { %9035 = vmatprep.subr.bf16.mxu0 %v12100_v43  ;;  %v12127_v43 = vld [vmem:[#allocation26 + $0xc4] ss:$16 sps:$4 sm:$0xff]  }
0x118e   :  { %8963 = vmatprep.subr.bf16.mxu1 %v12127_v43 }
0x1190   :  { %9036 = vmatpush1.bf16.msra.mxu0 %v12098_v55  ;;  %v12125_v55 = vld [vmem:[#allocation26 + $0xc0] ss:$16 sps:$4 sm:$0xff]  }
0x1191   :  { %9037 = vmatprep.subr.bf16.mxu0 %v12106_v63  ;;  %8964 = vmatpush1.bf16.msra.mxu1 %v12125_v55  ;;  %v12133_v63 = vld [vmem:[#allocation26 + $0xe4] ss:$16 sps:$4 sm:$0xff]  }
0x1192   :  { %8965 = vmatprep.subr.bf16.mxu1 %v12133_v63  ;;  %v13764_v63 = vld [vmem:[#allocation25 + $0x3] sm:$0x7] }
0x1194   :  { %9038 = vmatpush1.bf16.msra.mxu0 %v12104_v25  ;;  %v12131_v25 = vld [vmem:[#allocation26 + $0xe0] ss:$16 sps:$4 sm:$0xff]  }
0x1195   :  { %9039 = vmatprep.subr.bf16.mxu0 %v12112_v30  ;;  %8966 = vmatpush1.bf16.msra.mxu1 %v12131_v25  ;;  %v12139_v30 = vld [vmem:[#allocation26 + $0x104] ss:$16 sps:$4 sm:$0xff]  }
0x1196   :  { %8967 = vmatprep.subr.bf16.mxu1 %v12139_v30 }
0x1198   :  { %9040 = vmatpush1.bf16.msra.mxu0 %v12110_v49  ;;  %v12137_v49 = vld [vmem:[#allocation26 + $0x100] ss:$16 sps:$4 sm:$0xff]  }
0x1199   :  { %9041 = vmatprep.subr.bf16.mxu0 %v12118_v27  ;;  %8968 = vmatpush1.bf16.msra.mxu1 %v12137_v49  ;;  %v12145_v27 = vld [vmem:[#allocation26 + $0x124] ss:$16 sps:$4 sm:$0xff]   ;;  %v8299_v49 = vrot.slane %v13764_v63, %v13268_v0 }
0x119a   :  { %8969 = vmatprep.subr.bf16.mxu1 %v12145_v27 }
0x119c   :  { %9042 = vmatpush1.bf16.msra.mxu0 %v12116_v29  ;;  %v12143_v29 = vld [vmem:[#allocation26 + $0x120] ss:$16 sps:$4 sm:$0xff]  }
0x119d   :  { %9043 = vmatprep.subr.bf16.mxu0 %v12124_v45  ;;  %v12151_v45 = vld [vmem:[#allocation26 + $0x144] ss:$16 sps:$4 sm:$0xff]   ;;  %8970 = vmatpush1.bf16.msra.mxu1 %v12143_v29 }
0x119e   :  { %8971 = vmatprep.subr.bf16.mxu1 %v12151_v45 }
0x11a0   :  { %9044 = vmatpush1.bf16.msra.mxu0 %v12122_v42  ;;  %v12149_v42 = vld [vmem:[#allocation26 + $0x140] ss:$16 sps:$4 sm:$0xff]  }
0x11a1   :  { %9045 = vmatprep.subr.bf16.mxu0 %v12130_v18  ;;  %8972 = vmatpush1.bf16.msra.mxu1 %v12149_v42 }
0x11a4   :  { %9046 = vmatpush1.bf16.msra.mxu0 %v12128_v59  ;;  %v8220_v59 = vld [vmem:[#allocation23 + $0x3] sm:$0x7] }
0x11a5   :  { %9047 = vmatprep.subr.bf16.mxu0 %v12136_v21  ;;  %v8273_v30 = vrot.slane %v8220_v59, %v13285_v17 }
0x11a8   :  { %9048 = vmatpush1.bf16.msra.mxu0 %v12134_v48  ;;  %v8277_v48 = vrot.slane %v8220_v59, %v13268_v0 }
0x11a9   :  { %9049 = vmatprep.subr.bf16.mxu0 %v12142_v23 }
0x11ac   :  { %9050 = vmatpush1.bf16.msra.mxu0 %v12140_v26  ;;  %v8295_v26 = vrot.slane %v13764_v63, %v13285_v17 }
0x11ad   :  { %9051 = vmatprep.subr.bf16.mxu0 %v12148_v28 }
0x11b0   :  { %9052 = vmatpush1.bf16.msra.mxu0 %v12146_v34 }
0x11b1   :  { %9053 = vmatprep.subr.bf16.mxu0 %v12154_v4 }
0x123e   :  { %v8163_v38 = vpop.f32.mrb[56].mxu0 }
0x123f   :  { %v8165_v11 = vpop.f32.mrb[57].mxu0  ;;  %v8164_v35 = vadd.f32 %v8163_v38, %v7861_v19  ;;  %v12152_v38 = vld [vmem:[#allocation26 + $0x148] ss:$16 sps:$4 sm:$0xff]  }
0x1240   :  { %v8167_v33 = vpop.f32.mrb[58].mxu0  ;;  %v8166_v39 = vadd.f32 %v8165_v11, %v7865_v40  ;;  %v12157_v11 = vld [vmem:[#allocation26 + $0x164] ss:$16 sps:$4 sm:$0xff]   ;;  %9054 = vmatpush1.bf16.msra.mxu0 %v12152_v38 }
0x1241   :  { %v8169_v22 = vpop.f32.mrb[59].mxu0  ;;  %v8168_v41 = vadd.f32 %v8167_v33, %v7861_v19  ;;  %v13721_v16 = vadd.f32 %v8164_v35, %v13694_v60  ;;  %v12160_v33 = vld [vmem:[#allocation26 + $0x16c] ss:$16 sps:$4 sm:$0xff]   ;;  %8973 = vmatprep.subr.bf16.mxu1 %v12157_v11  ;;  %v12163_v19 = vld [vmem:[#allocation26 + $0x184] ss:$16 sps:$4 sm:$0xff]  }
0x1242   :  { %v8170_v37 = vadd.f32 %v8169_v22, %v7865_v40  ;;  %v13724_v52 = vadd.f32 %v8166_v39, %v13690_v36  ;;  %v12155_v22 = vld [vmem:[#allocation26 + $0x160] ss:$16 sps:$4 sm:$0xff]   ;;  %9055 = vmatprep.subr.bf16.mxu0 %v12160_v33  ;;  %v12166_v40 = vld [vmem:[#allocation26 + $0x18c] ss:$16 sps:$4 sm:$0xff]   ;;  %v12164_v39 = vld [vmem:[#allocation26 + $0x188] ss:$16 sps:$4 sm:$0xff]  }
0x1243   :  { %v13727_v14 = vadd.f32 %v8168_v41, %v13696_v58  ;;  %v8233_v3 = vmul.f32 %v13721_v16, %v13721_v16  ;;  %8974 = vmatpush1.bf16.msra.mxu1 %v12155_v22  ;;  %v12161_v35 = vld [vmem:[#allocation26 + $0x180] ss:$16 sps:$4 sm:$0xff]   ;;  %v12169_v41 = vld [vmem:[#allocation26 + $0x1a4] ss:$16 sps:$4 sm:$0xff]  }
0x1244   :  { %v13730_v56 = vadd.f32 %v8170_v37, %v13692_v53  ;;  %v8223_v36 = vadd.f32 %v13724_v52, %v13721_v16  ;;  %v8234_v58 = vmul.f32 %v13724_v52, %v13724_v52  ;;  %9056 = vmatpush1.bf16.msra.mxu0 %v12158_v8  ;;  %8975 = vmatprep.subr.bf16.mxu1 %v12163_v19  ;;  %v12172_v37 = vld [vmem:[#allocation26 + $0x1ac] ss:$16 sps:$4 sm:$0xff]  }
0x1245   :  { %v8236_v6 = vmul.f32 %v13727_v14, %v13727_v14  ;;  %9057 = vmatprep.subr.bf16.mxu0 %v12166_v40 }
0x1246   :  { %v8227_v53 = vadd.f32 %v13730_v56, %v13727_v14  ;;  %v8237_v44 = vmul.f32 %v13730_v56, %v13730_v56  ;;  %v8239_v10 = vadd.f32 %v8234_v58, %v8233_v3  ;;  %v12179_v3 = vld [vmem:[#allocation26 + $0x1e0] ss:$16 sps:$4 sm:$0xff]   ;;  %v12190_v58 = vld [vmem:[#allocation26 + $0x20c] ss:$16 sps:$4 sm:$0xff]  }
0x1247   :  { %8976 = vmatpush1.bf16.msra.mxu1 %v12161_v35 }
0x1248   :  { %v8243_v20 = vadd.f32 %v8237_v44, %v8236_v6  ;;  %9058 = vmatpush1.bf16.msra.mxu0 %v12164_v39  ;;  %8977 = vmatprep.subr.bf16.mxu1 %v12169_v41 }
0x1249   :  { %9059 = vmatprep.subr.bf16.mxu0 %v12172_v37 }
0x125e   :  { %v10659_v13 = vpop.f32.mrb[60].mxu0 }
0x125f   :  { %v10660_v54 = vpop.f32.mrb[61].mxu0 }
0x1260   :  { %v10661_v46 = vadd.f32 %v10660_v54, %v10659_v13  ;;  %v10662_v47 = vpop.f32.mrb[62].mxu0  ;;  %v12167_v13 = vld [vmem:[#allocation26 + $0x1a0] ss:$16 sps:$4 sm:$0xff]   ;;  %v12175_v54 = vld [vmem:[#allocation26 + $0x1c4] ss:$16 sps:$4 sm:$0xff]  }
0x1261   :  { %v10663_v61 = vpop.f32.mrb[63].mxu0  ;;  %8978 = vmatpush1.bf16.msra.mxu1 %v12167_v13 }
0x1262   :  { %v8207_v62 = vadd.f32 %v10661_v46, %v7869_v1  ;;  %v10664_v51 = vadd.f32 %v10663_v61, %v10662_v47  ;;  %v12178_v46 = vld [vmem:[#allocation26 + $0x1cc] ss:$16 sps:$4 sm:$0xff]   ;;  %v12173_v47 = vld [vmem:[#allocation26 + $0x1c0] ss:$16 sps:$4 sm:$0xff]   ;;  %v12176_v61 = vld [vmem:[#allocation26 + $0x1c8] ss:$16 sps:$4 sm:$0xff]   ;;  %8979 = vmatprep.subr.bf16.mxu1 %v12175_v54 }
0x1264   :  { %v13735_v60 = vadd.f32 %v8207_v62, %v13711_v50  ;;  %v8210_v5 = vadd.f32 %v10664_v51, %v7869_v1  ;;  %v12170_v1 = vld [vmem:[#allocation26 + $0x1a8] ss:$16 sps:$4 sm:$0xff]   ;;  %v12181_v62 = vld [vmem:[#allocation26 + $0x1e4] ss:$16 sps:$4 sm:$0xff]   ;;  %v12184_v51 = vld [vmem:[#allocation26 + $0x1ec] ss:$16 sps:$4 sm:$0xff]  }
0x1265   :  { %9060 = vmatpush1.bf16.msra.mxu0 %v12170_v1  ;;  %8980 = vmatpush1.bf16.msra.mxu1 %v12173_v47 }
0x1266   :  { %v13746_v7 = vadd.f32 %v8210_v5, %v13709_v57  ;;  %v8224_v15 = vadd.f32 %v8223_v36, %v13735_v60  ;;  %v8235_v50 = vmul.f32 %v13735_v60, %v13735_v60  ;;  %9061 = vmatprep.subr.bf16.mxu0 %v12178_v46  ;;  %v12182_v5 = vld [vmem:[#allocation26 + $0x1e8] ss:$16 sps:$4 sm:$0xff]   ;;  %8981 = vmatprep.subr.bf16.mxu1 %v12181_v62  ;;  %v12187_v36 = vld [vmem:[#allocation26 + $0x204] ss:$16 sps:$4 sm:$0xff]  }
0x1268   :  { %8225 = vadd.xlane.f32.xlu0 %v8224_v15  ;;  %v8228_v9 = vadd.f32 %v8227_v53, %v13746_v7  ;;  %v8238_v32 = vmul.f32 %v13746_v7, %v13746_v7  ;;  %v8240_v2 = vadd.f32 %v8239_v10, %v8235_v50 }
0x1269   :  { %9062 = vmatpush1.bf16.msra.mxu0 %v12176_v61  ;;  %8982 = vmatpush1.bf16.msra.mxu1 %v12179_v3 }
0x126a   :  { %8229 = vadd.xlane.f32.xlu1 %v8228_v9  ;;  %v8244_v57 = vadd.f32 %v8243_v20, %v8238_v32  ;;  %9063 = vmatprep.subr.bf16.mxu0 %v12184_v51 }
0x126b   :  { %8992 = vmatprep.subr.bf16.mxu1 %v12187_v36 }
0x126c   :  { %8241 = vadd.xlane.f32.xlu0 %v8240_v2 }
0x126d   :  { %9064 = vmatpush1.bf16.msra.mxu0 %v12182_v5 }
0x126e   :  { %8245 = vadd.xlane.f32.xlu1 %v8244_v57  ;;  %9074 = vmatprep.subr.bf16.mxu0 %v12190_v58 }
0x12f5   :  { %v8226_v53 = vpop.xlane.xlu0 %8225 }
0x12f6   :  { %v13756_v6 = vmul.f32 0.0033333334, %v8226_v53 }
0x12f7   :  { %v8230_v15 = vpop.xlane.xlu1 %8229 }
0x12f8   :  { %v13758_v50 = vmul.f32 0.0033333334, %v8230_v15  ;;  %v8249_v9 = vmul.f32 %v13756_v6, %v13756_v6  ;;  %v8253_v21 = vsub.f32 %v13721_v16, %v13756_v6  ;;  %v8254_v25 = vsub.f32 %v13724_v52, %v13756_v6  ;;  %v12185_v15 = vld [vmem:[#allocation26 + $0x200] ss:$16 sps:$4 sm:$0xff]  }
0x12f9   :  { %v8242_v44 = vpop.xlane.xlu0 %8241 }
0x12fa   :  { %v8247_v10 = vmul.f32 0.0033333334, %v8242_v44  ;;  %v8250_v20 = vmul.f32 %v13758_v50, %v13758_v50  ;;  %v8256_v27 = vsub.f32 %v13727_v14, %v13758_v50  ;;  %v8257_v16 = vsub.f32 %v13730_v56, %v13758_v50  ;;  %v12188_v44 = vld [vmem:[#allocation26 + $0x208] ss:$16 sps:$4 sm:$0xff]  }
0x12fb   :  { %v8246_v32 = vpop.xlane.xlu1 %8245  ;;  %v8258_v58 = vsub.f32 %v13746_v7, %v13758_v50  ;;  %v8281_v7 = vrot.slane %v8220_v59, %v13292_v31  ;;  %v12199_v50 = vld [vmem:[#allocation26 + $0x244] ss:$16 sps:$4 sm:$0xff]  }
0x12fc   :  { %v8251_v2 = vsub.f32 %v8247_v10, %v8249_v9  ;;  %v8248_v57 = vmul.f32 0.0033333334, %v8246_v32  ;;  %v12193_v10 = vld [vmem:[#allocation26 + $0x224] ss:$16 sps:$4 sm:$0xff]   ;;  %v12196_v32 = vld [vmem:[#allocation26 + $0x22c] ss:$16 sps:$4 sm:$0xff]  }
0x12fd   :  { %v12205_v59 = vld [vmem:[#allocation26 + $0x264] ss:$16 sps:$4 sm:$0xff]  }
0x12fe   :  { %v8259_v43 = vadd.f32 1e-05, %v8251_v2  ;;  %v8252_v18 = vsub.f32 %v8248_v57, %v8250_v20  ;;  %v8255_v2 = vsub.f32 %v13735_v60, %v13756_v6  ;;  %v12191_v57 = vld [vmem:[#allocation26 + $0x220] ss:$16 sps:$4 sm:$0xff]  }
0x12ff   :  { %v12197_v6 = vld [vmem:[#allocation26 + $0x240] ss:$16 sps:$4 sm:$0xff]  }
0x1300   :  { %12293 = vrsqrt.f32 %v8259_v43  ;;  %v8260_v55 = vadd.f32 1e-05, %v8252_v18  ;;  %v12194_v43 = vld [vmem:[#allocation26 + $0x228] ss:$16 sps:$4 sm:$0xff]  }
0x1302   :  { %12295 = vrsqrt.f32 %v8260_v55  ;;  %v12202_v55 = vld [vmem:[#allocation26 + $0x24c] ss:$16 sps:$4 sm:$0xff]  }
0x130a   :  { %v12294_v23 = vpop.eup %12293 }
0x130b   :  { %v8264_v28 = vmul.f32 %v12294_v23, %v8254_v25  ;;  %v8263_v29 = vmul.f32 %v12294_v23, %v8253_v21  ;;  %v8265_v18 = vmul.f32 %v12294_v23, %v8255_v2  ;;  %v12200_v21 = vld [vmem:[#allocation26 + $0x248] ss:$16 sps:$4 sm:$0xff]   ;;  %v12248_v2 = vld [vmem:[#allocation29 + $0x98] sm:$0xff]  }
0x130c   :  { %v12296_v52 = vpop.eup %12295 }
0x130d   :  { %v8267_v34 = vmul.f32 %v12296_v52, %v8257_v16  ;;  %v8286_v45 = vmul.f32 %v8277_v48, %v8264_v28  ;;  %v8266_v4 = vmul.f32 %v12296_v52, %v8256_v27  ;;  %v8285_v42 = vmul.f32 %v8273_v30, %v8263_v29  ;;  %v12214_v16 = vld [vmem:[#allocation26 + $0x28c] ss:$16 sps:$4 sm:$0xff]   ;;  %v12209_v29 = vld [vmem:[#allocation26 + $0x280] ss:$16 sps:$4 sm:$0xff]  }
0x130e   :  { %v8268_v20 = vmul.f32 %v12296_v52, %v8258_v58  ;;  %v8287_v25 = vmul.f32 %v8281_v7, %v8265_v18  ;;  %v12212_v52 = vld [vmem:[#allocation26 + $0x288] ss:$16 sps:$4 sm:$0xff]  }
0x130f   :  { %v8289_v38 = vmul.f32 %v8277_v48, %v8267_v34  ;;  %v8308_v11 = vadd.f32 %v8299_v49, %v8286_v45  ;;  %v8288_v33 = vmul.f32 %v8273_v30, %v8266_v4  ;;  %v8307_v22 = vadd.f32 %v8295_v26, %v8285_v42  ;;  %v12208_v30 = vld [vmem:[#allocation26 + $0x26c] ss:$16 sps:$4 sm:$0xff]   ;;  %v12217_v34 = vld [vmem:[#allocation26 + $0x2a4] ss:$16 sps:$4 sm:$0xff]   ;;  %v12215_v42 = vld [vmem:[#allocation26 + $0x2a0] ss:$16 sps:$4 sm:$0xff]  }
0x1310   :  { %v8290_v60 = vmul.f32 %v8281_v7, %v8268_v20  ;;  %v8303_v48 = vrot.slane %v13764_v63, %v13292_v31  ;;  %v12220_v45 = vld [vmem:[#allocation26 + $0x2ac] ss:$16 sps:$4 sm:$0xff]   ;;  %v12241_v58 = vld [vmem:[#allocation29 + $0x50] sm:$0xff]   ;;  %v12249_v20 = vld [vmem:[#allocation29 + $0x60] sm:$0xff]  }
0x1311   :  { %v8311_v8 = vadd.f32 %v8299_v49, %v8289_v38  ;;  %v8314_v19 = vmax.f32 %v8308_v11, 0.0  ;;  %v8310_v40 = vadd.f32 %v8295_v26, %v8288_v33  ;;  %v8313_v35 = vmax.f32 %v8307_v22, 0.0  ;;  %v12203_v49 = vld [vmem:[#allocation26 + $0x260] ss:$16 sps:$4 sm:$0xff]   ;;  %v12206_v26 = vld [vmem:[#allocation26 + $0x268] ss:$16 sps:$4 sm:$0xff]  }
0x1312   :  { %v8312_v23 = vadd.f32 %v8303_v48, %v8290_v60  ;;  %v8309_v27 = vadd.f32 %v8303_v48, %v8287_v25  ;;  %v12218_v38 = vld [vmem:[#allocation26 + $0x2a8] ss:$16 sps:$4 sm:$0xff]   ;;  %v12223_v33 = vld [vmem:[#allocation26 + $0x2c4] ss:$16 sps:$4 sm:$0xff]   ;;  %v12226_v22 = vld [vmem:[#allocation26 + $0x2cc] ss:$16 sps:$4 sm:$0xff]  }
0x1313   :  { %v8317_v39 = vmax.f32 %v8311_v8, 0.0  ;;  %v8320_v14 = vpack.c.bf16 %v8314_v19, %v8314_v19  ;;  %v8316_v41 = vmax.f32 %v8310_v40, 0.0  ;;  %v8319_v37 = vpack.c.bf16 %v8313_v35, %v8313_v35  ;;  %v12221_v19 = vld [vmem:[#allocation26 + $0x2c0] ss:$16 sps:$4 sm:$0xff]   ;;  %v12224_v40 = vld [vmem:[#allocation26 + $0x2c8] ss:$16 sps:$4 sm:$0xff]  }
0x1314   :  { %v8318_v28 = vmax.f32 %v8312_v23, 0.0  ;;  %v8315_v63 = vmax.f32 %v8309_v27, 0.0  ;;  %v12252_v18 = vld [vmem:[#allocation29 + $0xa0] sm:$0xff]   ;;  %v12253_v7 = vld [vmem:[#allocation29 + $0x68] sm:$0xff]   ;;  %v12259_v25 = vld [vmem:[#allocation29 + $0x30] sm:$0xff]  }
0x1315   :  { %v8323_v56 = vpack.c.bf16 %v8317_v39, %v8317_v39  ;;  %v8450_v13 = vunpack.c.l.b16 %v8320_v14  ;;  %v8322_v1 = vpack.c.bf16 %v8316_v41, %v8316_v41  ;;  %v8449_v54 = vunpack.c.l.b16 %v8319_v37  ;;  %v12229_v39 = vld [vmem:[#allocation26 + $0x2e4] ss:$16 sps:$4 sm:$0xff]   ;;  %v12232_v14 = vld [vmem:[#allocation26 + $0x2ec] ss:$16 sps:$4 sm:$0xff]   ;;  %v12227_v37 = vld [vmem:[#allocation26 + $0x2e0] ss:$16 sps:$4 sm:$0xff]  }
0x1316   :  { %v8324_v4 = vpack.c.bf16 %v8318_v28, %v8318_v28  ;;  %v8321_v11 = vpack.c.bf16 %v8315_v63, %v8315_v63  ;;  %v12256_v60 = vld [vmem:[#allocation29 + $0xa8] sm:$0xff]   ;;  %v12260_v48 = vld [vmem:[#allocation29 + $0xb0] sm:$0xff]   ;;  %v12263_v23 = vld [vmem:[#allocation29 + $0x38] sm:$0xff]  }
0x1317   :  { %v8453_v46 = vunpack.c.l.b16 %v8323_v56  ;;  %v8452_v47 = vunpack.c.l.b16 %v8322_v1  ;;  %v8459_v61 = vrot.slane %v8450_v13, 7  ;;  %v8455_v51 = vrot.slane %v8449_v54, 7  ;;  %v12230_v56 = vld [vmem:[#allocation26 + $0x2e8] ss:$16 sps:$4 sm:$0xff]  }
0x1318   :  { %v8454_v8 = vunpack.c.l.b16 %v8324_v4  ;;  %v8451_v35 = vunpack.c.l.b16 %v8321_v11  ;;  %v12233_v1 = vld [vmem:[#allocation29 + $0x40] sm:$0xff]  }
0x1319   :  { %v8460_v62 = vrot.slane %v8453_v46, 6  ;;  %v8456_v3 = vrot.slane %v8452_v47, 6  ;;  %v12234_v54 = vld [vmem:[#allocation29 + $0xc0] sm:$0xff]  }
0x131a   :  { %v8463_v41 = vrot.slane %v8454_v8, 6  ;;  %v8462_v13 = vrot.slane %v8451_v35, 7  ;;  %v12235_v47 = vld [vmem:[#allocation29] sm:$0xff]  }
0x131b   :  { %v8461_v5 = vsel %vm8457_vm4, %v8460_v62, %v8459_v61  ;;  %v8458_v36 = vsel %vm8457_vm4, %v8456_v3, %v8455_v51  ;;  %v12236_v61 = vld [vmem:[#allocation29 + $0x80] sm:$0xff]   ;;  %v12237_v51 = vld [vmem:[#allocation29 + $0x48] sm:$0xff]  }
0x131c   :  { %v8466_v53 = vpack.c.b16 %v8461_v5, %v8461_v5  ;;  %v8465_v9 = vpack.c.b16 %v8458_v36, %v8458_v36  ;;  %v8464_v46 = vsel %vm8457_vm4, %v8463_v41, %v8462_v13  ;;  %v12238_v3 = vld [vmem:[#allocation29 + $0xc8] sm:$0xff]  }
0x131d   :  { %v8467_v62 = vpack.c.b16 %v8464_v46, %v8464_v46  ;;  %v12239_v5 = vld [vmem:[#allocation29 + $0x8] sm:$0xff]  }
0x131e   :  { %8983 = vmatprep.mubr.bf16.mxu1 %v8466_v53  ;;  %9065 = vmatprep.mubr.bf16.mxu0 %v8466_v53  ;;  %v12240_v36 = vld [vmem:[#allocation29 + $0x88] sm:$0xff]   ;;  %v12242_v53 = vld [vmem:[#allocation29 + $0xd0] sm:$0xff]  }
0x131f   :  { %8984 = vmatmul.mubr.bf16.vlgmr.msra.gmra.mrb[80].mxu1 %v8465_v9  ;;  %9066 = vmatmul.mubr.bf16.vlgmr.msra.gmra.mrb[64].mxu0 %v8465_v9  ;;  %v12245_v9 = vld [vmem:[#allocation29 + $0x58] sm:$0xff]  }
0x1320   :  { %8993 = vmatpush1.bf16.msra.mxu1 %v12185_v15  ;;  %9075 = vmatpush1.bf16.msra.mxu0 %v12188_v44  ;;  %v12243_v15 = vld [vmem:[#allocation29 + $0x10] sm:$0xff]  }
0x1321   :  { %8994 = vmatprep.subr.bf16.mxu1 %v12193_v10  ;;  %9076 = vmatprep.subr.bf16.mxu0 %v12196_v32  ;;  %v12244_v44 = vld [vmem:[#allocation29 + $0x90] sm:$0xff]   ;;  %v12246_v10 = vld [vmem:[#allocation29 + $0xd8] sm:$0xff]  }
0x1322   :  { %9024 = vmatprep.mubr.bf16.mxu1 %v12767_v24  ;;  %9106 = vmatprep.mubr.bf16.mxu0 %v12767_v24  ;;  %v12211_v24 = vld [vmem:[#allocation26 + $0x284] ss:$16 sps:$4 sm:$0xff]   ;;  %v12247_v32 = vld [vmem:[#allocation29 + $0x18] sm:$0xff]  }
0x1324   :  { %8995 = vmatpush1.bf16.msra.mxu1 %v12191_v57  ;;  %9077 = vmatpush1.bf16.msra.mxu0 %v12194_v43  ;;  %v12250_v57 = vld [vmem:[#allocation29 + $0xe0] sm:$0xff]  }
0x1325   :  { %8996 = vmatprep.subr.bf16.mxu1 %v12199_v50  ;;  %9078 = vmatprep.subr.bf16.mxu0 %v12202_v55  ;;  %v12251_v43 = vld [vmem:[#allocation29 + $0x20] sm:$0xff]   ;;  %v12254_v50 = vld [vmem:[#allocation29 + $0xe8] sm:$0xff]  }
0x1326   :  { %v12255_v55 = vld [vmem:[#allocation29 + $0x28] sm:$0xff]  }
0x1328   :  { %8997 = vmatpush1.bf16.msra.mxu1 %v12197_v6  ;;  %9079 = vmatpush1.bf16.msra.mxu0 %v12200_v21  ;;  %v12257_v6 = vld [vmem:[#allocation29 + $0x70] sm:$0xff]  }
0x1329   :  { %8998 = vmatprep.subr.bf16.mxu1 %v12205_v59  ;;  %9080 = vmatprep.subr.bf16.mxu0 %v12208_v30  ;;  %v12258_v21 = vld [vmem:[#allocation29 + $0xf0] sm:$0xff]   ;;  %v12261_v59 = vld [vmem:[#allocation29 + $0x78] sm:$0xff]  }
0x132a   :  { %v12262_v30 = vld [vmem:[#allocation29 + $0xf8] sm:$0xff]  }
0x132c   :  { %8999 = vmatpush1.bf16.msra.mxu1 %v12203_v49  ;;  %9081 = vmatpush1.bf16.msra.mxu0 %v12206_v26  ;;  %v12264_v49 = vld [vmem:[#allocation29 + $0xb8] sm:$0xff]  }
0x132d   :  { %9000 = vmatprep.subr.bf16.mxu1 %v12211_v24  ;;  %9082 = vmatprep.subr.bf16.mxu0 %v12214_v16  ;;  %v8421_v26 = vld [vmem:[#allocation28] sm:$0xf] }
0x132e   :  { %v8426_v27 = vrot.slane %v8421_v26, %v13285_v17  ;;  %v8434_v24 = vrot.slane %v8421_v26, %v13292_v31  ;;  %v8430_v16 = vrot.slane %v8421_v26, %v13268_v0  ;;  %v8438_v28 = vrot.slane %v8421_v26, %v13278_v12 }
0x1330   :  { %9001 = vmatpush1.bf16.msra.mxu1 %v12209_v29  ;;  %9083 = vmatpush1.bf16.msra.mxu0 %v12212_v52 }
0x1331   :  { %9002 = vmatprep.subr.bf16.mxu1 %v12217_v34  ;;  %9084 = vmatprep.subr.bf16.mxu0 %v12220_v45 }
0x1334   :  { %9003 = vmatpush1.bf16.msra.mxu1 %v12215_v42  ;;  %9085 = vmatpush1.bf16.msra.mxu0 %v12218_v38 }
0x1335   :  { %9004 = vmatprep.subr.bf16.mxu1 %v12223_v33  ;;  %9086 = vmatprep.subr.bf16.mxu0 %v12226_v22 }
0x1338   :  { %9005 = vmatpush1.bf16.msra.mxu1 %v12221_v19  ;;  %9087 = vmatpush1.bf16.msra.mxu0 %v12224_v40 }
0x1339   :  { %9006 = vmatprep.subr.bf16.mxu1 %v12229_v39  ;;  %9088 = vmatprep.subr.bf16.mxu0 %v12232_v14 }
0x133c   :  { %9007 = vmatpush1.bf16.msra.mxu1 %v12227_v37  ;;  %9089 = vmatpush1.bf16.msra.mxu0 %v12230_v56  ;;  %v10448_v37 = vld [vmem:[#allocation31] ss:$0 sm:$0xff] }
0x133d   :  { %10665 = vmatprep.subr.bf16.mxu1 %v12233_v1  ;;  %10687 = vmatprep.subr.bf16.mxu0 %v12234_v54 }
0x133f   :  { %9025 = vmatmul.mubr.bf16.vlgmr.msra.gmra.mrb[80].mxu1 %v8467_v62  ;;  %9107 = vmatmul.mubr.bf16.vlgmr.msra.gmra.mrb[64].mxu0 %v8467_v62 }
0x1340   :  { %10666 = vmatpush3.bf16.msra.mxu1 %v12235_v47  ;;  %10688 = vmatpush3.bf16.msra.mxu0 %v12236_v61 }
0x1341   :  { %10667 = vmatprep.subr.bf16.mxu1 %v12237_v51  ;;  %10689 = vmatprep.subr.bf16.mxu0 %v12238_v3 }
0x1344   :  { %10668 = vmatpush3.bf16.msra.mxu1 %v12239_v5  ;;  %10690 = vmatpush3.bf16.msra.mxu0 %v12240_v36 }
0x1345   :  { %10669 = vmatprep.subr.bf16.mxu1 %v12241_v58  ;;  %10691 = vmatprep.subr.bf16.mxu0 %v12242_v53 }
0x1348   :  { %10670 = vmatpush3.bf16.msra.mxu1 %v12243_v15  ;;  %10692 = vmatpush3.bf16.msra.mxu0 %v12244_v44 }
0x1349   :  { %10671 = vmatprep.subr.bf16.mxu1 %v12245_v9  ;;  %10693 = vmatprep.subr.bf16.mxu0 %v12246_v10 }
0x134c   :  { %10672 = vmatpush3.bf16.msra.mxu1 %v12247_v32  ;;  %10694 = vmatpush3.bf16.msra.mxu0 %v12248_v2 }
0x134d   :  { %10673 = vmatprep.subr.bf16.mxu1 %v12249_v20  ;;  %10695 = vmatprep.subr.bf16.mxu0 %v12250_v57 }
0x1350   :  { %10674 = vmatpush3.bf16.msra.mxu1 %v12251_v43  ;;  %10696 = vmatpush3.bf16.msra.mxu0 %v12252_v18 }
0x1351   :  { %10675 = vmatprep.subr.bf16.mxu1 %v12253_v7  ;;  %10697 = vmatprep.subr.bf16.mxu0 %v12254_v50 }
0x1354   :  { %10676 = vmatpush3.bf16.msra.mxu1 %v12255_v55  ;;  %10698 = vmatpush3.bf16.msra.mxu0 %v12256_v60 }
0x1355   :  { %10677 = vmatprep.subr.bf16.mxu1 %v12257_v6  ;;  %10699 = vmatprep.subr.bf16.mxu0 %v12258_v21 }
0x1358   :  { %10678 = vmatpush3.bf16.msra.mxu1 %v12259_v25  ;;  %10700 = vmatpush3.bf16.msra.mxu0 %v12260_v48 }
0x1359   :  { %10679 = vmatprep.subr.bf16.mxu1 %v12261_v59  ;;  %10701 = vmatprep.subr.bf16.mxu0 %v12262_v30 }
0x135c   :  { %10680 = vmatpush3.bf16.msra.mxu1 %v12263_v23  ;;  %10702 = vmatpush3.bf16.msra.mxu0 %v12264_v49 }
0x1412   :  { %v9026_v29 = vpop.f32.mrb[80].mxu1  ;;  %v9108_v52 = vpop.f32.mrb[64].mxu0 }
0x1413   :  { %v10885_v63 = vadd.f32 %v9026_v29, %v8426_v27  ;;  %v10887_v34 = vadd.f32 %v9108_v52, %v8434_v24  ;;  %v9028_v45 = vpop.f32.mrb[81].mxu1  ;;  %v9110_v4 = vpop.f32.mrb[65].mxu0 }
0x1414   :  { %v10886_v42 = vadd.f32 %v9028_v45, %v8430_v16  ;;  %v10888_v38 = vadd.f32 %v9110_v4, %v8438_v28  ;;  %v9030_v11 = vpop.f32.mrb[82].mxu1  ;;  %v9112_v33 = vpop.f32.mrb[66].mxu0 }
0x1415   :  { %v9115_v22 = vmax.f32 %v10885_v63, 0.0  ;;  %v9117_v8 = vmax.f32 %v10887_v34, 0.0  ;;  %v9031_v19 = vpop.f32.mrb[83].mxu1  ;;  %v9113_v17 = vpop.f32.mrb[67].mxu0 }
0x1416   :  { %v9116_v40 = vmax.f32 %v10886_v42, 0.0  ;;  %v9118_v31 = vmax.f32 %v10888_v38, 0.0 }
0x1417   :  { %v9119_v39 = vpack.c.bf16 %v9115_v22, %v9115_v22  ;;  %v9121_v12 = vpack.c.bf16 %v9117_v8, %v9117_v8 }
0x1418   :  { %v9120_v35 = vpack.c.bf16 %v9116_v40, %v9116_v40  ;;  %v9122_v0 = vpack.c.bf16 %v9118_v31, %v9118_v31 }
0x141a   :  { %9418 = vmatprep.mubr.bf16.mxu1 %v9120_v35  ;;  %9458 = vmatprep.mubr.bf16.mxu0 %v9122_v0 }
0x141b   :  { %9419 = vmatmul.mubr.bf16.vlgmr.msra.gmra.mrb[84].mxu1 %v9119_v39  ;;  %9459 = vmatmul.mubr.bf16.vlgmr.msra.gmra.mrb[68].mxu0 %v9121_v12 }
0x14ee   :  { %v10681_v14 = vpop.f32.mrb[84].mxu1  ;;  %v10703_v41 = vpop.f32.mrb[68].mxu0 }
0x14ef   :  { %v10682_v56 = vpop.f32.mrb[85].mxu1  ;;  %v10704_v13 = vpop.f32.mrb[69].mxu0 }
0x14f0   :  { %v10683_v1 = vadd.f32 %v10682_v56, %v10681_v14  ;;  %v10705_v54 = vadd.f32 %v10704_v13, %v10703_v41  ;;  %v10684_v46 = vpop.f32.mrb[86].mxu1  ;;  %v10706_v47 = vpop.f32.mrb[70].mxu0 }
0x14f1   :  { %v10685_v61 = vpop.f32.mrb[87].mxu1  ;;  %v10707_v62 = vpop.f32.mrb[71].mxu0 }
0x14f2   :  { %v9421_v51 = vadd.f32 %v10683_v1, %v10448_v37 }
0x14f4   :  { %v9461_v3 = vadd.f32 %v10705_v54, %v9421_v51 }
0x14f6   :  { %9466 = vst [vmem:[#allocation32] sm:$0x3] %v9461_v3 }
0x14f7   :  { %12698 = shalt.err (!%p12695_p3)
}
0x14f8   :  { %s13846_s16 = sld [smem:[#allocation47_spill]] }
0x14fe   :  { %s12699_s22 = scalar_lea.hbm %s13846_s16, 32 }
0x14ff   :  { %p12700_p4 = scmp.ne.s32.totalorder %s13846_s16, %s12699_s22  ;;  %p12703_p5 = scmp.lt.u32.totalorder %s12699_s22, %s13846_s16 }
0x1501   :  { %p12705_p6 = pnand %p12703_p5, %p12700_p4 }
0x1503   :  { %12708 = shalt.err (!%p12705_p6)
}
0x1504   :  { %9476 = dma.vmem_to_hbm [thread:$0]  %s9474_s11, 32, %s13846_s16, [#allocation5]  }
0x1505   :  { %12729 = dma.done.wait [#allocation5], 32  }
0x1506   :  { %12730 = vsyncadd [#allocation5], 4294967264 }
0x1507   :  { %9480 = vsyncpa [#allocation4], 1 }
0x1508   :  { %9481 = vsyncpa [#allocation9], 1 }
0x1509   :  { %9482 = vsyncpa [#allocation12], 1 }
0x150a   :  { %9483 = vsyncpa [#allocation15], 1 }
0x150b   :  { %9484 = vsyncpa [#allocation18], 1 }
0x150c   :  { %9485 = vsyncpa [#allocation21], 1 }
0x150d   :  { %9486 = vsyncpa [#allocation24], 1 }
0x150e   :  { %9487 = vsyncpa [#allocation27], 1 }
0x150f   :  { %9488 = vsyncpa [#allocation30], 1 }
0x1510   :  { %9489 = vsyncpa [#allocation5], 1 }
0x1511   :  { %9490 = vsyncpa [#allocation6], 1 }

</bundles_post_ra>
